<compile_context>
chip_gen: v7x
topology: tpu7x:2x2x1
jax: 0.10.0
libtpu: 0.0.40
codegen_flags: <defaults>
</compile_context>

<pallas_src>
import jax
import jax.numpy as jnp
from jax.experimental import pallas as pl
from jax.experimental.pallas import tpu as pltpu


# Static architecture description: (kh, kw, stride, out_channels).
_CONV_CFG = ((8, 8, 4, 32), (4, 4, 2, 64), (3, 3, 1, 64))
_FC1_OUT = 512
_CONV_OUT_HW = 7      # spatial size after conv3 for 84x84 inputs (Atari DQN)
_LANES = 128          # lane-dense output width used by every matmul

VMEM_LIMIT_BYTES = 48 * 1024 * 1024   # < v7x's 64 MiB physical VMEM per TC


def _round_up(x, m):
    return (x + m - 1) // m * m


def _cdiv(a, b):
    return (a + b - 1) // b


def _vmem_capacity_bytes():
    try:
        return int(pltpu.get_tpu_info().vmem_capacity_bytes)
    except Exception:                  # query failed -> assume smallest (v7x)
        return 64 * 1024 * 1024


_BIG_VMEM = _vmem_capacity_bytes() >= 100 * 1024 * 1024   # v5e/v6e: 128 MiB
CONV_M_TILE_CAP = 1024 if _BIG_VMEM else 512               # v7x keeps <= 512
FC_M_TILE_CAP = 256     # keeps the (tm, 512) fused-FC hidden activation small


def _pick_m_tile(M, cap):
    """Choose the M (row) tile.

    Small M: one block spanning the full dim (block == array dim, so the
    (8,128) divisibility rule does not apply; no padding, no partial blocks).
    Large M: at least two 16-row-aligned tiles so the "parallel" grid axis can
    shard across v7x's two TensorCores; tile size capped by the VMEM budget.
    """
    if M < 256:
        return max(M, 1)
    n_tiles = max(_cdiv(M, cap), 2)
    return _round_up(_cdiv(M, n_tiles), 16)


# ----------------------------------------------------------------------------
# Pallas kernels
# ----------------------------------------------------------------------------
def _conv_matmul_kernel(x_ref, w_ref, b_ref, o_ref):
    # bf16 x bf16 -> f32 accumulate on the MXU; bias + ReLU in f32 on the VPU;
    # store the lane-dense 128-wide result as bf16.
    acc = jnp.dot(x_ref[...], w_ref[...], preferred_element_type=jnp.float32)
    o_ref[...] = jnp.maximum(acc + b_ref[...], 0.0).astype(o_ref.dtype)


def _fc_fused_kernel(x_ref, w1_ref, b1_ref, w2_ref, b2_ref, o_ref):
    # fc1 (+bias, ReLU) and fc2 (+bias) fused: the hidden activation never
    # leaves VMEM/vregs and is cast to bf16 right after the ReLU so the f32
    # (tm, 512) value does not spill between the two dots.
    h = jnp.dot(x_ref[...], w1_ref[...], preferred_element_type=jnp.float32)
    h = jnp.maximum(h + b1_ref[...], 0.0).astype(w2_ref.dtype)
    y = jnp.dot(h, w2_ref[...], preferred_element_type=jnp.float32)
    o_ref[...] = (y + b2_ref[...]).astype(o_ref.dtype)


# ----------------------------------------------------------------------------
# Pallas wrappers
# ----------------------------------------------------------------------------
def pallas_conv_matmul(x, w, b):
    """relu(x @ w + b) with bf16 in/out and f32 accumulation.

    x: (M, K) bf16 im2col patches (K = kh*kw*ic, natural size, no K padding).
    w: (K, 128) bf16, output channels zero-padded to the 128-lane width.
    b: (1, 128) f32.
    Returns (M, 128) bf16 (padding channels are exactly zero).
    """
    M, K = x.shape
    Kw, N = w.shape
    assert Kw == K and N == _LANES
    tm = _pick_m_tile(M, CONV_M_TILE_CAP)
    return pl.pallas_call(
        _conv_matmul_kernel,
        out_shape=jax.ShapeDtypeStruct((M, N), jnp.bfloat16),
        grid=(_cdiv(M, tm),),
        in_specs=[
            pl.BlockSpec((tm, K), lambda i: (i, 0)),
            pl.BlockSpec((K, N), lambda i: (0, 0)),
            pl.BlockSpec((1, N), lambda i: (0, 0)),
        ],
        out_specs=pl.BlockSpec((tm, N), lambda i: (i, 0)),
        compiler_params=pltpu.CompilerParams(
            dimension_semantics=("parallel",),
            vmem_limit_bytes=VMEM_LIMIT_BYTES,
        ),
    )(x, w, b)


def pallas_fc_fused(x, w1, b1, w2, b2):
    """(relu(x @ w1 + b1)) @ w2 + b2 in a single pallas_call; f32 output."""
    M, K = x.shape
    H = w1.shape[1]
    Np = w2.shape[1]
    tm = _pick_m_tile(M, FC_M_TILE_CAP)
    return pl.pallas_call(
        _fc_fused_kernel,
        out_shape=jax.ShapeDtypeStruct((M, Np), jnp.float32),
        grid=(_cdiv(M, tm),),
        in_specs=[
            pl.BlockSpec((tm, K), lambda i: (i, 0)),
            pl.BlockSpec((K, H), lambda i: (0, 0)),
            pl.BlockSpec((1, H), lambda i: (0, 0)),
            pl.BlockSpec((H, Np), lambda i: (0, 0)),
            pl.BlockSpec((1, Np), lambda i: (0, 0)),
        ],
        out_specs=pl.BlockSpec((tm, Np), lambda i: (i, 0)),
        compiler_params=pltpu.CompilerParams(
            dimension_semantics=("parallel",),
            vmem_limit_bytes=VMEM_LIMIT_BYTES,
        ),
    )(x, w1, b1, w2, b2)


# ----------------------------------------------------------------------------
# Conv2d (valid padding) = NHWC im2col (slices + concat, no transposes) + MXU
# ----------------------------------------------------------------------------
def conv2d_relu_nhwc(x, w, b, *, kh, kw, stride, ic):
    """x: (B, H, W, C>=ic) bf16 NHWC; only the first `ic` channels are valid
    (the channel narrowing fuses into the im2col slice copies).
    Returns (B, oh, ow, 128) bf16 with output channels zero-padded to 128.
    """
    B, H, W, _ = x.shape
    oh = (H - kh) // stride + 1
    ow = (W - kw) // stride + 1
    cols = []
    for i in range(kh):
        for j in range(kw):
            cols.append(
                x[:, i:i + stride * oh:stride, j:j + stride * ow:stride, :ic])
    patches = jnp.concatenate(cols, axis=-1)            # (B, oh, ow, kh*kw*ic)
    patches = patches.reshape(B * oh * ow, kh * kw * ic)
    out = pallas_conv_matmul(patches, w, b)             # (B*oh*ow, 128) bf16
    return out.reshape(B, oh, ow, _LANES)               # stays NHWC, 128-wide


# ----------------------------------------------------------------------------
# Parameters (PyTorch layout) + one-time repacking for the Pallas kernels
# ----------------------------------------------------------------------------
def init_params(key, n_states, n_actions):
    def uinit(k, shape, fan_in):
        bound = 1.0 / jnp.sqrt(jnp.float32(fan_in))
        return jax.random.uniform(k, shape, jnp.float32, -bound, bound)

    ks = jax.random.split(key, 10)
    p = {}
    p["w1"] = uinit(ks[0], (32, n_states, 8, 8), n_states * 8 * 8)
    p["b1"] = uinit(ks[1], (32,), n_states * 8 * 8)
    p["w2"] = uinit(ks[2], (64, 32, 4, 4), 32 * 4 * 4)
    p["b2"] = uinit(ks[3], (64,), 32 * 4 * 4)
    p["w3"] = uinit(ks[4], (64, 64, 3, 3), 64 * 3 * 3)
    p["b3"] = uinit(ks[5], (64,), 64 * 3 * 3)
    p["wf1"] = uinit(ks[6], (7 * 7 * 64, 512), 7 * 7 * 64)    # stored (in, out)
    p["bf1"] = uinit(ks[7], (512,), 7 * 7 * 64)
    p["wf2"] = uinit(ks[8], (512, n_actions), 512)
    p["bf2"] = uinit(ks[9], (n_actions,), 512)
    return p


def prepare_params(params):
    """One-time repacking (call once, outside the hot forward path):
      * conv weights -> (kh*kw*ic, 128) bf16 matmul layout in (kh, kw, c) row
        order; output channels zero-padded to the 128-lane width; reduction
        dim K kept at its natural size (no K padding).
      * fc1 weight rows rebuilt for the (7, 7, 128)-channel NHWC flatten that
        the lane-padded conv3 output produces (zero rows for channels
        64..127), replacing torch's (64, 7, 7) NCHW flatten order.
      * fc2 output columns zero-padded to 128; all biases stored as (1, N) f32.
    """
    prep = {}
    for idx, (kh, kw, _stride, _oc) in enumerate(_CONV_CFG, start=1):
        w = params[f"w{idx}"]                    # torch layout (oc, ic, kh, kw)
        b = params[f"b{idx}"]
        oc, ic = w.shape[0], w.shape[1]
        w_mat = w.transpose(2, 3, 1, 0).reshape(kh * kw * ic, oc)
        prep[f"cw{idx}"] = (jnp.zeros((kh * kw * ic, _LANES), jnp.bfloat16)
                            .at[:, :oc].set(w_mat.astype(jnp.bfloat16)))
        prep[f"cb{idx}"] = jnp.zeros((1, _LANES), jnp.float32).at[0, :oc].set(b)

    hw = _CONV_OUT_HW
    c3 = _CONV_CFG[-1][-1]                       # 64 valid conv3 channels
    wf1 = params["wf1"].reshape(c3, hw, hw, _FC1_OUT)        # (c, h, w, out)
    wf1_hwc = (jnp.zeros((hw, hw, _LANES, _FC1_OUT), jnp.float32)
               .at[:, :, :c3, :].set(wf1.transpose(1, 2, 0, 3)))
    prep["wf1"] = (wf1_hwc.reshape(hw * hw * _LANES, _FC1_OUT)
                   .astype(jnp.bfloat16))
    prep["bf1"] = params["bf1"].reshape(1, _FC1_OUT).astype(jnp.float32)

    wf2 = params["wf2"]                          # (512, n_actions)
    n_act = wf2.shape[1]
    np2 = _round_up(n_act, _LANES)
    prep["wf2"] = (jnp.zeros((_FC1_OUT, np2), jnp.bfloat16)
                   .at[:, :n_act].set(wf2.astype(jnp.bfloat16)))
    prep["bf2"] = (jnp.zeros((1, np2), jnp.float32)
                   .at[0, :n_act].set(params["bf2"]))
    return prep


def make_dqn_forward(n_actions):
    @jax.jit
    def forward(prep, x_nchw):
        # Single layout change + single cast: NCHW f32 -> NHWC bf16.
        x = jnp.transpose(x_nchw, (0, 2, 3, 1)).astype(jnp.bfloat16)
        ic = x.shape[-1]
        for idx, (kh, kw, stride, oc) in enumerate(_CONV_CFG, start=1):
            x = conv2d_relu_nhwc(x, prep[f"cw{idx}"], prep[f"cb{idx}"],
                                 kh=kh, kw=kw, stride=stride, ic=ic)
            ic = oc   # only the first `oc` channels of the 128-wide output
                      # are valid inputs for the next conv layer
        B = x.shape[0]
        # conv3 output stays 128-channel padded; wf1 was packed for the
        # (7, 7, 128) flatten so no channel slice / re-pad happens here.
        x = x.reshape(B, -1)
        q = pallas_fc_fused(x, prep["wf1"], prep["bf1"],
                            prep["wf2"], prep["bf2"])
        return q[:, :n_actions]
    return forward


# ----------------------------------------------------------------------------
# Pure-JAX reference (XLA conv) with matching bf16 operand precision
# ----------------------------------------------------------------------------
def dqn_reference(params, x):
    def conv(x, w, b, s):
        o = jax.lax.conv_general_dilated(
            x.astype(jnp.bfloat16), w.astype(jnp.bfloat16), (s, s), "VALID",
            dimension_numbers=("NCHW", "OIHW", "NCHW"),
            preferred_element_type=jnp.float32)
        return jax.nn.relu(o + b[None, :, None, None])

    x = conv(x, params["w1"], params["b1"], 4)
    x = conv(x, params["w2"], params["b2"], 2)
    x = conv(x, params["w3"], params["b3"], 1)
    x = x.reshape(x.shape[0], -1)
    h = jax.nn.relu(
        jnp.dot(x.astype(jnp.bfloat16), params["wf1"].astype(jnp.bfloat16),
                preferred_element_type=jnp.float32) + params["bf1"])
    return jnp.dot(h.astype(jnp.bfloat16), params["wf2"].astype(jnp.bfloat16),
                   preferred_element_type=jnp.float32) + params["bf2"]


if __name__ == "__main__":
    key = jax.random.PRNGKey(0)
    k_param, k_x = jax.random.split(key)

    B, n_states, n_actions = 2, 4, 6
    # Spatial size 84 is forced by fc1's in_features = 7*7*64 (Atari DQN).
    x = jax.random.normal(k_x, (B, n_states, 84, 84), jnp.float32)
    params = init_params(k_param, n_states, n_actions)

    prep = jax.block_until_ready(prepare_params(params))  # one-time packing
    forward = make_dqn_forward(n_actions)

    y = jax.block_until_ready(forward(prep, x))
    assert y.shape == (B, n_actions) and y.dtype == jnp.float32

    y_ref = jax.block_until_ready(dqn_reference(params, x))
    # bf16 operands / f32 accumulation on both paths -> tight agreement.
    assert jnp.allclose(y, y_ref, atol=2e-2, rtol=2e-2), float(
        jnp.max(jnp.abs(y - y_ref)))

    print("KERNEL_OK")
</pallas_src>

<mosaic_0001>
module attributes {stable_mosaic.version = 11 : i64} {
  func.func @_conv_matmul_kernel(%arg0: i32, %arg1: memref<400x256xbf16, #tpu.memory_space<vmem>>, %arg2: memref<256x128xbf16, #tpu.memory_space<vmem>>, %arg3: memref<1x128xf32, #tpu.memory_space<vmem>>, %arg4: memref<400x128xbf16, #tpu.memory_space<vmem>>) attributes {dimension_semantics = [#tpu.dimension_semantics<parallel>], iteration_bounds = array<i64: 2>, scalar_prefetch = 0 : i64, scratch_operands = 0 : i64, tpu.core_type = #tpu.core_type<tc>, window_params = [{transform_indices = @transform_0, window_bounds = array<i64: 400, 256>}, {pipeline_mode = #tpu.pipeline_mode<synchronous>, transform_indices = @transform_1, window_bounds = array<i64: 256, 128>}, {pipeline_mode = #tpu.pipeline_mode<synchronous>, transform_indices = @transform_2, window_bounds = array<i64: 1, 128>}, {transform_indices = @transform_3, window_bounds = array<i64: 400, 128>}]} {
    %c0 = arith.constant 0 : index
    %c0_0 = arith.constant 0 : index
    %0 = vector.load %arg1[%c0, %c0_0] : memref<400x256xbf16, #tpu.memory_space<vmem>>, vector<400x256xbf16>
    %c0_1 = arith.constant 0 : index
    %c0_2 = arith.constant 0 : index
    %1 = vector.load %arg2[%c0_1, %c0_2] : memref<256x128xbf16, #tpu.memory_space<vmem>>, vector<256x128xbf16>
    %cst = arith.constant dense<0.000000e+00> : vector<400x128xf32>
    %2 = tpu.matmul %0, %1, %cst {dimension_numbers = #tpu.dot_dimension_numbers<[1], [0], [0], [1], [0, 0, 1, 1], [], []>} : vector<400x256xbf16>, vector<256x128xbf16>, vector<400x128xf32> -> vector<400x128xf32>
    %c0_3 = arith.constant 0 : index
    %c0_4 = arith.constant 0 : index
    %3 = vector.load %arg3[%c0_3, %c0_4] : memref<1x128xf32, #tpu.memory_space<vmem>>, vector<1x128xf32>
    %4 = vector.broadcast %3 : vector<1x128xf32> to vector<400x128xf32>
    %5 = arith.addf %2, %4 : vector<400x128xf32>
    %cst_5 = arith.constant 0.000000e+00 : f32
    %6 = vector.broadcast %cst_5 : f32 to vector<400x128xf32>
    %7 = arith.maximumf %5, %6 : vector<400x128xf32>
    %8 = arith.truncf %7 : vector<400x128xf32> to vector<400x128xbf16>
    %c0_6 = arith.constant 0 : index
    %c0_7 = arith.constant 0 : index
    %9 = vector.load %arg4[%c0_6, %c0_7] : memref<400x128xbf16, #tpu.memory_space<vmem>>, vector<400x128xbf16>
    tpu.vector_store %arg4[%c0_6, %c0_7], %8 {strides = array<i32>} : memref<400x128xbf16, #tpu.memory_space<vmem>>, vector<400x128xbf16>,
    return
  }
  func.func @transform_0(%arg0: i32) -> (i32, i32) {
    %c0_i32 = arith.constant 0 : i32
    %c0_i32_0 = arith.constant 0 : i32
    return %arg0, %c0_i32 : i32, i32
  }
  func.func @transform_1(%arg0: i32) -> (i32, i32) {
    %c0_i32 = arith.constant 0 : i32
    %c0_i32_0 = arith.constant 0 : i32
    %c0_i32_1 = arith.constant 0 : i32
    return %c0_i32, %c0_i32_0 : i32, i32
  }
  func.func @transform_2(%arg0: i32) -> (i32, i32) {
    %c0_i32 = arith.constant 0 : i32
    %c0_i32_0 = arith.constant 0 : i32
    %c0_i32_1 = arith.constant 0 : i32
    return %c0_i32, %c0_i32_0 : i32, i32
  }
  func.func @transform_3(%arg0: i32) -> (i32, i32) {
    %c0_i32 = arith.constant 0 : i32
    %c0_i32_0 = arith.constant 0 : i32
    return %arg0, %c0_i32 : i32, i32
  }
}

module attributes {stable_mosaic.version = 11 : i64} {
  func.func @_conv_matmul_kernel(%arg0: i32, %arg1: memref<162x512xbf16, #tpu.memory_space<vmem>>, %arg2: memref<512x128xbf16, #tpu.memory_space<vmem>>, %arg3: memref<1x128xf32, #tpu.memory_space<vmem>>, %arg4: memref<162x128xbf16, #tpu.memory_space<vmem>>) attributes {dimension_semantics = [#tpu.dimension_semantics<parallel>], iteration_bounds = array<i64: 1>, scalar_prefetch = 0 : i64, scratch_operands = 0 : i64, tpu.core_type = #tpu.core_type<tc>, window_params = [{transform_indices = @transform_0, window_bounds = array<i64: 162, 512>}, {pipeline_mode = #tpu.pipeline_mode<synchronous>, transform_indices = @transform_1, window_bounds = array<i64: 512, 128>}, {pipeline_mode = #tpu.pipeline_mode<synchronous>, transform_indices = @transform_2, window_bounds = array<i64: 1, 128>}, {transform_indices = @transform_3, window_bounds = array<i64: 162, 128>}]} {
    %c0 = arith.constant 0 : index
    %c0_0 = arith.constant 0 : index
    %0 = vector.load %arg1[%c0, %c0_0] : memref<162x512xbf16, #tpu.memory_space<vmem>>, vector<162x512xbf16>
    %c0_1 = arith.constant 0 : index
    %c0_2 = arith.constant 0 : index
    %1 = vector.load %arg2[%c0_1, %c0_2] : memref<512x128xbf16, #tpu.memory_space<vmem>>, vector<512x128xbf16>
    %cst = arith.constant dense<0.000000e+00> : vector<162x128xf32>
    %2 = tpu.matmul %0, %1, %cst {dimension_numbers = #tpu.dot_dimension_numbers<[1], [0], [0], [1], [0, 0, 1, 1], [], []>} : vector<162x512xbf16>, vector<512x128xbf16>, vector<162x128xf32> -> vector<162x128xf32>
    %c0_3 = arith.constant 0 : index
    %c0_4 = arith.constant 0 : index
    %3 = vector.load %arg3[%c0_3, %c0_4] : memref<1x128xf32, #tpu.memory_space<vmem>>, vector<1x128xf32>
    %4 = vector.broadcast %3 : vector<1x128xf32> to vector<162x128xf32>
    %5 = arith.addf %2, %4 : vector<162x128xf32>
    %cst_5 = arith.constant 0.000000e+00 : f32
    %6 = vector.broadcast %cst_5 : f32 to vector<162x128xf32>
    %7 = arith.maximumf %5, %6 : vector<162x128xf32>
    %8 = arith.truncf %7 : vector<162x128xf32> to vector<162x128xbf16>
    %c0_6 = arith.constant 0 : index
    %c0_7 = arith.constant 0 : index
    %9 = vector.load %arg4[%c0_6, %c0_7] : memref<162x128xbf16, #tpu.memory_space<vmem>>, vector<162x128xbf16>
    tpu.vector_store %arg4[%c0_6, %c0_7], %8 {strides = array<i32>} : memref<162x128xbf16, #tpu.memory_space<vmem>>, vector<162x128xbf16>,
    return
  }
  func.func @transform_0(%arg0: i32) -> (i32, i32) {
    %c0_i32 = arith.constant 0 : i32
    %c0_i32_0 = arith.constant 0 : i32
    return %arg0, %c0_i32 : i32, i32
  }
  func.func @transform_1(%arg0: i32) -> (i32, i32) {
    %c0_i32 = arith.constant 0 : i32
    %c0_i32_0 = arith.constant 0 : i32
    %c0_i32_1 = arith.constant 0 : i32
    return %c0_i32, %c0_i32_0 : i32, i32
  }
  func.func @transform_2(%arg0: i32) -> (i32, i32) {
    %c0_i32 = arith.constant 0 : i32
    %c0_i32_0 = arith.constant 0 : i32
    %c0_i32_1 = arith.constant 0 : i32
    return %c0_i32, %c0_i32_0 : i32, i32
  }
  func.func @transform_3(%arg0: i32) -> (i32, i32) {
    %c0_i32 = arith.constant 0 : i32
    %c0_i32_0 = arith.constant 0 : i32
    return %arg0, %c0_i32 : i32, i32
  }
}

module attributes {stable_mosaic.version = 11 : i64} {
  func.func @_conv_matmul_kernel(%arg0: i32, %arg1: memref<98x576xbf16, #tpu.memory_space<vmem>>, %arg2: memref<576x128xbf16, #tpu.memory_space<vmem>>, %arg3: memref<1x128xf32, #tpu.memory_space<vmem>>, %arg4: memref<98x128xbf16, #tpu.memory_space<vmem>>) attributes {dimension_semantics = [#tpu.dimension_semantics<parallel>], iteration_bounds = array<i64: 1>, scalar_prefetch = 0 : i64, scratch_operands = 0 : i64, tpu.core_type = #tpu.core_type<tc>, window_params = [{transform_indices = @transform_0, window_bounds = array<i64: 98, 576>}, {pipeline_mode = #tpu.pipeline_mode<synchronous>, transform_indices = @transform_1, window_bounds = array<i64: 576, 128>}, {pipeline_mode = #tpu.pipeline_mode<synchronous>, transform_indices = @transform_2, window_bounds = array<i64: 1, 128>}, {transform_indices = @transform_3, window_bounds = array<i64: 98, 128>}]} {
    %c0 = arith.constant 0 : index
    %c0_0 = arith.constant 0 : index
    %0 = vector.load %arg1[%c0, %c0_0] : memref<98x576xbf16, #tpu.memory_space<vmem>>, vector<98x576xbf16>
    %c0_1 = arith.constant 0 : index
    %c0_2 = arith.constant 0 : index
    %1 = vector.load %arg2[%c0_1, %c0_2] : memref<576x128xbf16, #tpu.memory_space<vmem>>, vector<576x128xbf16>
    %cst = arith.constant dense<0.000000e+00> : vector<98x128xf32>
    %2 = tpu.matmul %0, %1, %cst {dimension_numbers = #tpu.dot_dimension_numbers<[1], [0], [0], [1], [0, 0, 1, 1], [], []>} : vector<98x576xbf16>, vector<576x128xbf16>, vector<98x128xf32> -> vector<98x128xf32>
    %c0_3 = arith.constant 0 : index
    %c0_4 = arith.constant 0 : index
    %3 = vector.load %arg3[%c0_3, %c0_4] : memref<1x128xf32, #tpu.memory_space<vmem>>, vector<1x128xf32>
    %4 = vector.broadcast %3 : vector<1x128xf32> to vector<98x128xf32>
    %5 = arith.addf %2, %4 : vector<98x128xf32>
    %cst_5 = arith.constant 0.000000e+00 : f32
    %6 = vector.broadcast %cst_5 : f32 to vector<98x128xf32>
    %7 = arith.maximumf %5, %6 : vector<98x128xf32>
    %8 = arith.truncf %7 : vector<98x128xf32> to vector<98x128xbf16>
    %c0_6 = arith.constant 0 : index
    %c0_7 = arith.constant 0 : index
    %9 = vector.load %arg4[%c0_6, %c0_7] : memref<98x128xbf16, #tpu.memory_space<vmem>>, vector<98x128xbf16>
    tpu.vector_store %arg4[%c0_6, %c0_7], %8 {strides = array<i32>} : memref<98x128xbf16, #tpu.memory_space<vmem>>, vector<98x128xbf16>,
    return
  }
  func.func @transform_0(%arg0: i32) -> (i32, i32) {
    %c0_i32 = arith.constant 0 : i32
    %c0_i32_0 = arith.constant 0 : i32
    return %arg0, %c0_i32 : i32, i32
  }
  func.func @transform_1(%arg0: i32) -> (i32, i32) {
    %c0_i32 = arith.constant 0 : i32
    %c0_i32_0 = arith.constant 0 : i32
    %c0_i32_1 = arith.constant 0 : i32
    return %c0_i32, %c0_i32_0 : i32, i32
  }
  func.func @transform_2(%arg0: i32) -> (i32, i32) {
    %c0_i32 = arith.constant 0 : i32
    %c0_i32_0 = arith.constant 0 : i32
    %c0_i32_1 = arith.constant 0 : i32
    return %c0_i32, %c0_i32_0 : i32, i32
  }
  func.func @transform_3(%arg0: i32) -> (i32, i32) {
    %c0_i32 = arith.constant 0 : i32
    %c0_i32_0 = arith.constant 0 : i32
    return %arg0, %c0_i32 : i32, i32
  }
}

module attributes {stable_mosaic.version = 11 : i64} {
  func.func @_fc_fused_kernel(%arg0: i32, %arg1: memref<2x6272xbf16, #tpu.memory_space<vmem>>, %arg2: memref<6272x512xbf16, #tpu.memory_space<vmem>>, %arg3: memref<1x512xf32, #tpu.memory_space<vmem>>, %arg4: memref<512x128xbf16, #tpu.memory_space<vmem>>, %arg5: memref<1x128xf32, #tpu.memory_space<vmem>>, %arg6: memref<2x128xf32, #tpu.memory_space<vmem>>) attributes {dimension_semantics = [#tpu.dimension_semantics<parallel>], iteration_bounds = array<i64: 1>, scalar_prefetch = 0 : i64, scratch_operands = 0 : i64, tpu.core_type = #tpu.core_type<tc>, window_params = [{transform_indices = @transform_0, window_bounds = array<i64: 2, 6272>}, {pipeline_mode = #tpu.pipeline_mode<synchronous>, transform_indices = @transform_1, window_bounds = array<i64: 6272, 512>}, {pipeline_mode = #tpu.pipeline_mode<synchronous>, transform_indices = @transform_2, window_bounds = array<i64: 1, 512>}, {pipeline_mode = #tpu.pipeline_mode<synchronous>, transform_indices = @transform_3, window_bounds = array<i64: 512, 128>}, {pipeline_mode = #tpu.pipeline_mode<synchronous>, transform_indices = @transform_4, window_bounds = array<i64: 1, 128>}, {transform_indices = @transform_5, window_bounds = array<i64: 2, 128>}]} {
    %c0 = arith.constant 0 : index
    %c0_0 = arith.constant 0 : index
    %0 = vector.load %arg1[%c0, %c0_0] : memref<2x6272xbf16, #tpu.memory_space<vmem>>, vector<2x6272xbf16>
    %c0_1 = arith.constant 0 : index
    %c0_2 = arith.constant 0 : index
    %1 = vector.load %arg2[%c0_1, %c0_2] : memref<6272x512xbf16, #tpu.memory_space<vmem>>, vector<6272x512xbf16>
    %cst = arith.constant dense<0.000000e+00> : vector<2x512xf32>
    %2 = tpu.matmul %0, %1, %cst {dimension_numbers = #tpu.dot_dimension_numbers<[1], [0], [0], [1], [0, 0, 1, 1], [], []>} : vector<2x6272xbf16>, vector<6272x512xbf16>, vector<2x512xf32> -> vector<2x512xf32>
    %c0_3 = arith.constant 0 : index
    %c0_4 = arith.constant 0 : index
    %3 = vector.load %arg3[%c0_3, %c0_4] : memref<1x512xf32, #tpu.memory_space<vmem>>, vector<1x512xf32>
    %4 = vector.broadcast %3 : vector<1x512xf32> to vector<2x512xf32>
    %5 = arith.addf %2, %4 : vector<2x512xf32>
    %cst_5 = arith.constant 0.000000e+00 : f32
    %6 = vector.broadcast %cst_5 : f32 to vector<2x512xf32>
    %7 = arith.maximumf %5, %6 : vector<2x512xf32>
    %8 = arith.truncf %7 : vector<2x512xf32> to vector<2x512xbf16>
    %c0_6 = arith.constant 0 : index
    %c0_7 = arith.constant 0 : index
    %9 = vector.load %arg4[%c0_6, %c0_7] : memref<512x128xbf16, #tpu.memory_space<vmem>>, vector<512x128xbf16>
    %cst_8 = arith.constant dense<0.000000e+00> : vector<2x128xf32>
    %10 = tpu.matmul %8, %9, %cst_8 {dimension_numbers = #tpu.dot_dimension_numbers<[1], [0], [0], [1], [0, 0, 1, 1], [], []>} : vector<2x512xbf16>, vector<512x128xbf16>, vector<2x128xf32> -> vector<2x128xf32>
    %c0_9 = arith.constant 0 : index
    %c0_10 = arith.constant 0 : index
    %11 = vector.load %arg5[%c0_9, %c0_10] : memref<1x128xf32, #tpu.memory_space<vmem>>, vector<1x128xf32>
    %12 = vector.broadcast %11 : vector<1x128xf32> to vector<2x128xf32>
    %13 = arith.addf %10, %12 : vector<2x128xf32>
    %c0_11 = arith.constant 0 : index
    %c0_12 = arith.constant 0 : index
    %14 = vector.load %arg6[%c0_11, %c0_12] : memref<2x128xf32, #tpu.memory_space<vmem>>, vector<2x128xf32>
    tpu.vector_store %arg6[%c0_11, %c0_12], %13 {strides = array<i32>} : memref<2x128xf32, #tpu.memory_space<vmem>>, vector<2x128xf32>,
    return
  }
  func.func @transform_0(%arg0: i32) -> (i32, i32) {
    %c0_i32 = arith.constant 0 : i32
    %c0_i32_0 = arith.constant 0 : i32
    return %arg0, %c0_i32 : i32, i32
  }
  func.func @transform_1(%arg0: i32) -> (i32, i32) {
    %c0_i32 = arith.constant 0 : i32
    %c0_i32_0 = arith.constant 0 : i32
    %c0_i32_1 = arith.constant 0 : i32
    return %c0_i32, %c0_i32_0 : i32, i32
  }
  func.func @transform_2(%arg0: i32) -> (i32, i32) {
    %c0_i32 = arith.constant 0 : i32
    %c0_i32_0 = arith.constant 0 : i32
    %c0_i32_1 = arith.constant 0 : i32
    return %c0_i32, %c0_i32_0 : i32, i32
  }
  func.func @transform_3(%arg0: i32) -> (i32, i32) {
    %c0_i32 = arith.constant 0 : i32
    %c0_i32_0 = arith.constant 0 : i32
    %c0_i32_1 = arith.constant 0 : i32
    return %c0_i32, %c0_i32_0 : i32, i32
  }
  func.func @transform_4(%arg0: i32) -> (i32, i32) {
    %c0_i32 = arith.constant 0 : i32
    %c0_i32_0 = arith.constant 0 : i32
    %c0_i32_1 = arith.constant 0 : i32
    return %c0_i32, %c0_i32_0 : i32, i32
  }
  func.func @transform_5(%arg0: i32) -> (i32, i32) {
    %c0_i32 = arith.constant 0 : i32
    %c0_i32_0 = arith.constant 0 : i32
    return %arg0, %c0_i32 : i32, i32
  }
}

</mosaic_0001>

<bundles_post_ra>
// kernel: forward.4
= control target key start
LH: loop header
LB: loop body
LE: loop exit
PB: predicated region body
PF: predicated region fallthrough
CT: control target
= control target key end

     0   :  { %s1690_s12 = smov 0   ;;  %s1925_s0 = inlined_call_operand.vmem [shape: bf16[800,256], index: 0, kind: input, shape index: {}]   ;;  %s1926_s1 = inlined_call_operand.vmem [shape: bf16[256,128], index: 1, kind: input, shape index: {}]   ;;  %s1927_s2 = inlined_call_operand.vmem [shape: f32[1,128], index: 2, kind: input, shape index: {}]   ;;  %s1928_s3 = inlined_call_operand.vmem [shape: bf16[800,128], index: 3, kind: output, shape index: {}]  }
   0x1 LB: > { %s1202_s13 = sadd.s32 4294967295, %s1667_s12   ;;  %p1206_p0 = scmp.ge.s32.totalorder %s1667_s12, 1  ;;  %s1667_s12 = sphi %s1690_s12, %s13_s12  }
   0x2   : > { %p139_p1 = scmp.lt.s32.totalorder %s1667_s12, 3 }
   0x4   : > { %p140_p2 = pnand %p1206_p0, %p139_p1 }
   0x5   : > { %v1570_v0 = vld [vmem:[%s1926_s1] sm:$0xff] (!%p140_p2)   ;;  %v1669_v1 = vmov (!%p140_p2), 0   ;;  %s164_s16 = smul.u32 (!%p140_p2), 50, %s1202_s13  ;;  %v1571_v2 = vld [vmem:[%s1926_s1 + $0x8] sm:$0xff] (!%p140_p2)   ;;  %v1572_v3 = vld [vmem:[%s1926_s1 + $0x10] sm:$0xff] (!%p140_p2)  }
   0x6   : > { %143 = sbr.rel (%p140_p2) target bundleno = 387 (0x183), region = 32  ;;  %613 = vmatprep.subr.bf16.mxu0 (!%p140_p2), %v1669_v1  ;;  %1529 = vmatprep.subr.bf16.mxu1 (!%p140_p2), %v1669_v1  ;;  %v1573_v4 = vld [vmem:[%s1926_s1 + $0x18] sm:$0xff] (!%p140_p2)   ;;  %v1574_v5 = vld [vmem:[%s1926_s1 + $0x20] sm:$0xff] (!%p140_p2)   ;;  %v1575_v7 = vld [vmem:[%s1926_s1 + $0x28] sm:$0xff] (!%p140_p2)  }
   0x7   : > { %614 = vmatpush1.bf16.msra.mxu0 (!%p140_p2), %v1570_v0  ;;  %1545 = vmatpush1.bf16.msra.mxu1 (!%p140_p2), %v1570_v0  ;;  %p165_p3 = scmp.lt.s32.totalorder (!%p140_p2), %s164_s16, 99  ;;  %v1576_v9 = vld [vmem:[%s1926_s1 + $0x30] sm:$0xff] (!%p140_p2)   ;;  %v1577_v10 = vld [vmem:[%s1926_s1 + $0x38] sm:$0xff] (!%p140_p2)   ;;  %v1578_v11 = vld [vmem:[%s1926_s1 + $0x40] sm:$0xff] (!%p140_p2)  }
   0x8   : > { %615 = vmatprep.subr.bf16.mxu0 (!%p140_p2), %v1669_v1  ;;  %1530 = vmatprep.subr.bf16.mxu1 (!%p140_p2), %v1669_v1  ;;  %v1579_v12 = vld [vmem:[%s1926_s1 + $0x48] sm:$0xff] (!%p140_p2)   ;;  %v1580_v13 = vld [vmem:[%s1926_s1 + $0x50] sm:$0xff] (!%p140_p2)   ;;  %v1581_v14 = vld [vmem:[%s1926_s1 + $0x58] sm:$0xff] (!%p140_p2)  }
   0x9   : > { %v1582_v15 = vld [vmem:[%s1926_s1 + $0x60] sm:$0xff] (!%p140_p2)   ;;  %v1583_v16 = vld [vmem:[%s1926_s1 + $0x68] sm:$0xff] (!%p140_p2)   ;;  %v1584_v17 = vld [vmem:[%s1926_s1 + $0x70] sm:$0xff] (!%p140_p2)  }
   0xa   : > { %v1585_v18 = vld [vmem:[%s1926_s1 + $0x78] sm:$0xff] (!%p140_p2)  }
   0xb   : > { %616 = vmatpush1.bf16.msra.mxu0 (!%p140_p2), %v1571_v2  ;;  %1546 = vmatpush1.bf16.msra.mxu1 (!%p140_p2), %v1571_v2 }
   0xc   : > { %617 = vmatprep.subr.bf16.mxu0 (!%p140_p2), %v1669_v1  ;;  %1531 = vmatprep.subr.bf16.mxu1 (!%p140_p2), %v1669_v1 }
   0xd   : > { %s1930_s16 = smov (!%p165_p3, %s164_s16), 99 }
   0xe   : > { %s1329_s23 = sshll.u32 %s1930_s16, 3  ;;  %s1209_s29 = sshll.u32 %s1930_s16, 2 }
   0xf   : > { %618 = vmatpush1.bf16.msra.mxu0 %v1572_v3  ;;  %1547 = vmatpush1.bf16.msra.mxu1 %v1572_v3  ;;  %s1727_s28 = scalar_lea.vmem %s1925_s0, %s1329_s23  ;;  %v1839_v3 = vld [vmem:[%s1927_s2] ss:$0 sm:$0xff]  ;;  %s1849_s4 = scalar_lea.vmem %s1928_s3, %s1209_s29 }
  0x10   : > { %619 = vmatprep.subr.bf16.mxu0 %v1669_v1  ;;  %1532 = vmatprep.subr.bf16.mxu1 %v1669_v1  ;;  %v1588_v6 = vld [vmem:[%s1727_s28 + $0x4] ss:$8 sps:$4 sm:$0xff]   ;;  %v1591_v8 = vld [vmem:[%s1727_s28 + $0xd4] ss:$8 sps:$4 sm:$0xff]   ;;  %v1586_v19 = vld [vmem:[%s1727_s28] ss:$8 sps:$4 sm:$0xff]  }
  0x11   : > { %645 = vmatprep.mubr.bf16.mxu0 %v1588_v6  ;;  %749 = vmatprep.mubr.bf16.mxu1 %v1591_v8  ;;  %v1589_v20 = vld [vmem:[%s1727_s28 + $0xd0] ss:$8 sps:$4 sm:$0xff]   ;;  %v1592_v21 = vld [vmem:[%s1727_s28 + $0x14] ss:$8 sps:$4 sm:$0xff]   ;;  %v1595_v22 = vld [vmem:[%s1727_s28 + $0xe4] ss:$8 sps:$4 sm:$0xff]  }
  0x12   : > { %v1594_v23 = vld [vmem:[%s1727_s28 + $0x10] ss:$8 sps:$4 sm:$0xff]   ;;  %v1597_v24 = vld [vmem:[%s1727_s28 + $0xe0] ss:$8 sps:$4 sm:$0xff]   ;;  %v1598_v25 = vld [vmem:[%s1727_s28 + $0x24] ss:$8 sps:$4 sm:$0xff]  }
  0x13   : > { %620 = vmatpush1.bf16.msra.mxu0 %v1573_v4  ;;  %1548 = vmatpush1.bf16.msra.mxu1 %v1573_v4  ;;  %v1601_v26 = vld [vmem:[%s1727_s28 + $0xf4] ss:$8 sps:$4 sm:$0xff]   ;;  %v1600_v27 = vld [vmem:[%s1727_s28 + $0x20] ss:$8 sps:$4 sm:$0xff]   ;;  %v1603_v28 = vld [vmem:[%s1727_s28 + $0xf0] ss:$8 sps:$4 sm:$0xff]  }
  0x14   : > { %621 = vmatprep.subr.bf16.mxu0 %v1669_v1  ;;  %1533 = vmatprep.subr.bf16.mxu1 %v1669_v1  ;;  %v1604_v29 = vld [vmem:[%s1727_s28 + $0x34] ss:$8 sps:$4 sm:$0xff]   ;;  %v1607_v30 = vld [vmem:[%s1727_s28 + $0x104] ss:$8 sps:$4 sm:$0xff]   ;;  %v1606_v31 = vld [vmem:[%s1727_s28 + $0x30] ss:$8 sps:$4 sm:$0xff]  }
  0x15   : > { %v1609_v32 = vld [vmem:[%s1727_s28 + $0x100] ss:$8 sps:$4 sm:$0xff]   ;;  %v1610_v33 = vld [vmem:[%s1727_s28 + $0x44] ss:$8 sps:$4 sm:$0xff]   ;;  %v1613_v34 = vld [vmem:[%s1727_s28 + $0x114] ss:$8 sps:$4 sm:$0xff]  }
  0x16   : > { %v1612_v35 = vld [vmem:[%s1727_s28 + $0x40] ss:$8 sps:$4 sm:$0xff]   ;;  %v1615_v36 = vld [vmem:[%s1727_s28 + $0x110] ss:$8 sps:$4 sm:$0xff]   ;;  %v1616_v37 = vld [vmem:[%s1727_s28 + $0x54] ss:$8 sps:$4 sm:$0xff]  }
  0x17   : > { %622 = vmatpush1.bf16.msra.mxu0 %v1574_v5  ;;  %1549 = vmatpush1.bf16.msra.mxu1 %v1574_v5  ;;  %v1619_v38 = vld [vmem:[%s1727_s28 + $0x124] ss:$8 sps:$4 sm:$0xff]   ;;  %v1618_v39 = vld [vmem:[%s1727_s28 + $0x50] ss:$8 sps:$4 sm:$0xff]   ;;  %v1621_v40 = vld [vmem:[%s1727_s28 + $0x120] ss:$8 sps:$4 sm:$0xff]  }
  0x18   : > { %623 = vmatprep.subr.bf16.mxu0 %v1669_v1  ;;  %1534 = vmatprep.subr.bf16.mxu1 %v1669_v1  ;;  %v1622_v41 = vld [vmem:[%s1727_s28 + $0x64] ss:$8 sps:$4 sm:$0xff]   ;;  %v1625_v42 = vld [vmem:[%s1727_s28 + $0x134] ss:$8 sps:$4 sm:$0xff]   ;;  %v1624_v43 = vld [vmem:[%s1727_s28 + $0x60] ss:$8 sps:$4 sm:$0xff]  }
  0x19   : > { %v1627_v44 = vld [vmem:[%s1727_s28 + $0x130] ss:$8 sps:$4 sm:$0xff]   ;;  %v1628_v45 = vld [vmem:[%s1727_s28 + $0x74] ss:$8 sps:$4 sm:$0xff]   ;;  %v1631_v46 = vld [vmem:[%s1727_s28 + $0x144] ss:$8 sps:$4 sm:$0xff]  }
  0x1a   : > { %v1630_v47 = vld [vmem:[%s1727_s28 + $0x70] ss:$8 sps:$4 sm:$0xff]   ;;  %v1633_v48 = vld [vmem:[%s1727_s28 + $0x140] ss:$8 sps:$4 sm:$0xff]   ;;  %v1634_v49 = vld [vmem:[%s1727_s28 + $0x84] ss:$8 sps:$4 sm:$0xff]  }
  0x1b   : > { %624 = vmatpush1.bf16.msra.mxu0 %v1575_v7  ;;  %1550 = vmatpush1.bf16.msra.mxu1 %v1575_v7  ;;  %v1637_v50 = vld [vmem:[%s1727_s28 + $0x154] ss:$8 sps:$4 sm:$0xff]   ;;  %v1636_v51 = vld [vmem:[%s1727_s28 + $0x80] ss:$8 sps:$4 sm:$0xff]   ;;  %v1639_v52 = vld [vmem:[%s1727_s28 + $0x150] ss:$8 sps:$4 sm:$0xff]  }
  0x1c   : > { %625 = vmatprep.subr.bf16.mxu0 %v1669_v1  ;;  %1535 = vmatprep.subr.bf16.mxu1 %v1669_v1  ;;  %v1640_v53 = vld [vmem:[%s1727_s28 + $0x94] ss:$8 sps:$4 sm:$0xff]   ;;  %v1643_v54 = vld [vmem:[%s1727_s28 + $0x164] ss:$8 sps:$4 sm:$0xff]   ;;  %v1642_v55 = vld [vmem:[%s1727_s28 + $0x90] ss:$8 sps:$4 sm:$0xff]  }
  0x1d   : > { %v1645_v56 = vld [vmem:[%s1727_s28 + $0x160] ss:$8 sps:$4 sm:$0xff]   ;;  %v1646_v57 = vld [vmem:[%s1727_s28 + $0xa4] ss:$8 sps:$4 sm:$0xff]   ;;  %v1649_v58 = vld [vmem:[%s1727_s28 + $0x174] ss:$8 sps:$4 sm:$0xff]  }
  0x1e   : > { %v1648_v59 = vld [vmem:[%s1727_s28 + $0xa0] ss:$8 sps:$4 sm:$0xff]   ;;  %v1651_v60 = vld [vmem:[%s1727_s28 + $0x170] ss:$8 sps:$4 sm:$0xff]   ;;  %v1652_v61 = vld [vmem:[%s1727_s28 + $0xb4] ss:$8 sps:$4 sm:$0xff]  }
  0x1f   : > { %626 = vmatpush1.bf16.msra.mxu0 %v1576_v9  ;;  %1551 = vmatpush1.bf16.msra.mxu1 %v1576_v9  ;;  %v1655_v62 = vld [vmem:[%s1727_s28 + $0x184] ss:$8 sps:$4 sm:$0xff]   ;;  %v1654_v63 = vld [vmem:[%s1727_s28 + $0xb0] ss:$8 sps:$4 sm:$0xff]   ;;  %v1657_v0 = vld [vmem:[%s1727_s28 + $0x180] ss:$8 sps:$4 sm:$0xff]  }
  0x20   : > { %627 = vmatprep.subr.bf16.mxu0 %v1669_v1  ;;  %1536 = vmatprep.subr.bf16.mxu1 %v1669_v1  ;;  %v1660_v2 = vld [vmem:[%s1727_s28 + $0xc0] ss:$8 sps:$4 sm:$0xff]  }
  0x23   : > { %628 = vmatpush1.bf16.msra.mxu0 %v1577_v10  ;;  %1552 = vmatpush1.bf16.msra.mxu1 %v1577_v10 }
  0x24   : > { %629 = vmatprep.subr.bf16.mxu0 %v1669_v1  ;;  %1537 = vmatprep.subr.bf16.mxu1 %v1669_v1 }
  0x27   : > { %630 = vmatpush1.bf16.msra.mxu0 %v1578_v11  ;;  %1553 = vmatpush1.bf16.msra.mxu1 %v1578_v11 }
  0x28   : > { %631 = vmatprep.subr.bf16.mxu0 %v1669_v1  ;;  %1538 = vmatprep.subr.bf16.mxu1 %v1669_v1 }
  0x2b   : > { %632 = vmatpush1.bf16.msra.mxu0 %v1579_v12  ;;  %1554 = vmatpush1.bf16.msra.mxu1 %v1579_v12 }
  0x2c   : > { %633 = vmatprep.subr.bf16.mxu0 %v1669_v1  ;;  %1539 = vmatprep.subr.bf16.mxu1 %v1669_v1 }
  0x2f   : > { %634 = vmatpush1.bf16.msra.mxu0 %v1580_v13  ;;  %1555 = vmatpush1.bf16.msra.mxu1 %v1580_v13 }
  0x30   : > { %635 = vmatprep.subr.bf16.mxu0 %v1669_v1  ;;  %1540 = vmatprep.subr.bf16.mxu1 %v1669_v1 }
  0x33   : > { %636 = vmatpush1.bf16.msra.mxu0 %v1581_v14  ;;  %1556 = vmatpush1.bf16.msra.mxu1 %v1581_v14 }
  0x34   : > { %637 = vmatprep.subr.bf16.mxu0 %v1669_v1  ;;  %1541 = vmatprep.subr.bf16.mxu1 %v1669_v1 }
  0x37   : > { %638 = vmatpush1.bf16.msra.mxu0 %v1582_v15  ;;  %1557 = vmatpush1.bf16.msra.mxu1 %v1582_v15 }
  0x38   : > { %639 = vmatprep.subr.bf16.mxu0 %v1669_v1  ;;  %1542 = vmatprep.subr.bf16.mxu1 %v1669_v1 }
  0x3b   : > { %640 = vmatpush1.bf16.msra.mxu0 %v1583_v16  ;;  %1558 = vmatpush1.bf16.msra.mxu1 %v1583_v16 }
  0x3c   : > { %641 = vmatprep.subr.bf16.mxu0 %v1669_v1  ;;  %1543 = vmatprep.subr.bf16.mxu1 %v1669_v1 }
  0x3f   : > { %642 = vmatpush1.bf16.msra.mxu0 %v1584_v17  ;;  %1559 = vmatpush1.bf16.msra.mxu1 %v1584_v17 }
  0x40   : > { %643 = vmatprep.subr.bf16.mxu0 %v1669_v1  ;;  %1544 = vmatprep.subr.bf16.mxu1 %v1669_v1  ;;  %v1658_v1 = vld [vmem:[%s1727_s28 + $0xc4] ss:$8 sps:$4 sm:$0xff]  }
  0x43   : > { %644 = vmatpush1.bf16.msra.mxu0 %v1585_v18  ;;  %1560 = vmatpush1.bf16.msra.mxu1 %v1585_v18 }
  0x46   : > { %646 = vmatmul.mubr.bf16.vlgmr.msra.gmra.mrb[0].mxu0 %v1586_v19  ;;  %750 = vmatmul.mubr.bf16.vlgmr.msra.gmra.mrb[0].mxu1 %v1589_v20 }
  0x47   : > { %653 = vmatprep.mubr.bf16.mxu0 %v1592_v21  ;;  %757 = vmatprep.mubr.bf16.mxu1 %v1595_v22 }
  0x4e   : > { %654 = vmatmul.mubr.bf16.gmra.mrb[4].mxu0 %v1594_v23  ;;  %758 = vmatmul.mubr.bf16.gmra.mrb[4].mxu1 %v1597_v24 }
  0x4f   : > { %661 = vmatprep.mubr.bf16.mxu0 %v1598_v25  ;;  %765 = vmatprep.mubr.bf16.mxu1 %v1601_v26 }
  0x56   : > { %662 = vmatmul.mubr.bf16.gmra.mrb[8].mxu0 %v1600_v27  ;;  %766 = vmatmul.mubr.bf16.gmra.mrb[8].mxu1 %v1603_v28 }
  0x57   : > { %669 = vmatprep.mubr.bf16.mxu0 %v1604_v29  ;;  %773 = vmatprep.mubr.bf16.mxu1 %v1607_v30 }
  0x5e   : > { %670 = vmatmul.mubr.bf16.gmra.mrb[12].mxu0 %v1606_v31  ;;  %774 = vmatmul.mubr.bf16.gmra.mrb[12].mxu1 %v1609_v32 }
  0x5f   : > { %677 = vmatprep.mubr.bf16.mxu0 %v1610_v33  ;;  %781 = vmatprep.mubr.bf16.mxu1 %v1613_v34 }
  0x66   : > { %678 = vmatmul.mubr.bf16.gmra.mrb[16].mxu0 %v1612_v35  ;;  %782 = vmatmul.mubr.bf16.gmra.mrb[16].mxu1 %v1615_v36 }
  0x67   : > { %685 = vmatprep.mubr.bf16.mxu0 %v1616_v37  ;;  %789 = vmatprep.mubr.bf16.mxu1 %v1619_v38 }
  0x6e   : > { %686 = vmatmul.mubr.bf16.gmra.mrb[20].mxu0 %v1618_v39  ;;  %790 = vmatmul.mubr.bf16.gmra.mrb[20].mxu1 %v1621_v40 }
  0x6f   : > { %693 = vmatprep.mubr.bf16.mxu0 %v1622_v41  ;;  %797 = vmatprep.mubr.bf16.mxu1 %v1625_v42 }
  0x76   : > { %694 = vmatmul.mubr.bf16.gmra.mrb[24].mxu0 %v1624_v43  ;;  %798 = vmatmul.mubr.bf16.gmra.mrb[24].mxu1 %v1627_v44 }
  0x77   : > { %701 = vmatprep.mubr.bf16.mxu0 %v1628_v45  ;;  %805 = vmatprep.mubr.bf16.mxu1 %v1631_v46 }
  0x7e   : > { %702 = vmatmul.mubr.bf16.gmra.mrb[28].mxu0 %v1630_v47  ;;  %806 = vmatmul.mubr.bf16.gmra.mrb[28].mxu1 %v1633_v48 }
  0x7f   : > { %709 = vmatprep.mubr.bf16.mxu0 %v1634_v49  ;;  %813 = vmatprep.mubr.bf16.mxu1 %v1637_v50 }
  0x86   : > { %710 = vmatmul.mubr.bf16.gmra.mrb[32].mxu0 %v1636_v51  ;;  %814 = vmatmul.mubr.bf16.gmra.mrb[32].mxu1 %v1639_v52 }
  0x87   : > { %717 = vmatprep.mubr.bf16.mxu0 %v1640_v53  ;;  %821 = vmatprep.mubr.bf16.mxu1 %v1643_v54 }
  0x8e   : > { %718 = vmatmul.mubr.bf16.gmra.mrb[36].mxu0 %v1642_v55  ;;  %822 = vmatmul.mubr.bf16.gmra.mrb[36].mxu1 %v1645_v56 }
  0x8f   : > { %725 = vmatprep.mubr.bf16.mxu0 %v1646_v57  ;;  %829 = vmatprep.mubr.bf16.mxu1 %v1649_v58 }
  0x96   : > { %726 = vmatmul.mubr.bf16.gmra.mrb[40].mxu0 %v1648_v59  ;;  %830 = vmatmul.mubr.bf16.gmra.mrb[40].mxu1 %v1651_v60 }
  0x97   : > { %733 = vmatprep.mubr.bf16.mxu0 %v1652_v61  ;;  %837 = vmatprep.mubr.bf16.mxu1 %v1655_v62 }
  0x9e   : > { %734 = vmatmul.mubr.bf16.gmra.mrb[44].mxu0 %v1654_v63  ;;  %838 = vmatmul.mubr.bf16.gmra.mrb[44].mxu1 %v1657_v0 }
  0x9f   : > { %741 = vmatprep.mubr.bf16.mxu0 %v1658_v1 }
  0xa6   : > { %742 = vmatmul.mubr.bf16.gmra.mrb[48].mxu0 %v1660_v2 }
 0x119   : > { %v647_v4 = vpop.f32.mrb[0].mxu0  ;;  %v751_v5 = vpop.f32.mrb[0].mxu1 }
 0x11a   : > { %v648_v6 = vadd.f32 %v1839_v3, %v647_v4  ;;  %v649_v7 = vpop.f32.mrb[1].mxu0  ;;  %v752_v8 = vadd.f32 %v1839_v3, %v751_v5  ;;  %v753_v9 = vpop.f32.mrb[1].mxu1 }
 0x11b   : > { %v650_v10 = vpop.f32.mrb[2].mxu0  ;;  %v754_v11 = vpop.f32.mrb[2].mxu1 }
 0x11c   : > { %v651_v12 = vadd.f32 %v1839_v3, %v650_v10  ;;  %v652_v13 = vpop.f32.mrb[3].mxu0  ;;  %v872_v14 = vmax.f32 %v752_v8, 0.0  ;;  %v755_v15 = vadd.f32 %v1839_v3, %v754_v11  ;;  %v756_v16 = vpop.f32.mrb[3].mxu1  ;;  %v846_v17 = vmax.f32 %v648_v6, 0.0 }
 0x11e   : > { %v847_v18 = vmax.f32 %v651_v12, 0.0  ;;  %v873_v19 = vmax.f32 %v755_v15, 0.0 }
 0x120   : > { %v1383_v20 = vpack.c.bf16 %v847_v18, %v846_v17  ;;  %v1448_v21 = vpack.c.bf16 %v873_v19, %v872_v14 }
 0x121   : > { %v655_v22 = vpop.f32.mrb[4].mxu0  ;;  %v759_v23 = vpop.f32.mrb[4].mxu1 }
 0x122   : > { %1384 = vst [vmem:[%s1849_s4] sm:$0xff] %v1383_v20   ;;  %1517 = vst [vmem:[%s1849_s4 + $0x68] sm:$0xff] %v1448_v21   ;;  %v656_v24 = vadd.f32 %v1839_v3, %v655_v22  ;;  %v657_v25 = vpop.f32.mrb[5].mxu0  ;;  %v760_v26 = vadd.f32 %v1839_v3, %v759_v23  ;;  %v761_v27 = vpop.f32.mrb[5].mxu1 }
 0x123   : > { %v658_v28 = vpop.f32.mrb[6].mxu0  ;;  %v762_v29 = vpop.f32.mrb[6].mxu1 }
 0x124   : > { %v659_v30 = vadd.f32 %v1839_v3, %v658_v28  ;;  %v660_v31 = vpop.f32.mrb[7].mxu0  ;;  %v874_v32 = vmax.f32 %v760_v26, 0.0  ;;  %v763_v33 = vadd.f32 %v1839_v3, %v762_v29  ;;  %v764_v34 = vpop.f32.mrb[7].mxu1  ;;  %v848_v35 = vmax.f32 %v656_v24, 0.0 }
 0x126   : > { %v849_v36 = vmax.f32 %v659_v30, 0.0  ;;  %v875_v37 = vmax.f32 %v763_v33, 0.0 }
 0x128   : > { %v1388_v38 = vpack.c.bf16 %v849_v36, %v848_v35  ;;  %v1453_v39 = vpack.c.bf16 %v875_v37, %v874_v32 }
 0x129   : > { %v663_v40 = vpop.f32.mrb[8].mxu0  ;;  %v767_v41 = vpop.f32.mrb[8].mxu1 }
 0x12a   : > { %1505 = vst [vmem:[%s1849_s4 + $0x8] sm:$0xff] %v1388_v38   ;;  %1518 = vst [vmem:[%s1849_s4 + $0x70] sm:$0xff] %v1453_v39   ;;  %v664_v42 = vadd.f32 %v1839_v3, %v663_v40  ;;  %v665_v43 = vpop.f32.mrb[9].mxu0  ;;  %v768_v44 = vadd.f32 %v1839_v3, %v767_v41  ;;  %v769_v45 = vpop.f32.mrb[9].mxu1 }
 0x12b   : > { %v666_v46 = vpop.f32.mrb[10].mxu0  ;;  %v770_v47 = vpop.f32.mrb[10].mxu1 }
 0x12c   : > { %v667_v48 = vadd.f32 %v1839_v3, %v666_v46  ;;  %v668_v49 = vpop.f32.mrb[11].mxu0  ;;  %v876_v50 = vmax.f32 %v768_v44, 0.0  ;;  %v771_v51 = vadd.f32 %v1839_v3, %v770_v47  ;;  %v772_v52 = vpop.f32.mrb[11].mxu1  ;;  %v850_v53 = vmax.f32 %v664_v42, 0.0 }
 0x12e   : > { %v851_v54 = vmax.f32 %v667_v48, 0.0  ;;  %v877_v55 = vmax.f32 %v771_v51, 0.0 }
 0x130   : > { %v1393_v56 = vpack.c.bf16 %v851_v54, %v850_v53  ;;  %v1458_v57 = vpack.c.bf16 %v877_v55, %v876_v50 }
 0x131   : > { %v671_v58 = vpop.f32.mrb[12].mxu0  ;;  %v775_v59 = vpop.f32.mrb[12].mxu1 }
 0x132   : > { %1506 = vst [vmem:[%s1849_s4 + $0x10] sm:$0xff] %v1393_v56   ;;  %1519 = vst [vmem:[%s1849_s4 + $0x78] sm:$0xff] %v1458_v57   ;;  %v672_v60 = vadd.f32 %v1839_v3, %v671_v58  ;;  %v673_v61 = vpop.f32.mrb[13].mxu0  ;;  %v776_v62 = vadd.f32 %v1839_v3, %v775_v59  ;;  %v777_v63 = vpop.f32.mrb[13].mxu1 }
 0x133   : > { %v674_v0 = vpop.f32.mrb[14].mxu0  ;;  %v778_v1 = vpop.f32.mrb[14].mxu1 }
 0x134   : > { %v675_v2 = vadd.f32 %v1839_v3, %v674_v0  ;;  %v676_v4 = vpop.f32.mrb[15].mxu0  ;;  %v878_v5 = vmax.f32 %v776_v62, 0.0  ;;  %v779_v6 = vadd.f32 %v1839_v3, %v778_v1  ;;  %v780_v7 = vpop.f32.mrb[15].mxu1  ;;  %v852_v8 = vmax.f32 %v672_v60, 0.0 }
 0x136   : > { %v853_v9 = vmax.f32 %v675_v2, 0.0  ;;  %v879_v10 = vmax.f32 %v779_v6, 0.0 }
 0x138   : > { %v1398_v11 = vpack.c.bf16 %v853_v9, %v852_v8  ;;  %v1463_v12 = vpack.c.bf16 %v879_v10, %v878_v5 }
 0x139   : > { %v679_v13 = vpop.f32.mrb[16].mxu0  ;;  %v783_v14 = vpop.f32.mrb[16].mxu1 }
 0x13a   : > { %1507 = vst [vmem:[%s1849_s4 + $0x18] sm:$0xff] %v1398_v11   ;;  %1520 = vst [vmem:[%s1849_s4 + $0x80] sm:$0xff] %v1463_v12   ;;  %v680_v15 = vadd.f32 %v1839_v3, %v679_v13  ;;  %v681_v16 = vpop.f32.mrb[17].mxu0  ;;  %v784_v17 = vadd.f32 %v1839_v3, %v783_v14  ;;  %v785_v18 = vpop.f32.mrb[17].mxu1 }
 0x13b   : > { %v682_v19 = vpop.f32.mrb[18].mxu0  ;;  %v786_v20 = vpop.f32.mrb[18].mxu1 }
 0x13c   : > { %v683_v21 = vadd.f32 %v1839_v3, %v682_v19  ;;  %v684_v22 = vpop.f32.mrb[19].mxu0  ;;  %v880_v23 = vmax.f32 %v784_v17, 0.0  ;;  %v787_v24 = vadd.f32 %v1839_v3, %v786_v20  ;;  %v788_v25 = vpop.f32.mrb[19].mxu1  ;;  %v854_v26 = vmax.f32 %v680_v15, 0.0 }
 0x13e   : > { %v855_v27 = vmax.f32 %v683_v21, 0.0  ;;  %v881_v28 = vmax.f32 %v787_v24, 0.0 }
 0x140   : > { %v1403_v29 = vpack.c.bf16 %v855_v27, %v854_v26  ;;  %v1468_v30 = vpack.c.bf16 %v881_v28, %v880_v23 }
 0x141   : > { %v687_v31 = vpop.f32.mrb[20].mxu0  ;;  %v791_v32 = vpop.f32.mrb[20].mxu1 }
 0x142   : > { %1508 = vst [vmem:[%s1849_s4 + $0x20] sm:$0xff] %v1403_v29   ;;  %1521 = vst [vmem:[%s1849_s4 + $0x88] sm:$0xff] %v1468_v30   ;;  %v688_v33 = vadd.f32 %v1839_v3, %v687_v31  ;;  %v689_v34 = vpop.f32.mrb[21].mxu0  ;;  %v792_v35 = vadd.f32 %v1839_v3, %v791_v32  ;;  %v793_v36 = vpop.f32.mrb[21].mxu1 }
 0x143   : > { %v690_v37 = vpop.f32.mrb[22].mxu0  ;;  %v794_v38 = vpop.f32.mrb[22].mxu1 }
 0x144   : > { %v691_v39 = vadd.f32 %v1839_v3, %v690_v37  ;;  %v692_v40 = vpop.f32.mrb[23].mxu0  ;;  %v882_v41 = vmax.f32 %v792_v35, 0.0  ;;  %v795_v42 = vadd.f32 %v1839_v3, %v794_v38  ;;  %v796_v43 = vpop.f32.mrb[23].mxu1  ;;  %v856_v44 = vmax.f32 %v688_v33, 0.0 }
 0x146   : > { %v857_v45 = vmax.f32 %v691_v39, 0.0  ;;  %v883_v46 = vmax.f32 %v795_v42, 0.0 }
 0x148   : > { %v1408_v47 = vpack.c.bf16 %v857_v45, %v856_v44  ;;  %v1473_v48 = vpack.c.bf16 %v883_v46, %v882_v41 }
 0x149   : > { %v695_v49 = vpop.f32.mrb[24].mxu0  ;;  %v799_v50 = vpop.f32.mrb[24].mxu1 }
 0x14a   : > { %1509 = vst [vmem:[%s1849_s4 + $0x28] sm:$0xff] %v1408_v47   ;;  %1522 = vst [vmem:[%s1849_s4 + $0x90] sm:$0xff] %v1473_v48   ;;  %v696_v51 = vadd.f32 %v1839_v3, %v695_v49  ;;  %v697_v52 = vpop.f32.mrb[25].mxu0  ;;  %v800_v53 = vadd.f32 %v1839_v3, %v799_v50  ;;  %v801_v54 = vpop.f32.mrb[25].mxu1 }
 0x14b   : > { %v698_v55 = vpop.f32.mrb[26].mxu0  ;;  %v802_v56 = vpop.f32.mrb[26].mxu1 }
 0x14c   : > { %v699_v57 = vadd.f32 %v1839_v3, %v698_v55  ;;  %v700_v58 = vpop.f32.mrb[27].mxu0  ;;  %v884_v59 = vmax.f32 %v800_v53, 0.0  ;;  %v803_v60 = vadd.f32 %v1839_v3, %v802_v56  ;;  %v804_v61 = vpop.f32.mrb[27].mxu1  ;;  %v858_v62 = vmax.f32 %v696_v51, 0.0 }
 0x14e   : > { %v859_v63 = vmax.f32 %v699_v57, 0.0  ;;  %v885_v0 = vmax.f32 %v803_v60, 0.0 }
 0x150   : > { %v1413_v1 = vpack.c.bf16 %v859_v63, %v858_v62  ;;  %v1478_v2 = vpack.c.bf16 %v885_v0, %v884_v59 }
 0x151   : > { %v703_v4 = vpop.f32.mrb[28].mxu0  ;;  %v807_v5 = vpop.f32.mrb[28].mxu1 }
 0x152   : > { %1510 = vst [vmem:[%s1849_s4 + $0x30] sm:$0xff] %v1413_v1   ;;  %1523 = vst [vmem:[%s1849_s4 + $0x98] sm:$0xff] %v1478_v2   ;;  %v704_v6 = vadd.f32 %v1839_v3, %v703_v4  ;;  %v705_v7 = vpop.f32.mrb[29].mxu0  ;;  %v808_v8 = vadd.f32 %v1839_v3, %v807_v5  ;;  %v809_v9 = vpop.f32.mrb[29].mxu1 }
 0x153   : > { %v706_v10 = vpop.f32.mrb[30].mxu0  ;;  %v810_v11 = vpop.f32.mrb[30].mxu1 }
 0x154   : > { %v707_v12 = vadd.f32 %v1839_v3, %v706_v10  ;;  %v708_v13 = vpop.f32.mrb[31].mxu0  ;;  %v886_v14 = vmax.f32 %v808_v8, 0.0  ;;  %v811_v15 = vadd.f32 %v1839_v3, %v810_v11  ;;  %v812_v16 = vpop.f32.mrb[31].mxu1  ;;  %v860_v17 = vmax.f32 %v704_v6, 0.0 }
 0x156   : > { %v861_v18 = vmax.f32 %v707_v12, 0.0  ;;  %v887_v19 = vmax.f32 %v811_v15, 0.0 }
 0x158   : > { %v1418_v20 = vpack.c.bf16 %v861_v18, %v860_v17  ;;  %v1483_v21 = vpack.c.bf16 %v887_v19, %v886_v14 }
 0x159   : > { %v711_v22 = vpop.f32.mrb[32].mxu0  ;;  %v815_v23 = vpop.f32.mrb[32].mxu1 }
 0x15a   : > { %1511 = vst [vmem:[%s1849_s4 + $0x38] sm:$0xff] %v1418_v20   ;;  %1524 = vst [vmem:[%s1849_s4 + $0xa0] sm:$0xff] %v1483_v21   ;;  %v712_v24 = vadd.f32 %v1839_v3, %v711_v22  ;;  %v713_v25 = vpop.f32.mrb[33].mxu0  ;;  %v816_v26 = vadd.f32 %v1839_v3, %v815_v23  ;;  %v817_v27 = vpop.f32.mrb[33].mxu1 }
 0x15b   : > { %v714_v28 = vpop.f32.mrb[34].mxu0  ;;  %v818_v29 = vpop.f32.mrb[34].mxu1 }
 0x15c   : > { %v715_v30 = vadd.f32 %v1839_v3, %v714_v28  ;;  %v716_v31 = vpop.f32.mrb[35].mxu0  ;;  %v888_v32 = vmax.f32 %v816_v26, 0.0  ;;  %v819_v33 = vadd.f32 %v1839_v3, %v818_v29  ;;  %v820_v34 = vpop.f32.mrb[35].mxu1  ;;  %v862_v35 = vmax.f32 %v712_v24, 0.0 }
 0x15e   : > { %v863_v36 = vmax.f32 %v715_v30, 0.0  ;;  %v889_v37 = vmax.f32 %v819_v33, 0.0 }
 0x160   : > { %v1423_v38 = vpack.c.bf16 %v863_v36, %v862_v35  ;;  %v1488_v39 = vpack.c.bf16 %v889_v37, %v888_v32 }
 0x161   : > { %v719_v40 = vpop.f32.mrb[36].mxu0  ;;  %v823_v41 = vpop.f32.mrb[36].mxu1 }
 0x162   : > { %1512 = vst [vmem:[%s1849_s4 + $0x40] sm:$0xff] %v1423_v38   ;;  %1525 = vst [vmem:[%s1849_s4 + $0xa8] sm:$0xff] %v1488_v39   ;;  %v720_v42 = vadd.f32 %v1839_v3, %v719_v40  ;;  %v721_v43 = vpop.f32.mrb[37].mxu0  ;;  %v824_v44 = vadd.f32 %v1839_v3, %v823_v41  ;;  %v825_v45 = vpop.f32.mrb[37].mxu1 }
 0x163   : > { %v722_v46 = vpop.f32.mrb[38].mxu0  ;;  %v826_v47 = vpop.f32.mrb[38].mxu1 }
 0x164   : > { %v723_v48 = vadd.f32 %v1839_v3, %v722_v46  ;;  %v724_v49 = vpop.f32.mrb[39].mxu0  ;;  %v890_v50 = vmax.f32 %v824_v44, 0.0  ;;  %v827_v51 = vadd.f32 %v1839_v3, %v826_v47  ;;  %v828_v52 = vpop.f32.mrb[39].mxu1  ;;  %v864_v53 = vmax.f32 %v720_v42, 0.0 }
 0x166   : > { %v865_v54 = vmax.f32 %v723_v48, 0.0  ;;  %v891_v55 = vmax.f32 %v827_v51, 0.0 }
 0x168   : > { %v1428_v56 = vpack.c.bf16 %v865_v54, %v864_v53  ;;  %v1493_v57 = vpack.c.bf16 %v891_v55, %v890_v50 }
 0x169   : > { %v727_v58 = vpop.f32.mrb[40].mxu0  ;;  %v831_v59 = vpop.f32.mrb[40].mxu1 }
 0x16a   : > { %1513 = vst [vmem:[%s1849_s4 + $0x48] sm:$0xff] %v1428_v56   ;;  %1526 = vst [vmem:[%s1849_s4 + $0xb0] sm:$0xff] %v1493_v57   ;;  %v728_v60 = vadd.f32 %v1839_v3, %v727_v58  ;;  %v729_v61 = vpop.f32.mrb[41].mxu0  ;;  %v832_v62 = vadd.f32 %v1839_v3, %v831_v59  ;;  %v833_v63 = vpop.f32.mrb[41].mxu1 }
 0x16b   : > { %v730_v0 = vpop.f32.mrb[42].mxu0  ;;  %v834_v1 = vpop.f32.mrb[42].mxu1 }
 0x16c   : > { %v731_v2 = vadd.f32 %v1839_v3, %v730_v0  ;;  %v732_v4 = vpop.f32.mrb[43].mxu0  ;;  %v892_v5 = vmax.f32 %v832_v62, 0.0  ;;  %v835_v6 = vadd.f32 %v1839_v3, %v834_v1  ;;  %v836_v7 = vpop.f32.mrb[43].mxu1  ;;  %v866_v8 = vmax.f32 %v728_v60, 0.0 }
 0x16e   : > { %v867_v9 = vmax.f32 %v731_v2, 0.0  ;;  %v893_v10 = vmax.f32 %v835_v6, 0.0 }
 0x170   : > { %v1433_v11 = vpack.c.bf16 %v867_v9, %v866_v8  ;;  %v1498_v12 = vpack.c.bf16 %v893_v10, %v892_v5 }
 0x171   : > { %v735_v13 = vpop.f32.mrb[44].mxu0  ;;  %v839_v14 = vpop.f32.mrb[44].mxu1 }
 0x172   : > { %1514 = vst [vmem:[%s1849_s4 + $0x50] sm:$0xff] %v1433_v11   ;;  %1527 = vst [vmem:[%s1849_s4 + $0xb8] sm:$0xff] %v1498_v12   ;;  %v736_v15 = vadd.f32 %v1839_v3, %v735_v13  ;;  %v737_v16 = vpop.f32.mrb[45].mxu0  ;;  %v840_v17 = vadd.f32 %v1839_v3, %v839_v14  ;;  %v841_v18 = vpop.f32.mrb[45].mxu1 }
 0x173   : > { %v738_v19 = vpop.f32.mrb[46].mxu0  ;;  %v842_v20 = vpop.f32.mrb[46].mxu1 }
 0x174   : > { %v739_v21 = vadd.f32 %v1839_v3, %v738_v19  ;;  %v740_v22 = vpop.f32.mrb[47].mxu0  ;;  %v894_v23 = vmax.f32 %v840_v17, 0.0  ;;  %v843_v24 = vadd.f32 %v1839_v3, %v842_v20  ;;  %v844_v25 = vpop.f32.mrb[47].mxu1  ;;  %v868_v26 = vmax.f32 %v736_v15, 0.0 }
 0x176   : > { %v869_v27 = vmax.f32 %v739_v21, 0.0  ;;  %v895_v28 = vmax.f32 %v843_v24, 0.0 }
 0x178   : > { %v1438_v29 = vpack.c.bf16 %v869_v27, %v868_v26  ;;  %v1503_v30 = vpack.c.bf16 %v895_v28, %v894_v23 }
 0x179   : > { %v743_v31 = vpop.f32.mrb[48].mxu0 }
 0x17a   : > { %1515 = vst [vmem:[%s1849_s4 + $0x58] sm:$0xff] %v1438_v29   ;;  %1528 = vst [vmem:[%s1849_s4 + $0xc0] sm:$0xff] %v1503_v30   ;;  %v744_v32 = vadd.f32 %v1839_v3, %v743_v31  ;;  %v745_v33 = vpop.f32.mrb[49].mxu0 }
 0x17b   : > { %v746_v34 = vpop.f32.mrb[50].mxu0 }
 0x17c   : > { %v747_v35 = vadd.f32 %v1839_v3, %v746_v34  ;;  %v748_v36 = vpop.f32.mrb[51].mxu0  ;;  %v870_v37 = vmax.f32 %v744_v32, 0.0 }
 0x17e   : > { %v871_v38 = vmax.f32 %v747_v35, 0.0 }
 0x180   : > { %v1443_v39 = vpack.c.bf16 %v871_v38, %v870_v37 }
 0x182   : > { %1516 = vst [vmem:[%s1849_s4 + $0x60] sm:$0xff] %v1443_v39  }
 0x183 PF: > { %s13_s12 = sadd.s32 1, %s1667_s12  }
 0x184   : > { %p10_p4 = scmp.ge.s32.totalorder %s13_s12, 4  }
 0x186   :  { %12 = sbr.rel (!%p10_p4) target bundleno = 1 (0x1), region = 62 }

// kernel: forward.5
= control target key start
LH: loop header
LB: loop body
LE: loop exit
PB: predicated region body
PF: predicated region fallthrough
CT: control target
= control target key end

     0   :  { %s1644_s1 = inlined_call_operand.vmem [shape: bf16[512,128], index: 1, kind: input, shape index: {}]   ;;  %s1645_s0 = inlined_call_operand.vmem [shape: bf16[162,512], index: 0, kind: input, shape index: {}]   ;;  %s1646_s2 = inlined_call_operand.vmem [shape: f32[1,128], index: 2, kind: input, shape index: {}]   ;;  %s1647_s3 = inlined_call_operand.vmem [shape: bf16[162,128], index: 3, kind: output, shape index: {}]  }
   0x1   :  { %v1247_v0 = vld [vmem:[%s1644_s1 + $0x40] sm:$0xff]   ;;  %v1251_v4 = vld [vmem:[%s1644_s1 + $0x48] sm:$0xff]   ;;  %v1255_v8 = vld [vmem:[%s1644_s1 + $0x50] sm:$0xff]  }
   0x2   :  { %v1248_v1 = vld [vmem:[%s1644_s1 + $0xc0] sm:$0xff]   ;;  %1083 = vmatprep.subr.bf16.mxu0 %v1247_v0  ;;  %v1252_v5 = vld [vmem:[%s1644_s1 + $0xc8] sm:$0xff]   ;;  %v1256_v9 = vld [vmem:[%s1644_s1 + $0xd0] sm:$0xff]  }
   0x3   :  { %v1249_v2 = vld [vmem:[%s1644_s1] sm:$0xff]   ;;  %1165 = vmatprep.subr.bf16.mxu1 %v1248_v1  ;;  %v1253_v6 = vld [vmem:[%s1644_s1 + $0x8] sm:$0xff]   ;;  %v1257_v10 = vld [vmem:[%s1644_s1 + $0x10] sm:$0xff]  }
   0x4   :  { %v1250_v3 = vld [vmem:[%s1644_s1 + $0x80] sm:$0xff]   ;;  %1084 = vmatpush3.bf16.msra.mxu0 %v1249_v2  ;;  %v1254_v7 = vld [vmem:[%s1644_s1 + $0x88] sm:$0xff]   ;;  %v1258_v11 = vld [vmem:[%s1644_s1 + $0x90] sm:$0xff]  }
   0x5   :  { %1166 = vmatpush3.bf16.msra.mxu1 %v1250_v3  ;;  %1085 = vmatprep.subr.bf16.mxu0 %v1251_v4  ;;  %v1259_v12 = vld [vmem:[%s1644_s1 + $0x58] sm:$0xff]   ;;  %v1263_v16 = vld [vmem:[%s1644_s1 + $0x60] sm:$0xff]   ;;  %v1267_v20 = vld [vmem:[%s1644_s1 + $0x68] sm:$0xff]  }
   0x6   :  { %1167 = vmatprep.subr.bf16.mxu1 %v1252_v5  ;;  %v1260_v13 = vld [vmem:[%s1644_s1 + $0xd8] sm:$0xff]   ;;  %v1264_v17 = vld [vmem:[%s1644_s1 + $0xe0] sm:$0xff]   ;;  %v1268_v21 = vld [vmem:[%s1644_s1 + $0xe8] sm:$0xff]  }
   0x7   :  { %v1261_v14 = vld [vmem:[%s1644_s1 + $0x18] sm:$0xff]   ;;  %v1265_v18 = vld [vmem:[%s1644_s1 + $0x20] sm:$0xff]   ;;  %v1269_v22 = vld [vmem:[%s1644_s1 + $0x28] sm:$0xff]  }
   0x8   :  { %1086 = vmatpush3.bf16.msra.mxu0 %v1253_v6  ;;  %v1262_v15 = vld [vmem:[%s1644_s1 + $0x98] sm:$0xff]   ;;  %v1266_v19 = vld [vmem:[%s1644_s1 + $0xa0] sm:$0xff]   ;;  %v1270_v23 = vld [vmem:[%s1644_s1 + $0xa8] sm:$0xff]  }
   0x9   :  { %1168 = vmatpush3.bf16.msra.mxu1 %v1254_v7  ;;  %1087 = vmatprep.subr.bf16.mxu0 %v1255_v8  ;;  %v1271_v24 = vld [vmem:[%s1644_s1 + $0x70] sm:$0xff]   ;;  %v1275_v28 = vld [vmem:[%s1644_s1 + $0x78] sm:$0xff]   ;;  %v55_v6 = vld [vmem:[%s1645_s0 + $0x140] sm:$0x11] }
   0xa   :  { %1169 = vmatprep.subr.bf16.mxu1 %v1256_v9  ;;  %v1272_v25 = vld [vmem:[%s1644_s1 + $0xf0] sm:$0xff]   ;;  %v1276_v29 = vld [vmem:[%s1644_s1 + $0xf8] sm:$0xff]   ;;  %v56_v7 = vld [vmem:[%s1645_s0 + $0x148] sm:$0x11] }
   0xb   :  { %v1273_v26 = vld [vmem:[%s1644_s1 + $0x30] sm:$0xff]   ;;  %v1277_v30 = vld [vmem:[%s1644_s1 + $0x38] sm:$0xff]  }
   0xc   :  { %1088 = vmatpush3.bf16.msra.mxu0 %v1257_v10  ;;  %v1274_v27 = vld [vmem:[%s1644_s1 + $0xb0] sm:$0xff]   ;;  %v1278_v31 = vld [vmem:[%s1644_s1 + $0xb8] sm:$0xff]   ;;  %v947_v10 = vcombine.high %v55_v6, %v55_v6 }
   0xd   :  { %1170 = vmatpush3.bf16.msra.mxu1 %v1258_v11  ;;  %1089 = vmatprep.subr.bf16.mxu0 %v1259_v12  ;;  %v1279_v32 = vld [vmem:[%s1645_s0] ss:$16 sps:$4 sm:$0xff]   ;;  %v1281_v33 = vld [vmem:[%s1645_s0 + $0x4] ss:$16 sps:$4 sm:$0xff]   ;;  %v1282_v34 = vld [vmem:[%s1645_s0 + $0x8] ss:$16 sps:$4 sm:$0xff]   ;;  %v949_v11 = vcombine.high %v56_v7, %v56_v7  ;;  %v946_v12 = vcombine.low %v55_v6, %v55_v6 }
   0xe   :  { %1171 = vmatprep.subr.bf16.mxu1 %v1260_v13  ;;  %v1284_v35 = vld [vmem:[%s1645_s0 + $0xc] ss:$16 sps:$4 sm:$0xff]   ;;  %566 = vmatprep.mubr.bf16.mxu0 %v1281_v33  ;;  %v1285_v36 = vld [vmem:[%s1645_s0 + $0x24] ss:$16 sps:$4 sm:$0xff]   ;;  %v1289_v38 = vld [vmem:[%s1645_s0 + $0x20] ss:$16 sps:$4 sm:$0xff]   ;;  %v948_v13 = vcombine.low %v56_v7, %v56_v7 }
   0xf   :  { %686 = vmatprep.mubr.bf16.mxu1 %v1284_v35  ;;  %v1287_v37 = vld [vmem:[%s1645_s0 + $0x2c] ss:$16 sps:$4 sm:$0xff]   ;;  %v1290_v39 = vld [vmem:[%s1645_s0 + $0x28] ss:$16 sps:$4 sm:$0xff]   ;;  %v1291_v40 = vld [vmem:[%s1645_s0 + $0x44] ss:$16 sps:$4 sm:$0xff]  }
  0x10   :  { %1090 = vmatpush3.bf16.msra.mxu0 %v1261_v14  ;;  %v1293_v41 = vld [vmem:[%s1645_s0 + $0x4c] ss:$16 sps:$4 sm:$0xff]   ;;  %v1295_v42 = vld [vmem:[%s1645_s0 + $0x40] ss:$16 sps:$4 sm:$0xff]   ;;  %v1296_v43 = vld [vmem:[%s1645_s0 + $0x48] ss:$16 sps:$4 sm:$0xff]  }
  0x11   :  { %1172 = vmatpush3.bf16.msra.mxu1 %v1262_v15  ;;  %1091 = vmatprep.subr.bf16.mxu0 %v1263_v16  ;;  %v1297_v44 = vld [vmem:[%s1645_s0 + $0x64] ss:$16 sps:$4 sm:$0xff]   ;;  %v1299_v45 = vld [vmem:[%s1645_s0 + $0x6c] ss:$16 sps:$4 sm:$0xff]   ;;  %v1301_v46 = vld [vmem:[%s1645_s0 + $0x60] ss:$16 sps:$4 sm:$0xff]  }
  0x12   :  { %1173 = vmatprep.subr.bf16.mxu1 %v1264_v17  ;;  %v1302_v47 = vld [vmem:[%s1645_s0 + $0x68] ss:$16 sps:$4 sm:$0xff]   ;;  %v1303_v48 = vld [vmem:[%s1645_s0 + $0x84] ss:$16 sps:$4 sm:$0xff]   ;;  %v1305_v49 = vld [vmem:[%s1645_s0 + $0x8c] ss:$16 sps:$4 sm:$0xff]  }
  0x13   :  { %v1307_v50 = vld [vmem:[%s1645_s0 + $0x80] ss:$16 sps:$4 sm:$0xff]   ;;  %v1308_v51 = vld [vmem:[%s1645_s0 + $0x88] ss:$16 sps:$4 sm:$0xff]   ;;  %v1309_v52 = vld [vmem:[%s1645_s0 + $0xa4] ss:$16 sps:$4 sm:$0xff]  }
  0x14   :  { %1092 = vmatpush3.bf16.msra.mxu0 %v1265_v18  ;;  %v1311_v53 = vld [vmem:[%s1645_s0 + $0xac] ss:$16 sps:$4 sm:$0xff]   ;;  %v1313_v54 = vld [vmem:[%s1645_s0 + $0xa0] ss:$16 sps:$4 sm:$0xff]   ;;  %v1314_v55 = vld [vmem:[%s1645_s0 + $0xa8] ss:$16 sps:$4 sm:$0xff]  }
  0x15   :  { %1174 = vmatpush3.bf16.msra.mxu1 %v1266_v19  ;;  %1093 = vmatprep.subr.bf16.mxu0 %v1267_v20  ;;  %v1315_v56 = vld [vmem:[%s1645_s0 + $0xc4] ss:$16 sps:$4 sm:$0xff]   ;;  %v1317_v57 = vld [vmem:[%s1645_s0 + $0xcc] ss:$16 sps:$4 sm:$0xff]   ;;  %v1319_v58 = vld [vmem:[%s1645_s0 + $0xc0] ss:$16 sps:$4 sm:$0xff]  }
  0x16   :  { %1175 = vmatprep.subr.bf16.mxu1 %v1268_v21  ;;  %v1320_v59 = vld [vmem:[%s1645_s0 + $0xc8] ss:$16 sps:$4 sm:$0xff]   ;;  %v1321_v60 = vld [vmem:[%s1645_s0 + $0xe4] ss:$16 sps:$4 sm:$0xff]   ;;  %v1323_v61 = vld [vmem:[%s1645_s0 + $0xec] ss:$16 sps:$4 sm:$0xff]  }
  0x17   :  { %v1325_v62 = vld [vmem:[%s1645_s0 + $0xe0] ss:$16 sps:$4 sm:$0xff]   ;;  %v1326_v63 = vld [vmem:[%s1645_s0 + $0xe8] ss:$16 sps:$4 sm:$0xff]   ;;  %v1327_v0 = vld [vmem:[%s1645_s0 + $0x104] ss:$16 sps:$4 sm:$0xff]  }
  0x18   :  { %1094 = vmatpush3.bf16.msra.mxu0 %v1269_v22  ;;  %v1329_v1 = vld [vmem:[%s1645_s0 + $0x10c] ss:$16 sps:$4 sm:$0xff]   ;;  %v1331_v2 = vld [vmem:[%s1645_s0 + $0x100] ss:$16 sps:$4 sm:$0xff]   ;;  %v1332_v3 = vld [vmem:[%s1645_s0 + $0x108] ss:$16 sps:$4 sm:$0xff]  }
  0x19   :  { %1176 = vmatpush3.bf16.msra.mxu1 %v1270_v23  ;;  %1095 = vmatprep.subr.bf16.mxu0 %v1271_v24  ;;  %v1333_v4 = vld [vmem:[%s1645_s0 + $0x124] ss:$16 sps:$4 sm:$0xff]   ;;  %v1335_v5 = vld [vmem:[%s1645_s0 + $0x12c] ss:$16 sps:$4 sm:$0xff]   ;;  %v1337_v8 = vld [vmem:[%s1645_s0 + $0x120] ss:$16 sps:$4 sm:$0xff]  }
  0x1a   :  { %1177 = vmatprep.subr.bf16.mxu1 %v1272_v25  ;;  %v1338_v9 = vld [vmem:[%s1645_s0 + $0x128] ss:$16 sps:$4 sm:$0xff]   ;;  %v1588_v16 = vld [vmem:[%s1646_s2] ss:$0 sm:$0xff] }
  0x1c   :  { %1096 = vmatpush3.bf16.msra.mxu0 %v1273_v26 }
  0x1d   :  { %1178 = vmatpush3.bf16.msra.mxu1 %v1274_v27  ;;  %1097 = vmatprep.subr.bf16.mxu0 %v1275_v28 }
  0x1e   :  { %1179 = vmatprep.subr.bf16.mxu1 %v1276_v29 }
  0x20   :  { %1098 = vmatpush3.bf16.msra.mxu0 %v1277_v30 }
  0x21   :  { %1180 = vmatpush3.bf16.msra.mxu1 %v1278_v31 }
  0x23   :  { %567 = vmatmul.mubr.bf16.vlgmr.msra.gmra.mrb[0].mxu0 %v1279_v32 }
  0x24   :  { %687 = vmatmul.mubr.bf16.vlgmr.msra.gmra.mrb[0].mxu1 %v1282_v34  ;;  %574 = vmatprep.mubr.bf16.mxu0 %v1285_v36 }
  0x25   :  { %694 = vmatprep.mubr.bf16.mxu1 %v1287_v37 }
  0x2b   :  { %575 = vmatmul.mubr.bf16.gmra.mrb[4].mxu0 %v1289_v38 }
  0x2c   :  { %695 = vmatmul.mubr.bf16.gmra.mrb[4].mxu1 %v1290_v39  ;;  %582 = vmatprep.mubr.bf16.mxu0 %v1291_v40 }
  0x2d   :  { %702 = vmatprep.mubr.bf16.mxu1 %v1293_v41 }
  0x33   :  { %583 = vmatmul.mubr.bf16.gmra.mrb[8].mxu0 %v1295_v42 }
  0x34   :  { %703 = vmatmul.mubr.bf16.gmra.mrb[8].mxu1 %v1296_v43  ;;  %590 = vmatprep.mubr.bf16.mxu0 %v1297_v44 }
  0x35   :  { %710 = vmatprep.mubr.bf16.mxu1 %v1299_v45 }
  0x3b   :  { %591 = vmatmul.mubr.bf16.gmra.mrb[12].mxu0 %v1301_v46 }
  0x3c   :  { %711 = vmatmul.mubr.bf16.gmra.mrb[12].mxu1 %v1302_v47  ;;  %598 = vmatprep.mubr.bf16.mxu0 %v1303_v48 }
  0x3d   :  { %718 = vmatprep.mubr.bf16.mxu1 %v1305_v49 }
  0x43   :  { %599 = vmatmul.mubr.bf16.gmra.mrb[16].mxu0 %v1307_v50 }
  0x44   :  { %719 = vmatmul.mubr.bf16.gmra.mrb[16].mxu1 %v1308_v51  ;;  %606 = vmatprep.mubr.bf16.mxu0 %v1309_v52 }
  0x45   :  { %726 = vmatprep.mubr.bf16.mxu1 %v1311_v53 }
  0x4b   :  { %607 = vmatmul.mubr.bf16.gmra.mrb[20].mxu0 %v1313_v54 }
  0x4c   :  { %727 = vmatmul.mubr.bf16.gmra.mrb[20].mxu1 %v1314_v55  ;;  %614 = vmatprep.mubr.bf16.mxu0 %v1315_v56 }
  0x4d   :  { %734 = vmatprep.mubr.bf16.mxu1 %v1317_v57 }
  0x53   :  { %615 = vmatmul.mubr.bf16.gmra.mrb[24].mxu0 %v1319_v58 }
  0x54   :  { %735 = vmatmul.mubr.bf16.gmra.mrb[24].mxu1 %v1320_v59  ;;  %622 = vmatprep.mubr.bf16.mxu0 %v1321_v60 }
  0x55   :  { %742 = vmatprep.mubr.bf16.mxu1 %v1323_v61 }
  0x5b   :  { %623 = vmatmul.mubr.bf16.gmra.mrb[28].mxu0 %v1325_v62 }
  0x5c   :  { %743 = vmatmul.mubr.bf16.gmra.mrb[28].mxu1 %v1326_v63  ;;  %630 = vmatprep.mubr.bf16.mxu0 %v1327_v0 }
  0x5d   :  { %750 = vmatprep.mubr.bf16.mxu1 %v1329_v1 }
  0x63   :  { %631 = vmatmul.mubr.bf16.gmra.mrb[32].mxu0 %v1331_v2 }
  0x64   :  { %751 = vmatmul.mubr.bf16.gmra.mrb[32].mxu1 %v1332_v3  ;;  %638 = vmatprep.mubr.bf16.mxu0 %v1333_v4 }
  0x65   :  { %758 = vmatprep.mubr.bf16.mxu1 %v1335_v5 }
  0x6b   :  { %639 = vmatmul.mubr.bf16.gmra.mrb[36].mxu0 %v1337_v8 }
  0x6c   :  { %759 = vmatmul.mubr.bf16.gmra.mrb[36].mxu1 %v1338_v9  ;;  %646 = vmatprep.mubr.bf16.mxu0 %v947_v10 }
  0x6d   :  { %766 = vmatprep.mubr.bf16.mxu1 %v949_v11 }
  0x73   :  { %647 = vmatmul.mubr.bf16.gmra.mrb[40].mxu0 %v946_v12 }
  0x74   :  { %767 = vmatmul.mubr.bf16.gmra.mrb[40].mxu1 %v948_v13 }
  0xf6   :  { %v1099_v14 = vpop.f32.mrb[0].mxu0 }
  0xf7   :  { %v1181_v15 = vpop.f32.mrb[0].mxu1  ;;  %v1100_v17 = vpop.f32.mrb[1].mxu0 }
  0xf8   :  { %v1101_v18 = vadd.f32 %v1100_v17, %v1099_v14  ;;  %v1182_v19 = vpop.f32.mrb[1].mxu1  ;;  %v1102_v20 = vpop.f32.mrb[2].mxu0 }
  0xf9   :  { %v1183_v21 = vadd.f32 %v1182_v19, %v1181_v15  ;;  %v1184_v22 = vpop.f32.mrb[2].mxu1  ;;  %v1103_v23 = vpop.f32.mrb[3].mxu0 }
  0xfa   :  { %v569_v24 = vadd.f32 %v1101_v18, %v1588_v16  ;;  %v1104_v25 = vadd.f32 %v1103_v23, %v1102_v20  ;;  %v1185_v26 = vpop.f32.mrb[3].mxu1 }
  0xfb   :  { %v1186_v27 = vadd.f32 %v1185_v26, %v1184_v22 }
  0xfc   :  { %v689_v28 = vadd.f32 %v1183_v21, %v569_v24  ;;  %v572_v29 = vadd.f32 %v1104_v25, %v1588_v16 }
  0xfe   :  { %v692_v30 = vadd.f32 %v1186_v27, %v572_v29  ;;  %v1105_v31 = vpop.f32.mrb[4].mxu0  ;;  %v774_v34 = vmax.f32 %v689_v28, 0.0 }
  0xff   :  { %v1187_v32 = vpop.f32.mrb[4].mxu1  ;;  %v1106_v33 = vpop.f32.mrb[5].mxu0 }
 0x100   :  { %v775_v35 = vmax.f32 %v692_v30, 0.0  ;;  %v1107_v36 = vadd.f32 %v1106_v33, %v1105_v31  ;;  %v1188_v37 = vpop.f32.mrb[5].mxu1  ;;  %v1108_v38 = vpop.f32.mrb[6].mxu0 }
 0x101   :  { %v1189_v39 = vadd.f32 %v1188_v37, %v1187_v32  ;;  %v1190_v40 = vpop.f32.mrb[6].mxu1  ;;  %v1109_v41 = vpop.f32.mrb[7].mxu0 }
 0x102   :  { %v1027_v42 = vpack.c.bf16 %v775_v35, %v774_v34  ;;  %v577_v43 = vadd.f32 %v1107_v36, %v1588_v16  ;;  %v1110_v44 = vadd.f32 %v1109_v41, %v1108_v38  ;;  %v1191_v45 = vpop.f32.mrb[7].mxu1 }
 0x103   :  { %v1192_v46 = vadd.f32 %v1191_v45, %v1190_v40 }
 0x104   :  { %1028 = vst [vmem:[%s1647_s3] sm:$0xff] %v1027_v42   ;;  %v697_v47 = vadd.f32 %v1189_v39, %v577_v43  ;;  %v580_v48 = vadd.f32 %v1110_v44, %v1588_v16 }
 0x106   :  { %v700_v49 = vadd.f32 %v1192_v46, %v580_v48  ;;  %v1111_v50 = vpop.f32.mrb[8].mxu0  ;;  %v776_v53 = vmax.f32 %v697_v47, 0.0 }
 0x107   :  { %v1193_v51 = vpop.f32.mrb[8].mxu1  ;;  %v1112_v52 = vpop.f32.mrb[9].mxu0 }
 0x108   :  { %v777_v54 = vmax.f32 %v700_v49, 0.0  ;;  %v1113_v55 = vadd.f32 %v1112_v52, %v1111_v50  ;;  %v1194_v56 = vpop.f32.mrb[9].mxu1  ;;  %v1114_v57 = vpop.f32.mrb[10].mxu0 }
 0x109   :  { %v1195_v58 = vadd.f32 %v1194_v56, %v1193_v51  ;;  %v1196_v59 = vpop.f32.mrb[10].mxu1  ;;  %v1115_v60 = vpop.f32.mrb[11].mxu0 }
 0x10a   :  { %v1032_v61 = vpack.c.bf16 %v777_v54, %v776_v53  ;;  %v585_v62 = vadd.f32 %v1113_v55, %v1588_v16  ;;  %v1116_v63 = vadd.f32 %v1115_v60, %v1114_v57  ;;  %v1197_v0 = vpop.f32.mrb[11].mxu1 }
 0x10b   :  { %v1198_v1 = vadd.f32 %v1197_v0, %v1196_v59 }
 0x10c   :  { %1074 = vst [vmem:[%s1647_s3 + $0x8] sm:$0xff] %v1032_v61   ;;  %v705_v2 = vadd.f32 %v1195_v58, %v585_v62  ;;  %v588_v3 = vadd.f32 %v1116_v63, %v1588_v16 }
 0x10e   :  { %v708_v4 = vadd.f32 %v1198_v1, %v588_v3  ;;  %v1117_v5 = vpop.f32.mrb[12].mxu0  ;;  %v778_v8 = vmax.f32 %v705_v2, 0.0 }
 0x10f   :  { %v1199_v6 = vpop.f32.mrb[12].mxu1  ;;  %v1118_v7 = vpop.f32.mrb[13].mxu0 }
 0x110   :  { %v779_v9 = vmax.f32 %v708_v4, 0.0  ;;  %v1119_v10 = vadd.f32 %v1118_v7, %v1117_v5  ;;  %v1200_v11 = vpop.f32.mrb[13].mxu1  ;;  %v1120_v12 = vpop.f32.mrb[14].mxu0 }
 0x111   :  { %v1201_v13 = vadd.f32 %v1200_v11, %v1199_v6  ;;  %v1202_v14 = vpop.f32.mrb[14].mxu1  ;;  %v1121_v15 = vpop.f32.mrb[15].mxu0 }
 0x112   :  { %v1037_v17 = vpack.c.bf16 %v779_v9, %v778_v8  ;;  %v593_v18 = vadd.f32 %v1119_v10, %v1588_v16  ;;  %v1122_v19 = vadd.f32 %v1121_v15, %v1120_v12  ;;  %v1203_v20 = vpop.f32.mrb[15].mxu1 }
 0x113   :  { %v1204_v21 = vadd.f32 %v1203_v20, %v1202_v14 }
 0x114   :  { %1075 = vst [vmem:[%s1647_s3 + $0x10] sm:$0xff] %v1037_v17   ;;  %v713_v22 = vadd.f32 %v1201_v13, %v593_v18  ;;  %v596_v23 = vadd.f32 %v1122_v19, %v1588_v16 }
 0x116   :  { %v716_v24 = vadd.f32 %v1204_v21, %v596_v23  ;;  %v1123_v25 = vpop.f32.mrb[16].mxu0  ;;  %v780_v28 = vmax.f32 %v713_v22, 0.0 }
 0x117   :  { %v1205_v26 = vpop.f32.mrb[16].mxu1  ;;  %v1124_v27 = vpop.f32.mrb[17].mxu0 }
 0x118   :  { %v781_v29 = vmax.f32 %v716_v24, 0.0  ;;  %v1125_v30 = vadd.f32 %v1124_v27, %v1123_v25  ;;  %v1206_v31 = vpop.f32.mrb[17].mxu1  ;;  %v1126_v32 = vpop.f32.mrb[18].mxu0 }
 0x119   :  { %v1207_v33 = vadd.f32 %v1206_v31, %v1205_v26  ;;  %v1208_v34 = vpop.f32.mrb[18].mxu1  ;;  %v1127_v35 = vpop.f32.mrb[19].mxu0 }
 0x11a   :  { %v1042_v36 = vpack.c.bf16 %v781_v29, %v780_v28  ;;  %v601_v37 = vadd.f32 %v1125_v30, %v1588_v16  ;;  %v1128_v38 = vadd.f32 %v1127_v35, %v1126_v32  ;;  %v1209_v39 = vpop.f32.mrb[19].mxu1 }
 0x11b   :  { %v1210_v40 = vadd.f32 %v1209_v39, %v1208_v34 }
 0x11c   :  { %1076 = vst [vmem:[%s1647_s3 + $0x18] sm:$0xff] %v1042_v36   ;;  %v721_v41 = vadd.f32 %v1207_v33, %v601_v37  ;;  %v604_v42 = vadd.f32 %v1128_v38, %v1588_v16 }
 0x11e   :  { %v724_v43 = vadd.f32 %v1210_v40, %v604_v42  ;;  %v1129_v44 = vpop.f32.mrb[20].mxu0  ;;  %v782_v47 = vmax.f32 %v721_v41, 0.0 }
 0x11f   :  { %v1211_v45 = vpop.f32.mrb[20].mxu1  ;;  %v1130_v46 = vpop.f32.mrb[21].mxu0 }
 0x120   :  { %v783_v48 = vmax.f32 %v724_v43, 0.0  ;;  %v1131_v49 = vadd.f32 %v1130_v46, %v1129_v44  ;;  %v1212_v50 = vpop.f32.mrb[21].mxu1  ;;  %v1132_v51 = vpop.f32.mrb[22].mxu0 }
 0x121   :  { %v1213_v52 = vadd.f32 %v1212_v50, %v1211_v45  ;;  %v1214_v53 = vpop.f32.mrb[22].mxu1  ;;  %v1133_v54 = vpop.f32.mrb[23].mxu0 }
 0x122   :  { %v1047_v55 = vpack.c.bf16 %v783_v48, %v782_v47  ;;  %v609_v56 = vadd.f32 %v1131_v49, %v1588_v16  ;;  %v1134_v57 = vadd.f32 %v1133_v54, %v1132_v51  ;;  %v1215_v58 = vpop.f32.mrb[23].mxu1 }
 0x123   :  { %v1216_v59 = vadd.f32 %v1215_v58, %v1214_v53 }
 0x124   :  { %1077 = vst [vmem:[%s1647_s3 + $0x20] sm:$0xff] %v1047_v55   ;;  %v729_v60 = vadd.f32 %v1213_v52, %v609_v56  ;;  %v612_v61 = vadd.f32 %v1134_v57, %v1588_v16 }
 0x126   :  { %v732_v62 = vadd.f32 %v1216_v59, %v612_v61  ;;  %v1135_v63 = vpop.f32.mrb[24].mxu0  ;;  %v784_v2 = vmax.f32 %v729_v60, 0.0 }
 0x127   :  { %v1217_v0 = vpop.f32.mrb[24].mxu1  ;;  %v1136_v1 = vpop.f32.mrb[25].mxu0 }
 0x128   :  { %v785_v3 = vmax.f32 %v732_v62, 0.0  ;;  %v1137_v4 = vadd.f32 %v1136_v1, %v1135_v63  ;;  %v1218_v5 = vpop.f32.mrb[25].mxu1  ;;  %v1138_v6 = vpop.f32.mrb[26].mxu0 }
 0x129   :  { %v1219_v7 = vadd.f32 %v1218_v5, %v1217_v0  ;;  %v1220_v8 = vpop.f32.mrb[26].mxu1  ;;  %v1139_v9 = vpop.f32.mrb[27].mxu0 }
 0x12a   :  { %v1052_v10 = vpack.c.bf16 %v785_v3, %v784_v2  ;;  %v617_v11 = vadd.f32 %v1137_v4, %v1588_v16  ;;  %v1140_v12 = vadd.f32 %v1139_v9, %v1138_v6  ;;  %v1221_v13 = vpop.f32.mrb[27].mxu1 }
 0x12b   :  { %v1222_v14 = vadd.f32 %v1221_v13, %v1220_v8 }
 0x12c   :  { %1078 = vst [vmem:[%s1647_s3 + $0x28] sm:$0xff] %v1052_v10   ;;  %v737_v15 = vadd.f32 %v1219_v7, %v617_v11  ;;  %v620_v17 = vadd.f32 %v1140_v12, %v1588_v16 }
 0x12e   :  { %v740_v18 = vadd.f32 %v1222_v14, %v620_v17  ;;  %v1141_v19 = vpop.f32.mrb[28].mxu0  ;;  %v786_v22 = vmax.f32 %v737_v15, 0.0 }
 0x12f   :  { %v1223_v20 = vpop.f32.mrb[28].mxu1  ;;  %v1142_v21 = vpop.f32.mrb[29].mxu0 }
 0x130   :  { %v787_v23 = vmax.f32 %v740_v18, 0.0  ;;  %v1143_v24 = vadd.f32 %v1142_v21, %v1141_v19  ;;  %v1224_v25 = vpop.f32.mrb[29].mxu1  ;;  %v1144_v26 = vpop.f32.mrb[30].mxu0 }
 0x131   :  { %v1225_v27 = vadd.f32 %v1224_v25, %v1223_v20  ;;  %v1226_v28 = vpop.f32.mrb[30].mxu1  ;;  %v1145_v29 = vpop.f32.mrb[31].mxu0 }
 0x132   :  { %v1057_v30 = vpack.c.bf16 %v787_v23, %v786_v22  ;;  %v625_v31 = vadd.f32 %v1143_v24, %v1588_v16  ;;  %v1146_v32 = vadd.f32 %v1145_v29, %v1144_v26  ;;  %v1227_v33 = vpop.f32.mrb[31].mxu1 }
 0x133   :  { %v1228_v34 = vadd.f32 %v1227_v33, %v1226_v28 }
 0x134   :  { %1079 = vst [vmem:[%s1647_s3 + $0x30] sm:$0xff] %v1057_v30   ;;  %v745_v35 = vadd.f32 %v1225_v27, %v625_v31  ;;  %v628_v36 = vadd.f32 %v1146_v32, %v1588_v16 }
 0x136   :  { %v748_v37 = vadd.f32 %v1228_v34, %v628_v36  ;;  %v1147_v38 = vpop.f32.mrb[32].mxu0  ;;  %v788_v41 = vmax.f32 %v745_v35, 0.0 }
 0x137   :  { %v1229_v39 = vpop.f32.mrb[32].mxu1  ;;  %v1148_v40 = vpop.f32.mrb[33].mxu0 }
 0x138   :  { %v789_v42 = vmax.f32 %v748_v37, 0.0  ;;  %v1149_v43 = vadd.f32 %v1148_v40, %v1147_v38  ;;  %v1230_v44 = vpop.f32.mrb[33].mxu1  ;;  %v1150_v45 = vpop.f32.mrb[34].mxu0 }
 0x139   :  { %v1231_v46 = vadd.f32 %v1230_v44, %v1229_v39  ;;  %v1232_v47 = vpop.f32.mrb[34].mxu1  ;;  %v1151_v48 = vpop.f32.mrb[35].mxu0 }
 0x13a   :  { %v1062_v49 = vpack.c.bf16 %v789_v42, %v788_v41  ;;  %v633_v50 = vadd.f32 %v1149_v43, %v1588_v16  ;;  %v1152_v51 = vadd.f32 %v1151_v48, %v1150_v45  ;;  %v1233_v52 = vpop.f32.mrb[35].mxu1 }
 0x13b   :  { %v1234_v53 = vadd.f32 %v1233_v52, %v1232_v47 }
 0x13c   :  { %1080 = vst [vmem:[%s1647_s3 + $0x38] sm:$0xff] %v1062_v49   ;;  %v753_v54 = vadd.f32 %v1231_v46, %v633_v50  ;;  %v636_v55 = vadd.f32 %v1152_v51, %v1588_v16 }
 0x13e   :  { %v756_v56 = vadd.f32 %v1234_v53, %v636_v55  ;;  %v1153_v57 = vpop.f32.mrb[36].mxu0  ;;  %v790_v60 = vmax.f32 %v753_v54, 0.0 }
 0x13f   :  { %v1235_v58 = vpop.f32.mrb[36].mxu1  ;;  %v1154_v59 = vpop.f32.mrb[37].mxu0 }
 0x140   :  { %v791_v61 = vmax.f32 %v756_v56, 0.0  ;;  %v1155_v62 = vadd.f32 %v1154_v59, %v1153_v57  ;;  %v1236_v63 = vpop.f32.mrb[37].mxu1  ;;  %v1156_v0 = vpop.f32.mrb[38].mxu0 }
 0x141   :  { %v1237_v1 = vadd.f32 %v1236_v63, %v1235_v58  ;;  %v1238_v2 = vpop.f32.mrb[38].mxu1  ;;  %v1157_v3 = vpop.f32.mrb[39].mxu0 }
 0x142   :  { %v1067_v4 = vpack.c.bf16 %v791_v61, %v790_v60  ;;  %v641_v5 = vadd.f32 %v1155_v62, %v1588_v16  ;;  %v1158_v6 = vadd.f32 %v1157_v3, %v1156_v0  ;;  %v1239_v7 = vpop.f32.mrb[39].mxu1 }
 0x143   :  { %v1240_v8 = vadd.f32 %v1239_v7, %v1238_v2 }
 0x144   :  { %1081 = vst [vmem:[%s1647_s3 + $0x40] sm:$0xff] %v1067_v4   ;;  %v761_v9 = vadd.f32 %v1237_v1, %v641_v5  ;;  %v644_v10 = vadd.f32 %v1158_v6, %v1588_v16 }
 0x146   :  { %v764_v11 = vadd.f32 %v1240_v8, %v644_v10  ;;  %v1159_v12 = vpop.f32.mrb[40].mxu0  ;;  %v792_v15 = vmax.f32 %v761_v9, 0.0 }
 0x147   :  { %v1241_v13 = vpop.f32.mrb[40].mxu1  ;;  %v1160_v14 = vpop.f32.mrb[41].mxu0 }
 0x148   :  { %v793_v17 = vmax.f32 %v764_v11, 0.0  ;;  %v1161_v18 = vadd.f32 %v1160_v14, %v1159_v12  ;;  %v1242_v19 = vpop.f32.mrb[41].mxu1  ;;  %v1162_v20 = vpop.f32.mrb[42].mxu0 }
 0x149   :  { %v1243_v21 = vadd.f32 %v1242_v19, %v1241_v13  ;;  %v1244_v22 = vpop.f32.mrb[42].mxu1  ;;  %v1163_v23 = vpop.f32.mrb[43].mxu0 }
 0x14a   :  { %v1072_v24 = vpack.c.bf16 %v793_v17, %v792_v15  ;;  %v649_v25 = vadd.f32 %v1161_v18, %v1588_v16  ;;  %v1245_v26 = vpop.f32.mrb[43].mxu1 }
 0x14c   :  { %1082 = vst [vmem:[%s1647_s3 + $0x48] sm:$0xff] %v1072_v24   ;;  %v769_v27 = vadd.f32 %v1243_v21, %v649_v25 }
 0x14e   :  { %v794_v28 = vmax.f32 %v769_v27, 0.0 }
 0x150   :  { %v1023_v29 = vpack.c.bf16 %v794_v28, %v794_v28 }
 0x152   :  { %900 = vst [vmem:[%s1647_s3 + $0x50] sm:$0x1] %v1023_v29 }

// kernel: forward.6
= control target key start
LH: loop header
LB: loop body
LE: loop exit
PB: predicated region body
PF: predicated region fallthrough
CT: control target
= control target key end

     0   :  { %v1281_v34 = vmov 0.0   ;;  %vm1282_vm0 = vmmov 0   ;;  %vm516_vm1 = vcmask 523264   ;;  %s1602_s1 = inlined_call_operand.vmem [shape: bf16[576,128], index: 1, kind: input, shape index: {}]   ;;  %s1603_s0 = inlined_call_operand.vmem [shape: bf16[98,576], index: 0, kind: input, shape index: {}]   ;;  %s1604_s2 = inlined_call_operand.vmem [shape: f32[1,128], index: 2, kind: input, shape index: {}]   ;;  %s1605_s3 = inlined_call_operand.vmem [shape: bf16[98,128], index: 3, kind: output, shape index: {}]  }
   0x1   :  { %v1198_v0 = vld [vmem:[%s1602_s1 + $0x40] sm:$0xff]   ;;  %v1202_v4 = vld [vmem:[%s1602_s1 + $0x48] sm:$0xff]   ;;  %v1206_v8 = vld [vmem:[%s1602_s1 + $0x50] sm:$0xff]  }
   0x2   :  { %v1199_v1 = vld [vmem:[%s1602_s1 + $0xc0] sm:$0xff]   ;;  %1025 = vmatprep.subr.bf16.mxu0 %v1198_v0  ;;  %v1203_v5 = vld [vmem:[%s1602_s1 + $0xc8] sm:$0xff]   ;;  %v1207_v9 = vld [vmem:[%s1602_s1 + $0xd0] sm:$0xff]  }
   0x3   :  { %v1200_v2 = vld [vmem:[%s1602_s1] sm:$0xff]   ;;  %1083 = vmatprep.subr.bf16.mxu1 %v1199_v1  ;;  %v1204_v6 = vld [vmem:[%s1602_s1 + $0x8] sm:$0xff]   ;;  %v1208_v10 = vld [vmem:[%s1602_s1 + $0x10] sm:$0xff]  }
   0x4   :  { %v1201_v3 = vld [vmem:[%s1602_s1 + $0x80] sm:$0xff]   ;;  %1026 = vmatpush3.bf16.msra.mxu0 %v1200_v2  ;;  %v1205_v7 = vld [vmem:[%s1602_s1 + $0x88] sm:$0xff]   ;;  %v1209_v11 = vld [vmem:[%s1602_s1 + $0x90] sm:$0xff]  }
   0x5   :  { %1084 = vmatpush3.bf16.msra.mxu1 %v1201_v3  ;;  %1027 = vmatprep.subr.bf16.mxu0 %v1202_v4  ;;  %v1210_v12 = vld [vmem:[%s1602_s1 + $0x58] sm:$0xff]   ;;  %v1214_v16 = vld [vmem:[%s1602_s1 + $0x60] sm:$0xff]   ;;  %v1218_v20 = vld [vmem:[%s1602_s1 + $0x68] sm:$0xff]  }
   0x6   :  { %1085 = vmatprep.subr.bf16.mxu1 %v1203_v5  ;;  %v1211_v13 = vld [vmem:[%s1602_s1 + $0xd8] sm:$0xff]   ;;  %v1215_v17 = vld [vmem:[%s1602_s1 + $0xe0] sm:$0xff]   ;;  %v1219_v21 = vld [vmem:[%s1602_s1 + $0xe8] sm:$0xff]  }
   0x7   :  { %v1212_v14 = vld [vmem:[%s1602_s1 + $0x18] sm:$0xff]   ;;  %v1216_v18 = vld [vmem:[%s1602_s1 + $0x20] sm:$0xff]   ;;  %v1220_v22 = vld [vmem:[%s1602_s1 + $0x28] sm:$0xff]  }
   0x8   :  { %1028 = vmatpush3.bf16.msra.mxu0 %v1204_v6  ;;  %v1213_v15 = vld [vmem:[%s1602_s1 + $0x98] sm:$0xff]   ;;  %v1217_v19 = vld [vmem:[%s1602_s1 + $0xa0] sm:$0xff]   ;;  %v1221_v23 = vld [vmem:[%s1602_s1 + $0xa8] sm:$0xff]  }
   0x9   :  { %1086 = vmatpush3.bf16.msra.mxu1 %v1205_v7  ;;  %1029 = vmatprep.subr.bf16.mxu0 %v1206_v8  ;;  %v1222_v24 = vld [vmem:[%s1602_s1 + $0x70] sm:$0xff]   ;;  %v1226_v28 = vld [vmem:[%s1602_s1 + $0x78] sm:$0xff]   ;;  %v1235_v36 = vld [vmem:[%s1603_s0 + $0xc] ss:$20 sps:$4 sm:$0xff]  }
   0xa   :  { %1087 = vmatprep.subr.bf16.mxu1 %v1207_v9  ;;  %v1223_v25 = vld [vmem:[%s1602_s1 + $0xf0] sm:$0xff]   ;;  %v1227_v29 = vld [vmem:[%s1602_s1 + $0xf8] sm:$0xff]   ;;  %v1236_v37 = vld [vmem:[%s1602_s1 + $0x100] sm:$0xff]   ;;  %658 = vmatprep.mubr.bf16.mxu1 %v1235_v36 }
   0xb   :  { %v1224_v26 = vld [vmem:[%s1602_s1 + $0x30] sm:$0xff]   ;;  %v1228_v30 = vld [vmem:[%s1602_s1 + $0x38] sm:$0xff]   ;;  %v1237_v38 = vld [vmem:[%s1603_s0 + $0x2c] ss:$20 sps:$4 sm:$0xff]  }
   0xc   :  { %1030 = vmatpush3.bf16.msra.mxu0 %v1208_v10  ;;  %v1225_v27 = vld [vmem:[%s1602_s1 + $0xb0] sm:$0xff]   ;;  %v1229_v31 = vld [vmem:[%s1602_s1 + $0xb8] sm:$0xff]   ;;  %v1247_v43 = vld [vmem:[%s1602_s1 + $0x108] sm:$0xff]  }
   0xd   :  { %1088 = vmatpush3.bf16.msra.mxu1 %v1209_v11  ;;  %1031 = vmatprep.subr.bf16.mxu0 %v1210_v12  ;;  %v1230_v32 = vld [vmem:[%s1603_s0] ss:$20 sps:$4 sm:$0xff]   ;;  %v1232_v33 = vld [vmem:[%s1603_s0 + $0x4] ss:$20 sps:$4 sm:$0xff]   ;;  %v1233_v35 = vld [vmem:[%s1603_s0 + $0x8] ss:$20 sps:$4 sm:$0xff]  }
   0xe   :  { %1089 = vmatprep.subr.bf16.mxu1 %v1211_v13  ;;  %570 = vmatprep.mubr.bf16.mxu0 %v1232_v33  ;;  %v1239_v39 = vld [vmem:[%s1603_s0 + $0x34] ss:$20 sps:$4 sm:$0xff]   ;;  %v1242_v41 = vld [vmem:[%s1603_s0 + $0x30] ss:$20 sps:$4 sm:$0xff]   ;;  %v1249_v47 = vld [vmem:[%s1603_s0 + $0x58] ss:$20 sps:$4 sm:$0xff]  }
   0xf   :  { %v1241_v40 = vld [vmem:[%s1603_s0 + $0x28] ss:$20 sps:$4 sm:$0xff]   ;;  %v1256_v45 = vld [vmem:[%s1602_s1 + $0x110] sm:$0xff]   ;;  %v1252_v49 = vld [vmem:[%s1603_s0 + $0x84] ss:$20 sps:$4 sm:$0xff]  }
  0x10   :  { %1032 = vmatpush3.bf16.msra.mxu0 %v1212_v14  ;;  %v1243_v42 = vld [vmem:[%s1603_s0 + $0x54] ss:$20 sps:$4 sm:$0xff]   ;;  %v1245_v44 = vld [vmem:[%s1603_s0 + $0x5c] ss:$20 sps:$4 sm:$0xff]   ;;  %v1254_v51 = vld [vmem:[%s1603_s0 + $0x78] ss:$20 sps:$4 sm:$0xff]  }
  0x11   :  { %1090 = vmatpush3.bf16.msra.mxu1 %v1213_v15  ;;  %1033 = vmatprep.subr.bf16.mxu0 %v1214_v16  ;;  %v1248_v46 = vld [vmem:[%s1603_s0 + $0x50] ss:$20 sps:$4 sm:$0xff]   ;;  %v1269_v50 = vld [vmem:[%s1602_s1 + $0x118] sm:$0xff]   ;;  %v1255_v52 = vld [vmem:[%s1603_s0 + $0x80] ss:$20 sps:$4 sm:$0xff]  }
  0x12   :  { %1091 = vmatprep.subr.bf16.mxu1 %v1215_v17  ;;  %v1250_v48 = vld [vmem:[%s1603_s0 + $0x7c] ss:$20 sps:$4 sm:$0xff]   ;;  %v1257_v53 = vld [vmem:[%s1603_s0 + $0xa4] ss:$20 sps:$4 sm:$0xff]   ;;  %v1259_v54 = vld [vmem:[%s1603_s0 + $0xac] ss:$20 sps:$4 sm:$0xff]  }
  0x13   :  { %v1261_v55 = vld [vmem:[%s1603_s0 + $0xa0] ss:$20 sps:$4 sm:$0xff]   ;;  %v1262_v56 = vld [vmem:[%s1603_s0 + $0xa8] ss:$20 sps:$4 sm:$0xff]   ;;  %v1268_v62 = vld [vmem:[%s1603_s0 + $0xd0] ss:$20 sps:$4 sm:$0xff]  }
  0x14   :  { %1034 = vmatpush3.bf16.msra.mxu0 %v1216_v18  ;;  %v1263_v57 = vld [vmem:[%s1603_s0 + $0xcc] ss:$20 sps:$4 sm:$0xff]   ;;  %v1265_v58 = vld [vmem:[%s1603_s0 + $0xd4] ss:$20 sps:$4 sm:$0xff]   ;;  %v52_v60 = vld [vmem:[%s1603_s0 + $0xf8] sm:$0x11] }
  0x15   :  { %1092 = vmatpush3.bf16.msra.mxu1 %v1217_v19  ;;  %1035 = vmatprep.subr.bf16.mxu0 %v1218_v20  ;;  %v51_v59 = vld [vmem:[%s1603_s0 + $0xf0] sm:$0x11]  ;;  %v1267_v61 = vld [vmem:[%s1603_s0 + $0xc8] ss:$20 sps:$4 sm:$0xff]   ;;  %v919_v0 = vcombine.high %v52_v60, %v52_v60  ;;  %v918_v2 = vcombine.low %v52_v60, %v52_v60  ;;  %v1276_v5 = vld [vmem:[%s1603_s0 + $0x38] ss:$20 sps:$4 sm:$0xff]  }
  0x16   :  { %1093 = vmatprep.subr.bf16.mxu1 %v1219_v21  ;;  %v917_v63 = vcombine.high %v51_v59, %v51_v59  ;;  %v916_v1 = vcombine.low %v51_v59, %v51_v59  ;;  %v1274_v3 = vld [vmem:[%s1603_s0 + $0x10] ss:$20 sps:$4 sm:$0xff]   ;;  %v1277_v6 = vld [vmem:[%s1603_s0 + $0xd8] ss:$20 sps:$4 sm:$0xff]   ;;  %v1278_v7 = vld [vmem:[%s1603_s0 + $0x60] ss:$20 sps:$4 sm:$0xff]  }
  0x17   :  { %v1275_v4 = vld [vmem:[%s1603_s0 + $0xb0] ss:$20 sps:$4 sm:$0xff]   ;;  %v1279_v8 = vld [vmem:[%s1603_s0 + $0x100] ss:$0 sps:$4 sm:$0x11]  }
  0x18   :  { %1036 = vmatpush3.bf16.msra.mxu0 %v1220_v22  ;;  %v1280_v9 = vld [vmem:[%s1603_s0 + $0x88] ss:$20 sps:$4 sm:$0xff]   ;;  %v1542_v11 = vld [vmem:[%s1604_s2] ss:$0 sm:$0xff] }
  0x19   :  { %1094 = vmatpush3.bf16.msra.mxu1 %v1221_v23  ;;  %1037 = vmatprep.subr.bf16.mxu0 %v1222_v24 }
  0x1a   :  { %1095 = vmatprep.subr.bf16.mxu1 %v1223_v25 }
  0x1c   :  { %1038 = vmatpush3.bf16.msra.mxu0 %v1224_v26 }
  0x1d   :  { %1096 = vmatpush3.bf16.msra.mxu1 %v1225_v27  ;;  %1039 = vmatprep.subr.bf16.mxu0 %v1226_v28 }
  0x1e   :  { %1097 = vmatprep.subr.bf16.mxu1 %v1227_v29 }
  0x20   :  { %1040 = vmatpush3.bf16.msra.mxu0 %v1228_v30 }
  0x21   :  { %1098 = vmatpush3.bf16.msra.mxu1 %v1229_v31  ;;  %1152 = vmatprep.subr.bf16.mxu0 %v1281_v34 }
  0x22   :  { %1188 = vmatprep.subr.bf16.mxu1 %v1281_v34 }
  0x23   :  { %571 = vmatmul.mubr.bf16.vlgmr.msra.gmra.mrb[0].mxu0 %v1230_v32 }
  0x24   :  { %659 = vmatmul.mubr.bf16.vlgmr.msra.gmra.mrb[0].mxu1 %v1233_v35  ;;  %1153 = vmatpush3.bf16.msra.mxu0 %v1236_v37 }
  0x25   :  { %578 = vmatprep.mubr.bf16.mxu0 %v1237_v38  ;;  %1192 = vmatpush3.bf16.msra.mxu1 %v1236_v37 }
  0x26   :  { %666 = vmatprep.mubr.bf16.mxu1 %v1239_v39  ;;  %1154 = vmatprep.subr.bf16.mxu0 %v1281_v34 }
  0x27   :  { %1189 = vmatprep.subr.bf16.mxu1 %v1281_v34 }
  0x28   :  { %1155 = vmatpush3.bf16.msra.mxu0 %v1247_v43 }
  0x29   :  { %1193 = vmatpush3.bf16.msra.mxu1 %v1247_v43  ;;  %1156 = vmatprep.subr.bf16.mxu0 %v1281_v34 }
  0x2a   :  { %1190 = vmatprep.subr.bf16.mxu1 %v1281_v34 }
  0x2b   :  { %579 = vmatmul.mubr.bf16.gmra.mrb[4].mxu0 %v1241_v40 }
  0x2c   :  { %667 = vmatmul.mubr.bf16.gmra.mrb[4].mxu1 %v1242_v41  ;;  %586 = vmatprep.mubr.bf16.mxu0 %v1243_v42 }
  0x2d   :  { %674 = vmatprep.mubr.bf16.mxu1 %v1245_v44  ;;  %1157 = vmatpush3.bf16.msra.mxu0 %v1256_v45 }
  0x2e   :  { %1194 = vmatpush3.bf16.msra.mxu1 %v1256_v45  ;;  %1158 = vmatprep.subr.bf16.mxu0 %v1281_v34 }
  0x2f   :  { %1191 = vmatprep.subr.bf16.mxu1 %v1281_v34 }
  0x31   :  { %1159 = vmatpush3.bf16.msra.mxu0 %v1269_v50 }
  0x32   :  { %1195 = vmatpush3.bf16.msra.mxu1 %v1269_v50 }
  0x33   :  { %587 = vmatmul.mubr.bf16.gmra.mrb[8].mxu0 %v1248_v46 }
  0x34   :  { %675 = vmatmul.mubr.bf16.gmra.mrb[8].mxu1 %v1249_v47  ;;  %594 = vmatprep.mubr.bf16.mxu0 %v1250_v48 }
  0x35   :  { %682 = vmatprep.mubr.bf16.mxu1 %v1252_v49 }
  0x3b   :  { %595 = vmatmul.mubr.bf16.gmra.mrb[12].mxu0 %v1254_v51 }
  0x3c   :  { %683 = vmatmul.mubr.bf16.gmra.mrb[12].mxu1 %v1255_v52  ;;  %602 = vmatprep.mubr.bf16.mxu0 %v1257_v53 }
  0x3d   :  { %690 = vmatprep.mubr.bf16.mxu1 %v1259_v54 }
  0x43   :  { %603 = vmatmul.mubr.bf16.gmra.mrb[16].mxu0 %v1261_v55 }
  0x44   :  { %691 = vmatmul.mubr.bf16.gmra.mrb[16].mxu1 %v1262_v56  ;;  %610 = vmatprep.mubr.bf16.mxu0 %v1263_v57 }
  0x45   :  { %698 = vmatprep.mubr.bf16.mxu1 %v1265_v58 }
  0x4b   :  { %611 = vmatmul.mubr.bf16.gmra.mrb[20].mxu0 %v1267_v61 }
  0x4c   :  { %699 = vmatmul.mubr.bf16.gmra.mrb[20].mxu1 %v1268_v62  ;;  %618 = vmatprep.mubr.bf16.mxu0 %v917_v63 }
  0x4d   :  { %706 = vmatprep.mubr.bf16.mxu1 %v919_v0 }
  0x53   :  { %619 = vmatmul.mubr.bf16.gmra.mrb[24].mxu0 %v916_v1 }
  0x54   :  { %707 = vmatmul.mubr.bf16.gmra.mrb[24].mxu1 %v918_v2  ;;  %1160 = vmatprep.mubr.msk.bf16.mxu0 %vm1282_vm0, %v1281_v34 }
  0x55   :  { %1176 = vmatprep.mubr.msk.bf16.mxu1 %vm1282_vm0, %v1281_v34 }
  0x5b   :  { %1161 = vmatmul.mubr.msk.bf16.vlgmr.msra.gmra.mrb[28].mxu0 %vm516_vm1, %v1274_v3 }
  0x5c   :  { %1177 = vmatmul.mubr.msk.bf16.vlgmr.msra.gmra.mrb[28].mxu1 %vm516_vm1, %v1275_v4  ;;  %1164 = vmatprep.mubr.msk.bf16.mxu0 %vm1282_vm0, %v1281_v34 }
  0x5d   :  { %1180 = vmatprep.mubr.msk.bf16.mxu1 %vm1282_vm0, %v1281_v34 }
  0x63   :  { %1165 = vmatmul.mubr.msk.bf16.gmra.mrb[32].mxu0 %vm516_vm1, %v1276_v5 }
  0x64   :  { %1181 = vmatmul.mubr.msk.bf16.gmra.mrb[32].mxu1 %vm516_vm1, %v1277_v6  ;;  %1168 = vmatprep.mubr.msk.bf16.mxu0 %vm1282_vm0, %v1281_v34 }
  0x65   :  { %1184 = vmatprep.mubr.msk.bf16.mxu1 %vm1282_vm0, %v1281_v34 }
  0x6b   :  { %1169 = vmatmul.mubr.msk.bf16.gmra.mrb[36].mxu0 %vm516_vm1, %v1278_v7 }
  0x6c   :  { %1185 = vmatmul.mubr.msk.bf16.gmra.mrb[36].mxu1 %vm516_vm1, %v1279_v8  ;;  %1172 = vmatprep.mubr.msk.bf16.mxu0 %vm1282_vm0, %v1281_v34 }
  0x73   :  { %1173 = vmatmul.mubr.msk.bf16.gmra.mrb[40].mxu0 %vm516_vm1, %v1280_v9 }
  0xf6   :  { %v1041_v10 = vpop.f32.mrb[0].mxu0 }
  0xf7   :  { %v1042_v12 = vpop.f32.mrb[1].mxu0  ;;  %v1099_v13 = vpop.f32.mrb[0].mxu1 }
  0xf8   :  { %v1043_v14 = vadd.f32 %v1042_v12, %v1041_v10  ;;  %v1044_v15 = vpop.f32.mrb[2].mxu0  ;;  %v1100_v16 = vpop.f32.mrb[1].mxu1 }
  0xf9   :  { %v1045_v17 = vpop.f32.mrb[3].mxu0  ;;  %v1101_v18 = vadd.f32 %v1100_v16, %v1099_v13  ;;  %v1102_v19 = vpop.f32.mrb[2].mxu1 }
  0xfa   :  { %v573_v20 = vadd.f32 %v1043_v14, %v1542_v11  ;;  %v1046_v21 = vadd.f32 %v1045_v17, %v1044_v15  ;;  %v1103_v22 = vpop.f32.mrb[3].mxu1 }
  0xfb   :  { %v1104_v23 = vadd.f32 %v1103_v22, %v1102_v19 }
  0xfc   :  { %v576_v24 = vadd.f32 %v1046_v21, %v1542_v11  ;;  %v1546_v25 = vadd.f32 %v1101_v18, %v573_v20 }
  0xfe   :  { %v1047_v26 = vpop.f32.mrb[4].mxu0  ;;  %v1548_v27 = vadd.f32 %v1104_v23, %v576_v24 }
  0xff   :  { %v1048_v28 = vpop.f32.mrb[5].mxu0  ;;  %v1105_v29 = vpop.f32.mrb[4].mxu1 }
 0x100   :  { %v1049_v30 = vadd.f32 %v1048_v28, %v1047_v26  ;;  %v1050_v31 = vpop.f32.mrb[6].mxu0  ;;  %v1106_v32 = vpop.f32.mrb[5].mxu1 }
 0x101   :  { %v1051_v33 = vpop.f32.mrb[7].mxu0  ;;  %v1107_v34 = vadd.f32 %v1106_v32, %v1105_v29  ;;  %v1108_v35 = vpop.f32.mrb[6].mxu1 }
 0x102   :  { %v581_v36 = vadd.f32 %v1049_v30, %v1542_v11  ;;  %v1052_v37 = vadd.f32 %v1051_v33, %v1050_v31  ;;  %v1109_v38 = vpop.f32.mrb[7].mxu1 }
 0x103   :  { %v1110_v39 = vadd.f32 %v1109_v38, %v1108_v35 }
 0x104   :  { %v584_v40 = vadd.f32 %v1052_v37, %v1542_v11  ;;  %v1552_v41 = vadd.f32 %v1107_v34, %v581_v36 }
 0x106   :  { %v1053_v42 = vpop.f32.mrb[8].mxu0  ;;  %v1554_v43 = vadd.f32 %v1110_v39, %v584_v40 }
 0x107   :  { %v1054_v44 = vpop.f32.mrb[9].mxu0  ;;  %v1111_v45 = vpop.f32.mrb[8].mxu1 }
 0x108   :  { %v1055_v46 = vadd.f32 %v1054_v44, %v1053_v42  ;;  %v1056_v47 = vpop.f32.mrb[10].mxu0  ;;  %v1112_v48 = vpop.f32.mrb[9].mxu1 }
 0x109   :  { %v1057_v49 = vpop.f32.mrb[11].mxu0  ;;  %v1113_v50 = vadd.f32 %v1112_v48, %v1111_v45  ;;  %v1114_v51 = vpop.f32.mrb[10].mxu1 }
 0x10a   :  { %v589_v52 = vadd.f32 %v1055_v46, %v1542_v11  ;;  %v1058_v53 = vadd.f32 %v1057_v49, %v1056_v47  ;;  %v1115_v54 = vpop.f32.mrb[11].mxu1 }
 0x10b   :  { %v1116_v55 = vadd.f32 %v1115_v54, %v1114_v51 }
 0x10c   :  { %v592_v56 = vadd.f32 %v1058_v53, %v1542_v11  ;;  %v1558_v57 = vadd.f32 %v1113_v50, %v589_v52 }
 0x10e   :  { %v1059_v58 = vpop.f32.mrb[12].mxu0  ;;  %v1560_v59 = vadd.f32 %v1116_v55, %v592_v56 }
 0x10f   :  { %v1060_v60 = vpop.f32.mrb[13].mxu0  ;;  %v1117_v61 = vpop.f32.mrb[12].mxu1 }
 0x110   :  { %v1061_v62 = vadd.f32 %v1060_v60, %v1059_v58  ;;  %v1062_v63 = vpop.f32.mrb[14].mxu0  ;;  %v1118_v0 = vpop.f32.mrb[13].mxu1 }
 0x111   :  { %v1063_v1 = vpop.f32.mrb[15].mxu0  ;;  %v1119_v2 = vadd.f32 %v1118_v0, %v1117_v61  ;;  %v1120_v3 = vpop.f32.mrb[14].mxu1 }
 0x112   :  { %v597_v4 = vadd.f32 %v1061_v62, %v1542_v11  ;;  %v1064_v5 = vadd.f32 %v1063_v1, %v1062_v63  ;;  %v1121_v6 = vpop.f32.mrb[15].mxu1 }
 0x113   :  { %v1122_v7 = vadd.f32 %v1121_v6, %v1120_v3 }
 0x114   :  { %v600_v8 = vadd.f32 %v1064_v5, %v1542_v11  ;;  %v1564_v9 = vadd.f32 %v1119_v2, %v597_v4 }
 0x116   :  { %v1065_v10 = vpop.f32.mrb[16].mxu0  ;;  %v1566_v12 = vadd.f32 %v1122_v7, %v600_v8 }
 0x117   :  { %v1066_v13 = vpop.f32.mrb[17].mxu0  ;;  %v1123_v14 = vpop.f32.mrb[16].mxu1 }
 0x118   :  { %v1067_v15 = vadd.f32 %v1066_v13, %v1065_v10  ;;  %v1068_v16 = vpop.f32.mrb[18].mxu0  ;;  %v1124_v17 = vpop.f32.mrb[17].mxu1 }
 0x119   :  { %v1069_v18 = vpop.f32.mrb[19].mxu0  ;;  %v1125_v19 = vadd.f32 %v1124_v17, %v1123_v14  ;;  %v1126_v20 = vpop.f32.mrb[18].mxu1 }
 0x11a   :  { %v605_v21 = vadd.f32 %v1067_v15, %v1542_v11  ;;  %v1070_v22 = vadd.f32 %v1069_v18, %v1068_v16  ;;  %v1127_v23 = vpop.f32.mrb[19].mxu1 }
 0x11b   :  { %v1128_v24 = vadd.f32 %v1127_v23, %v1126_v20 }
 0x11c   :  { %v608_v26 = vadd.f32 %v1070_v22, %v1542_v11  ;;  %v693_v28 = vadd.f32 %v1125_v19, %v605_v21 }
 0x11e   :  { %v1071_v29 = vpop.f32.mrb[20].mxu0  ;;  %v696_v30 = vadd.f32 %v1128_v24, %v608_v26 }
 0x11f   :  { %v1072_v31 = vpop.f32.mrb[21].mxu0  ;;  %v1129_v32 = vpop.f32.mrb[20].mxu1 }
 0x120   :  { %v1073_v33 = vadd.f32 %v1072_v31, %v1071_v29  ;;  %v1074_v34 = vpop.f32.mrb[22].mxu0  ;;  %v1130_v35 = vpop.f32.mrb[21].mxu1 }
 0x121   :  { %v1075_v36 = vpop.f32.mrb[23].mxu0  ;;  %v1131_v37 = vadd.f32 %v1130_v35, %v1129_v32  ;;  %v1132_v38 = vpop.f32.mrb[22].mxu1 }
 0x122   :  { %v613_v39 = vadd.f32 %v1073_v33, %v1542_v11  ;;  %v1076_v40 = vadd.f32 %v1075_v36, %v1074_v34  ;;  %v1133_v42 = vpop.f32.mrb[23].mxu1 }
 0x123   :  { %v1134_v44 = vadd.f32 %v1133_v42, %v1132_v38 }
 0x124   :  { %v616_v45 = vadd.f32 %v1076_v40, %v1542_v11  ;;  %v701_v46 = vadd.f32 %v1131_v37, %v613_v39 }
 0x126   :  { %v1077_v47 = vpop.f32.mrb[24].mxu0  ;;  %v704_v48 = vadd.f32 %v1134_v44, %v616_v45 }
 0x127   :  { %v1078_v49 = vpop.f32.mrb[25].mxu0  ;;  %v1135_v50 = vpop.f32.mrb[24].mxu1 }
 0x128   :  { %v1079_v51 = vadd.f32 %v1078_v49, %v1077_v47  ;;  %v1080_v52 = vpop.f32.mrb[26].mxu0  ;;  %v1136_v53 = vpop.f32.mrb[25].mxu1 }
 0x129   :  { %v1081_v54 = vpop.f32.mrb[27].mxu0  ;;  %v1137_v55 = vadd.f32 %v1136_v53, %v1135_v50  ;;  %v1138_v56 = vpop.f32.mrb[26].mxu1 }
 0x12a   :  { %v621_v58 = vadd.f32 %v1079_v51, %v1542_v11  ;;  %v1139_v60 = vpop.f32.mrb[27].mxu1 }
 0x12c   :  { %v709_v61 = vadd.f32 %v1137_v55, %v621_v58 }
 0x12e   :  { %v748_v62 = vpop.f32.mrb[28].mxu0 }
 0x12f   :  { %v749_v63 = vadd.f32 %v748_v62, %v1546_v25  ;;  %v780_v0 = vpop.f32.mrb[28].mxu1  ;;  %v1162_v1 = vpop.f32.mrb[29].mxu0 }
 0x130   :  { %v781_v2 = vadd.f32 %v780_v0, %v693_v28  ;;  %v1178_v3 = vpop.f32.mrb[29].mxu1  ;;  %v751_v4 = vpop.f32.mrb[30].mxu0 }
 0x131   :  { %v752_v5 = vadd.f32 %v751_v4, %v1548_v27  ;;  %v783_v6 = vpop.f32.mrb[30].mxu1  ;;  %v1163_v7 = vpop.f32.mrb[31].mxu0  ;;  %v802_v13 = vmax.f32 %v749_v63, 0.0 }
 0x132   :  { %v784_v8 = vadd.f32 %v783_v6, %v696_v30  ;;  %v1179_v10 = vpop.f32.mrb[31].mxu1  ;;  %v810_v15 = vmax.f32 %v781_v2, 0.0 }
 0x133   :  { %v803_v14 = vmax.f32 %v752_v5, 0.0 }
 0x134   :  { %v811_v11 = vmax.f32 %v784_v8, 0.0 }
 0x135   :  { %v993_v16 = vpack.c.bf16 %v803_v14, %v802_v13 }
 0x136   :  { %v1013_v17 = vpack.c.bf16 %v811_v11, %v810_v15  ;;  %v756_v18 = vpop.f32.mrb[32].mxu0 }
 0x137   :  { %994 = vst [vmem:[%s1605_s3] sm:$0xff] %v993_v16   ;;  %v757_v25 = vadd.f32 %v756_v18, %v1552_v41  ;;  %v788_v19 = vpop.f32.mrb[32].mxu1  ;;  %v1166_v20 = vpop.f32.mrb[33].mxu0 }
 0x138   :  { %1023 = vst [vmem:[%s1605_s3 + $0x20] sm:$0xff] %v1013_v17   ;;  %v789_v27 = vadd.f32 %v788_v19, %v701_v46  ;;  %v1182_v21 = vpop.f32.mrb[33].mxu1  ;;  %v759_v22 = vpop.f32.mrb[34].mxu0 }
 0x139   :  { %v760_v23 = vadd.f32 %v759_v22, %v1554_v43  ;;  %v791_v24 = vpop.f32.mrb[34].mxu1  ;;  %v1167_v26 = vpop.f32.mrb[35].mxu0  ;;  %v804_v30 = vmax.f32 %v757_v25, 0.0 }
 0x13a   :  { %v792_v28 = vadd.f32 %v791_v24, %v704_v48  ;;  %v1183_v29 = vpop.f32.mrb[35].mxu1  ;;  %v812_v32 = vmax.f32 %v789_v27, 0.0 }
 0x13b   :  { %v805_v31 = vmax.f32 %v760_v23, 0.0 }
 0x13c   :  { %v813_v33 = vmax.f32 %v792_v28, 0.0 }
 0x13d   :  { %v998_v41 = vpack.c.bf16 %v805_v31, %v804_v30 }
 0x13e   :  { %v1018_v34 = vpack.c.bf16 %v813_v33, %v812_v32  ;;  %v764_v35 = vpop.f32.mrb[36].mxu0 }
 0x13f   :  { %1020 = vst [vmem:[%s1605_s3 + $0x8] sm:$0xff] %v998_v41   ;;  %v765_v36 = vadd.f32 %v764_v35, %v1558_v57  ;;  %v796_v37 = vpop.f32.mrb[36].mxu1  ;;  %v1170_v38 = vpop.f32.mrb[37].mxu0 }
 0x140   :  { %1024 = vst [vmem:[%s1605_s3 + $0x28] sm:$0xff] %v1018_v34   ;;  %v797_v43 = vadd.f32 %v796_v37, %v709_v61  ;;  %v767_v39 = vpop.f32.mrb[38].mxu0  ;;  %v1186_v40 = vpop.f32.mrb[37].mxu1 }
 0x141   :  { %v768_v42 = vadd.f32 %v767_v39, %v1560_v59  ;;  %v1171_v44 = vpop.f32.mrb[39].mxu0  ;;  %v799_v45 = vpop.f32.mrb[38].mxu1  ;;  %v806_v48 = vmax.f32 %v765_v36, 0.0 }
 0x142   :  { %v814_v46 = vmax.f32 %v797_v43, 0.0  ;;  %v1187_v47 = vpop.f32.mrb[39].mxu1 }
 0x143   :  { %v807_v49 = vmax.f32 %v768_v42, 0.0 }
 0x144   :  { %v989_v50 = vpack.c.bf16 %v814_v46, %v814_v46 }
 0x145   :  { %v1003_v51 = vpack.c.bf16 %v807_v49, %v806_v48 }
 0x146   :  { %880 = vst [vmem:[%s1605_s3 + $0x30] sm:$0x1] %v989_v50  ;;  %v772_v57 = vpop.f32.mrb[40].mxu0 }
 0x147   :  { %1021 = vst [vmem:[%s1605_s3 + $0x10] sm:$0xff] %v1003_v51   ;;  %v773_v52 = vadd.f32 %v772_v57, %v1564_v9  ;;  %v1174_v59 = vpop.f32.mrb[41].mxu0 }
 0x148   :  { %v775_v53 = vpop.f32.mrb[42].mxu0 }
 0x149   :  { %v776_v54 = vadd.f32 %v775_v53, %v1566_v12  ;;  %v1175_v55 = vpop.f32.mrb[43].mxu0  ;;  %v808_v56 = vmax.f32 %v773_v52, 0.0 }
 0x14b   :  { %v809_v58 = vmax.f32 %v776_v54, 0.0 }
 0x14d   :  { %v1008_v60 = vpack.c.bf16 %v809_v58, %v808_v56 }
 0x14f   :  { %1022 = vst [vmem:[%s1605_s3 + $0x18] sm:$0xff] %v1008_v60  }

// kernel: forward.7
= control target key start
LH: loop header
LB: loop body
LE: loop exit
PB: predicated region body
PF: predicated region fallthrough
CT: control target
= control target key end

     0   :  { %v1599_v36 = vlaneseq  ;;  %v16504_v37 = vmov 1966171168   ;;  %s21636_s0 = inlined_call_operand.vmem [shape: bf16[2,6272], index: 0, kind: input, shape index: {}]   ;;  %s21637_s1 = inlined_call_operand.vmem [shape: bf16[6272,512], index: 1, kind: input, shape index: {}]   ;;  %s21638_s2 = inlined_call_operand.vmem [shape: f32[1,512], index: 2, kind: input, shape index: {}]   ;;  %s21639_s3 = inlined_call_operand.vmem [shape: bf16[512,128], index: 3, kind: input, shape index: {}]   ;;  %s21640_s4 = inlined_call_operand.vmem [shape: f32[1,128], index: 4, kind: input, shape index: {}]   ;;  %s21641_s5 = inlined_call_operand.hbm [shape: f32[2,128], index: 5, kind: output, shape index: {}]  }
   0x1   :  { %v14084_v0 = vld [vmem:[%s21637_s1 + $0x4] ss:$16 sps:$4 sm:$0xff]   ;;  %v14086_v1 = vld [vmem:[%s21637_s1 + $0xc] ss:$16 sps:$4 sm:$0xff]   ;;  %v14088_v2 = vld [vmem:[%s21637_s1] ss:$16 sps:$4 sm:$0xff]   ;;  %v1628_v38 = vunpack.c.l.s4 %v16504_v37 }
   0x2   :  { %9823 = vmatprep.subr.bf16.mxu0 %v14084_v0  ;;  %v14089_v3 = vld [vmem:[%s21637_s1 + $0x8] ss:$16 sps:$4 sm:$0xff]   ;;  %10848 = vmatprep.subr.bf16.mxu1 %v14086_v1  ;;  %v14090_v4 = vld [vmem:[%s21637_s1 + $0x24] ss:$16 sps:$4 sm:$0xff]   ;;  %v14092_v5 = vld [vmem:[%s21637_s1 + $0x2c] ss:$16 sps:$4 sm:$0xff]  }
   0x3   :  { %9824 = vmatpush1.bf16.msra.mxu0 %v14088_v2  ;;  %10849 = vmatpush1.bf16.msra.mxu1 %v14089_v3  ;;  %v14094_v6 = vld [vmem:[%s21637_s1 + $0x20] ss:$16 sps:$4 sm:$0xff]   ;;  %v14095_v7 = vld [vmem:[%s21637_s1 + $0x28] ss:$16 sps:$4 sm:$0xff]   ;;  %v14096_v8 = vld [vmem:[%s21637_s1 + $0x44] ss:$16 sps:$4 sm:$0xff]   ;;  %v1629_v43 = vunpack.c.0.s8 %v1628_v38 }
   0x4   :  { %9825 = vmatprep.subr.bf16.mxu0 %v14090_v4  ;;  %10850 = vmatprep.subr.bf16.mxu1 %v14092_v5  ;;  %v14098_v9 = vld [vmem:[%s21637_s1 + $0x4c] ss:$16 sps:$4 sm:$0xff]   ;;  %v14100_v10 = vld [vmem:[%s21637_s1 + $0x40] ss:$16 sps:$4 sm:$0xff]   ;;  %v14101_v11 = vld [vmem:[%s21637_s1 + $0x48] ss:$16 sps:$4 sm:$0xff]  }
   0x5   :  { %v14102_v12 = vld [vmem:[%s21637_s1 + $0x64] ss:$16 sps:$4 sm:$0xff]   ;;  %v14104_v13 = vld [vmem:[%s21637_s1 + $0x6c] ss:$16 sps:$4 sm:$0xff]   ;;  %v14106_v14 = vld [vmem:[%s21637_s1 + $0x60] ss:$16 sps:$4 sm:$0xff]  }
   0x6   :  { %v14107_v15 = vld [vmem:[%s21637_s1 + $0x68] ss:$16 sps:$4 sm:$0xff]   ;;  %v14108_v16 = vld [vmem:[%s21637_s1 + $0x84] ss:$16 sps:$4 sm:$0xff]   ;;  %v14110_v17 = vld [vmem:[%s21637_s1 + $0x8c] ss:$16 sps:$4 sm:$0xff]  }
   0x7   :  { %9826 = vmatpush1.bf16.msra.mxu0 %v14094_v6  ;;  %10851 = vmatpush1.bf16.msra.mxu1 %v14095_v7  ;;  %v14112_v18 = vld [vmem:[%s21637_s1 + $0x80] ss:$16 sps:$4 sm:$0xff]   ;;  %v14113_v19 = vld [vmem:[%s21637_s1 + $0x88] ss:$16 sps:$4 sm:$0xff]   ;;  %v14114_v20 = vld [vmem:[%s21637_s1 + $0xa4] ss:$16 sps:$4 sm:$0xff]  }
   0x8   :  { %9827 = vmatprep.subr.bf16.mxu0 %v14096_v8  ;;  %10852 = vmatprep.subr.bf16.mxu1 %v14098_v9  ;;  %v14116_v21 = vld [vmem:[%s21637_s1 + $0xac] ss:$16 sps:$4 sm:$0xff]   ;;  %v14118_v22 = vld [vmem:[%s21637_s1 + $0xa0] ss:$16 sps:$4 sm:$0xff]   ;;  %v14119_v23 = vld [vmem:[%s21637_s1 + $0xa8] ss:$16 sps:$4 sm:$0xff]  }
   0x9   :  { %v14120_v24 = vld [vmem:[%s21637_s1 + $0xc4] ss:$16 sps:$4 sm:$0xff]   ;;  %v14122_v25 = vld [vmem:[%s21637_s1 + $0xcc] ss:$16 sps:$4 sm:$0xff]   ;;  %v14124_v26 = vld [vmem:[%s21637_s1 + $0xc0] ss:$16 sps:$4 sm:$0xff]  }
   0xa   :  { %v14125_v27 = vld [vmem:[%s21637_s1 + $0xc8] ss:$16 sps:$4 sm:$0xff]   ;;  %v14126_v28 = vld [vmem:[%s21637_s1 + $0xe4] ss:$16 sps:$4 sm:$0xff]   ;;  %v14128_v29 = vld [vmem:[%s21637_s1 + $0xec] ss:$16 sps:$4 sm:$0xff]  }
   0xb   :  { %9828 = vmatpush1.bf16.msra.mxu0 %v14100_v10  ;;  %10853 = vmatpush1.bf16.msra.mxu1 %v14101_v11  ;;  %v14130_v30 = vld [vmem:[%s21637_s1 + $0xe0] ss:$16 sps:$4 sm:$0xff]   ;;  %v14131_v31 = vld [vmem:[%s21637_s1 + $0xe8] ss:$16 sps:$4 sm:$0xff]   ;;  %v14132_v32 = vld [vmem:[%s21637_s1 + $0x104] ss:$16 sps:$4 sm:$0xff]  }
   0xc   :  { %9829 = vmatprep.subr.bf16.mxu0 %v14102_v12  ;;  %10854 = vmatprep.subr.bf16.mxu1 %v14104_v13  ;;  %v14134_v33 = vld [vmem:[%s21637_s1 + $0x10c] ss:$16 sps:$4 sm:$0xff]   ;;  %v14136_v34 = vld [vmem:[%s21637_s1 + $0x100] ss:$16 sps:$4 sm:$0xff]   ;;  %v14137_v35 = vld [vmem:[%s21637_s1 + $0x108] ss:$16 sps:$4 sm:$0xff]  }
   0xd   :  { %v14138_v39 = vld [vmem:[%s21637_s1 + $0x124] ss:$16 sps:$4 sm:$0xff]   ;;  %v14140_v40 = vld [vmem:[%s21637_s1 + $0x12c] ss:$16 sps:$4 sm:$0xff]   ;;  %v14142_v41 = vld [vmem:[%s21637_s1 + $0x120] ss:$16 sps:$4 sm:$0xff]  }
   0xe   :  { %v16654_v42 = vshrl.u32 %v1599_v36, 7  ;;  %v14143_v44 = vld [vmem:[%s21637_s1 + $0x128] ss:$16 sps:$4 sm:$0xff]   ;;  %v14144_v45 = vld [vmem:[%s21637_s1 + $0x144] ss:$16 sps:$4 sm:$0xff]  }
   0xf   :  { %9830 = vmatpush1.bf16.msra.mxu0 %v14106_v14  ;;  %10855 = vmatpush1.bf16.msra.mxu1 %v14107_v15  ;;  %v14146_v46 = vld [vmem:[%s21637_s1 + $0x14c] ss:$16 sps:$4 sm:$0xff]   ;;  %v14148_v47 = vld [vmem:[%s21637_s1 + $0x140] ss:$16 sps:$4 sm:$0xff]   ;;  %v14149_v48 = vld [vmem:[%s21637_s1 + $0x148] ss:$16 sps:$4 sm:$0xff]  }
  0x10   :  { %9831 = vmatprep.subr.bf16.mxu0 %v14108_v16  ;;  %10856 = vmatprep.subr.bf16.mxu1 %v14110_v17  ;;  %v16672_v49 = vsub.s32 %v1629_v43, %v16654_v42  ;;  %v14150_v50 = vld [vmem:[%s21637_s1 + $0x164] ss:$16 sps:$4 sm:$0xff]   ;;  %v14152_v51 = vld [vmem:[%s21637_s1 + $0x16c] ss:$16 sps:$4 sm:$0xff]   ;;  %v14154_v53 = vld [vmem:[%s21637_s1 + $0x160] ss:$16 sps:$4 sm:$0xff]  }
  0x11   :  { %v16683_v52 = vld [vmem:[%s21636_s0] sm:$0xff]  ;;  %v14155_v55 = vld [vmem:[%s21637_s1 + $0x168] ss:$16 sps:$4 sm:$0xff]   ;;  %v14158_v57 = vld [vmem:[%s21637_s1 + $0x18c] ss:$16 sps:$4 sm:$0xff]  }
  0x12   :  { %v1633_v54 = vrot.slane %v16683_v52, %v16672_v49  ;;  %v14156_v56 = vld [vmem:[%s21637_s1 + $0x184] ss:$16 sps:$4 sm:$0xff]   ;;  %v14160_v59 = vld [vmem:[%s21637_s1 + $0x180] ss:$16 sps:$4 sm:$0xff]   ;;  %v14161_v61 = vld [vmem:[%s21637_s1 + $0x188] ss:$16 sps:$4 sm:$0xff]  }
  0x13   :  { %9832 = vmatpush1.bf16.msra.mxu0 %v14112_v18  ;;  %10857 = vmatpush1.bf16.msra.mxu1 %v14113_v19  ;;  %v14162_v62 = vld [vmem:[%s21637_s1 + $0x1a4] ss:$16 sps:$4 sm:$0xff]   ;;  %v14164_v63 = vld [vmem:[%s21637_s1 + $0x1ac] ss:$16 sps:$4 sm:$0xff]   ;;  %v14166_v0 = vld [vmem:[%s21637_s1 + $0x1a0] ss:$16 sps:$4 sm:$0xff]  }
  0x14   :  { %9833 = vmatprep.subr.bf16.mxu0 %v14114_v20  ;;  %10858 = vmatprep.subr.bf16.mxu1 %v14116_v21  ;;  %v1641_v58 = vcombine.high %v1633_v54, %v1633_v54  ;;  %v14167_v1 = vld [vmem:[%s21637_s1 + $0x1a8] ss:$16 sps:$4 sm:$0xff]   ;;  %v14168_v2 = vld [vmem:[%s21637_s1 + $0x1c4] ss:$16 sps:$4 sm:$0xff]   ;;  %v14170_v3 = vld [vmem:[%s21637_s1 + $0x1cc] ss:$16 sps:$4 sm:$0xff]   ;;  %v16752_v13 = vrot.slane %v1633_v54, %v16672_v49 }
  0x15   :  { %v14172_v4 = vld [vmem:[%s21637_s1 + $0x1c0] ss:$16 sps:$4 sm:$0xff]   ;;  %v14173_v5 = vld [vmem:[%s21637_s1 + $0x1c8] ss:$16 sps:$4 sm:$0xff]   ;;  %v14174_v6 = vld [vmem:[%s21637_s1 + $0x1e4] ss:$16 sps:$4 sm:$0xff]  }
  0x16   :  { %v1663_v60 = vrot.slane %v1641_v58, %v16672_v49  ;;  %v14176_v7 = vld [vmem:[%s21637_s1 + $0x1ec] ss:$16 sps:$4 sm:$0xff]   ;;  %v14178_v8 = vld [vmem:[%s21637_s1 + $0x1e0] ss:$16 sps:$4 sm:$0xff]   ;;  %v14179_v9 = vld [vmem:[%s21637_s1 + $0x1e8] ss:$16 sps:$4 sm:$0xff]  }
  0x17   :  { %9834 = vmatpush1.bf16.msra.mxu0 %v14118_v22  ;;  %10859 = vmatpush1.bf16.msra.mxu1 %v14119_v23  ;;  %v14182_v10 = vld [vmem:[%s21637_s1 + $0x204] ss:$16 sps:$4 sm:$0xff]   ;;  %v14185_v11 = vld [vmem:[%s21637_s1 + $0x20c] ss:$16 sps:$4 sm:$0xff]   ;;  %v14180_v12 = vld [vmem:[%s21637_s1 + $0x200] ss:$16 sps:$4 sm:$0xff]  }
  0x18   :  { %9835 = vmatprep.subr.bf16.mxu0 %v14120_v24  ;;  %10860 = vmatprep.subr.bf16.mxu1 %v14122_v25  ;;  %v14183_v14 = vld [vmem:[%s21637_s1 + $0x208] ss:$16 sps:$4 sm:$0xff]   ;;  %v14188_v15 = vld [vmem:[%s21637_s1 + $0x224] ss:$16 sps:$4 sm:$0xff]   ;;  %v14191_v16 = vld [vmem:[%s21637_s1 + $0x22c] ss:$16 sps:$4 sm:$0xff]   ;;  %v1673_v17 = vcombine.high %v1663_v60, %v1663_v60 }
  0x19   :  { %9855 = vmatprep.mubr.bf16.mxu0 %v1663_v60  ;;  %10880 = vmatprep.mubr.bf16.mxu1 %v1663_v60  ;;  %v14186_v18 = vld [vmem:[%s21637_s1 + $0x220] ss:$16 sps:$4 sm:$0xff]   ;;  %v14189_v19 = vld [vmem:[%s21637_s1 + $0x228] ss:$16 sps:$4 sm:$0xff]   ;;  %v14194_v20 = vld [vmem:[%s21637_s1 + $0x244] ss:$16 sps:$4 sm:$0xff]  }
  0x1a   :  { %v14197_v21 = vld [vmem:[%s21637_s1 + $0x24c] ss:$16 sps:$4 sm:$0xff]   ;;  %v14192_v22 = vld [vmem:[%s21637_s1 + $0x240] ss:$16 sps:$4 sm:$0xff]   ;;  %v14195_v23 = vld [vmem:[%s21637_s1 + $0x248] ss:$16 sps:$4 sm:$0xff]  }
  0x1b   :  { %9836 = vmatpush1.bf16.msra.mxu0 %v14124_v26  ;;  %10861 = vmatpush1.bf16.msra.mxu1 %v14125_v27  ;;  %v14200_v24 = vld [vmem:[%s21637_s1 + $0x264] ss:$16 sps:$4 sm:$0xff]   ;;  %v14203_v25 = vld [vmem:[%s21637_s1 + $0x26c] ss:$16 sps:$4 sm:$0xff]   ;;  %v14198_v26 = vld [vmem:[%s21637_s1 + $0x260] ss:$16 sps:$4 sm:$0xff]  }
  0x1c   :  { %9837 = vmatprep.subr.bf16.mxu0 %v14126_v28  ;;  %10862 = vmatprep.subr.bf16.mxu1 %v14128_v29  ;;  %v14201_v27 = vld [vmem:[%s21637_s1 + $0x268] ss:$16 sps:$4 sm:$0xff]   ;;  %v14206_v28 = vld [vmem:[%s21637_s1 + $0x284] ss:$16 sps:$4 sm:$0xff]   ;;  %v14209_v29 = vld [vmem:[%s21637_s1 + $0x28c] ss:$16 sps:$4 sm:$0xff]  }
  0x1d   :  { %v14218_v36 = vld [vmem:[%s21637_s1 + $0x2c4] ss:$16 sps:$4 sm:$0xff]   ;;  %v14221_v37 = vld [vmem:[%s21637_s1 + $0x2cc] ss:$16 sps:$4 sm:$0xff]   ;;  %v14216_v38 = vld [vmem:[%s21637_s1 + $0x2c0] ss:$16 sps:$4 sm:$0xff]  }
  0x1e   :  { %v14222_v43 = vld [vmem:[%s21637_s1 + $0x2e0] ss:$16 sps:$4 sm:$0xff]   ;;  %v14237_v54 = vld [vmem:[%s21637_s1 + $0x328] ss:$16 sps:$4 sm:$0xff]   ;;  %v14251_v60 = vld [vmem:[%s21637_s1 + $0x36c] ss:$16 sps:$4 sm:$0xff]  }
  0x1f   :  { %9838 = vmatpush1.bf16.msra.mxu0 %v14130_v30  ;;  %10863 = vmatpush1.bf16.msra.mxu1 %v14131_v31  ;;  %v14204_v30 = vld [vmem:[%s21637_s1 + $0x280] ss:$16 sps:$4 sm:$0xff]   ;;  %v14207_v31 = vld [vmem:[%s21637_s1 + $0x288] ss:$16 sps:$4 sm:$0xff]  }
  0x20   :  { %9839 = vmatprep.subr.bf16.mxu0 %v14132_v32  ;;  %10864 = vmatprep.subr.bf16.mxu1 %v14134_v33  ;;  %v14212_v32 = vld [vmem:[%s21637_s1 + $0x2a4] ss:$16 sps:$4 sm:$0xff]   ;;  %v14215_v33 = vld [vmem:[%s21637_s1 + $0x2ac] ss:$16 sps:$4 sm:$0xff]   ;;  %v14243_v58 = vld [vmem:[%s21637_s1 + $0x348] ss:$16 sps:$4 sm:$0xff]  }
  0x23   :  { %9840 = vmatpush1.bf16.msra.mxu0 %v14136_v34  ;;  %10865 = vmatpush1.bf16.msra.mxu1 %v14137_v35  ;;  %v14210_v34 = vld [vmem:[%s21637_s1 + $0x2a0] ss:$16 sps:$4 sm:$0xff]   ;;  %v14213_v35 = vld [vmem:[%s21637_s1 + $0x2a8] ss:$16 sps:$4 sm:$0xff]  }
  0x24   :  { %9841 = vmatprep.subr.bf16.mxu0 %v14138_v39  ;;  %10866 = vmatprep.subr.bf16.mxu1 %v14140_v40  ;;  %v14219_v39 = vld [vmem:[%s21637_s1 + $0x2c8] ss:$16 sps:$4 sm:$0xff]   ;;  %v14224_v40 = vld [vmem:[%s21637_s1 + $0x2e4] ss:$16 sps:$4 sm:$0xff]  }
  0x27   :  { %9842 = vmatpush1.bf16.msra.mxu0 %v14142_v41  ;;  %10867 = vmatpush1.bf16.msra.mxu1 %v14143_v44  ;;  %v14227_v41 = vld [vmem:[%s21637_s1 + $0x2ec] ss:$16 sps:$4 sm:$0xff]   ;;  %v14225_v44 = vld [vmem:[%s21637_s1 + $0x2e8] ss:$16 sps:$4 sm:$0xff]  }
  0x28   :  { %9843 = vmatprep.subr.bf16.mxu0 %v14144_v45  ;;  %10868 = vmatprep.subr.bf16.mxu1 %v14146_v46  ;;  %v14230_v45 = vld [vmem:[%s21637_s1 + $0x304] ss:$16 sps:$4 sm:$0xff]   ;;  %v14233_v46 = vld [vmem:[%s21637_s1 + $0x30c] ss:$16 sps:$4 sm:$0xff]  }
  0x2b   :  { %9844 = vmatpush1.bf16.msra.mxu0 %v14148_v47  ;;  %10869 = vmatpush1.bf16.msra.mxu1 %v14149_v48  ;;  %v14228_v47 = vld [vmem:[%s21637_s1 + $0x300] ss:$16 sps:$4 sm:$0xff]   ;;  %v14231_v48 = vld [vmem:[%s21637_s1 + $0x308] ss:$16 sps:$4 sm:$0xff]  }
  0x2c   :  { %9845 = vmatprep.subr.bf16.mxu0 %v14150_v50  ;;  %10870 = vmatprep.subr.bf16.mxu1 %v14152_v51  ;;  %v14236_v50 = vld [vmem:[%s21637_s1 + $0x324] ss:$16 sps:$4 sm:$0xff]   ;;  %v14239_v51 = vld [vmem:[%s21637_s1 + $0x32c] ss:$16 sps:$4 sm:$0xff]  }
  0x2f   :  { %9846 = vmatpush1.bf16.msra.mxu0 %v14154_v53  ;;  %10871 = vmatpush1.bf16.msra.mxu1 %v14155_v55  ;;  %v14234_v53 = vld [vmem:[%s21637_s1 + $0x320] ss:$16 sps:$4 sm:$0xff]   ;;  %v14242_v55 = vld [vmem:[%s21637_s1 + $0x344] ss:$16 sps:$4 sm:$0xff]  }
  0x30   :  { %9847 = vmatprep.subr.bf16.mxu0 %v14156_v56  ;;  %10872 = vmatprep.subr.bf16.mxu1 %v14158_v57  ;;  %v14245_v56 = vld [vmem:[%s21637_s1 + $0x34c] ss:$16 sps:$4 sm:$0xff]   ;;  %v14240_v57 = vld [vmem:[%s21637_s1 + $0x340] ss:$16 sps:$4 sm:$0xff]  }
  0x33   :  { %9848 = vmatpush1.bf16.msra.mxu0 %v14160_v59  ;;  %10873 = vmatpush1.bf16.msra.mxu1 %v14161_v61  ;;  %v14248_v59 = vld [vmem:[%s21637_s1 + $0x364] ss:$16 sps:$4 sm:$0xff]   ;;  %v14246_v61 = vld [vmem:[%s21637_s1 + $0x360] ss:$16 sps:$4 sm:$0xff]  }
  0x34   :  { %9849 = vmatprep.subr.bf16.mxu0 %v14162_v62  ;;  %10874 = vmatprep.subr.bf16.mxu1 %v14164_v63  ;;  %v14249_v62 = vld [vmem:[%s21637_s1 + $0x368] ss:$16 sps:$4 sm:$0xff]   ;;  %v14254_v63 = vld [vmem:[%s21637_s1 + $0x384] ss:$16 sps:$4 sm:$0xff]  }
  0x37   :  { %9850 = vmatpush1.bf16.msra.mxu0 %v14166_v0  ;;  %10875 = vmatpush1.bf16.msra.mxu1 %v14167_v1  ;;  %v14257_v0 = vld [vmem:[%s21637_s1 + $0x38c] ss:$16 sps:$4 sm:$0xff]   ;;  %v14252_v1 = vld [vmem:[%s21637_s1 + $0x380] ss:$16 sps:$4 sm:$0xff]  }
  0x38   :  { %9851 = vmatprep.subr.bf16.mxu0 %v14168_v2  ;;  %10876 = vmatprep.subr.bf16.mxu1 %v14170_v3  ;;  %v14255_v2 = vld [vmem:[%s21637_s1 + $0x388] ss:$16 sps:$4 sm:$0xff]   ;;  %v14260_v3 = vld [vmem:[%s21637_s1 + $0x3a4] ss:$16 sps:$4 sm:$0xff]  }
  0x3b   :  { %9852 = vmatpush1.bf16.msra.mxu0 %v14172_v4  ;;  %10877 = vmatpush1.bf16.msra.mxu1 %v14173_v5  ;;  %v14263_v4 = vld [vmem:[%s21637_s1 + $0x3ac] ss:$16 sps:$4 sm:$0xff]   ;;  %v14258_v5 = vld [vmem:[%s21637_s1 + $0x3a0] ss:$16 sps:$4 sm:$0xff]  }
  0x3c   :  { %9853 = vmatprep.subr.bf16.mxu0 %v14174_v6  ;;  %10878 = vmatprep.subr.bf16.mxu1 %v14176_v7  ;;  %v14261_v6 = vld [vmem:[%s21637_s1 + $0x3a8] ss:$16 sps:$4 sm:$0xff]   ;;  %v14266_v7 = vld [vmem:[%s21637_s1 + $0x3c4] ss:$16 sps:$4 sm:$0xff]  }
  0x3f   :  { %9854 = vmatpush1.bf16.msra.mxu0 %v14178_v8  ;;  %10879 = vmatpush1.bf16.msra.mxu1 %v14179_v9  ;;  %v14269_v8 = vld [vmem:[%s21637_s1 + $0x3cc] ss:$16 sps:$4 sm:$0xff]   ;;  %v1626_v9 = vcombine.high %v16683_v52, %v16683_v52 }
  0x40   :  { %9864 = vmatprep.subr.bf16.mxu0 %v14182_v10  ;;  %10889 = vmatprep.subr.bf16.mxu1 %v14185_v11  ;;  %v14264_v10 = vld [vmem:[%s21637_s1 + $0x3c0] ss:$16 sps:$4 sm:$0xff]   ;;  %v14267_v11 = vld [vmem:[%s21637_s1 + $0x3c8] ss:$16 sps:$4 sm:$0xff]   ;;  %v14275_v52 = vld [vmem:[%s21637_s1 + $0x3ec] ss:$16 sps:$4 sm:$0xff]  }
  0x42   :  { %9856 = vmatmul.mubr.bf16.vlgmr.msra.gmra.mrb[0].mxu0 %v16752_v13  ;;  %10881 = vmatmul.mubr.bf16.vlgmr.msra.gmra.mrb[0].mxu1 %v16752_v13 }
  0x43   :  { %9865 = vmatpush1.bf16.msra.mxu0 %v14180_v12  ;;  %10890 = vmatpush1.bf16.msra.mxu1 %v14183_v14  ;;  %v14272_v12 = vld [vmem:[%s21637_s1 + $0x3e4] ss:$16 sps:$4 sm:$0xff]   ;;  %v16936_v14 = vrot.slane %v1626_v9, %v16672_v49  ;;  %v14351_v9 = vld [vmem:[%s21637_s1 + $0x588] ss:$16 sps:$4 sm:$0xff]  }
  0x44   :  { %9866 = vmatprep.subr.bf16.mxu0 %v14188_v15  ;;  %10891 = vmatprep.subr.bf16.mxu1 %v14191_v16  ;;  %v14270_v15 = vld [vmem:[%s21637_s1 + $0x3e0] ss:$16 sps:$4 sm:$0xff]   ;;  %v14273_v16 = vld [vmem:[%s21637_s1 + $0x3e8] ss:$16 sps:$4 sm:$0xff]  }
  0x45   :  { %9896 = vmatprep.mubr.bf16.mxu0 %v1673_v17  ;;  %10921 = vmatprep.mubr.bf16.mxu1 %v1673_v17  ;;  %v14278_v17 = vld [vmem:[%s21637_s1 + $0x404] ss:$16 sps:$4 sm:$0xff]  }
  0x47   :  { %9867 = vmatpush1.bf16.msra.mxu0 %v14186_v18  ;;  %10892 = vmatpush1.bf16.msra.mxu1 %v14189_v19  ;;  %v14281_v18 = vld [vmem:[%s21637_s1 + $0x40c] ss:$16 sps:$4 sm:$0xff]   ;;  %v1642_v19 = vcombine.high %v16936_v14, %v16936_v14 }
  0x48   :  { %9868 = vmatprep.subr.bf16.mxu0 %v14194_v20  ;;  %10893 = vmatprep.subr.bf16.mxu1 %v14197_v21  ;;  %v14276_v20 = vld [vmem:[%s21637_s1 + $0x400] ss:$16 sps:$4 sm:$0xff]   ;;  %v1671_v21 = vcombine.high %v16752_v13, %v16752_v13 }
  0x49   :  { %v14282_v13 = vld [vmem:[%s21637_s1 + $0x420] ss:$16 sps:$4 sm:$0xff]  }
  0x4b   :  { %9869 = vmatpush1.bf16.msra.mxu0 %v14192_v22  ;;  %10894 = vmatpush1.bf16.msra.mxu1 %v14195_v23  ;;  %v14279_v22 = vld [vmem:[%s21637_s1 + $0x408] ss:$16 sps:$4 sm:$0xff]   ;;  %v14284_v23 = vld [vmem:[%s21637_s1 + $0x424] ss:$16 sps:$4 sm:$0xff]  }
  0x4c   :  { %9870 = vmatprep.subr.bf16.mxu0 %v14200_v24  ;;  %10895 = vmatprep.subr.bf16.mxu1 %v14203_v25  ;;  %v14287_v24 = vld [vmem:[%s21637_s1 + $0x42c] ss:$16 sps:$4 sm:$0xff]   ;;  %v16967_v25 = vrot.slane %v1642_v19, %v16672_v49  ;;  %v14368_v19 = vld [vmem:[%s21637_s1 + $0x5e4] ss:$16 sps:$4 sm:$0xff]  }
  0x4f   :  { %9871 = vmatpush1.bf16.msra.mxu0 %v14198_v26  ;;  %10896 = vmatpush1.bf16.msra.mxu1 %v14201_v27  ;;  %v14285_v26 = vld [vmem:[%s21637_s1 + $0x428] ss:$16 sps:$4 sm:$0xff]   ;;  %v14290_v27 = vld [vmem:[%s21637_s1 + $0x444] ss:$16 sps:$4 sm:$0xff]  }
  0x50   :  { %9872 = vmatprep.subr.bf16.mxu0 %v14206_v28  ;;  %10897 = vmatprep.subr.bf16.mxu1 %v14209_v29  ;;  %v14293_v28 = vld [vmem:[%s21637_s1 + $0x44c] ss:$16 sps:$4 sm:$0xff]   ;;  %v14288_v29 = vld [vmem:[%s21637_s1 + $0x440] ss:$16 sps:$4 sm:$0xff]  }
  0x53   :  { %9873 = vmatpush1.bf16.msra.mxu0 %v14204_v30  ;;  %10898 = vmatpush1.bf16.msra.mxu1 %v14207_v31  ;;  %v14291_v30 = vld [vmem:[%s21637_s1 + $0x448] ss:$16 sps:$4 sm:$0xff]   ;;  %v14296_v31 = vld [vmem:[%s21637_s1 + $0x464] ss:$16 sps:$4 sm:$0xff]  }
  0x54   :  { %9874 = vmatprep.subr.bf16.mxu0 %v14212_v32  ;;  %10899 = vmatprep.subr.bf16.mxu1 %v14215_v33  ;;  %v14299_v32 = vld [vmem:[%s21637_s1 + $0x46c] ss:$16 sps:$4 sm:$0xff]   ;;  %v14294_v33 = vld [vmem:[%s21637_s1 + $0x460] ss:$16 sps:$4 sm:$0xff]  }
  0x57   :  { %9875 = vmatpush1.bf16.msra.mxu0 %v14210_v34  ;;  %10900 = vmatpush1.bf16.msra.mxu1 %v14213_v35  ;;  %v14297_v34 = vld [vmem:[%s21637_s1 + $0x468] ss:$16 sps:$4 sm:$0xff]   ;;  %v14302_v35 = vld [vmem:[%s21637_s1 + $0x484] ss:$16 sps:$4 sm:$0xff]  }
  0x58   :  { %9876 = vmatprep.subr.bf16.mxu0 %v14218_v36  ;;  %10901 = vmatprep.subr.bf16.mxu1 %v14221_v37  ;;  %v14305_v36 = vld [vmem:[%s21637_s1 + $0x48c] ss:$16 sps:$4 sm:$0xff]   ;;  %v14300_v37 = vld [vmem:[%s21637_s1 + $0x480] ss:$16 sps:$4 sm:$0xff]  }
  0x5b   :  { %9877 = vmatpush1.bf16.msra.mxu0 %v14216_v38  ;;  %10902 = vmatpush1.bf16.msra.mxu1 %v14219_v39  ;;  %v14303_v38 = vld [vmem:[%s21637_s1 + $0x488] ss:$16 sps:$4 sm:$0xff]   ;;  %v14308_v39 = vld [vmem:[%s21637_s1 + $0x4a4] ss:$16 sps:$4 sm:$0xff]  }
  0x5c   :  { %9878 = vmatprep.subr.bf16.mxu0 %v14224_v40  ;;  %10903 = vmatprep.subr.bf16.mxu1 %v14227_v41  ;;  %v14311_v40 = vld [vmem:[%s21637_s1 + $0x4ac] ss:$16 sps:$4 sm:$0xff]   ;;  %v14306_v41 = vld [vmem:[%s21637_s1 + $0x4a0] ss:$16 sps:$4 sm:$0xff]  }
  0x5f   :  { %9879 = vmatpush1.bf16.msra.mxu0 %v14222_v43  ;;  %10904 = vmatpush1.bf16.msra.mxu1 %v14225_v44  ;;  %v14309_v43 = vld [vmem:[%s21637_s1 + $0x4a8] ss:$16 sps:$4 sm:$0xff]   ;;  %v14314_v44 = vld [vmem:[%s21637_s1 + $0x4c4] ss:$16 sps:$4 sm:$0xff]  }
  0x60   :  { %9880 = vmatprep.subr.bf16.mxu0 %v14230_v45  ;;  %10905 = vmatprep.subr.bf16.mxu1 %v14233_v46  ;;  %v14317_v45 = vld [vmem:[%s21637_s1 + $0x4cc] ss:$16 sps:$4 sm:$0xff]   ;;  %v14312_v46 = vld [vmem:[%s21637_s1 + $0x4c0] ss:$16 sps:$4 sm:$0xff]  }
  0x63   :  { %9881 = vmatpush1.bf16.msra.mxu0 %v14228_v47  ;;  %10906 = vmatpush1.bf16.msra.mxu1 %v14231_v48  ;;  %v14315_v47 = vld [vmem:[%s21637_s1 + $0x4c8] ss:$16 sps:$4 sm:$0xff]   ;;  %v14320_v48 = vld [vmem:[%s21637_s1 + $0x4e4] ss:$16 sps:$4 sm:$0xff]  }
  0x64   :  { %9882 = vmatprep.subr.bf16.mxu0 %v14236_v50  ;;  %10907 = vmatprep.subr.bf16.mxu1 %v14239_v51  ;;  %v14323_v50 = vld [vmem:[%s21637_s1 + $0x4ec] ss:$16 sps:$4 sm:$0xff]   ;;  %v14318_v51 = vld [vmem:[%s21637_s1 + $0x4e0] ss:$16 sps:$4 sm:$0xff]  }
  0x67   :  { %9883 = vmatpush1.bf16.msra.mxu0 %v14234_v53  ;;  %10908 = vmatpush1.bf16.msra.mxu1 %v14237_v54  ;;  %v14321_v53 = vld [vmem:[%s21637_s1 + $0x4e8] ss:$16 sps:$4 sm:$0xff]   ;;  %v14326_v54 = vld [vmem:[%s21637_s1 + $0x504] ss:$16 sps:$4 sm:$0xff]  }
  0x68   :  { %9884 = vmatprep.subr.bf16.mxu0 %v14242_v55  ;;  %10909 = vmatprep.subr.bf16.mxu1 %v14245_v56  ;;  %v14329_v55 = vld [vmem:[%s21637_s1 + $0x50c] ss:$16 sps:$4 sm:$0xff]   ;;  %v14324_v56 = vld [vmem:[%s21637_s1 + $0x500] ss:$16 sps:$4 sm:$0xff]  }
  0x6b   :  { %9885 = vmatpush1.bf16.msra.mxu0 %v14240_v57  ;;  %10910 = vmatpush1.bf16.msra.mxu1 %v14243_v58  ;;  %v14327_v57 = vld [vmem:[%s21637_s1 + $0x508] ss:$16 sps:$4 sm:$0xff]   ;;  %v14332_v58 = vld [vmem:[%s21637_s1 + $0x524] ss:$16 sps:$4 sm:$0xff]  }
  0x6c   :  { %9886 = vmatprep.subr.bf16.mxu0 %v14248_v59  ;;  %10911 = vmatprep.subr.bf16.mxu1 %v14251_v60  ;;  %v14335_v59 = vld [vmem:[%s21637_s1 + $0x52c] ss:$16 sps:$4 sm:$0xff]   ;;  %v14330_v60 = vld [vmem:[%s21637_s1 + $0x520] ss:$16 sps:$4 sm:$0xff]  }
  0x6f   :  { %9887 = vmatpush1.bf16.msra.mxu0 %v14246_v61  ;;  %10912 = vmatpush1.bf16.msra.mxu1 %v14249_v62  ;;  %v14333_v61 = vld [vmem:[%s21637_s1 + $0x528] ss:$16 sps:$4 sm:$0xff]   ;;  %v14338_v62 = vld [vmem:[%s21637_s1 + $0x544] ss:$16 sps:$4 sm:$0xff]  }
  0x70   :  { %9888 = vmatprep.subr.bf16.mxu0 %v14254_v63  ;;  %10913 = vmatprep.subr.bf16.mxu1 %v14257_v0  ;;  %v14341_v63 = vld [vmem:[%s21637_s1 + $0x54c] ss:$16 sps:$4 sm:$0xff]   ;;  %v14336_v0 = vld [vmem:[%s21637_s1 + $0x540] ss:$16 sps:$4 sm:$0xff]  }
  0x73   :  { %9889 = vmatpush1.bf16.msra.mxu0 %v14252_v1  ;;  %10914 = vmatpush1.bf16.msra.mxu1 %v14255_v2  ;;  %v14339_v1 = vld [vmem:[%s21637_s1 + $0x548] ss:$16 sps:$4 sm:$0xff]   ;;  %v14344_v2 = vld [vmem:[%s21637_s1 + $0x564] ss:$16 sps:$4 sm:$0xff]  }
  0x74   :  { %9890 = vmatprep.subr.bf16.mxu0 %v14260_v3  ;;  %10915 = vmatprep.subr.bf16.mxu1 %v14263_v4  ;;  %v14347_v3 = vld [vmem:[%s21637_s1 + $0x56c] ss:$16 sps:$4 sm:$0xff]   ;;  %v14342_v4 = vld [vmem:[%s21637_s1 + $0x560] ss:$16 sps:$4 sm:$0xff]  }
  0x77   :  { %9891 = vmatpush1.bf16.msra.mxu0 %v14258_v5  ;;  %10916 = vmatpush1.bf16.msra.mxu1 %v14261_v6  ;;  %v14345_v5 = vld [vmem:[%s21637_s1 + $0x568] ss:$16 sps:$4 sm:$0xff]   ;;  %v14350_v6 = vld [vmem:[%s21637_s1 + $0x584] ss:$16 sps:$4 sm:$0xff]  }
  0x78   :  { %9892 = vmatprep.subr.bf16.mxu0 %v14266_v7  ;;  %10917 = vmatprep.subr.bf16.mxu1 %v14269_v8  ;;  %v14353_v7 = vld [vmem:[%s21637_s1 + $0x58c] ss:$16 sps:$4 sm:$0xff]   ;;  %v14348_v8 = vld [vmem:[%s21637_s1 + $0x580] ss:$16 sps:$4 sm:$0xff]  }
  0x7b   :  { %9893 = vmatpush1.bf16.msra.mxu0 %v14264_v10  ;;  %10918 = vmatpush1.bf16.msra.mxu1 %v14267_v11  ;;  %v14356_v10 = vld [vmem:[%s21637_s1 + $0x5a4] ss:$16 sps:$4 sm:$0xff]   ;;  %v14359_v11 = vld [vmem:[%s21637_s1 + $0x5ac] ss:$16 sps:$4 sm:$0xff]  }
  0x7c   :  { %9894 = vmatprep.subr.bf16.mxu0 %v14272_v12  ;;  %10919 = vmatprep.subr.bf16.mxu1 %v14275_v52  ;;  %v14354_v12 = vld [vmem:[%s21637_s1 + $0x5a0] ss:$16 sps:$4 sm:$0xff]   ;;  %v14357_v52 = vld [vmem:[%s21637_s1 + $0x5a8] ss:$16 sps:$4 sm:$0xff]  }
  0x7f   :  { %9895 = vmatpush1.bf16.msra.mxu0 %v14270_v15  ;;  %10920 = vmatpush1.bf16.msra.mxu1 %v14273_v16  ;;  %v14362_v15 = vld [vmem:[%s21637_s1 + $0x5c4] ss:$16 sps:$4 sm:$0xff]   ;;  %v14365_v16 = vld [vmem:[%s21637_s1 + $0x5cc] ss:$16 sps:$4 sm:$0xff]  }
  0x80   :  { %9905 = vmatprep.subr.bf16.mxu0 %v14278_v17  ;;  %10930 = vmatprep.subr.bf16.mxu1 %v14281_v18  ;;  %v14360_v17 = vld [vmem:[%s21637_s1 + $0x5c0] ss:$16 sps:$4 sm:$0xff]   ;;  %v14363_v18 = vld [vmem:[%s21637_s1 + $0x5c8] ss:$16 sps:$4 sm:$0xff]  }
  0x82   :  { %9897 = vmatmul.mubr.bf16.vlgmr.msra.gmra.mrb[0].mxu0 %v1671_v21  ;;  %10922 = vmatmul.mubr.bf16.vlgmr.msra.gmra.mrb[0].mxu1 %v1671_v21  ;;  %v14366_v21 = vld [vmem:[%s21637_s1 + $0x5e0] ss:$16 sps:$4 sm:$0xff]  }
  0x83   :  { %9906 = vmatpush1.bf16.msra.mxu0 %v14276_v20  ;;  %10931 = vmatpush1.bf16.msra.mxu1 %v14279_v22  ;;  %v14371_v20 = vld [vmem:[%s21637_s1 + $0x5ec] ss:$16 sps:$4 sm:$0xff]   ;;  %v14369_v22 = vld [vmem:[%s21637_s1 + $0x5e8] ss:$16 sps:$4 sm:$0xff]  }
  0x84   :  { %9907 = vmatprep.subr.bf16.mxu0 %v14284_v23  ;;  %10932 = vmatprep.subr.bf16.mxu1 %v14287_v24  ;;  %v14375_v23 = vld [vmem:[%s21637_s1 + $0x604] ss:$16 sps:$4 sm:$0xff]   ;;  %v14378_v24 = vld [vmem:[%s21637_s1 + $0x60c] ss:$16 sps:$4 sm:$0xff]  }
  0x85   :  { %9937 = vmatprep.mubr.bf16.mxu0 %v16967_v25  ;;  %10962 = vmatprep.mubr.bf16.mxu1 %v16967_v25 }
  0x87   :  { %9908 = vmatpush1.bf16.msra.mxu0 %v14282_v13  ;;  %10933 = vmatpush1.bf16.msra.mxu1 %v14285_v26  ;;  %v14373_v13 = vld [vmem:[%s21637_s1 + $0x600] ss:$16 sps:$4 sm:$0xff]   ;;  %v17156_v26 = vrot.slane %v16936_v14, %v16672_v49  ;;  %v1674_v14 = vcombine.high %v16967_v25, %v16967_v25  ;;  %v14387_v25 = vld [vmem:[%s21637_s1 + $0x644] ss:$16 sps:$4 sm:$0xff]  }
  0x88   :  { %9909 = vmatprep.subr.bf16.mxu0 %v14290_v27  ;;  %10934 = vmatprep.subr.bf16.mxu1 %v14293_v28  ;;  %v14376_v27 = vld [vmem:[%s21637_s1 + $0x608] ss:$16 sps:$4 sm:$0xff]   ;;  %v14381_v28 = vld [vmem:[%s21637_s1 + $0x624] ss:$16 sps:$4 sm:$0xff]  }
  0x8b   :  { %9910 = vmatpush1.bf16.msra.mxu0 %v14288_v29  ;;  %10935 = vmatpush1.bf16.msra.mxu1 %v14291_v30  ;;  %v14384_v29 = vld [vmem:[%s21637_s1 + $0x62c] ss:$16 sps:$4 sm:$0xff]   ;;  %v14379_v30 = vld [vmem:[%s21637_s1 + $0x620] ss:$16 sps:$4 sm:$0xff]  }
  0x8c   :  { %9911 = vmatprep.subr.bf16.mxu0 %v14296_v31  ;;  %10936 = vmatprep.subr.bf16.mxu1 %v14299_v32  ;;  %v14382_v31 = vld [vmem:[%s21637_s1 + $0x628] ss:$16 sps:$4 sm:$0xff]   ;;  %v14390_v32 = vld [vmem:[%s21637_s1 + $0x64c] ss:$16 sps:$4 sm:$0xff]  }
  0x8f   :  { %9912 = vmatpush1.bf16.msra.mxu0 %v14294_v33  ;;  %10937 = vmatpush1.bf16.msra.mxu1 %v14297_v34  ;;  %v14385_v33 = vld [vmem:[%s21637_s1 + $0x640] ss:$16 sps:$4 sm:$0xff]   ;;  %v14388_v34 = vld [vmem:[%s21637_s1 + $0x648] ss:$16 sps:$4 sm:$0xff]  }
  0x90   :  { %9913 = vmatprep.subr.bf16.mxu0 %v14302_v35  ;;  %10938 = vmatprep.subr.bf16.mxu1 %v14305_v36  ;;  %v14393_v35 = vld [vmem:[%s21637_s1 + $0x664] ss:$16 sps:$4 sm:$0xff]   ;;  %v14396_v36 = vld [vmem:[%s21637_s1 + $0x66c] ss:$16 sps:$4 sm:$0xff]  }
  0x93   :  { %9914 = vmatpush1.bf16.msra.mxu0 %v14300_v37  ;;  %10939 = vmatpush1.bf16.msra.mxu1 %v14303_v38  ;;  %v14391_v37 = vld [vmem:[%s21637_s1 + $0x660] ss:$16 sps:$4 sm:$0xff]   ;;  %v14394_v38 = vld [vmem:[%s21637_s1 + $0x668] ss:$16 sps:$4 sm:$0xff]  }
  0x94   :  { %9915 = vmatprep.subr.bf16.mxu0 %v14308_v39  ;;  %10940 = vmatprep.subr.bf16.mxu1 %v14311_v40  ;;  %v14399_v39 = vld [vmem:[%s21637_s1 + $0x684] ss:$16 sps:$4 sm:$0xff]   ;;  %v14402_v40 = vld [vmem:[%s21637_s1 + $0x68c] ss:$16 sps:$4 sm:$0xff]  }
  0x97   :  { %9916 = vmatpush1.bf16.msra.mxu0 %v14306_v41  ;;  %10941 = vmatpush1.bf16.msra.mxu1 %v14309_v43  ;;  %v14397_v41 = vld [vmem:[%s21637_s1 + $0x680] ss:$16 sps:$4 sm:$0xff]   ;;  %v14400_v43 = vld [vmem:[%s21637_s1 + $0x688] ss:$16 sps:$4 sm:$0xff]  }
  0x98   :  { %9917 = vmatprep.subr.bf16.mxu0 %v14314_v44  ;;  %10942 = vmatprep.subr.bf16.mxu1 %v14317_v45  ;;  %v14405_v44 = vld [vmem:[%s21637_s1 + $0x6a4] ss:$16 sps:$4 sm:$0xff]   ;;  %v14408_v45 = vld [vmem:[%s21637_s1 + $0x6ac] ss:$16 sps:$4 sm:$0xff]  }
  0x9b   :  { %9918 = vmatpush1.bf16.msra.mxu0 %v14312_v46  ;;  %10943 = vmatpush1.bf16.msra.mxu1 %v14315_v47  ;;  %v14403_v46 = vld [vmem:[%s21637_s1 + $0x6a0] ss:$16 sps:$4 sm:$0xff]   ;;  %v14406_v47 = vld [vmem:[%s21637_s1 + $0x6a8] ss:$16 sps:$4 sm:$0xff]  }
  0x9c   :  { %9919 = vmatprep.subr.bf16.mxu0 %v14320_v48  ;;  %10944 = vmatprep.subr.bf16.mxu1 %v14323_v50  ;;  %v14411_v48 = vld [vmem:[%s21637_s1 + $0x6c4] ss:$16 sps:$4 sm:$0xff]   ;;  %v14414_v50 = vld [vmem:[%s21637_s1 + $0x6cc] ss:$16 sps:$4 sm:$0xff]  }
  0x9f   :  { %9920 = vmatpush1.bf16.msra.mxu0 %v14318_v51  ;;  %10945 = vmatpush1.bf16.msra.mxu1 %v14321_v53  ;;  %v14409_v51 = vld [vmem:[%s21637_s1 + $0x6c0] ss:$16 sps:$4 sm:$0xff]   ;;  %v14412_v53 = vld [vmem:[%s21637_s1 + $0x6c8] ss:$16 sps:$4 sm:$0xff]  }
  0xa0   :  { %9921 = vmatprep.subr.bf16.mxu0 %v14326_v54  ;;  %10946 = vmatprep.subr.bf16.mxu1 %v14329_v55  ;;  %v14417_v54 = vld [vmem:[%s21637_s1 + $0x6e4] ss:$16 sps:$4 sm:$0xff]   ;;  %v14420_v55 = vld [vmem:[%s21637_s1 + $0x6ec] ss:$16 sps:$4 sm:$0xff]  }
  0xa3   :  { %9922 = vmatpush1.bf16.msra.mxu0 %v14324_v56  ;;  %10947 = vmatpush1.bf16.msra.mxu1 %v14327_v57  ;;  %v14415_v56 = vld [vmem:[%s21637_s1 + $0x6e0] ss:$16 sps:$4 sm:$0xff]   ;;  %v14418_v57 = vld [vmem:[%s21637_s1 + $0x6e8] ss:$16 sps:$4 sm:$0xff]  }
  0xa4   :  { %9923 = vmatprep.subr.bf16.mxu0 %v14332_v58  ;;  %10948 = vmatprep.subr.bf16.mxu1 %v14335_v59  ;;  %v14423_v58 = vld [vmem:[%s21637_s1 + $0x704] ss:$16 sps:$4 sm:$0xff]   ;;  %v14426_v59 = vld [vmem:[%s21637_s1 + $0x70c] ss:$16 sps:$4 sm:$0xff]  }
  0xa7   :  { %9924 = vmatpush1.bf16.msra.mxu0 %v14330_v60  ;;  %10949 = vmatpush1.bf16.msra.mxu1 %v14333_v61  ;;  %v14421_v60 = vld [vmem:[%s21637_s1 + $0x700] ss:$16 sps:$4 sm:$0xff]   ;;  %v14424_v61 = vld [vmem:[%s21637_s1 + $0x708] ss:$16 sps:$4 sm:$0xff]  }
  0xa8   :  { %9925 = vmatprep.subr.bf16.mxu0 %v14338_v62  ;;  %10950 = vmatprep.subr.bf16.mxu1 %v14341_v63  ;;  %v14429_v62 = vld [vmem:[%s21637_s1 + $0x724] ss:$16 sps:$4 sm:$0xff]   ;;  %v14432_v63 = vld [vmem:[%s21637_s1 + $0x72c] ss:$16 sps:$4 sm:$0xff]  }
  0xab   :  { %9926 = vmatpush1.bf16.msra.mxu0 %v14336_v0  ;;  %10951 = vmatpush1.bf16.msra.mxu1 %v14339_v1  ;;  %v14427_v0 = vld [vmem:[%s21637_s1 + $0x720] ss:$16 sps:$4 sm:$0xff]   ;;  %v14430_v1 = vld [vmem:[%s21637_s1 + $0x728] ss:$16 sps:$4 sm:$0xff]  }
  0xac   :  { %9927 = vmatprep.subr.bf16.mxu0 %v14344_v2  ;;  %10952 = vmatprep.subr.bf16.mxu1 %v14347_v3  ;;  %v14435_v2 = vld [vmem:[%s21637_s1 + $0x744] ss:$16 sps:$4 sm:$0xff]   ;;  %v14438_v3 = vld [vmem:[%s21637_s1 + $0x74c] ss:$16 sps:$4 sm:$0xff]  }
  0xaf   :  { %9928 = vmatpush1.bf16.msra.mxu0 %v14342_v4  ;;  %10953 = vmatpush1.bf16.msra.mxu1 %v14345_v5  ;;  %v14433_v4 = vld [vmem:[%s21637_s1 + $0x740] ss:$16 sps:$4 sm:$0xff]   ;;  %v14436_v5 = vld [vmem:[%s21637_s1 + $0x748] ss:$16 sps:$4 sm:$0xff]  }
  0xb0   :  { %9929 = vmatprep.subr.bf16.mxu0 %v14350_v6  ;;  %10954 = vmatprep.subr.bf16.mxu1 %v14353_v7  ;;  %v14441_v6 = vld [vmem:[%s21637_s1 + $0x764] ss:$16 sps:$4 sm:$0xff]   ;;  %v14444_v7 = vld [vmem:[%s21637_s1 + $0x76c] ss:$16 sps:$4 sm:$0xff]  }
  0xb3   :  { %9930 = vmatpush1.bf16.msra.mxu0 %v14348_v8  ;;  %10955 = vmatpush1.bf16.msra.mxu1 %v14351_v9  ;;  %v14439_v8 = vld [vmem:[%s21637_s1 + $0x760] ss:$16 sps:$4 sm:$0xff]   ;;  %v14442_v9 = vld [vmem:[%s21637_s1 + $0x768] ss:$16 sps:$4 sm:$0xff]  }
  0xb4   :  { %9931 = vmatprep.subr.bf16.mxu0 %v14356_v10  ;;  %10956 = vmatprep.subr.bf16.mxu1 %v14359_v11  ;;  %v14447_v10 = vld [vmem:[%s21637_s1 + $0x784] ss:$16 sps:$4 sm:$0xff]   ;;  %v14450_v11 = vld [vmem:[%s21637_s1 + $0x78c] ss:$16 sps:$4 sm:$0xff]  }
  0xb7   :  { %9932 = vmatpush1.bf16.msra.mxu0 %v14354_v12  ;;  %10957 = vmatpush1.bf16.msra.mxu1 %v14357_v52  ;;  %v14445_v12 = vld [vmem:[%s21637_s1 + $0x780] ss:$16 sps:$4 sm:$0xff]   ;;  %v14448_v52 = vld [vmem:[%s21637_s1 + $0x788] ss:$16 sps:$4 sm:$0xff]  }
  0xb8   :  { %9933 = vmatprep.subr.bf16.mxu0 %v14362_v15  ;;  %10958 = vmatprep.subr.bf16.mxu1 %v14365_v16  ;;  %v14453_v15 = vld [vmem:[%s21637_s1 + $0x7a4] ss:$16 sps:$4 sm:$0xff]   ;;  %v14456_v16 = vld [vmem:[%s21637_s1 + $0x7ac] ss:$16 sps:$4 sm:$0xff]  }
  0xbb   :  { %9934 = vmatpush1.bf16.msra.mxu0 %v14360_v17  ;;  %10959 = vmatpush1.bf16.msra.mxu1 %v14363_v18  ;;  %v14451_v17 = vld [vmem:[%s21637_s1 + $0x7a0] ss:$16 sps:$4 sm:$0xff]   ;;  %v14454_v18 = vld [vmem:[%s21637_s1 + $0x7a8] ss:$16 sps:$4 sm:$0xff]  }
  0xbc   :  { %9935 = vmatprep.subr.bf16.mxu0 %v14368_v19  ;;  %10960 = vmatprep.subr.bf16.mxu1 %v14371_v20  ;;  %v14459_v19 = vld [vmem:[%s21637_s1 + $0x7c4] ss:$16 sps:$4 sm:$0xff]   ;;  %v14462_v20 = vld [vmem:[%s21637_s1 + $0x7cc] ss:$16 sps:$4 sm:$0xff]  }
  0xbf   :  { %9936 = vmatpush1.bf16.msra.mxu0 %v14366_v21  ;;  %10961 = vmatpush1.bf16.msra.mxu1 %v14369_v22  ;;  %v17330_v21 = vld.sshfl [vmem:[%s21636_s0 + $0x8] sm:$0xff pattern:$0x75316420]  ;;  %v14457_v22 = vld [vmem:[%s21637_s1 + $0x7c0] ss:$16 sps:$4 sm:$0xff]  }
  0xc0   :  { %9946 = vmatprep.subr.bf16.mxu0 %v14375_v23  ;;  %10971 = vmatprep.subr.bf16.mxu1 %v14378_v24  ;;  %v14460_v23 = vld [vmem:[%s21637_s1 + $0x7c8] ss:$16 sps:$4 sm:$0xff]   ;;  %v14465_v24 = vld [vmem:[%s21637_s1 + $0x7e4] ss:$16 sps:$4 sm:$0xff]  }
  0xc2   :  { %9938 = vmatmul.mubr.bf16.vlgmr.msra.gmra.mrb[0].mxu0 %v17156_v26  ;;  %10963 = vmatmul.mubr.bf16.vlgmr.msra.gmra.mrb[0].mxu1 %v17156_v26 }
  0xc3   :  { %9947 = vmatpush1.bf16.msra.mxu0 %v14373_v13  ;;  %10972 = vmatpush1.bf16.msra.mxu1 %v14376_v27  ;;  %v14468_v13 = vld [vmem:[%s21637_s1 + $0x7ec] ss:$16 sps:$4 sm:$0xff]   ;;  %v14463_v27 = vld [vmem:[%s21637_s1 + $0x7e0] ss:$16 sps:$4 sm:$0xff]  }
  0xc4   :  { %9948 = vmatprep.subr.bf16.mxu0 %v14381_v28  ;;  %10973 = vmatprep.subr.bf16.mxu1 %v14384_v29  ;;  %v14466_v28 = vld [vmem:[%s21637_s1 + $0x7e8] ss:$16 sps:$4 sm:$0xff]   ;;  %v14471_v29 = vld [vmem:[%s21637_s1 + $0x804] ss:$16 sps:$4 sm:$0xff]  }
  0xc5   :  { %9978 = vmatprep.mubr.bf16.mxu0 %v1674_v14  ;;  %11003 = vmatprep.mubr.bf16.mxu1 %v1674_v14  ;;  %v14474_v14 = vld [vmem:[%s21637_s1 + $0x80c] ss:$16 sps:$4 sm:$0xff]  }
  0xc7   :  { %9949 = vmatpush1.bf16.msra.mxu0 %v14379_v30  ;;  %10974 = vmatpush1.bf16.msra.mxu1 %v14382_v31  ;;  %v1690_v30 = vcombine.high %v17330_v21, %v17330_v21  ;;  %v1672_v31 = vcombine.high %v17156_v26, %v17156_v26  ;;  %v14480_v26 = vld [vmem:[%s21637_s1 + $0x82c] ss:$16 sps:$4 sm:$0xff]  }
  0xc8   :  { %9950 = vmatprep.subr.bf16.mxu0 %v14387_v25  ;;  %10975 = vmatprep.subr.bf16.mxu1 %v14390_v32  ;;  %v14469_v25 = vld [vmem:[%s21637_s1 + $0x800] ss:$16 sps:$4 sm:$0xff]   ;;  %v14472_v32 = vld [vmem:[%s21637_s1 + $0x808] ss:$16 sps:$4 sm:$0xff]  }
  0xcb   :  { %9951 = vmatpush1.bf16.msra.mxu0 %v14385_v33  ;;  %10976 = vmatpush1.bf16.msra.mxu1 %v14388_v34  ;;  %v14477_v33 = vld [vmem:[%s21637_s1 + $0x824] ss:$16 sps:$4 sm:$0xff]   ;;  %v17373_v34 = vrot.slane %v1690_v30, %v16672_v49 }
  0xcc   :  { %9952 = vmatprep.subr.bf16.mxu0 %v14393_v35  ;;  %10977 = vmatprep.subr.bf16.mxu1 %v14396_v36  ;;  %v14475_v35 = vld [vmem:[%s21637_s1 + $0x820] ss:$16 sps:$4 sm:$0xff]   ;;  %v14478_v36 = vld [vmem:[%s21637_s1 + $0x828] ss:$16 sps:$4 sm:$0xff]   ;;  %v14561_v30 = vld [vmem:[%s21637_s1 + $0x9e4] ss:$16 sps:$4 sm:$0xff]  }
  0xcf   :  { %9953 = vmatpush1.bf16.msra.mxu0 %v14391_v37  ;;  %10978 = vmatpush1.bf16.msra.mxu1 %v14394_v38  ;;  %v14483_v37 = vld [vmem:[%s21637_s1 + $0x844] ss:$16 sps:$4 sm:$0xff]   ;;  %v14486_v38 = vld [vmem:[%s21637_s1 + $0x84c] ss:$16 sps:$4 sm:$0xff]  }
  0xd0   :  { %9954 = vmatprep.subr.bf16.mxu0 %v14399_v39  ;;  %10979 = vmatprep.subr.bf16.mxu1 %v14402_v40  ;;  %v14481_v39 = vld [vmem:[%s21637_s1 + $0x840] ss:$16 sps:$4 sm:$0xff]   ;;  %v14484_v40 = vld [vmem:[%s21637_s1 + $0x848] ss:$16 sps:$4 sm:$0xff]  }
  0xd3   :  { %9955 = vmatpush1.bf16.msra.mxu0 %v14397_v41  ;;  %10980 = vmatpush1.bf16.msra.mxu1 %v14400_v43  ;;  %v14489_v41 = vld [vmem:[%s21637_s1 + $0x864] ss:$16 sps:$4 sm:$0xff]   ;;  %v14492_v43 = vld [vmem:[%s21637_s1 + $0x86c] ss:$16 sps:$4 sm:$0xff]  }
  0xd4   :  { %9956 = vmatprep.subr.bf16.mxu0 %v14405_v44  ;;  %10981 = vmatprep.subr.bf16.mxu1 %v14408_v45  ;;  %v14487_v44 = vld [vmem:[%s21637_s1 + $0x860] ss:$16 sps:$4 sm:$0xff]   ;;  %v14490_v45 = vld [vmem:[%s21637_s1 + $0x868] ss:$16 sps:$4 sm:$0xff]  }
  0xd7   :  { %9957 = vmatpush1.bf16.msra.mxu0 %v14403_v46  ;;  %10982 = vmatpush1.bf16.msra.mxu1 %v14406_v47  ;;  %v14495_v46 = vld [vmem:[%s21637_s1 + $0x884] ss:$16 sps:$4 sm:$0xff]   ;;  %v14498_v47 = vld [vmem:[%s21637_s1 + $0x88c] ss:$16 sps:$4 sm:$0xff]  }
  0xd8   :  { %9958 = vmatprep.subr.bf16.mxu0 %v14411_v48  ;;  %10983 = vmatprep.subr.bf16.mxu1 %v14414_v50  ;;  %v14493_v48 = vld [vmem:[%s21637_s1 + $0x880] ss:$16 sps:$4 sm:$0xff]   ;;  %v14496_v50 = vld [vmem:[%s21637_s1 + $0x888] ss:$16 sps:$4 sm:$0xff]  }
  0xdb   :  { %9959 = vmatpush1.bf16.msra.mxu0 %v14409_v51  ;;  %10984 = vmatpush1.bf16.msra.mxu1 %v14412_v53  ;;  %v14501_v51 = vld [vmem:[%s21637_s1 + $0x8a4] ss:$16 sps:$4 sm:$0xff]   ;;  %v14504_v53 = vld [vmem:[%s21637_s1 + $0x8ac] ss:$16 sps:$4 sm:$0xff]  }
  0xdc   :  { %9960 = vmatprep.subr.bf16.mxu0 %v14417_v54  ;;  %10985 = vmatprep.subr.bf16.mxu1 %v14420_v55  ;;  %v14499_v54 = vld [vmem:[%s21637_s1 + $0x8a0] ss:$16 sps:$4 sm:$0xff]   ;;  %v14502_v55 = vld [vmem:[%s21637_s1 + $0x8a8] ss:$16 sps:$4 sm:$0xff]  }
  0xdf   :  { %9961 = vmatpush1.bf16.msra.mxu0 %v14415_v56  ;;  %10986 = vmatpush1.bf16.msra.mxu1 %v14418_v57  ;;  %v14507_v56 = vld [vmem:[%s21637_s1 + $0x8c4] ss:$16 sps:$4 sm:$0xff]   ;;  %v14510_v57 = vld [vmem:[%s21637_s1 + $0x8cc] ss:$16 sps:$4 sm:$0xff]  }
  0xe0   :  { %9962 = vmatprep.subr.bf16.mxu0 %v14423_v58  ;;  %10987 = vmatprep.subr.bf16.mxu1 %v14426_v59  ;;  %v14505_v58 = vld [vmem:[%s21637_s1 + $0x8c0] ss:$16 sps:$4 sm:$0xff]   ;;  %v14508_v59 = vld [vmem:[%s21637_s1 + $0x8c8] ss:$16 sps:$4 sm:$0xff]  }
  0xe3   :  { %9963 = vmatpush1.bf16.msra.mxu0 %v14421_v60  ;;  %10988 = vmatpush1.bf16.msra.mxu1 %v14424_v61  ;;  %v14513_v60 = vld [vmem:[%s21637_s1 + $0x8e4] ss:$16 sps:$4 sm:$0xff]   ;;  %v14516_v61 = vld [vmem:[%s21637_s1 + $0x8ec] ss:$16 sps:$4 sm:$0xff]  }
  0xe4   :  { %9964 = vmatprep.subr.bf16.mxu0 %v14429_v62  ;;  %10989 = vmatprep.subr.bf16.mxu1 %v14432_v63  ;;  %v14511_v62 = vld [vmem:[%s21637_s1 + $0x8e0] ss:$16 sps:$4 sm:$0xff]   ;;  %v14514_v63 = vld [vmem:[%s21637_s1 + $0x8e8] ss:$16 sps:$4 sm:$0xff]  }
  0xe7   :  { %9965 = vmatpush1.bf16.msra.mxu0 %v14427_v0  ;;  %10990 = vmatpush1.bf16.msra.mxu1 %v14430_v1  ;;  %v14519_v0 = vld [vmem:[%s21637_s1 + $0x904] ss:$16 sps:$4 sm:$0xff]   ;;  %v14522_v1 = vld [vmem:[%s21637_s1 + $0x90c] ss:$16 sps:$4 sm:$0xff]  }
  0xe8   :  { %9966 = vmatprep.subr.bf16.mxu0 %v14435_v2  ;;  %10991 = vmatprep.subr.bf16.mxu1 %v14438_v3  ;;  %v14517_v2 = vld [vmem:[%s21637_s1 + $0x900] ss:$16 sps:$4 sm:$0xff]   ;;  %v14520_v3 = vld [vmem:[%s21637_s1 + $0x908] ss:$16 sps:$4 sm:$0xff]  }
  0xeb   :  { %9967 = vmatpush1.bf16.msra.mxu0 %v14433_v4  ;;  %10992 = vmatpush1.bf16.msra.mxu1 %v14436_v5  ;;  %v14525_v4 = vld [vmem:[%s21637_s1 + $0x924] ss:$16 sps:$4 sm:$0xff]   ;;  %v14528_v5 = vld [vmem:[%s21637_s1 + $0x92c] ss:$16 sps:$4 sm:$0xff]  }
  0xec   :  { %9968 = vmatprep.subr.bf16.mxu0 %v14441_v6  ;;  %10993 = vmatprep.subr.bf16.mxu1 %v14444_v7  ;;  %v14523_v6 = vld [vmem:[%s21637_s1 + $0x920] ss:$16 sps:$4 sm:$0xff]   ;;  %v14526_v7 = vld [vmem:[%s21637_s1 + $0x928] ss:$16 sps:$4 sm:$0xff]  }
  0xef   :  { %9969 = vmatpush1.bf16.msra.mxu0 %v14439_v8  ;;  %10994 = vmatpush1.bf16.msra.mxu1 %v14442_v9  ;;  %v14531_v8 = vld [vmem:[%s21637_s1 + $0x944] ss:$16 sps:$4 sm:$0xff]   ;;  %v14534_v9 = vld [vmem:[%s21637_s1 + $0x94c] ss:$16 sps:$4 sm:$0xff]  }
  0xf0   :  { %9970 = vmatprep.subr.bf16.mxu0 %v14447_v10  ;;  %10995 = vmatprep.subr.bf16.mxu1 %v14450_v11  ;;  %v14529_v10 = vld [vmem:[%s21637_s1 + $0x940] ss:$16 sps:$4 sm:$0xff]   ;;  %v14532_v11 = vld [vmem:[%s21637_s1 + $0x948] ss:$16 sps:$4 sm:$0xff]  }
  0xf3   :  { %9971 = vmatpush1.bf16.msra.mxu0 %v14445_v12  ;;  %10996 = vmatpush1.bf16.msra.mxu1 %v14448_v52  ;;  %v14537_v12 = vld [vmem:[%s21637_s1 + $0x964] ss:$16 sps:$4 sm:$0xff]   ;;  %v14540_v52 = vld [vmem:[%s21637_s1 + $0x96c] ss:$16 sps:$4 sm:$0xff]  }
  0xf4   :  { %9972 = vmatprep.subr.bf16.mxu0 %v14453_v15  ;;  %10997 = vmatprep.subr.bf16.mxu1 %v14456_v16  ;;  %v14535_v15 = vld [vmem:[%s21637_s1 + $0x960] ss:$16 sps:$4 sm:$0xff]   ;;  %v14538_v16 = vld [vmem:[%s21637_s1 + $0x968] ss:$16 sps:$4 sm:$0xff]  }
  0xf7   :  { %9973 = vmatpush1.bf16.msra.mxu0 %v14451_v17  ;;  %10998 = vmatpush1.bf16.msra.mxu1 %v14454_v18  ;;  %v14543_v17 = vld [vmem:[%s21637_s1 + $0x984] ss:$16 sps:$4 sm:$0xff]   ;;  %v14546_v18 = vld [vmem:[%s21637_s1 + $0x98c] ss:$16 sps:$4 sm:$0xff]  }
  0xf8   :  { %9974 = vmatprep.subr.bf16.mxu0 %v14459_v19  ;;  %10999 = vmatprep.subr.bf16.mxu1 %v14462_v20  ;;  %v14541_v19 = vld [vmem:[%s21637_s1 + $0x980] ss:$16 sps:$4 sm:$0xff]   ;;  %v14544_v20 = vld [vmem:[%s21637_s1 + $0x988] ss:$16 sps:$4 sm:$0xff]  }
  0xfb   :  { %9975 = vmatpush1.bf16.msra.mxu0 %v14457_v22  ;;  %11000 = vmatpush1.bf16.msra.mxu1 %v14460_v23  ;;  %v14549_v22 = vld [vmem:[%s21637_s1 + $0x9a4] ss:$16 sps:$4 sm:$0xff]   ;;  %v14552_v23 = vld [vmem:[%s21637_s1 + $0x9ac] ss:$16 sps:$4 sm:$0xff]  }
  0xfc   :  { %9976 = vmatprep.subr.bf16.mxu0 %v14465_v24  ;;  %11001 = vmatprep.subr.bf16.mxu1 %v14468_v13  ;;  %v14547_v24 = vld [vmem:[%s21637_s1 + $0x9a0] ss:$16 sps:$4 sm:$0xff]   ;;  %v14550_v13 = vld [vmem:[%s21637_s1 + $0x9a8] ss:$16 sps:$4 sm:$0xff]  }
  0xff   :  { %9977 = vmatpush1.bf16.msra.mxu0 %v14463_v27  ;;  %11002 = vmatpush1.bf16.msra.mxu1 %v14466_v28  ;;  %v14555_v27 = vld [vmem:[%s21637_s1 + $0x9c4] ss:$16 sps:$4 sm:$0xff]   ;;  %v14558_v28 = vld [vmem:[%s21637_s1 + $0x9cc] ss:$16 sps:$4 sm:$0xff]  }
 0x100   :  { %9987 = vmatprep.subr.bf16.mxu0 %v14471_v29  ;;  %11012 = vmatprep.subr.bf16.mxu1 %v14474_v14  ;;  %v14553_v29 = vld [vmem:[%s21637_s1 + $0x9c0] ss:$16 sps:$4 sm:$0xff]   ;;  %v14556_v14 = vld [vmem:[%s21637_s1 + $0x9c8] ss:$16 sps:$4 sm:$0xff]  }
 0x102   :  { %9979 = vmatmul.mubr.bf16.vlgmr.msra.gmra.mrb[0].mxu0 %v1672_v31  ;;  %11004 = vmatmul.mubr.bf16.vlgmr.msra.gmra.mrb[0].mxu1 %v1672_v31  ;;  %v14564_v31 = vld [vmem:[%s21637_s1 + $0x9ec] ss:$16 sps:$4 sm:$0xff]  }
 0x103   :  { %9988 = vmatpush1.bf16.msra.mxu0 %v14469_v25  ;;  %11013 = vmatpush1.bf16.msra.mxu1 %v14472_v32  ;;  %v14559_v25 = vld [vmem:[%s21637_s1 + $0x9e0] ss:$16 sps:$4 sm:$0xff]   ;;  %v14562_v32 = vld [vmem:[%s21637_s1 + $0x9e8] ss:$16 sps:$4 sm:$0xff]  }
 0x104   :  { %9989 = vmatprep.subr.bf16.mxu0 %v14477_v33  ;;  %11014 = vmatprep.subr.bf16.mxu1 %v14480_v26  ;;  %v14567_v33 = vld [vmem:[%s21637_s1 + $0xa04] ss:$16 sps:$4 sm:$0xff]   ;;  %v14570_v26 = vld [vmem:[%s21637_s1 + $0xa0c] ss:$16 sps:$4 sm:$0xff]  }
 0x105   :  { %10019 = vmatprep.mubr.bf16.mxu0 %v17373_v34  ;;  %11044 = vmatprep.mubr.bf16.mxu1 %v17373_v34 }
 0x107   :  { %9990 = vmatpush1.bf16.msra.mxu0 %v14475_v35  ;;  %11015 = vmatpush1.bf16.msra.mxu1 %v14478_v36  ;;  %v17559_v35 = vrot.slane %v17330_v21, %v16672_v49  ;;  %v14565_v36 = vld [vmem:[%s21637_s1 + $0xa00] ss:$16 sps:$4 sm:$0xff]   ;;  %v14576_v21 = vld [vmem:[%s21637_s1 + $0xa2c] ss:$16 sps:$4 sm:$0xff]  }
 0x108   :  { %9991 = vmatprep.subr.bf16.mxu0 %v14483_v37  ;;  %11016 = vmatprep.subr.bf16.mxu1 %v14486_v38  ;;  %v14568_v37 = vld [vmem:[%s21637_s1 + $0xa08] ss:$16 sps:$4 sm:$0xff]   ;;  %v14573_v38 = vld [vmem:[%s21637_s1 + $0xa24] ss:$16 sps:$4 sm:$0xff]  }
 0x10b   :  { %9992 = vmatpush1.bf16.msra.mxu0 %v14481_v39  ;;  %11017 = vmatpush1.bf16.msra.mxu1 %v14484_v40  ;;  %v1722_v39 = vcombine.high %v17373_v34, %v17373_v34  ;;  %v14571_v40 = vld [vmem:[%s21637_s1 + $0xa20] ss:$16 sps:$4 sm:$0xff]   ;;  %v14579_v34 = vld [vmem:[%s21637_s1 + $0xa44] ss:$16 sps:$4 sm:$0xff]  }
 0x10c   :  { %9993 = vmatprep.subr.bf16.mxu0 %v14489_v41  ;;  %11018 = vmatprep.subr.bf16.mxu1 %v14492_v43  ;;  %v14574_v41 = vld [vmem:[%s21637_s1 + $0xa28] ss:$16 sps:$4 sm:$0xff]   ;;  %v14582_v43 = vld [vmem:[%s21637_s1 + $0xa4c] ss:$16 sps:$4 sm:$0xff]  }
 0x10f   :  { %9994 = vmatpush1.bf16.msra.mxu0 %v14487_v44  ;;  %11019 = vmatpush1.bf16.msra.mxu1 %v14490_v45  ;;  %v14577_v44 = vld [vmem:[%s21637_s1 + $0xa40] ss:$16 sps:$4 sm:$0xff]   ;;  %v14580_v45 = vld [vmem:[%s21637_s1 + $0xa48] ss:$16 sps:$4 sm:$0xff]  }
 0x110   :  { %9995 = vmatprep.subr.bf16.mxu0 %v14495_v46  ;;  %11020 = vmatprep.subr.bf16.mxu1 %v14498_v47  ;;  %v14585_v46 = vld [vmem:[%s21637_s1 + $0xa64] ss:$16 sps:$4 sm:$0xff]   ;;  %v14588_v47 = vld [vmem:[%s21637_s1 + $0xa6c] ss:$16 sps:$4 sm:$0xff]  }
 0x113   :  { %9996 = vmatpush1.bf16.msra.mxu0 %v14493_v48  ;;  %11021 = vmatpush1.bf16.msra.mxu1 %v14496_v50  ;;  %v14583_v48 = vld [vmem:[%s21637_s1 + $0xa60] ss:$16 sps:$4 sm:$0xff]   ;;  %v14586_v50 = vld [vmem:[%s21637_s1 + $0xa68] ss:$16 sps:$4 sm:$0xff]  }
 0x114   :  { %9997 = vmatprep.subr.bf16.mxu0 %v14501_v51  ;;  %11022 = vmatprep.subr.bf16.mxu1 %v14504_v53  ;;  %v14591_v51 = vld [vmem:[%s21637_s1 + $0xa84] ss:$16 sps:$4 sm:$0xff]   ;;  %v14594_v53 = vld [vmem:[%s21637_s1 + $0xa8c] ss:$16 sps:$4 sm:$0xff]  }
 0x117   :  { %9998 = vmatpush1.bf16.msra.mxu0 %v14499_v54  ;;  %11023 = vmatpush1.bf16.msra.mxu1 %v14502_v55  ;;  %v14589_v54 = vld [vmem:[%s21637_s1 + $0xa80] ss:$16 sps:$4 sm:$0xff]   ;;  %v14592_v55 = vld [vmem:[%s21637_s1 + $0xa88] ss:$16 sps:$4 sm:$0xff]  }
 0x118   :  { %9999 = vmatprep.subr.bf16.mxu0 %v14507_v56  ;;  %11024 = vmatprep.subr.bf16.mxu1 %v14510_v57  ;;  %v14597_v56 = vld [vmem:[%s21637_s1 + $0xaa4] ss:$16 sps:$4 sm:$0xff]   ;;  %v14600_v57 = vld [vmem:[%s21637_s1 + $0xaac] ss:$16 sps:$4 sm:$0xff]  }
 0x11b   :  { %10000 = vmatpush1.bf16.msra.mxu0 %v14505_v58  ;;  %11025 = vmatpush1.bf16.msra.mxu1 %v14508_v59  ;;  %v14595_v58 = vld [vmem:[%s21637_s1 + $0xaa0] ss:$16 sps:$4 sm:$0xff]   ;;  %v14598_v59 = vld [vmem:[%s21637_s1 + $0xaa8] ss:$16 sps:$4 sm:$0xff]  }
 0x11c   :  { %10001 = vmatprep.subr.bf16.mxu0 %v14513_v60  ;;  %11026 = vmatprep.subr.bf16.mxu1 %v14516_v61  ;;  %v14603_v60 = vld [vmem:[%s21637_s1 + $0xac4] ss:$16 sps:$4 sm:$0xff]   ;;  %v14606_v61 = vld [vmem:[%s21637_s1 + $0xacc] ss:$16 sps:$4 sm:$0xff]  }
 0x11f   :  { %10002 = vmatpush1.bf16.msra.mxu0 %v14511_v62  ;;  %11027 = vmatpush1.bf16.msra.mxu1 %v14514_v63  ;;  %v14601_v62 = vld [vmem:[%s21637_s1 + $0xac0] ss:$16 sps:$4 sm:$0xff]   ;;  %v14604_v63 = vld [vmem:[%s21637_s1 + $0xac8] ss:$16 sps:$4 sm:$0xff]  }
 0x120   :  { %10003 = vmatprep.subr.bf16.mxu0 %v14519_v0  ;;  %11028 = vmatprep.subr.bf16.mxu1 %v14522_v1  ;;  %v14609_v0 = vld [vmem:[%s21637_s1 + $0xae4] ss:$16 sps:$4 sm:$0xff]   ;;  %v14612_v1 = vld [vmem:[%s21637_s1 + $0xaec] ss:$16 sps:$4 sm:$0xff]  }
 0x123   :  { %10004 = vmatpush1.bf16.msra.mxu0 %v14517_v2  ;;  %11029 = vmatpush1.bf16.msra.mxu1 %v14520_v3  ;;  %v14607_v2 = vld [vmem:[%s21637_s1 + $0xae0] ss:$16 sps:$4 sm:$0xff]   ;;  %v14610_v3 = vld [vmem:[%s21637_s1 + $0xae8] ss:$16 sps:$4 sm:$0xff]  }
 0x124   :  { %10005 = vmatprep.subr.bf16.mxu0 %v14525_v4  ;;  %11030 = vmatprep.subr.bf16.mxu1 %v14528_v5  ;;  %v14615_v4 = vld [vmem:[%s21637_s1 + $0xb04] ss:$16 sps:$4 sm:$0xff]   ;;  %v14618_v5 = vld [vmem:[%s21637_s1 + $0xb0c] ss:$16 sps:$4 sm:$0xff]  }
 0x127   :  { %10006 = vmatpush1.bf16.msra.mxu0 %v14523_v6  ;;  %11031 = vmatpush1.bf16.msra.mxu1 %v14526_v7  ;;  %v14613_v6 = vld [vmem:[%s21637_s1 + $0xb00] ss:$16 sps:$4 sm:$0xff]   ;;  %v14616_v7 = vld [vmem:[%s21637_s1 + $0xb08] ss:$16 sps:$4 sm:$0xff]  }
 0x128   :  { %10007 = vmatprep.subr.bf16.mxu0 %v14531_v8  ;;  %11032 = vmatprep.subr.bf16.mxu1 %v14534_v9  ;;  %v14621_v8 = vld [vmem:[%s21637_s1 + $0xb24] ss:$16 sps:$4 sm:$0xff]   ;;  %v14624_v9 = vld [vmem:[%s21637_s1 + $0xb2c] ss:$16 sps:$4 sm:$0xff]  }
 0x12b   :  { %10008 = vmatpush1.bf16.msra.mxu0 %v14529_v10  ;;  %11033 = vmatpush1.bf16.msra.mxu1 %v14532_v11  ;;  %v14619_v10 = vld [vmem:[%s21637_s1 + $0xb20] ss:$16 sps:$4 sm:$0xff]   ;;  %v14622_v11 = vld [vmem:[%s21637_s1 + $0xb28] ss:$16 sps:$4 sm:$0xff]  }
 0x12c   :  { %10009 = vmatprep.subr.bf16.mxu0 %v14537_v12  ;;  %11034 = vmatprep.subr.bf16.mxu1 %v14540_v52  ;;  %v14627_v12 = vld [vmem:[%s21637_s1 + $0xb44] ss:$16 sps:$4 sm:$0xff]   ;;  %v14630_v52 = vld [vmem:[%s21637_s1 + $0xb4c] ss:$16 sps:$4 sm:$0xff]  }
 0x12f   :  { %10010 = vmatpush1.bf16.msra.mxu0 %v14535_v15  ;;  %11035 = vmatpush1.bf16.msra.mxu1 %v14538_v16  ;;  %v14625_v15 = vld [vmem:[%s21637_s1 + $0xb40] ss:$16 sps:$4 sm:$0xff]   ;;  %v14628_v16 = vld [vmem:[%s21637_s1 + $0xb48] ss:$16 sps:$4 sm:$0xff]  }
 0x130   :  { %10011 = vmatprep.subr.bf16.mxu0 %v14543_v17  ;;  %11036 = vmatprep.subr.bf16.mxu1 %v14546_v18  ;;  %v14633_v17 = vld [vmem:[%s21637_s1 + $0xb64] ss:$16 sps:$4 sm:$0xff]   ;;  %v14636_v18 = vld [vmem:[%s21637_s1 + $0xb6c] ss:$16 sps:$4 sm:$0xff]  }
 0x133   :  { %10012 = vmatpush1.bf16.msra.mxu0 %v14541_v19  ;;  %11037 = vmatpush1.bf16.msra.mxu1 %v14544_v20  ;;  %v14631_v19 = vld [vmem:[%s21637_s1 + $0xb60] ss:$16 sps:$4 sm:$0xff]   ;;  %v14634_v20 = vld [vmem:[%s21637_s1 + $0xb68] ss:$16 sps:$4 sm:$0xff]  }
 0x134   :  { %10013 = vmatprep.subr.bf16.mxu0 %v14549_v22  ;;  %11038 = vmatprep.subr.bf16.mxu1 %v14552_v23  ;;  %v14639_v22 = vld [vmem:[%s21637_s1 + $0xb84] ss:$16 sps:$4 sm:$0xff]   ;;  %v14642_v23 = vld [vmem:[%s21637_s1 + $0xb8c] ss:$16 sps:$4 sm:$0xff]  }
 0x137   :  { %10014 = vmatpush1.bf16.msra.mxu0 %v14547_v24  ;;  %11039 = vmatpush1.bf16.msra.mxu1 %v14550_v13  ;;  %v14637_v24 = vld [vmem:[%s21637_s1 + $0xb80] ss:$16 sps:$4 sm:$0xff]   ;;  %v14640_v13 = vld [vmem:[%s21637_s1 + $0xb88] ss:$16 sps:$4 sm:$0xff]  }
 0x138   :  { %10015 = vmatprep.subr.bf16.mxu0 %v14555_v27  ;;  %11040 = vmatprep.subr.bf16.mxu1 %v14558_v28  ;;  %v14645_v27 = vld [vmem:[%s21637_s1 + $0xba4] ss:$16 sps:$4 sm:$0xff]   ;;  %v14648_v28 = vld [vmem:[%s21637_s1 + $0xbac] ss:$16 sps:$4 sm:$0xff]  }
 0x13b   :  { %10016 = vmatpush1.bf16.msra.mxu0 %v14553_v29  ;;  %11041 = vmatpush1.bf16.msra.mxu1 %v14556_v14  ;;  %v14643_v29 = vld [vmem:[%s21637_s1 + $0xba0] ss:$16 sps:$4 sm:$0xff]   ;;  %v14646_v14 = vld [vmem:[%s21637_s1 + $0xba8] ss:$16 sps:$4 sm:$0xff]  }
 0x13c   :  { %10017 = vmatprep.subr.bf16.mxu0 %v14561_v30  ;;  %11042 = vmatprep.subr.bf16.mxu1 %v14564_v31  ;;  %v14651_v30 = vld [vmem:[%s21637_s1 + $0xbc4] ss:$16 sps:$4 sm:$0xff]   ;;  %v14654_v31 = vld [vmem:[%s21637_s1 + $0xbcc] ss:$16 sps:$4 sm:$0xff]  }
 0x13f   :  { %10018 = vmatpush1.bf16.msra.mxu0 %v14559_v25  ;;  %11043 = vmatpush1.bf16.msra.mxu1 %v14562_v32  ;;  %v16474_v25 = vld [vmem:[%s21636_s0 + $0x8] sm:$0xff] }
 0x140   :  { %10028 = vmatprep.subr.bf16.mxu0 %v14567_v33  ;;  %11053 = vmatprep.subr.bf16.mxu1 %v14570_v26  ;;  %v1675_v32 = vcombine.high %v16474_v25, %v16474_v25  ;;  %v14649_v33 = vld [vmem:[%s21637_s1 + $0xbc0] ss:$16 sps:$4 sm:$0xff]   ;;  %v14652_v26 = vld [vmem:[%s21637_s1 + $0xbc8] ss:$16 sps:$4 sm:$0xff]  }
 0x141   :  { %v14733_v25 = vld [vmem:[%s21637_s1 + $0xd80] ss:$16 sps:$4 sm:$0xff]  }
 0x142   :  { %10020 = vmatmul.mubr.bf16.vlgmr.msra.gmra.mrb[0].mxu0 %v17559_v35  ;;  %11045 = vmatmul.mubr.bf16.vlgmr.msra.gmra.mrb[0].mxu1 %v17559_v35 }
 0x143   :  { %10029 = vmatpush1.bf16.msra.mxu0 %v14565_v36  ;;  %11054 = vmatpush1.bf16.msra.mxu1 %v14568_v37  ;;  %v14657_v36 = vld [vmem:[%s21637_s1 + $0xbe4] ss:$16 sps:$4 sm:$0xff]   ;;  %v14660_v37 = vld [vmem:[%s21637_s1 + $0xbec] ss:$16 sps:$4 sm:$0xff]  }
 0x144   :  { %10030 = vmatprep.subr.bf16.mxu0 %v14573_v38  ;;  %11055 = vmatprep.subr.bf16.mxu1 %v14576_v21  ;;  %v17749_v38 = vrot.slane %v1675_v32, %v16672_v49  ;;  %v14655_v21 = vld [vmem:[%s21637_s1 + $0xbe0] ss:$16 sps:$4 sm:$0xff]   ;;  %v14736_v32 = vld [vmem:[%s21637_s1 + $0xd88] ss:$16 sps:$4 sm:$0xff]  }
 0x145   :  { %10060 = vmatprep.mubr.bf16.mxu0 %v1722_v39  ;;  %11085 = vmatprep.mubr.bf16.mxu1 %v1722_v39  ;;  %v14658_v39 = vld [vmem:[%s21637_s1 + $0xbe8] ss:$16 sps:$4 sm:$0xff]  }
 0x147   :  { %10031 = vmatpush1.bf16.msra.mxu0 %v14571_v40  ;;  %11056 = vmatpush1.bf16.msra.mxu1 %v14574_v41  ;;  %v14663_v40 = vld [vmem:[%s21637_s1 + $0xc04] ss:$16 sps:$4 sm:$0xff]   ;;  %v14666_v41 = vld [vmem:[%s21637_s1 + $0xc0c] ss:$16 sps:$4 sm:$0xff]  }
 0x148   :  { %10032 = vmatprep.subr.bf16.mxu0 %v14579_v34  ;;  %11057 = vmatprep.subr.bf16.mxu1 %v14582_v43  ;;  %v1691_v34 = vcombine.high %v17749_v38, %v17749_v38  ;;  %v1720_v43 = vcombine.high %v17559_v35, %v17559_v35  ;;  %v14672_v35 = vld [vmem:[%s21637_s1 + $0xc2c] ss:$16 sps:$4 sm:$0xff]  }
 0x14b   :  { %10033 = vmatpush1.bf16.msra.mxu0 %v14577_v44  ;;  %11058 = vmatpush1.bf16.msra.mxu1 %v14580_v45  ;;  %v14661_v44 = vld [vmem:[%s21637_s1 + $0xc00] ss:$16 sps:$4 sm:$0xff]   ;;  %v14664_v45 = vld [vmem:[%s21637_s1 + $0xc08] ss:$16 sps:$4 sm:$0xff]  }
 0x14c   :  { %10034 = vmatprep.subr.bf16.mxu0 %v14585_v46  ;;  %11059 = vmatprep.subr.bf16.mxu1 %v14588_v47  ;;  %v14669_v46 = vld [vmem:[%s21637_s1 + $0xc24] ss:$16 sps:$4 sm:$0xff]   ;;  %v17780_v47 = vrot.slane %v1691_v34, %v16672_v49 }
 0x14d   :  { %v14753_v34 = vld [vmem:[%s21637_s1 + $0xde4] ss:$16 sps:$4 sm:$0xff]  }
 0x14f   :  { %10035 = vmatpush1.bf16.msra.mxu0 %v14583_v48  ;;  %11060 = vmatpush1.bf16.msra.mxu1 %v14586_v50  ;;  %v14667_v48 = vld [vmem:[%s21637_s1 + $0xc20] ss:$16 sps:$4 sm:$0xff]   ;;  %v14670_v50 = vld [vmem:[%s21637_s1 + $0xc28] ss:$16 sps:$4 sm:$0xff]  }
 0x150   :  { %10036 = vmatprep.subr.bf16.mxu0 %v14591_v51  ;;  %11061 = vmatprep.subr.bf16.mxu1 %v14594_v53  ;;  %v14675_v51 = vld [vmem:[%s21637_s1 + $0xc44] ss:$16 sps:$4 sm:$0xff]   ;;  %v14678_v53 = vld [vmem:[%s21637_s1 + $0xc4c] ss:$16 sps:$4 sm:$0xff]  }
 0x153   :  { %10037 = vmatpush1.bf16.msra.mxu0 %v14589_v54  ;;  %11062 = vmatpush1.bf16.msra.mxu1 %v14592_v55  ;;  %v14673_v54 = vld [vmem:[%s21637_s1 + $0xc40] ss:$16 sps:$4 sm:$0xff]   ;;  %v14676_v55 = vld [vmem:[%s21637_s1 + $0xc48] ss:$16 sps:$4 sm:$0xff]  }
 0x154   :  { %10038 = vmatprep.subr.bf16.mxu0 %v14597_v56  ;;  %11063 = vmatprep.subr.bf16.mxu1 %v14600_v57  ;;  %v14681_v56 = vld [vmem:[%s21637_s1 + $0xc64] ss:$16 sps:$4 sm:$0xff]   ;;  %v14684_v57 = vld [vmem:[%s21637_s1 + $0xc6c] ss:$16 sps:$4 sm:$0xff]  }
 0x157   :  { %10039 = vmatpush1.bf16.msra.mxu0 %v14595_v58  ;;  %11064 = vmatpush1.bf16.msra.mxu1 %v14598_v59  ;;  %v14679_v58 = vld [vmem:[%s21637_s1 + $0xc60] ss:$16 sps:$4 sm:$0xff]   ;;  %v14682_v59 = vld [vmem:[%s21637_s1 + $0xc68] ss:$16 sps:$4 sm:$0xff]  }
 0x158   :  { %10040 = vmatprep.subr.bf16.mxu0 %v14603_v60  ;;  %11065 = vmatprep.subr.bf16.mxu1 %v14606_v61  ;;  %v14687_v60 = vld [vmem:[%s21637_s1 + $0xc84] ss:$16 sps:$4 sm:$0xff]   ;;  %v14690_v61 = vld [vmem:[%s21637_s1 + $0xc8c] ss:$16 sps:$4 sm:$0xff]  }
 0x15b   :  { %10041 = vmatpush1.bf16.msra.mxu0 %v14601_v62  ;;  %11066 = vmatpush1.bf16.msra.mxu1 %v14604_v63  ;;  %v14685_v62 = vld [vmem:[%s21637_s1 + $0xc80] ss:$16 sps:$4 sm:$0xff]   ;;  %v14688_v63 = vld [vmem:[%s21637_s1 + $0xc88] ss:$16 sps:$4 sm:$0xff]  }
 0x15c   :  { %10042 = vmatprep.subr.bf16.mxu0 %v14609_v0  ;;  %11067 = vmatprep.subr.bf16.mxu1 %v14612_v1  ;;  %v14693_v0 = vld [vmem:[%s21637_s1 + $0xca4] ss:$16 sps:$4 sm:$0xff]   ;;  %v14696_v1 = vld [vmem:[%s21637_s1 + $0xcac] ss:$16 sps:$4 sm:$0xff]  }
 0x15f   :  { %10043 = vmatpush1.bf16.msra.mxu0 %v14607_v2  ;;  %11068 = vmatpush1.bf16.msra.mxu1 %v14610_v3  ;;  %v14691_v2 = vld [vmem:[%s21637_s1 + $0xca0] ss:$16 sps:$4 sm:$0xff]   ;;  %v14694_v3 = vld [vmem:[%s21637_s1 + $0xca8] ss:$16 sps:$4 sm:$0xff]  }
 0x160   :  { %10044 = vmatprep.subr.bf16.mxu0 %v14615_v4  ;;  %11069 = vmatprep.subr.bf16.mxu1 %v14618_v5  ;;  %v14699_v4 = vld [vmem:[%s21637_s1 + $0xcc4] ss:$16 sps:$4 sm:$0xff]   ;;  %v14702_v5 = vld [vmem:[%s21637_s1 + $0xccc] ss:$16 sps:$4 sm:$0xff]  }
 0x163   :  { %10045 = vmatpush1.bf16.msra.mxu0 %v14613_v6  ;;  %11070 = vmatpush1.bf16.msra.mxu1 %v14616_v7  ;;  %v14697_v6 = vld [vmem:[%s21637_s1 + $0xcc0] ss:$16 sps:$4 sm:$0xff]   ;;  %v14700_v7 = vld [vmem:[%s21637_s1 + $0xcc8] ss:$16 sps:$4 sm:$0xff]  }
 0x164   :  { %10046 = vmatprep.subr.bf16.mxu0 %v14621_v8  ;;  %11071 = vmatprep.subr.bf16.mxu1 %v14624_v9  ;;  %v14705_v8 = vld [vmem:[%s21637_s1 + $0xce4] ss:$16 sps:$4 sm:$0xff]   ;;  %v14708_v9 = vld [vmem:[%s21637_s1 + $0xcec] ss:$16 sps:$4 sm:$0xff]  }
 0x167   :  { %10047 = vmatpush1.bf16.msra.mxu0 %v14619_v10  ;;  %11072 = vmatpush1.bf16.msra.mxu1 %v14622_v11  ;;  %v14703_v10 = vld [vmem:[%s21637_s1 + $0xce0] ss:$16 sps:$4 sm:$0xff]   ;;  %v14706_v11 = vld [vmem:[%s21637_s1 + $0xce8] ss:$16 sps:$4 sm:$0xff]  }
 0x168   :  { %10048 = vmatprep.subr.bf16.mxu0 %v14627_v12  ;;  %11073 = vmatprep.subr.bf16.mxu1 %v14630_v52  ;;  %v14711_v12 = vld [vmem:[%s21637_s1 + $0xd04] ss:$16 sps:$4 sm:$0xff]   ;;  %v14714_v52 = vld [vmem:[%s21637_s1 + $0xd0c] ss:$16 sps:$4 sm:$0xff]  }
 0x16b   :  { %10049 = vmatpush1.bf16.msra.mxu0 %v14625_v15  ;;  %11074 = vmatpush1.bf16.msra.mxu1 %v14628_v16  ;;  %v14709_v15 = vld [vmem:[%s21637_s1 + $0xd00] ss:$16 sps:$4 sm:$0xff]   ;;  %v14712_v16 = vld [vmem:[%s21637_s1 + $0xd08] ss:$16 sps:$4 sm:$0xff]  }
 0x16c   :  { %10050 = vmatprep.subr.bf16.mxu0 %v14633_v17  ;;  %11075 = vmatprep.subr.bf16.mxu1 %v14636_v18  ;;  %v14717_v17 = vld [vmem:[%s21637_s1 + $0xd24] ss:$16 sps:$4 sm:$0xff]   ;;  %v14720_v18 = vld [vmem:[%s21637_s1 + $0xd2c] ss:$16 sps:$4 sm:$0xff]  }
 0x16f   :  { %10051 = vmatpush1.bf16.msra.mxu0 %v14631_v19  ;;  %11076 = vmatpush1.bf16.msra.mxu1 %v14634_v20  ;;  %v14715_v19 = vld [vmem:[%s21637_s1 + $0xd20] ss:$16 sps:$4 sm:$0xff]   ;;  %v14718_v20 = vld [vmem:[%s21637_s1 + $0xd28] ss:$16 sps:$4 sm:$0xff]  }
 0x170   :  { %10052 = vmatprep.subr.bf16.mxu0 %v14639_v22  ;;  %11077 = vmatprep.subr.bf16.mxu1 %v14642_v23  ;;  %v14723_v22 = vld [vmem:[%s21637_s1 + $0xd44] ss:$16 sps:$4 sm:$0xff]   ;;  %v14726_v23 = vld [vmem:[%s21637_s1 + $0xd4c] ss:$16 sps:$4 sm:$0xff]  }
 0x173   :  { %10053 = vmatpush1.bf16.msra.mxu0 %v14637_v24  ;;  %11078 = vmatpush1.bf16.msra.mxu1 %v14640_v13  ;;  %v14721_v24 = vld [vmem:[%s21637_s1 + $0xd40] ss:$16 sps:$4 sm:$0xff]   ;;  %v14724_v13 = vld [vmem:[%s21637_s1 + $0xd48] ss:$16 sps:$4 sm:$0xff]  }
 0x174   :  { %10054 = vmatprep.subr.bf16.mxu0 %v14645_v27  ;;  %11079 = vmatprep.subr.bf16.mxu1 %v14648_v28  ;;  %v14729_v27 = vld [vmem:[%s21637_s1 + $0xd64] ss:$16 sps:$4 sm:$0xff]   ;;  %v14732_v28 = vld [vmem:[%s21637_s1 + $0xd6c] ss:$16 sps:$4 sm:$0xff]  }
 0x177   :  { %10055 = vmatpush1.bf16.msra.mxu0 %v14643_v29  ;;  %11080 = vmatpush1.bf16.msra.mxu1 %v14646_v14  ;;  %v14727_v29 = vld [vmem:[%s21637_s1 + $0xd60] ss:$16 sps:$4 sm:$0xff]   ;;  %v14730_v14 = vld [vmem:[%s21637_s1 + $0xd68] ss:$16 sps:$4 sm:$0xff]  }
 0x178   :  { %10056 = vmatprep.subr.bf16.mxu0 %v14651_v30  ;;  %11081 = vmatprep.subr.bf16.mxu1 %v14654_v31  ;;  %v14735_v30 = vld [vmem:[%s21637_s1 + $0xd84] ss:$16 sps:$4 sm:$0xff]   ;;  %v14738_v31 = vld [vmem:[%s21637_s1 + $0xd8c] ss:$16 sps:$4 sm:$0xff]  }
 0x17b   :  { %10057 = vmatpush1.bf16.msra.mxu0 %v14649_v33  ;;  %11082 = vmatpush1.bf16.msra.mxu1 %v14652_v26  ;;  %v14741_v33 = vld [vmem:[%s21637_s1 + $0xda4] ss:$16 sps:$4 sm:$0xff]   ;;  %v14744_v26 = vld [vmem:[%s21637_s1 + $0xdac] ss:$16 sps:$4 sm:$0xff]  }
 0x17c   :  { %10058 = vmatprep.subr.bf16.mxu0 %v14657_v36  ;;  %11083 = vmatprep.subr.bf16.mxu1 %v14660_v37  ;;  %v14739_v36 = vld [vmem:[%s21637_s1 + $0xda0] ss:$16 sps:$4 sm:$0xff]   ;;  %v14742_v37 = vld [vmem:[%s21637_s1 + $0xda8] ss:$16 sps:$4 sm:$0xff]  }
 0x17f   :  { %10059 = vmatpush1.bf16.msra.mxu0 %v14655_v21  ;;  %11084 = vmatpush1.bf16.msra.mxu1 %v14658_v39  ;;  %v14747_v21 = vld [vmem:[%s21637_s1 + $0xdc4] ss:$16 sps:$4 sm:$0xff]   ;;  %v14750_v39 = vld [vmem:[%s21637_s1 + $0xdcc] ss:$16 sps:$4 sm:$0xff]  }
 0x180   :  { %10069 = vmatprep.subr.bf16.mxu0 %v14663_v40  ;;  %11094 = vmatprep.subr.bf16.mxu1 %v14666_v41  ;;  %v14745_v40 = vld [vmem:[%s21637_s1 + $0xdc0] ss:$16 sps:$4 sm:$0xff]   ;;  %v14748_v41 = vld [vmem:[%s21637_s1 + $0xdc8] ss:$16 sps:$4 sm:$0xff]  }
 0x182   :  { %10061 = vmatmul.mubr.bf16.vlgmr.msra.gmra.mrb[0].mxu0 %v1720_v43  ;;  %11086 = vmatmul.mubr.bf16.vlgmr.msra.gmra.mrb[0].mxu1 %v1720_v43  ;;  %v14756_v43 = vld [vmem:[%s21637_s1 + $0xdec] ss:$16 sps:$4 sm:$0xff]  }
 0x183   :  { %10070 = vmatpush1.bf16.msra.mxu0 %v14661_v44  ;;  %11095 = vmatpush1.bf16.msra.mxu1 %v14664_v45  ;;  %v14751_v44 = vld [vmem:[%s21637_s1 + $0xde0] ss:$16 sps:$4 sm:$0xff]   ;;  %v14754_v45 = vld [vmem:[%s21637_s1 + $0xde8] ss:$16 sps:$4 sm:$0xff]  }
 0x184   :  { %10071 = vmatprep.subr.bf16.mxu0 %v14669_v46  ;;  %11096 = vmatprep.subr.bf16.mxu1 %v14672_v35  ;;  %v14760_v46 = vld [vmem:[%s21637_s1 + $0xe04] ss:$16 sps:$4 sm:$0xff]   ;;  %v14763_v35 = vld [vmem:[%s21637_s1 + $0xe0c] ss:$16 sps:$4 sm:$0xff]  }
 0x185   :  { %10101 = vmatprep.mubr.bf16.mxu0 %v17780_v47  ;;  %11126 = vmatprep.mubr.bf16.mxu1 %v17780_v47 }
 0x187   :  { %10072 = vmatpush1.bf16.msra.mxu0 %v14667_v48  ;;  %11097 = vmatpush1.bf16.msra.mxu1 %v14670_v50  ;;  %v17966_v48 = vrot.slane %v17749_v38, %v16672_v49  ;;  %v14758_v50 = vld [vmem:[%s21637_s1 + $0xe00] ss:$16 sps:$4 sm:$0xff]   ;;  %v14769_v38 = vld [vmem:[%s21637_s1 + $0xe2c] ss:$16 sps:$4 sm:$0xff]  }
 0x188   :  { %10073 = vmatprep.subr.bf16.mxu0 %v14675_v51  ;;  %11098 = vmatprep.subr.bf16.mxu1 %v14678_v53  ;;  %v14761_v51 = vld [vmem:[%s21637_s1 + $0xe08] ss:$16 sps:$4 sm:$0xff]   ;;  %v14766_v53 = vld [vmem:[%s21637_s1 + $0xe24] ss:$16 sps:$4 sm:$0xff]  }
 0x18b   :  { %10074 = vmatpush1.bf16.msra.mxu0 %v14673_v54  ;;  %11099 = vmatpush1.bf16.msra.mxu1 %v14676_v55  ;;  %v1723_v54 = vcombine.high %v17780_v47, %v17780_v47  ;;  %v14764_v55 = vld [vmem:[%s21637_s1 + $0xe20] ss:$16 sps:$4 sm:$0xff]   ;;  %v14772_v47 = vld [vmem:[%s21637_s1 + $0xe44] ss:$16 sps:$4 sm:$0xff]  }
 0x18c   :  { %10075 = vmatprep.subr.bf16.mxu0 %v14681_v56  ;;  %11100 = vmatprep.subr.bf16.mxu1 %v14684_v57  ;;  %v14767_v56 = vld [vmem:[%s21637_s1 + $0xe28] ss:$16 sps:$4 sm:$0xff]   ;;  %v14775_v57 = vld [vmem:[%s21637_s1 + $0xe4c] ss:$16 sps:$4 sm:$0xff]  }
 0x18f   :  { %10076 = vmatpush1.bf16.msra.mxu0 %v14679_v58  ;;  %11101 = vmatpush1.bf16.msra.mxu1 %v14682_v59  ;;  %v14770_v58 = vld [vmem:[%s21637_s1 + $0xe40] ss:$16 sps:$4 sm:$0xff]   ;;  %v14773_v59 = vld [vmem:[%s21637_s1 + $0xe48] ss:$16 sps:$4 sm:$0xff]  }
 0x190   :  { %10077 = vmatprep.subr.bf16.mxu0 %v14687_v60  ;;  %11102 = vmatprep.subr.bf16.mxu1 %v14690_v61  ;;  %v14778_v60 = vld [vmem:[%s21637_s1 + $0xe64] ss:$16 sps:$4 sm:$0xff]   ;;  %v14781_v61 = vld [vmem:[%s21637_s1 + $0xe6c] ss:$16 sps:$4 sm:$0xff]  }
 0x193   :  { %10078 = vmatpush1.bf16.msra.mxu0 %v14685_v62  ;;  %11103 = vmatpush1.bf16.msra.mxu1 %v14688_v63  ;;  %v14776_v62 = vld [vmem:[%s21637_s1 + $0xe60] ss:$16 sps:$4 sm:$0xff]   ;;  %v14779_v63 = vld [vmem:[%s21637_s1 + $0xe68] ss:$16 sps:$4 sm:$0xff]  }
 0x194   :  { %10079 = vmatprep.subr.bf16.mxu0 %v14693_v0  ;;  %11104 = vmatprep.subr.bf16.mxu1 %v14696_v1  ;;  %v14784_v0 = vld [vmem:[%s21637_s1 + $0xe84] ss:$16 sps:$4 sm:$0xff]   ;;  %v14787_v1 = vld [vmem:[%s21637_s1 + $0xe8c] ss:$16 sps:$4 sm:$0xff]  }
 0x197   :  { %10080 = vmatpush1.bf16.msra.mxu0 %v14691_v2  ;;  %11105 = vmatpush1.bf16.msra.mxu1 %v14694_v3  ;;  %v14782_v2 = vld [vmem:[%s21637_s1 + $0xe80] ss:$16 sps:$4 sm:$0xff]   ;;  %v14785_v3 = vld [vmem:[%s21637_s1 + $0xe88] ss:$16 sps:$4 sm:$0xff]  }
 0x198   :  { %10081 = vmatprep.subr.bf16.mxu0 %v14699_v4  ;;  %11106 = vmatprep.subr.bf16.mxu1 %v14702_v5  ;;  %v14790_v4 = vld [vmem:[%s21637_s1 + $0xea4] ss:$16 sps:$4 sm:$0xff]   ;;  %v14793_v5 = vld [vmem:[%s21637_s1 + $0xeac] ss:$16 sps:$4 sm:$0xff]  }
 0x19b   :  { %10082 = vmatpush1.bf16.msra.mxu0 %v14697_v6  ;;  %11107 = vmatpush1.bf16.msra.mxu1 %v14700_v7  ;;  %v14788_v6 = vld [vmem:[%s21637_s1 + $0xea0] ss:$16 sps:$4 sm:$0xff]   ;;  %v14791_v7 = vld [vmem:[%s21637_s1 + $0xea8] ss:$16 sps:$4 sm:$0xff]  }
 0x19c   :  { %10083 = vmatprep.subr.bf16.mxu0 %v14705_v8  ;;  %11108 = vmatprep.subr.bf16.mxu1 %v14708_v9  ;;  %v14796_v8 = vld [vmem:[%s21637_s1 + $0xec4] ss:$16 sps:$4 sm:$0xff]   ;;  %v14799_v9 = vld [vmem:[%s21637_s1 + $0xecc] ss:$16 sps:$4 sm:$0xff]  }
 0x19f   :  { %10084 = vmatpush1.bf16.msra.mxu0 %v14703_v10  ;;  %11109 = vmatpush1.bf16.msra.mxu1 %v14706_v11  ;;  %v14794_v10 = vld [vmem:[%s21637_s1 + $0xec0] ss:$16 sps:$4 sm:$0xff]   ;;  %v14797_v11 = vld [vmem:[%s21637_s1 + $0xec8] ss:$16 sps:$4 sm:$0xff]  }
 0x1a0   :  { %10085 = vmatprep.subr.bf16.mxu0 %v14711_v12  ;;  %11110 = vmatprep.subr.bf16.mxu1 %v14714_v52  ;;  %v14802_v12 = vld [vmem:[%s21637_s1 + $0xee4] ss:$16 sps:$4 sm:$0xff]   ;;  %v14805_v52 = vld [vmem:[%s21637_s1 + $0xeec] ss:$16 sps:$4 sm:$0xff]  }
 0x1a3   :  { %10086 = vmatpush1.bf16.msra.mxu0 %v14709_v15  ;;  %11111 = vmatpush1.bf16.msra.mxu1 %v14712_v16  ;;  %v14800_v15 = vld [vmem:[%s21637_s1 + $0xee0] ss:$16 sps:$4 sm:$0xff]   ;;  %v14803_v16 = vld [vmem:[%s21637_s1 + $0xee8] ss:$16 sps:$4 sm:$0xff]  }
 0x1a4   :  { %10087 = vmatprep.subr.bf16.mxu0 %v14717_v17  ;;  %11112 = vmatprep.subr.bf16.mxu1 %v14720_v18  ;;  %v14808_v17 = vld [vmem:[%s21637_s1 + $0xf04] ss:$16 sps:$4 sm:$0xff]   ;;  %v14811_v18 = vld [vmem:[%s21637_s1 + $0xf0c] ss:$16 sps:$4 sm:$0xff]  }
 0x1a7   :  { %10088 = vmatpush1.bf16.msra.mxu0 %v14715_v19  ;;  %11113 = vmatpush1.bf16.msra.mxu1 %v14718_v20  ;;  %v14806_v19 = vld [vmem:[%s21637_s1 + $0xf00] ss:$16 sps:$4 sm:$0xff]   ;;  %v14809_v20 = vld [vmem:[%s21637_s1 + $0xf08] ss:$16 sps:$4 sm:$0xff]  }
 0x1a8   :  { %10089 = vmatprep.subr.bf16.mxu0 %v14723_v22  ;;  %11114 = vmatprep.subr.bf16.mxu1 %v14726_v23  ;;  %v14814_v22 = vld [vmem:[%s21637_s1 + $0xf24] ss:$16 sps:$4 sm:$0xff]   ;;  %v14817_v23 = vld [vmem:[%s21637_s1 + $0xf2c] ss:$16 sps:$4 sm:$0xff]  }
 0x1ab   :  { %10090 = vmatpush1.bf16.msra.mxu0 %v14721_v24  ;;  %11115 = vmatpush1.bf16.msra.mxu1 %v14724_v13  ;;  %v14812_v24 = vld [vmem:[%s21637_s1 + $0xf20] ss:$16 sps:$4 sm:$0xff]   ;;  %v14815_v13 = vld [vmem:[%s21637_s1 + $0xf28] ss:$16 sps:$4 sm:$0xff]  }
 0x1ac   :  { %10091 = vmatprep.subr.bf16.mxu0 %v14729_v27  ;;  %11116 = vmatprep.subr.bf16.mxu1 %v14732_v28  ;;  %v14820_v27 = vld [vmem:[%s21637_s1 + $0xf44] ss:$16 sps:$4 sm:$0xff]   ;;  %v14823_v28 = vld [vmem:[%s21637_s1 + $0xf4c] ss:$16 sps:$4 sm:$0xff]  }
 0x1af   :  { %10092 = vmatpush1.bf16.msra.mxu0 %v14727_v29  ;;  %11117 = vmatpush1.bf16.msra.mxu1 %v14730_v14  ;;  %v14818_v29 = vld [vmem:[%s21637_s1 + $0xf40] ss:$16 sps:$4 sm:$0xff]   ;;  %v14821_v14 = vld [vmem:[%s21637_s1 + $0xf48] ss:$16 sps:$4 sm:$0xff]  }
 0x1b0   :  { %10093 = vmatprep.subr.bf16.mxu0 %v14735_v30  ;;  %11118 = vmatprep.subr.bf16.mxu1 %v14738_v31  ;;  %v14826_v30 = vld [vmem:[%s21637_s1 + $0xf64] ss:$16 sps:$4 sm:$0xff]   ;;  %v14829_v31 = vld [vmem:[%s21637_s1 + $0xf6c] ss:$16 sps:$4 sm:$0xff]  }
 0x1b3   :  { %10094 = vmatpush1.bf16.msra.mxu0 %v14733_v25  ;;  %11119 = vmatpush1.bf16.msra.mxu1 %v14736_v32  ;;  %v14824_v25 = vld [vmem:[%s21637_s1 + $0xf60] ss:$16 sps:$4 sm:$0xff]   ;;  %v14827_v32 = vld [vmem:[%s21637_s1 + $0xf68] ss:$16 sps:$4 sm:$0xff]  }
 0x1b4   :  { %10095 = vmatprep.subr.bf16.mxu0 %v14741_v33  ;;  %11120 = vmatprep.subr.bf16.mxu1 %v14744_v26  ;;  %v14832_v33 = vld [vmem:[%s21637_s1 + $0xf84] ss:$16 sps:$4 sm:$0xff]   ;;  %v14835_v26 = vld [vmem:[%s21637_s1 + $0xf8c] ss:$16 sps:$4 sm:$0xff]  }
 0x1b7   :  { %10096 = vmatpush1.bf16.msra.mxu0 %v14739_v36  ;;  %11121 = vmatpush1.bf16.msra.mxu1 %v14742_v37  ;;  %v14830_v36 = vld [vmem:[%s21637_s1 + $0xf80] ss:$16 sps:$4 sm:$0xff]   ;;  %v14833_v37 = vld [vmem:[%s21637_s1 + $0xf88] ss:$16 sps:$4 sm:$0xff]  }
 0x1b8   :  { %10097 = vmatprep.subr.bf16.mxu0 %v14747_v21  ;;  %11122 = vmatprep.subr.bf16.mxu1 %v14750_v39  ;;  %v14838_v21 = vld [vmem:[%s21637_s1 + $0xfa4] ss:$16 sps:$4 sm:$0xff]   ;;  %v14841_v39 = vld [vmem:[%s21637_s1 + $0xfac] ss:$16 sps:$4 sm:$0xff]  }
 0x1bb   :  { %10098 = vmatpush1.bf16.msra.mxu0 %v14745_v40  ;;  %11123 = vmatpush1.bf16.msra.mxu1 %v14748_v41  ;;  %v14836_v40 = vld [vmem:[%s21637_s1 + $0xfa0] ss:$16 sps:$4 sm:$0xff]   ;;  %v14839_v41 = vld [vmem:[%s21637_s1 + $0xfa8] ss:$16 sps:$4 sm:$0xff]  }
 0x1bc   :  { %10099 = vmatprep.subr.bf16.mxu0 %v14753_v34  ;;  %11124 = vmatprep.subr.bf16.mxu1 %v14756_v43  ;;  %v14844_v34 = vld [vmem:[%s21637_s1 + $0xfc4] ss:$16 sps:$4 sm:$0xff]   ;;  %v14847_v43 = vld [vmem:[%s21637_s1 + $0xfcc] ss:$16 sps:$4 sm:$0xff]  }
 0x1bf   :  { %10100 = vmatpush1.bf16.msra.mxu0 %v14751_v44  ;;  %11125 = vmatpush1.bf16.msra.mxu1 %v14754_v45  ;;  %v18143_v44 = vld.sshfl [vmem:[%s21636_s0 + $0x10] sm:$0xff pattern:$0x75316420] }
 0x1c0   :  { %10110 = vmatprep.subr.bf16.mxu0 %v14760_v46  ;;  %11135 = vmatprep.subr.bf16.mxu1 %v14763_v35  ;;  %v14842_v45 = vld [vmem:[%s21637_s1 + $0xfc0] ss:$16 sps:$4 sm:$0xff]   ;;  %v14845_v46 = vld [vmem:[%s21637_s1 + $0xfc8] ss:$16 sps:$4 sm:$0xff]   ;;  %v14850_v35 = vld [vmem:[%s21637_s1 + $0xfe4] ss:$16 sps:$4 sm:$0xff]  }
 0x1c2   :  { %10102 = vmatmul.mubr.bf16.vlgmr.msra.gmra.mrb[0].mxu0 %v17966_v48  ;;  %11127 = vmatmul.mubr.bf16.vlgmr.msra.gmra.mrb[0].mxu1 %v17966_v48 }
 0x1c3   :  { %10111 = vmatpush1.bf16.msra.mxu0 %v14758_v50  ;;  %11136 = vmatpush1.bf16.msra.mxu1 %v14761_v51  ;;  %v14853_v50 = vld [vmem:[%s21637_s1 + $0xfec] ss:$16 sps:$4 sm:$0xff]   ;;  %v14848_v51 = vld [vmem:[%s21637_s1 + $0xfe0] ss:$16 sps:$4 sm:$0xff]  }
 0x1c4   :  { %10112 = vmatprep.subr.bf16.mxu0 %v14766_v53  ;;  %11137 = vmatprep.subr.bf16.mxu1 %v14769_v38  ;;  %v14851_v53 = vld [vmem:[%s21637_s1 + $0xfe8] ss:$16 sps:$4 sm:$0xff]   ;;  %v14856_v38 = vld [vmem:[%s21637_s1 + $0x1004] ss:$16 sps:$4 sm:$0xff]  }
 0x1c5   :  { %10142 = vmatprep.mubr.bf16.mxu0 %v1723_v54  ;;  %11167 = vmatprep.mubr.bf16.mxu1 %v1723_v54  ;;  %v14859_v54 = vld [vmem:[%s21637_s1 + $0x100c] ss:$16 sps:$4 sm:$0xff]  }
 0x1c7   :  { %10113 = vmatpush1.bf16.msra.mxu0 %v14764_v55  ;;  %11138 = vmatpush1.bf16.msra.mxu1 %v14767_v56  ;;  %v1739_v55 = vcombine.high %v18143_v44, %v18143_v44  ;;  %v1721_v56 = vcombine.high %v17966_v48, %v17966_v48  ;;  %v14865_v48 = vld [vmem:[%s21637_s1 + $0x102c] ss:$16 sps:$4 sm:$0xff]  }
 0x1c8   :  { %10114 = vmatprep.subr.bf16.mxu0 %v14772_v47  ;;  %11139 = vmatprep.subr.bf16.mxu1 %v14775_v57  ;;  %v14854_v47 = vld [vmem:[%s21637_s1 + $0x1000] ss:$16 sps:$4 sm:$0xff]   ;;  %v14857_v57 = vld [vmem:[%s21637_s1 + $0x1008] ss:$16 sps:$4 sm:$0xff]  }
 0x1cb   :  { %10115 = vmatpush1.bf16.msra.mxu0 %v14770_v58  ;;  %11140 = vmatpush1.bf16.msra.mxu1 %v14773_v59  ;;  %v14862_v58 = vld [vmem:[%s21637_s1 + $0x1024] ss:$16 sps:$4 sm:$0xff]   ;;  %v18186_v59 = vrot.slane %v1739_v55, %v16672_v49 }
 0x1cc   :  { %10116 = vmatprep.subr.bf16.mxu0 %v14778_v60  ;;  %11141 = vmatprep.subr.bf16.mxu1 %v14781_v61  ;;  %v14860_v60 = vld [vmem:[%s21637_s1 + $0x1020] ss:$16 sps:$4 sm:$0xff]   ;;  %v14863_v61 = vld [vmem:[%s21637_s1 + $0x1028] ss:$16 sps:$4 sm:$0xff]   ;;  %v14946_v55 = vld [vmem:[%s21637_s1 + $0x11e4] ss:$16 sps:$4 sm:$0xff]  }
 0x1cf   :  { %10117 = vmatpush1.bf16.msra.mxu0 %v14776_v62  ;;  %11142 = vmatpush1.bf16.msra.mxu1 %v14779_v63  ;;  %v14868_v62 = vld [vmem:[%s21637_s1 + $0x1044] ss:$16 sps:$4 sm:$0xff]   ;;  %v14871_v63 = vld [vmem:[%s21637_s1 + $0x104c] ss:$16 sps:$4 sm:$0xff]  }
 0x1d0   :  { %10118 = vmatprep.subr.bf16.mxu0 %v14784_v0  ;;  %11143 = vmatprep.subr.bf16.mxu1 %v14787_v1  ;;  %v14866_v0 = vld [vmem:[%s21637_s1 + $0x1040] ss:$16 sps:$4 sm:$0xff]   ;;  %v14869_v1 = vld [vmem:[%s21637_s1 + $0x1048] ss:$16 sps:$4 sm:$0xff]  }
 0x1d3   :  { %10119 = vmatpush1.bf16.msra.mxu0 %v14782_v2  ;;  %11144 = vmatpush1.bf16.msra.mxu1 %v14785_v3  ;;  %v14874_v2 = vld [vmem:[%s21637_s1 + $0x1064] ss:$16 sps:$4 sm:$0xff]   ;;  %v14877_v3 = vld [vmem:[%s21637_s1 + $0x106c] ss:$16 sps:$4 sm:$0xff]  }
 0x1d4   :  { %10120 = vmatprep.subr.bf16.mxu0 %v14790_v4  ;;  %11145 = vmatprep.subr.bf16.mxu1 %v14793_v5  ;;  %v14872_v4 = vld [vmem:[%s21637_s1 + $0x1060] ss:$16 sps:$4 sm:$0xff]   ;;  %v14875_v5 = vld [vmem:[%s21637_s1 + $0x1068] ss:$16 sps:$4 sm:$0xff]  }
 0x1d7   :  { %10121 = vmatpush1.bf16.msra.mxu0 %v14788_v6  ;;  %11146 = vmatpush1.bf16.msra.mxu1 %v14791_v7  ;;  %v14880_v6 = vld [vmem:[%s21637_s1 + $0x1084] ss:$16 sps:$4 sm:$0xff]   ;;  %v14883_v7 = vld [vmem:[%s21637_s1 + $0x108c] ss:$16 sps:$4 sm:$0xff]  }
 0x1d8   :  { %10122 = vmatprep.subr.bf16.mxu0 %v14796_v8  ;;  %11147 = vmatprep.subr.bf16.mxu1 %v14799_v9  ;;  %v14878_v8 = vld [vmem:[%s21637_s1 + $0x1080] ss:$16 sps:$4 sm:$0xff]   ;;  %v14881_v9 = vld [vmem:[%s21637_s1 + $0x1088] ss:$16 sps:$4 sm:$0xff]  }
 0x1db   :  { %10123 = vmatpush1.bf16.msra.mxu0 %v14794_v10  ;;  %11148 = vmatpush1.bf16.msra.mxu1 %v14797_v11  ;;  %v14886_v10 = vld [vmem:[%s21637_s1 + $0x10a4] ss:$16 sps:$4 sm:$0xff]   ;;  %v14889_v11 = vld [vmem:[%s21637_s1 + $0x10ac] ss:$16 sps:$4 sm:$0xff]  }
 0x1dc   :  { %10124 = vmatprep.subr.bf16.mxu0 %v14802_v12  ;;  %11149 = vmatprep.subr.bf16.mxu1 %v14805_v52  ;;  %v14884_v12 = vld [vmem:[%s21637_s1 + $0x10a0] ss:$16 sps:$4 sm:$0xff]   ;;  %v14887_v52 = vld [vmem:[%s21637_s1 + $0x10a8] ss:$16 sps:$4 sm:$0xff]  }
 0x1df   :  { %10125 = vmatpush1.bf16.msra.mxu0 %v14800_v15  ;;  %11150 = vmatpush1.bf16.msra.mxu1 %v14803_v16  ;;  %v14892_v15 = vld [vmem:[%s21637_s1 + $0x10c4] ss:$16 sps:$4 sm:$0xff]   ;;  %v14895_v16 = vld [vmem:[%s21637_s1 + $0x10cc] ss:$16 sps:$4 sm:$0xff]  }
 0x1e0   :  { %10126 = vmatprep.subr.bf16.mxu0 %v14808_v17  ;;  %11151 = vmatprep.subr.bf16.mxu1 %v14811_v18  ;;  %v14890_v17 = vld [vmem:[%s21637_s1 + $0x10c0] ss:$16 sps:$4 sm:$0xff]   ;;  %v14893_v18 = vld [vmem:[%s21637_s1 + $0x10c8] ss:$16 sps:$4 sm:$0xff]  }
 0x1e3   :  { %10127 = vmatpush1.bf16.msra.mxu0 %v14806_v19  ;;  %11152 = vmatpush1.bf16.msra.mxu1 %v14809_v20  ;;  %v14898_v19 = vld [vmem:[%s21637_s1 + $0x10e4] ss:$16 sps:$4 sm:$0xff]   ;;  %v14901_v20 = vld [vmem:[%s21637_s1 + $0x10ec] ss:$16 sps:$4 sm:$0xff]  }
 0x1e4   :  { %10128 = vmatprep.subr.bf16.mxu0 %v14814_v22  ;;  %11153 = vmatprep.subr.bf16.mxu1 %v14817_v23  ;;  %v14896_v22 = vld [vmem:[%s21637_s1 + $0x10e0] ss:$16 sps:$4 sm:$0xff]   ;;  %v14899_v23 = vld [vmem:[%s21637_s1 + $0x10e8] ss:$16 sps:$4 sm:$0xff]  }
 0x1e7   :  { %10129 = vmatpush1.bf16.msra.mxu0 %v14812_v24  ;;  %11154 = vmatpush1.bf16.msra.mxu1 %v14815_v13  ;;  %v14904_v24 = vld [vmem:[%s21637_s1 + $0x1104] ss:$16 sps:$4 sm:$0xff]   ;;  %v14907_v13 = vld [vmem:[%s21637_s1 + $0x110c] ss:$16 sps:$4 sm:$0xff]  }
 0x1e8   :  { %10130 = vmatprep.subr.bf16.mxu0 %v14820_v27  ;;  %11155 = vmatprep.subr.bf16.mxu1 %v14823_v28  ;;  %v14902_v27 = vld [vmem:[%s21637_s1 + $0x1100] ss:$16 sps:$4 sm:$0xff]   ;;  %v14905_v28 = vld [vmem:[%s21637_s1 + $0x1108] ss:$16 sps:$4 sm:$0xff]  }
 0x1eb   :  { %10131 = vmatpush1.bf16.msra.mxu0 %v14818_v29  ;;  %11156 = vmatpush1.bf16.msra.mxu1 %v14821_v14  ;;  %v14910_v29 = vld [vmem:[%s21637_s1 + $0x1124] ss:$16 sps:$4 sm:$0xff]   ;;  %v14913_v14 = vld [vmem:[%s21637_s1 + $0x112c] ss:$16 sps:$4 sm:$0xff]  }
 0x1ec   :  { %10132 = vmatprep.subr.bf16.mxu0 %v14826_v30  ;;  %11157 = vmatprep.subr.bf16.mxu1 %v14829_v31  ;;  %v14908_v30 = vld [vmem:[%s21637_s1 + $0x1120] ss:$16 sps:$4 sm:$0xff]   ;;  %v14911_v31 = vld [vmem:[%s21637_s1 + $0x1128] ss:$16 sps:$4 sm:$0xff]  }
 0x1ef   :  { %10133 = vmatpush1.bf16.msra.mxu0 %v14824_v25  ;;  %11158 = vmatpush1.bf16.msra.mxu1 %v14827_v32  ;;  %v14916_v25 = vld [vmem:[%s21637_s1 + $0x1144] ss:$16 sps:$4 sm:$0xff]   ;;  %v14919_v32 = vld [vmem:[%s21637_s1 + $0x114c] ss:$16 sps:$4 sm:$0xff]  }
 0x1f0   :  { %10134 = vmatprep.subr.bf16.mxu0 %v14832_v33  ;;  %11159 = vmatprep.subr.bf16.mxu1 %v14835_v26  ;;  %v14914_v33 = vld [vmem:[%s21637_s1 + $0x1140] ss:$16 sps:$4 sm:$0xff]   ;;  %v14917_v26 = vld [vmem:[%s21637_s1 + $0x1148] ss:$16 sps:$4 sm:$0xff]  }
 0x1f3   :  { %10135 = vmatpush1.bf16.msra.mxu0 %v14830_v36  ;;  %11160 = vmatpush1.bf16.msra.mxu1 %v14833_v37  ;;  %v14922_v36 = vld [vmem:[%s21637_s1 + $0x1164] ss:$16 sps:$4 sm:$0xff]   ;;  %v14925_v37 = vld [vmem:[%s21637_s1 + $0x116c] ss:$16 sps:$4 sm:$0xff]  }
 0x1f4   :  { %10136 = vmatprep.subr.bf16.mxu0 %v14838_v21  ;;  %11161 = vmatprep.subr.bf16.mxu1 %v14841_v39  ;;  %v14920_v21 = vld [vmem:[%s21637_s1 + $0x1160] ss:$16 sps:$4 sm:$0xff]   ;;  %v14923_v39 = vld [vmem:[%s21637_s1 + $0x1168] ss:$16 sps:$4 sm:$0xff]  }
 0x1f7   :  { %10137 = vmatpush1.bf16.msra.mxu0 %v14836_v40  ;;  %11162 = vmatpush1.bf16.msra.mxu1 %v14839_v41  ;;  %v14928_v40 = vld [vmem:[%s21637_s1 + $0x1184] ss:$16 sps:$4 sm:$0xff]   ;;  %v14931_v41 = vld [vmem:[%s21637_s1 + $0x118c] ss:$16 sps:$4 sm:$0xff]  }
 0x1f8   :  { %10138 = vmatprep.subr.bf16.mxu0 %v14844_v34  ;;  %11163 = vmatprep.subr.bf16.mxu1 %v14847_v43  ;;  %v14926_v34 = vld [vmem:[%s21637_s1 + $0x1180] ss:$16 sps:$4 sm:$0xff]   ;;  %v14929_v43 = vld [vmem:[%s21637_s1 + $0x1188] ss:$16 sps:$4 sm:$0xff]  }
 0x1fb   :  { %10139 = vmatpush1.bf16.msra.mxu0 %v14842_v45  ;;  %11164 = vmatpush1.bf16.msra.mxu1 %v14845_v46  ;;  %v14934_v45 = vld [vmem:[%s21637_s1 + $0x11a4] ss:$16 sps:$4 sm:$0xff]   ;;  %v14937_v46 = vld [vmem:[%s21637_s1 + $0x11ac] ss:$16 sps:$4 sm:$0xff]  }
 0x1fc   :  { %10140 = vmatprep.subr.bf16.mxu0 %v14850_v35  ;;  %11165 = vmatprep.subr.bf16.mxu1 %v14853_v50  ;;  %v14932_v35 = vld [vmem:[%s21637_s1 + $0x11a0] ss:$16 sps:$4 sm:$0xff]   ;;  %v14935_v50 = vld [vmem:[%s21637_s1 + $0x11a8] ss:$16 sps:$4 sm:$0xff]  }
 0x1ff   :  { %10141 = vmatpush1.bf16.msra.mxu0 %v14848_v51  ;;  %11166 = vmatpush1.bf16.msra.mxu1 %v14851_v53  ;;  %v14940_v51 = vld [vmem:[%s21637_s1 + $0x11c4] ss:$16 sps:$4 sm:$0xff]   ;;  %v14943_v53 = vld [vmem:[%s21637_s1 + $0x11cc] ss:$16 sps:$4 sm:$0xff]  }
 0x200   :  { %10151 = vmatprep.subr.bf16.mxu0 %v14856_v38  ;;  %11176 = vmatprep.subr.bf16.mxu1 %v14859_v54  ;;  %v14938_v38 = vld [vmem:[%s21637_s1 + $0x11c0] ss:$16 sps:$4 sm:$0xff]   ;;  %v14941_v54 = vld [vmem:[%s21637_s1 + $0x11c8] ss:$16 sps:$4 sm:$0xff]  }
 0x202   :  { %10143 = vmatmul.mubr.bf16.vlgmr.msra.gmra.mrb[0].mxu0 %v1721_v56  ;;  %11168 = vmatmul.mubr.bf16.vlgmr.msra.gmra.mrb[0].mxu1 %v1721_v56  ;;  %v14949_v56 = vld [vmem:[%s21637_s1 + $0x11ec] ss:$16 sps:$4 sm:$0xff]  }
 0x203   :  { %10152 = vmatpush1.bf16.msra.mxu0 %v14854_v47  ;;  %11177 = vmatpush1.bf16.msra.mxu1 %v14857_v57  ;;  %v14944_v47 = vld [vmem:[%s21637_s1 + $0x11e0] ss:$16 sps:$4 sm:$0xff]   ;;  %v14947_v57 = vld [vmem:[%s21637_s1 + $0x11e8] ss:$16 sps:$4 sm:$0xff]  }
 0x204   :  { %10153 = vmatprep.subr.bf16.mxu0 %v14862_v58  ;;  %11178 = vmatprep.subr.bf16.mxu1 %v14865_v48  ;;  %v14952_v58 = vld [vmem:[%s21637_s1 + $0x1204] ss:$16 sps:$4 sm:$0xff]   ;;  %v14955_v48 = vld [vmem:[%s21637_s1 + $0x120c] ss:$16 sps:$4 sm:$0xff]  }
 0x205   :  { %10183 = vmatprep.mubr.bf16.mxu0 %v18186_v59  ;;  %11208 = vmatprep.mubr.bf16.mxu1 %v18186_v59 }
 0x207   :  { %10154 = vmatpush1.bf16.msra.mxu0 %v14860_v60  ;;  %11179 = vmatpush1.bf16.msra.mxu1 %v14863_v61  ;;  %v18372_v60 = vrot.slane %v18143_v44, %v16672_v49  ;;  %v14950_v61 = vld [vmem:[%s21637_s1 + $0x1200] ss:$16 sps:$4 sm:$0xff]   ;;  %v14961_v44 = vld [vmem:[%s21637_s1 + $0x122c] ss:$16 sps:$4 sm:$0xff]  }
 0x208   :  { %10155 = vmatprep.subr.bf16.mxu0 %v14868_v62  ;;  %11180 = vmatprep.subr.bf16.mxu1 %v14871_v63  ;;  %v14953_v62 = vld [vmem:[%s21637_s1 + $0x1208] ss:$16 sps:$4 sm:$0xff]   ;;  %v14958_v63 = vld [vmem:[%s21637_s1 + $0x1224] ss:$16 sps:$4 sm:$0xff]  }
 0x20b   :  { %10156 = vmatpush1.bf16.msra.mxu0 %v14866_v0  ;;  %11181 = vmatpush1.bf16.msra.mxu1 %v14869_v1  ;;  %v1771_v0 = vcombine.high %v18186_v59, %v18186_v59  ;;  %v14956_v1 = vld [vmem:[%s21637_s1 + $0x1220] ss:$16 sps:$4 sm:$0xff]   ;;  %v14964_v59 = vld [vmem:[%s21637_s1 + $0x1244] ss:$16 sps:$4 sm:$0xff]  }
 0x20c   :  { %10157 = vmatprep.subr.bf16.mxu0 %v14874_v2  ;;  %11182 = vmatprep.subr.bf16.mxu1 %v14877_v3  ;;  %v14959_v2 = vld [vmem:[%s21637_s1 + $0x1228] ss:$16 sps:$4 sm:$0xff]   ;;  %v14967_v3 = vld [vmem:[%s21637_s1 + $0x124c] ss:$16 sps:$4 sm:$0xff]  }
 0x20f   :  { %10158 = vmatpush1.bf16.msra.mxu0 %v14872_v4  ;;  %11183 = vmatpush1.bf16.msra.mxu1 %v14875_v5  ;;  %v14962_v4 = vld [vmem:[%s21637_s1 + $0x1240] ss:$16 sps:$4 sm:$0xff]   ;;  %v14965_v5 = vld [vmem:[%s21637_s1 + $0x1248] ss:$16 sps:$4 sm:$0xff]  }
 0x210   :  { %10159 = vmatprep.subr.bf16.mxu0 %v14880_v6  ;;  %11184 = vmatprep.subr.bf16.mxu1 %v14883_v7  ;;  %v14970_v6 = vld [vmem:[%s21637_s1 + $0x1264] ss:$16 sps:$4 sm:$0xff]   ;;  %v14973_v7 = vld [vmem:[%s21637_s1 + $0x126c] ss:$16 sps:$4 sm:$0xff]  }
 0x213   :  { %10160 = vmatpush1.bf16.msra.mxu0 %v14878_v8  ;;  %11185 = vmatpush1.bf16.msra.mxu1 %v14881_v9  ;;  %v14968_v8 = vld [vmem:[%s21637_s1 + $0x1260] ss:$16 sps:$4 sm:$0xff]   ;;  %v14971_v9 = vld [vmem:[%s21637_s1 + $0x1268] ss:$16 sps:$4 sm:$0xff]  }
 0x214   :  { %10161 = vmatprep.subr.bf16.mxu0 %v14886_v10  ;;  %11186 = vmatprep.subr.bf16.mxu1 %v14889_v11  ;;  %v14976_v10 = vld [vmem:[%s21637_s1 + $0x1284] ss:$16 sps:$4 sm:$0xff]   ;;  %v14979_v11 = vld [vmem:[%s21637_s1 + $0x128c] ss:$16 sps:$4 sm:$0xff]  }
 0x217   :  { %10162 = vmatpush1.bf16.msra.mxu0 %v14884_v12  ;;  %11187 = vmatpush1.bf16.msra.mxu1 %v14887_v52  ;;  %v14974_v12 = vld [vmem:[%s21637_s1 + $0x1280] ss:$16 sps:$4 sm:$0xff]   ;;  %v14977_v52 = vld [vmem:[%s21637_s1 + $0x1288] ss:$16 sps:$4 sm:$0xff]  }
 0x218   :  { %10163 = vmatprep.subr.bf16.mxu0 %v14892_v15  ;;  %11188 = vmatprep.subr.bf16.mxu1 %v14895_v16  ;;  %v14982_v15 = vld [vmem:[%s21637_s1 + $0x12a4] ss:$16 sps:$4 sm:$0xff]   ;;  %v14985_v16 = vld [vmem:[%s21637_s1 + $0x12ac] ss:$16 sps:$4 sm:$0xff]  }
 0x21b   :  { %10164 = vmatpush1.bf16.msra.mxu0 %v14890_v17  ;;  %11189 = vmatpush1.bf16.msra.mxu1 %v14893_v18  ;;  %v14980_v17 = vld [vmem:[%s21637_s1 + $0x12a0] ss:$16 sps:$4 sm:$0xff]   ;;  %v14983_v18 = vld [vmem:[%s21637_s1 + $0x12a8] ss:$16 sps:$4 sm:$0xff]  }
 0x21c   :  { %10165 = vmatprep.subr.bf16.mxu0 %v14898_v19  ;;  %11190 = vmatprep.subr.bf16.mxu1 %v14901_v20  ;;  %v14988_v19 = vld [vmem:[%s21637_s1 + $0x12c4] ss:$16 sps:$4 sm:$0xff]   ;;  %v14991_v20 = vld [vmem:[%s21637_s1 + $0x12cc] ss:$16 sps:$4 sm:$0xff]  }
 0x21f   :  { %10166 = vmatpush1.bf16.msra.mxu0 %v14896_v22  ;;  %11191 = vmatpush1.bf16.msra.mxu1 %v14899_v23  ;;  %v14986_v22 = vld [vmem:[%s21637_s1 + $0x12c0] ss:$16 sps:$4 sm:$0xff]   ;;  %v14989_v23 = vld [vmem:[%s21637_s1 + $0x12c8] ss:$16 sps:$4 sm:$0xff]  }
 0x220   :  { %10167 = vmatprep.subr.bf16.mxu0 %v14904_v24  ;;  %11192 = vmatprep.subr.bf16.mxu1 %v14907_v13  ;;  %v14994_v24 = vld [vmem:[%s21637_s1 + $0x12e4] ss:$16 sps:$4 sm:$0xff]   ;;  %v14997_v13 = vld [vmem:[%s21637_s1 + $0x12ec] ss:$16 sps:$4 sm:$0xff]  }
 0x223   :  { %10168 = vmatpush1.bf16.msra.mxu0 %v14902_v27  ;;  %11193 = vmatpush1.bf16.msra.mxu1 %v14905_v28  ;;  %v14992_v27 = vld [vmem:[%s21637_s1 + $0x12e0] ss:$16 sps:$4 sm:$0xff]   ;;  %v14995_v28 = vld [vmem:[%s21637_s1 + $0x12e8] ss:$16 sps:$4 sm:$0xff]  }
 0x224   :  { %10169 = vmatprep.subr.bf16.mxu0 %v14910_v29  ;;  %11194 = vmatprep.subr.bf16.mxu1 %v14913_v14  ;;  %v15000_v29 = vld [vmem:[%s21637_s1 + $0x1304] ss:$16 sps:$4 sm:$0xff]   ;;  %v15003_v14 = vld [vmem:[%s21637_s1 + $0x130c] ss:$16 sps:$4 sm:$0xff]  }
 0x227   :  { %10170 = vmatpush1.bf16.msra.mxu0 %v14908_v30  ;;  %11195 = vmatpush1.bf16.msra.mxu1 %v14911_v31  ;;  %v14998_v30 = vld [vmem:[%s21637_s1 + $0x1300] ss:$16 sps:$4 sm:$0xff]   ;;  %v15001_v31 = vld [vmem:[%s21637_s1 + $0x1308] ss:$16 sps:$4 sm:$0xff]  }
 0x228   :  { %10171 = vmatprep.subr.bf16.mxu0 %v14916_v25  ;;  %11196 = vmatprep.subr.bf16.mxu1 %v14919_v32  ;;  %v15006_v25 = vld [vmem:[%s21637_s1 + $0x1324] ss:$16 sps:$4 sm:$0xff]   ;;  %v15009_v32 = vld [vmem:[%s21637_s1 + $0x132c] ss:$16 sps:$4 sm:$0xff]  }
 0x22b   :  { %10172 = vmatpush1.bf16.msra.mxu0 %v14914_v33  ;;  %11197 = vmatpush1.bf16.msra.mxu1 %v14917_v26  ;;  %v15004_v33 = vld [vmem:[%s21637_s1 + $0x1320] ss:$16 sps:$4 sm:$0xff]   ;;  %v15007_v26 = vld [vmem:[%s21637_s1 + $0x1328] ss:$16 sps:$4 sm:$0xff]  }
 0x22c   :  { %10173 = vmatprep.subr.bf16.mxu0 %v14922_v36  ;;  %11198 = vmatprep.subr.bf16.mxu1 %v14925_v37  ;;  %v15012_v36 = vld [vmem:[%s21637_s1 + $0x1344] ss:$16 sps:$4 sm:$0xff]   ;;  %v15015_v37 = vld [vmem:[%s21637_s1 + $0x134c] ss:$16 sps:$4 sm:$0xff]  }
 0x22f   :  { %10174 = vmatpush1.bf16.msra.mxu0 %v14920_v21  ;;  %11199 = vmatpush1.bf16.msra.mxu1 %v14923_v39  ;;  %v15010_v21 = vld [vmem:[%s21637_s1 + $0x1340] ss:$16 sps:$4 sm:$0xff]   ;;  %v15013_v39 = vld [vmem:[%s21637_s1 + $0x1348] ss:$16 sps:$4 sm:$0xff]  }
 0x230   :  { %10175 = vmatprep.subr.bf16.mxu0 %v14928_v40  ;;  %11200 = vmatprep.subr.bf16.mxu1 %v14931_v41  ;;  %v15018_v40 = vld [vmem:[%s21637_s1 + $0x1364] ss:$16 sps:$4 sm:$0xff]   ;;  %v15021_v41 = vld [vmem:[%s21637_s1 + $0x136c] ss:$16 sps:$4 sm:$0xff]  }
 0x233   :  { %10176 = vmatpush1.bf16.msra.mxu0 %v14926_v34  ;;  %11201 = vmatpush1.bf16.msra.mxu1 %v14929_v43  ;;  %v15016_v34 = vld [vmem:[%s21637_s1 + $0x1360] ss:$16 sps:$4 sm:$0xff]   ;;  %v15019_v43 = vld [vmem:[%s21637_s1 + $0x1368] ss:$16 sps:$4 sm:$0xff]  }
 0x234   :  { %10177 = vmatprep.subr.bf16.mxu0 %v14934_v45  ;;  %11202 = vmatprep.subr.bf16.mxu1 %v14937_v46  ;;  %v15024_v45 = vld [vmem:[%s21637_s1 + $0x1384] ss:$16 sps:$4 sm:$0xff]   ;;  %v15027_v46 = vld [vmem:[%s21637_s1 + $0x138c] ss:$16 sps:$4 sm:$0xff]  }
 0x237   :  { %10178 = vmatpush1.bf16.msra.mxu0 %v14932_v35  ;;  %11203 = vmatpush1.bf16.msra.mxu1 %v14935_v50  ;;  %v15022_v35 = vld [vmem:[%s21637_s1 + $0x1380] ss:$16 sps:$4 sm:$0xff]   ;;  %v15025_v50 = vld [vmem:[%s21637_s1 + $0x1388] ss:$16 sps:$4 sm:$0xff]  }
 0x238   :  { %10179 = vmatprep.subr.bf16.mxu0 %v14940_v51  ;;  %11204 = vmatprep.subr.bf16.mxu1 %v14943_v53  ;;  %v15030_v51 = vld [vmem:[%s21637_s1 + $0x13a4] ss:$16 sps:$4 sm:$0xff]   ;;  %v15033_v53 = vld [vmem:[%s21637_s1 + $0x13ac] ss:$16 sps:$4 sm:$0xff]  }
 0x23b   :  { %10180 = vmatpush1.bf16.msra.mxu0 %v14938_v38  ;;  %11205 = vmatpush1.bf16.msra.mxu1 %v14941_v54  ;;  %v15028_v38 = vld [vmem:[%s21637_s1 + $0x13a0] ss:$16 sps:$4 sm:$0xff]   ;;  %v15031_v54 = vld [vmem:[%s21637_s1 + $0x13a8] ss:$16 sps:$4 sm:$0xff]  }
 0x23c   :  { %10181 = vmatprep.subr.bf16.mxu0 %v14946_v55  ;;  %11206 = vmatprep.subr.bf16.mxu1 %v14949_v56  ;;  %v15036_v55 = vld [vmem:[%s21637_s1 + $0x13c4] ss:$16 sps:$4 sm:$0xff]   ;;  %v15039_v56 = vld [vmem:[%s21637_s1 + $0x13cc] ss:$16 sps:$4 sm:$0xff]  }
 0x23f   :  { %10182 = vmatpush1.bf16.msra.mxu0 %v14944_v47  ;;  %11207 = vmatpush1.bf16.msra.mxu1 %v14947_v57  ;;  %v16475_v47 = vld [vmem:[%s21636_s0 + $0x10] sm:$0xff] }
 0x240   :  { %10192 = vmatprep.subr.bf16.mxu0 %v14952_v58  ;;  %11217 = vmatprep.subr.bf16.mxu1 %v14955_v48  ;;  %v1724_v57 = vcombine.high %v16475_v47, %v16475_v47  ;;  %v15034_v58 = vld [vmem:[%s21637_s1 + $0x13c0] ss:$16 sps:$4 sm:$0xff]   ;;  %v15037_v48 = vld [vmem:[%s21637_s1 + $0x13c8] ss:$16 sps:$4 sm:$0xff]  }
 0x241   :  { %v15118_v47 = vld [vmem:[%s21637_s1 + $0x1580] ss:$16 sps:$4 sm:$0xff]  }
 0x242   :  { %10184 = vmatmul.mubr.bf16.vlgmr.msra.gmra.mrb[0].mxu0 %v18372_v60  ;;  %11209 = vmatmul.mubr.bf16.vlgmr.msra.gmra.mrb[0].mxu1 %v18372_v60 }
 0x243   :  { %10193 = vmatpush1.bf16.msra.mxu0 %v14950_v61  ;;  %11218 = vmatpush1.bf16.msra.mxu1 %v14953_v62  ;;  %v15042_v61 = vld [vmem:[%s21637_s1 + $0x13e4] ss:$16 sps:$4 sm:$0xff]   ;;  %v15045_v62 = vld [vmem:[%s21637_s1 + $0x13ec] ss:$16 sps:$4 sm:$0xff]  }
 0x244   :  { %10194 = vmatprep.subr.bf16.mxu0 %v14958_v63  ;;  %11219 = vmatprep.subr.bf16.mxu1 %v14961_v44  ;;  %v18562_v63 = vrot.slane %v1724_v57, %v16672_v49  ;;  %v15040_v44 = vld [vmem:[%s21637_s1 + $0x13e0] ss:$16 sps:$4 sm:$0xff]   ;;  %v15121_v57 = vld [vmem:[%s21637_s1 + $0x1588] ss:$16 sps:$4 sm:$0xff]  }
 0x245   :  { %10224 = vmatprep.mubr.bf16.mxu0 %v1771_v0  ;;  %11249 = vmatprep.mubr.bf16.mxu1 %v1771_v0  ;;  %v15043_v0 = vld [vmem:[%s21637_s1 + $0x13e8] ss:$16 sps:$4 sm:$0xff]  }
 0x247   :  { %10195 = vmatpush1.bf16.msra.mxu0 %v14956_v1  ;;  %11220 = vmatpush1.bf16.msra.mxu1 %v14959_v2  ;;  %v15048_v1 = vld [vmem:[%s21637_s1 + $0x1404] ss:$16 sps:$4 sm:$0xff]   ;;  %v15051_v2 = vld [vmem:[%s21637_s1 + $0x140c] ss:$16 sps:$4 sm:$0xff]  }
 0x248   :  { %10196 = vmatprep.subr.bf16.mxu0 %v14964_v59  ;;  %11221 = vmatprep.subr.bf16.mxu1 %v14967_v3  ;;  %v1740_v59 = vcombine.high %v18562_v63, %v18562_v63  ;;  %v1769_v3 = vcombine.high %v18372_v60, %v18372_v60  ;;  %v15057_v60 = vld [vmem:[%s21637_s1 + $0x142c] ss:$16 sps:$4 sm:$0xff]  }
 0x24b   :  { %10197 = vmatpush1.bf16.msra.mxu0 %v14962_v4  ;;  %11222 = vmatpush1.bf16.msra.mxu1 %v14965_v5  ;;  %v15046_v4 = vld [vmem:[%s21637_s1 + $0x1400] ss:$16 sps:$4 sm:$0xff]   ;;  %v15049_v5 = vld [vmem:[%s21637_s1 + $0x1408] ss:$16 sps:$4 sm:$0xff]  }
 0x24c   :  { %10198 = vmatprep.subr.bf16.mxu0 %v14970_v6  ;;  %11223 = vmatprep.subr.bf16.mxu1 %v14973_v7  ;;  %v15054_v6 = vld [vmem:[%s21637_s1 + $0x1424] ss:$16 sps:$4 sm:$0xff]   ;;  %v18593_v7 = vrot.slane %v1740_v59, %v16672_v49 }
 0x24d   :  { %v15138_v59 = vld [vmem:[%s21637_s1 + $0x15e4] ss:$16 sps:$4 sm:$0xff]  }
 0x24f   :  { %10199 = vmatpush1.bf16.msra.mxu0 %v14968_v8  ;;  %11224 = vmatpush1.bf16.msra.mxu1 %v14971_v9  ;;  %v15052_v8 = vld [vmem:[%s21637_s1 + $0x1420] ss:$16 sps:$4 sm:$0xff]   ;;  %v15055_v9 = vld [vmem:[%s21637_s1 + $0x1428] ss:$16 sps:$4 sm:$0xff]  }
 0x250   :  { %10200 = vmatprep.subr.bf16.mxu0 %v14976_v10  ;;  %11225 = vmatprep.subr.bf16.mxu1 %v14979_v11  ;;  %v15060_v10 = vld [vmem:[%s21637_s1 + $0x1444] ss:$16 sps:$4 sm:$0xff]   ;;  %v15063_v11 = vld [vmem:[%s21637_s1 + $0x144c] ss:$16 sps:$4 sm:$0xff]  }
 0x253   :  { %10201 = vmatpush1.bf16.msra.mxu0 %v14974_v12  ;;  %11226 = vmatpush1.bf16.msra.mxu1 %v14977_v52  ;;  %v15058_v12 = vld [vmem:[%s21637_s1 + $0x1440] ss:$16 sps:$4 sm:$0xff]   ;;  %v15061_v52 = vld [vmem:[%s21637_s1 + $0x1448] ss:$16 sps:$4 sm:$0xff]  }
 0x254   :  { %10202 = vmatprep.subr.bf16.mxu0 %v14982_v15  ;;  %11227 = vmatprep.subr.bf16.mxu1 %v14985_v16  ;;  %v15066_v15 = vld [vmem:[%s21637_s1 + $0x1464] ss:$16 sps:$4 sm:$0xff]   ;;  %v15069_v16 = vld [vmem:[%s21637_s1 + $0x146c] ss:$16 sps:$4 sm:$0xff]  }
 0x257   :  { %10203 = vmatpush1.bf16.msra.mxu0 %v14980_v17  ;;  %11228 = vmatpush1.bf16.msra.mxu1 %v14983_v18  ;;  %v15064_v17 = vld [vmem:[%s21637_s1 + $0x1460] ss:$16 sps:$4 sm:$0xff]   ;;  %v15067_v18 = vld [vmem:[%s21637_s1 + $0x1468] ss:$16 sps:$4 sm:$0xff]  }
 0x258   :  { %10204 = vmatprep.subr.bf16.mxu0 %v14988_v19  ;;  %11229 = vmatprep.subr.bf16.mxu1 %v14991_v20  ;;  %v15072_v19 = vld [vmem:[%s21637_s1 + $0x1484] ss:$16 sps:$4 sm:$0xff]   ;;  %v15075_v20 = vld [vmem:[%s21637_s1 + $0x148c] ss:$16 sps:$4 sm:$0xff]  }
 0x25b   :  { %10205 = vmatpush1.bf16.msra.mxu0 %v14986_v22  ;;  %11230 = vmatpush1.bf16.msra.mxu1 %v14989_v23  ;;  %v15070_v22 = vld [vmem:[%s21637_s1 + $0x1480] ss:$16 sps:$4 sm:$0xff]   ;;  %v15073_v23 = vld [vmem:[%s21637_s1 + $0x1488] ss:$16 sps:$4 sm:$0xff]  }
 0x25c   :  { %10206 = vmatprep.subr.bf16.mxu0 %v14994_v24  ;;  %11231 = vmatprep.subr.bf16.mxu1 %v14997_v13  ;;  %v15078_v24 = vld [vmem:[%s21637_s1 + $0x14a4] ss:$16 sps:$4 sm:$0xff]   ;;  %v15081_v13 = vld [vmem:[%s21637_s1 + $0x14ac] ss:$16 sps:$4 sm:$0xff]  }
 0x25f   :  { %10207 = vmatpush1.bf16.msra.mxu0 %v14992_v27  ;;  %11232 = vmatpush1.bf16.msra.mxu1 %v14995_v28  ;;  %v15076_v27 = vld [vmem:[%s21637_s1 + $0x14a0] ss:$16 sps:$4 sm:$0xff]   ;;  %v15079_v28 = vld [vmem:[%s21637_s1 + $0x14a8] ss:$16 sps:$4 sm:$0xff]  }
 0x260   :  { %10208 = vmatprep.subr.bf16.mxu0 %v15000_v29  ;;  %11233 = vmatprep.subr.bf16.mxu1 %v15003_v14  ;;  %v15084_v29 = vld [vmem:[%s21637_s1 + $0x14c4] ss:$16 sps:$4 sm:$0xff]   ;;  %v15087_v14 = vld [vmem:[%s21637_s1 + $0x14cc] ss:$16 sps:$4 sm:$0xff]  }
 0x263   :  { %10209 = vmatpush1.bf16.msra.mxu0 %v14998_v30  ;;  %11234 = vmatpush1.bf16.msra.mxu1 %v15001_v31  ;;  %v15082_v30 = vld [vmem:[%s21637_s1 + $0x14c0] ss:$16 sps:$4 sm:$0xff]   ;;  %v15085_v31 = vld [vmem:[%s21637_s1 + $0x14c8] ss:$16 sps:$4 sm:$0xff]  }
 0x264   :  { %10210 = vmatprep.subr.bf16.mxu0 %v15006_v25  ;;  %11235 = vmatprep.subr.bf16.mxu1 %v15009_v32  ;;  %v15090_v25 = vld [vmem:[%s21637_s1 + $0x14e4] ss:$16 sps:$4 sm:$0xff]   ;;  %v15093_v32 = vld [vmem:[%s21637_s1 + $0x14ec] ss:$16 sps:$4 sm:$0xff]  }
 0x267   :  { %10211 = vmatpush1.bf16.msra.mxu0 %v15004_v33  ;;  %11236 = vmatpush1.bf16.msra.mxu1 %v15007_v26  ;;  %v15088_v33 = vld [vmem:[%s21637_s1 + $0x14e0] ss:$16 sps:$4 sm:$0xff]   ;;  %v15091_v26 = vld [vmem:[%s21637_s1 + $0x14e8] ss:$16 sps:$4 sm:$0xff]  }
 0x268   :  { %10212 = vmatprep.subr.bf16.mxu0 %v15012_v36  ;;  %11237 = vmatprep.subr.bf16.mxu1 %v15015_v37  ;;  %v15096_v36 = vld [vmem:[%s21637_s1 + $0x1504] ss:$16 sps:$4 sm:$0xff]   ;;  %v15099_v37 = vld [vmem:[%s21637_s1 + $0x150c] ss:$16 sps:$4 sm:$0xff]  }
 0x26b   :  { %10213 = vmatpush1.bf16.msra.mxu0 %v15010_v21  ;;  %11238 = vmatpush1.bf16.msra.mxu1 %v15013_v39  ;;  %v15094_v21 = vld [vmem:[%s21637_s1 + $0x1500] ss:$16 sps:$4 sm:$0xff]   ;;  %v15097_v39 = vld [vmem:[%s21637_s1 + $0x1508] ss:$16 sps:$4 sm:$0xff]  }
 0x26c   :  { %10214 = vmatprep.subr.bf16.mxu0 %v15018_v40  ;;  %11239 = vmatprep.subr.bf16.mxu1 %v15021_v41  ;;  %v15102_v40 = vld [vmem:[%s21637_s1 + $0x1524] ss:$16 sps:$4 sm:$0xff]   ;;  %v15105_v41 = vld [vmem:[%s21637_s1 + $0x152c] ss:$16 sps:$4 sm:$0xff]  }
 0x26f   :  { %10215 = vmatpush1.bf16.msra.mxu0 %v15016_v34  ;;  %11240 = vmatpush1.bf16.msra.mxu1 %v15019_v43  ;;  %v15100_v34 = vld [vmem:[%s21637_s1 + $0x1520] ss:$16 sps:$4 sm:$0xff]   ;;  %v15103_v43 = vld [vmem:[%s21637_s1 + $0x1528] ss:$16 sps:$4 sm:$0xff]  }
 0x270   :  { %10216 = vmatprep.subr.bf16.mxu0 %v15024_v45  ;;  %11241 = vmatprep.subr.bf16.mxu1 %v15027_v46  ;;  %v15108_v45 = vld [vmem:[%s21637_s1 + $0x1544] ss:$16 sps:$4 sm:$0xff]   ;;  %v15111_v46 = vld [vmem:[%s21637_s1 + $0x154c] ss:$16 sps:$4 sm:$0xff]  }
 0x273   :  { %10217 = vmatpush1.bf16.msra.mxu0 %v15022_v35  ;;  %11242 = vmatpush1.bf16.msra.mxu1 %v15025_v50  ;;  %v15106_v35 = vld [vmem:[%s21637_s1 + $0x1540] ss:$16 sps:$4 sm:$0xff]   ;;  %v15109_v50 = vld [vmem:[%s21637_s1 + $0x1548] ss:$16 sps:$4 sm:$0xff]  }
 0x274   :  { %10218 = vmatprep.subr.bf16.mxu0 %v15030_v51  ;;  %11243 = vmatprep.subr.bf16.mxu1 %v15033_v53  ;;  %v15114_v51 = vld [vmem:[%s21637_s1 + $0x1564] ss:$16 sps:$4 sm:$0xff]   ;;  %v15117_v53 = vld [vmem:[%s21637_s1 + $0x156c] ss:$16 sps:$4 sm:$0xff]  }
 0x277   :  { %10219 = vmatpush1.bf16.msra.mxu0 %v15028_v38  ;;  %11244 = vmatpush1.bf16.msra.mxu1 %v15031_v54  ;;  %v15112_v38 = vld [vmem:[%s21637_s1 + $0x1560] ss:$16 sps:$4 sm:$0xff]   ;;  %v15115_v54 = vld [vmem:[%s21637_s1 + $0x1568] ss:$16 sps:$4 sm:$0xff]  }
 0x278   :  { %10220 = vmatprep.subr.bf16.mxu0 %v15036_v55  ;;  %11245 = vmatprep.subr.bf16.mxu1 %v15039_v56  ;;  %v15120_v55 = vld [vmem:[%s21637_s1 + $0x1584] ss:$16 sps:$4 sm:$0xff]   ;;  %v15123_v56 = vld [vmem:[%s21637_s1 + $0x158c] ss:$16 sps:$4 sm:$0xff]  }
 0x27b   :  { %10221 = vmatpush1.bf16.msra.mxu0 %v15034_v58  ;;  %11246 = vmatpush1.bf16.msra.mxu1 %v15037_v48  ;;  %v15126_v58 = vld [vmem:[%s21637_s1 + $0x15a4] ss:$16 sps:$4 sm:$0xff]   ;;  %v15129_v48 = vld [vmem:[%s21637_s1 + $0x15ac] ss:$16 sps:$4 sm:$0xff]  }
 0x27c   :  { %10222 = vmatprep.subr.bf16.mxu0 %v15042_v61  ;;  %11247 = vmatprep.subr.bf16.mxu1 %v15045_v62  ;;  %v15124_v61 = vld [vmem:[%s21637_s1 + $0x15a0] ss:$16 sps:$4 sm:$0xff]   ;;  %v15127_v62 = vld [vmem:[%s21637_s1 + $0x15a8] ss:$16 sps:$4 sm:$0xff]  }
 0x27f   :  { %10223 = vmatpush1.bf16.msra.mxu0 %v15040_v44  ;;  %11248 = vmatpush1.bf16.msra.mxu1 %v15043_v0  ;;  %v15132_v44 = vld [vmem:[%s21637_s1 + $0x15c4] ss:$16 sps:$4 sm:$0xff]   ;;  %v15135_v0 = vld [vmem:[%s21637_s1 + $0x15cc] ss:$16 sps:$4 sm:$0xff]  }
 0x280   :  { %10233 = vmatprep.subr.bf16.mxu0 %v15048_v1  ;;  %11258 = vmatprep.subr.bf16.mxu1 %v15051_v2  ;;  %v15130_v1 = vld [vmem:[%s21637_s1 + $0x15c0] ss:$16 sps:$4 sm:$0xff]   ;;  %v15133_v2 = vld [vmem:[%s21637_s1 + $0x15c8] ss:$16 sps:$4 sm:$0xff]  }
 0x282   :  { %10225 = vmatmul.mubr.bf16.vlgmr.msra.gmra.mrb[0].mxu0 %v1769_v3  ;;  %11250 = vmatmul.mubr.bf16.vlgmr.msra.gmra.mrb[0].mxu1 %v1769_v3  ;;  %v15141_v3 = vld [vmem:[%s21637_s1 + $0x15ec] ss:$16 sps:$4 sm:$0xff]  }
 0x283   :  { %10234 = vmatpush1.bf16.msra.mxu0 %v15046_v4  ;;  %11259 = vmatpush1.bf16.msra.mxu1 %v15049_v5  ;;  %v15136_v4 = vld [vmem:[%s21637_s1 + $0x15e0] ss:$16 sps:$4 sm:$0xff]   ;;  %v15139_v5 = vld [vmem:[%s21637_s1 + $0x15e8] ss:$16 sps:$4 sm:$0xff]  }
 0x284   :  { %10235 = vmatprep.subr.bf16.mxu0 %v15054_v6  ;;  %11260 = vmatprep.subr.bf16.mxu1 %v15057_v60  ;;  %v15145_v6 = vld [vmem:[%s21637_s1 + $0x1604] ss:$16 sps:$4 sm:$0xff]   ;;  %v15148_v60 = vld [vmem:[%s21637_s1 + $0x160c] ss:$16 sps:$4 sm:$0xff]  }
 0x285   :  { %10265 = vmatprep.mubr.bf16.mxu0 %v18593_v7  ;;  %11290 = vmatprep.mubr.bf16.mxu1 %v18593_v7 }
 0x287   :  { %10236 = vmatpush1.bf16.msra.mxu0 %v15052_v8  ;;  %11261 = vmatpush1.bf16.msra.mxu1 %v15055_v9  ;;  %v18779_v8 = vrot.slane %v18562_v63, %v16672_v49  ;;  %v15143_v9 = vld [vmem:[%s21637_s1 + $0x1600] ss:$16 sps:$4 sm:$0xff]   ;;  %v15154_v63 = vld [vmem:[%s21637_s1 + $0x162c] ss:$16 sps:$4 sm:$0xff]  }
 0x288   :  { %10237 = vmatprep.subr.bf16.mxu0 %v15060_v10  ;;  %11262 = vmatprep.subr.bf16.mxu1 %v15063_v11  ;;  %v15146_v10 = vld [vmem:[%s21637_s1 + $0x1608] ss:$16 sps:$4 sm:$0xff]   ;;  %v15151_v11 = vld [vmem:[%s21637_s1 + $0x1624] ss:$16 sps:$4 sm:$0xff]  }
 0x28b   :  { %10238 = vmatpush1.bf16.msra.mxu0 %v15058_v12  ;;  %11263 = vmatpush1.bf16.msra.mxu1 %v15061_v52  ;;  %v1772_v12 = vcombine.high %v18593_v7, %v18593_v7  ;;  %v15149_v52 = vld [vmem:[%s21637_s1 + $0x1620] ss:$16 sps:$4 sm:$0xff]   ;;  %v15157_v7 = vld [vmem:[%s21637_s1 + $0x1644] ss:$16 sps:$4 sm:$0xff]  }
 0x28c   :  { %10239 = vmatprep.subr.bf16.mxu0 %v15066_v15  ;;  %11264 = vmatprep.subr.bf16.mxu1 %v15069_v16  ;;  %v15152_v15 = vld [vmem:[%s21637_s1 + $0x1628] ss:$16 sps:$4 sm:$0xff]   ;;  %v15160_v16 = vld [vmem:[%s21637_s1 + $0x164c] ss:$16 sps:$4 sm:$0xff]  }
 0x28f   :  { %10240 = vmatpush1.bf16.msra.mxu0 %v15064_v17  ;;  %11265 = vmatpush1.bf16.msra.mxu1 %v15067_v18  ;;  %v15155_v17 = vld [vmem:[%s21637_s1 + $0x1640] ss:$16 sps:$4 sm:$0xff]   ;;  %v15158_v18 = vld [vmem:[%s21637_s1 + $0x1648] ss:$16 sps:$4 sm:$0xff]  }
 0x290   :  { %10241 = vmatprep.subr.bf16.mxu0 %v15072_v19  ;;  %11266 = vmatprep.subr.bf16.mxu1 %v15075_v20  ;;  %v15163_v19 = vld [vmem:[%s21637_s1 + $0x1664] ss:$16 sps:$4 sm:$0xff]   ;;  %v15166_v20 = vld [vmem:[%s21637_s1 + $0x166c] ss:$16 sps:$4 sm:$0xff]  }
 0x293   :  { %10242 = vmatpush1.bf16.msra.mxu0 %v15070_v22  ;;  %11267 = vmatpush1.bf16.msra.mxu1 %v15073_v23  ;;  %v15161_v22 = vld [vmem:[%s21637_s1 + $0x1660] ss:$16 sps:$4 sm:$0xff]   ;;  %v15164_v23 = vld [vmem:[%s21637_s1 + $0x1668] ss:$16 sps:$4 sm:$0xff]  }
 0x294   :  { %10243 = vmatprep.subr.bf16.mxu0 %v15078_v24  ;;  %11268 = vmatprep.subr.bf16.mxu1 %v15081_v13  ;;  %v15169_v24 = vld [vmem:[%s21637_s1 + $0x1684] ss:$16 sps:$4 sm:$0xff]   ;;  %v15172_v13 = vld [vmem:[%s21637_s1 + $0x168c] ss:$16 sps:$4 sm:$0xff]  }
 0x297   :  { %10244 = vmatpush1.bf16.msra.mxu0 %v15076_v27  ;;  %11269 = vmatpush1.bf16.msra.mxu1 %v15079_v28  ;;  %v15167_v27 = vld [vmem:[%s21637_s1 + $0x1680] ss:$16 sps:$4 sm:$0xff]   ;;  %v15170_v28 = vld [vmem:[%s21637_s1 + $0x1688] ss:$16 sps:$4 sm:$0xff]  }
 0x298   :  { %10245 = vmatprep.subr.bf16.mxu0 %v15084_v29  ;;  %11270 = vmatprep.subr.bf16.mxu1 %v15087_v14  ;;  %v15175_v29 = vld [vmem:[%s21637_s1 + $0x16a4] ss:$16 sps:$4 sm:$0xff]   ;;  %v15178_v14 = vld [vmem:[%s21637_s1 + $0x16ac] ss:$16 sps:$4 sm:$0xff]  }
 0x29b   :  { %10246 = vmatpush1.bf16.msra.mxu0 %v15082_v30  ;;  %11271 = vmatpush1.bf16.msra.mxu1 %v15085_v31  ;;  %v15173_v30 = vld [vmem:[%s21637_s1 + $0x16a0] ss:$16 sps:$4 sm:$0xff]   ;;  %v15176_v31 = vld [vmem:[%s21637_s1 + $0x16a8] ss:$16 sps:$4 sm:$0xff]  }
 0x29c   :  { %10247 = vmatprep.subr.bf16.mxu0 %v15090_v25  ;;  %11272 = vmatprep.subr.bf16.mxu1 %v15093_v32  ;;  %v15181_v25 = vld [vmem:[%s21637_s1 + $0x16c4] ss:$16 sps:$4 sm:$0xff]   ;;  %v15184_v32 = vld [vmem:[%s21637_s1 + $0x16cc] ss:$16 sps:$4 sm:$0xff]  }
 0x29f   :  { %10248 = vmatpush1.bf16.msra.mxu0 %v15088_v33  ;;  %11273 = vmatpush1.bf16.msra.mxu1 %v15091_v26  ;;  %v15179_v33 = vld [vmem:[%s21637_s1 + $0x16c0] ss:$16 sps:$4 sm:$0xff]   ;;  %v15182_v26 = vld [vmem:[%s21637_s1 + $0x16c8] ss:$16 sps:$4 sm:$0xff]  }
 0x2a0   :  { %10249 = vmatprep.subr.bf16.mxu0 %v15096_v36  ;;  %11274 = vmatprep.subr.bf16.mxu1 %v15099_v37  ;;  %v15187_v36 = vld [vmem:[%s21637_s1 + $0x16e4] ss:$16 sps:$4 sm:$0xff]   ;;  %v15190_v37 = vld [vmem:[%s21637_s1 + $0x16ec] ss:$16 sps:$4 sm:$0xff]  }
 0x2a3   :  { %10250 = vmatpush1.bf16.msra.mxu0 %v15094_v21  ;;  %11275 = vmatpush1.bf16.msra.mxu1 %v15097_v39  ;;  %v15185_v21 = vld [vmem:[%s21637_s1 + $0x16e0] ss:$16 sps:$4 sm:$0xff]   ;;  %v15188_v39 = vld [vmem:[%s21637_s1 + $0x16e8] ss:$16 sps:$4 sm:$0xff]  }
 0x2a4   :  { %10251 = vmatprep.subr.bf16.mxu0 %v15102_v40  ;;  %11276 = vmatprep.subr.bf16.mxu1 %v15105_v41  ;;  %v15193_v40 = vld [vmem:[%s21637_s1 + $0x1704] ss:$16 sps:$4 sm:$0xff]   ;;  %v15196_v41 = vld [vmem:[%s21637_s1 + $0x170c] ss:$16 sps:$4 sm:$0xff]  }
 0x2a7   :  { %10252 = vmatpush1.bf16.msra.mxu0 %v15100_v34  ;;  %11277 = vmatpush1.bf16.msra.mxu1 %v15103_v43  ;;  %v15191_v34 = vld [vmem:[%s21637_s1 + $0x1700] ss:$16 sps:$4 sm:$0xff]   ;;  %v15194_v43 = vld [vmem:[%s21637_s1 + $0x1708] ss:$16 sps:$4 sm:$0xff]  }
 0x2a8   :  { %10253 = vmatprep.subr.bf16.mxu0 %v15108_v45  ;;  %11278 = vmatprep.subr.bf16.mxu1 %v15111_v46  ;;  %v15199_v45 = vld [vmem:[%s21637_s1 + $0x1724] ss:$16 sps:$4 sm:$0xff]   ;;  %v15202_v46 = vld [vmem:[%s21637_s1 + $0x172c] ss:$16 sps:$4 sm:$0xff]  }
 0x2ab   :  { %10254 = vmatpush1.bf16.msra.mxu0 %v15106_v35  ;;  %11279 = vmatpush1.bf16.msra.mxu1 %v15109_v50  ;;  %v15197_v35 = vld [vmem:[%s21637_s1 + $0x1720] ss:$16 sps:$4 sm:$0xff]   ;;  %v15200_v50 = vld [vmem:[%s21637_s1 + $0x1728] ss:$16 sps:$4 sm:$0xff]  }
 0x2ac   :  { %10255 = vmatprep.subr.bf16.mxu0 %v15114_v51  ;;  %11280 = vmatprep.subr.bf16.mxu1 %v15117_v53  ;;  %v15205_v51 = vld [vmem:[%s21637_s1 + $0x1744] ss:$16 sps:$4 sm:$0xff]   ;;  %v15208_v53 = vld [vmem:[%s21637_s1 + $0x174c] ss:$16 sps:$4 sm:$0xff]  }
 0x2af   :  { %10256 = vmatpush1.bf16.msra.mxu0 %v15112_v38  ;;  %11281 = vmatpush1.bf16.msra.mxu1 %v15115_v54  ;;  %v15203_v38 = vld [vmem:[%s21637_s1 + $0x1740] ss:$16 sps:$4 sm:$0xff]   ;;  %v15206_v54 = vld [vmem:[%s21637_s1 + $0x1748] ss:$16 sps:$4 sm:$0xff]  }
 0x2b0   :  { %10257 = vmatprep.subr.bf16.mxu0 %v15120_v55  ;;  %11282 = vmatprep.subr.bf16.mxu1 %v15123_v56  ;;  %v15211_v55 = vld [vmem:[%s21637_s1 + $0x1764] ss:$16 sps:$4 sm:$0xff]   ;;  %v15214_v56 = vld [vmem:[%s21637_s1 + $0x176c] ss:$16 sps:$4 sm:$0xff]  }
 0x2b3   :  { %10258 = vmatpush1.bf16.msra.mxu0 %v15118_v47  ;;  %11283 = vmatpush1.bf16.msra.mxu1 %v15121_v57  ;;  %v15209_v47 = vld [vmem:[%s21637_s1 + $0x1760] ss:$16 sps:$4 sm:$0xff]   ;;  %v15212_v57 = vld [vmem:[%s21637_s1 + $0x1768] ss:$16 sps:$4 sm:$0xff]  }
 0x2b4   :  { %10259 = vmatprep.subr.bf16.mxu0 %v15126_v58  ;;  %11284 = vmatprep.subr.bf16.mxu1 %v15129_v48  ;;  %v15217_v58 = vld [vmem:[%s21637_s1 + $0x1784] ss:$16 sps:$4 sm:$0xff]   ;;  %v15220_v48 = vld [vmem:[%s21637_s1 + $0x178c] ss:$16 sps:$4 sm:$0xff]  }
 0x2b7   :  { %10260 = vmatpush1.bf16.msra.mxu0 %v15124_v61  ;;  %11285 = vmatpush1.bf16.msra.mxu1 %v15127_v62  ;;  %v15215_v61 = vld [vmem:[%s21637_s1 + $0x1780] ss:$16 sps:$4 sm:$0xff]   ;;  %v15218_v62 = vld [vmem:[%s21637_s1 + $0x1788] ss:$16 sps:$4 sm:$0xff]  }
 0x2b8   :  { %10261 = vmatprep.subr.bf16.mxu0 %v15132_v44  ;;  %11286 = vmatprep.subr.bf16.mxu1 %v15135_v0  ;;  %v15223_v44 = vld [vmem:[%s21637_s1 + $0x17a4] ss:$16 sps:$4 sm:$0xff]   ;;  %v15226_v0 = vld [vmem:[%s21637_s1 + $0x17ac] ss:$16 sps:$4 sm:$0xff]  }
 0x2bb   :  { %10262 = vmatpush1.bf16.msra.mxu0 %v15130_v1  ;;  %11287 = vmatpush1.bf16.msra.mxu1 %v15133_v2  ;;  %v15221_v1 = vld [vmem:[%s21637_s1 + $0x17a0] ss:$16 sps:$4 sm:$0xff]   ;;  %v15224_v2 = vld [vmem:[%s21637_s1 + $0x17a8] ss:$16 sps:$4 sm:$0xff]  }
 0x2bc   :  { %10263 = vmatprep.subr.bf16.mxu0 %v15138_v59  ;;  %11288 = vmatprep.subr.bf16.mxu1 %v15141_v3  ;;  %v15229_v59 = vld [vmem:[%s21637_s1 + $0x17c4] ss:$16 sps:$4 sm:$0xff]   ;;  %v15232_v3 = vld [vmem:[%s21637_s1 + $0x17cc] ss:$16 sps:$4 sm:$0xff]  }
 0x2bf   :  { %10264 = vmatpush1.bf16.msra.mxu0 %v15136_v4  ;;  %11289 = vmatpush1.bf16.msra.mxu1 %v15139_v5  ;;  %v18956_v4 = vld.sshfl [vmem:[%s21636_s0 + $0x18] sm:$0xff pattern:$0x75316420]  ;;  %v15227_v5 = vld [vmem:[%s21637_s1 + $0x17c0] ss:$16 sps:$4 sm:$0xff]  }
 0x2c0   :  { %10274 = vmatprep.subr.bf16.mxu0 %v15145_v6  ;;  %11299 = vmatprep.subr.bf16.mxu1 %v15148_v60  ;;  %v15230_v6 = vld [vmem:[%s21637_s1 + $0x17c8] ss:$16 sps:$4 sm:$0xff]   ;;  %v15235_v60 = vld [vmem:[%s21637_s1 + $0x17e4] ss:$16 sps:$4 sm:$0xff]  }
 0x2c2   :  { %10266 = vmatmul.mubr.bf16.vlgmr.msra.gmra.mrb[0].mxu0 %v18779_v8  ;;  %11291 = vmatmul.mubr.bf16.vlgmr.msra.gmra.mrb[0].mxu1 %v18779_v8 }
 0x2c3   :  { %10275 = vmatpush1.bf16.msra.mxu0 %v15143_v9  ;;  %11300 = vmatpush1.bf16.msra.mxu1 %v15146_v10  ;;  %v15238_v9 = vld [vmem:[%s21637_s1 + $0x17ec] ss:$16 sps:$4 sm:$0xff]   ;;  %v15233_v10 = vld [vmem:[%s21637_s1 + $0x17e0] ss:$16 sps:$4 sm:$0xff]  }
 0x2c4   :  { %10276 = vmatprep.subr.bf16.mxu0 %v15151_v11  ;;  %11301 = vmatprep.subr.bf16.mxu1 %v15154_v63  ;;  %v15236_v11 = vld [vmem:[%s21637_s1 + $0x17e8] ss:$16 sps:$4 sm:$0xff]   ;;  %v15241_v63 = vld [vmem:[%s21637_s1 + $0x1804] ss:$16 sps:$4 sm:$0xff]  }
 0x2c5   :  { %10306 = vmatprep.mubr.bf16.mxu0 %v1772_v12  ;;  %11331 = vmatprep.mubr.bf16.mxu1 %v1772_v12  ;;  %v15244_v12 = vld [vmem:[%s21637_s1 + $0x180c] ss:$16 sps:$4 sm:$0xff]  }
 0x2c7   :  { %10277 = vmatpush1.bf16.msra.mxu0 %v15149_v52  ;;  %11302 = vmatpush1.bf16.msra.mxu1 %v15152_v15  ;;  %v1788_v52 = vcombine.high %v18956_v4, %v18956_v4  ;;  %v1770_v15 = vcombine.high %v18779_v8, %v18779_v8  ;;  %v15250_v8 = vld [vmem:[%s21637_s1 + $0x182c] ss:$16 sps:$4 sm:$0xff]  }
 0x2c8   :  { %10278 = vmatprep.subr.bf16.mxu0 %v15157_v7  ;;  %11303 = vmatprep.subr.bf16.mxu1 %v15160_v16  ;;  %v15239_v7 = vld [vmem:[%s21637_s1 + $0x1800] ss:$16 sps:$4 sm:$0xff]   ;;  %v15242_v16 = vld [vmem:[%s21637_s1 + $0x1808] ss:$16 sps:$4 sm:$0xff]  }
 0x2cb   :  { %10279 = vmatpush1.bf16.msra.mxu0 %v15155_v17  ;;  %11304 = vmatpush1.bf16.msra.mxu1 %v15158_v18  ;;  %v15247_v17 = vld [vmem:[%s21637_s1 + $0x1824] ss:$16 sps:$4 sm:$0xff]   ;;  %v18999_v18 = vrot.slane %v1788_v52, %v16672_v49 }
 0x2cc   :  { %10280 = vmatprep.subr.bf16.mxu0 %v15163_v19  ;;  %11305 = vmatprep.subr.bf16.mxu1 %v15166_v20  ;;  %v15245_v19 = vld [vmem:[%s21637_s1 + $0x1820] ss:$16 sps:$4 sm:$0xff]   ;;  %v15248_v20 = vld [vmem:[%s21637_s1 + $0x1828] ss:$16 sps:$4 sm:$0xff]   ;;  %v15331_v52 = vld [vmem:[%s21637_s1 + $0x19e4] ss:$16 sps:$4 sm:$0xff]  }
 0x2cf   :  { %10281 = vmatpush1.bf16.msra.mxu0 %v15161_v22  ;;  %11306 = vmatpush1.bf16.msra.mxu1 %v15164_v23  ;;  %v15253_v22 = vld [vmem:[%s21637_s1 + $0x1844] ss:$16 sps:$4 sm:$0xff]   ;;  %v15256_v23 = vld [vmem:[%s21637_s1 + $0x184c] ss:$16 sps:$4 sm:$0xff]  }
 0x2d0   :  { %10282 = vmatprep.subr.bf16.mxu0 %v15169_v24  ;;  %11307 = vmatprep.subr.bf16.mxu1 %v15172_v13  ;;  %v15251_v24 = vld [vmem:[%s21637_s1 + $0x1840] ss:$16 sps:$4 sm:$0xff]   ;;  %v15254_v13 = vld [vmem:[%s21637_s1 + $0x1848] ss:$16 sps:$4 sm:$0xff]  }
 0x2d3   :  { %10283 = vmatpush1.bf16.msra.mxu0 %v15167_v27  ;;  %11308 = vmatpush1.bf16.msra.mxu1 %v15170_v28  ;;  %v15259_v27 = vld [vmem:[%s21637_s1 + $0x1864] ss:$16 sps:$4 sm:$0xff]   ;;  %v15262_v28 = vld [vmem:[%s21637_s1 + $0x186c] ss:$16 sps:$4 sm:$0xff]  }
 0x2d4   :  { %10284 = vmatprep.subr.bf16.mxu0 %v15175_v29  ;;  %11309 = vmatprep.subr.bf16.mxu1 %v15178_v14  ;;  %v15257_v29 = vld [vmem:[%s21637_s1 + $0x1860] ss:$16 sps:$4 sm:$0xff]   ;;  %v15260_v14 = vld [vmem:[%s21637_s1 + $0x1868] ss:$16 sps:$4 sm:$0xff]  }
 0x2d7   :  { %10285 = vmatpush1.bf16.msra.mxu0 %v15173_v30  ;;  %11310 = vmatpush1.bf16.msra.mxu1 %v15176_v31  ;;  %v15265_v30 = vld [vmem:[%s21637_s1 + $0x1884] ss:$16 sps:$4 sm:$0xff]   ;;  %v15268_v31 = vld [vmem:[%s21637_s1 + $0x188c] ss:$16 sps:$4 sm:$0xff]  }
 0x2d8   :  { %10286 = vmatprep.subr.bf16.mxu0 %v15181_v25  ;;  %11311 = vmatprep.subr.bf16.mxu1 %v15184_v32  ;;  %v15263_v25 = vld [vmem:[%s21637_s1 + $0x1880] ss:$16 sps:$4 sm:$0xff]   ;;  %v15266_v32 = vld [vmem:[%s21637_s1 + $0x1888] ss:$16 sps:$4 sm:$0xff]  }
 0x2db   :  { %10287 = vmatpush1.bf16.msra.mxu0 %v15179_v33  ;;  %11312 = vmatpush1.bf16.msra.mxu1 %v15182_v26  ;;  %v15271_v33 = vld [vmem:[%s21637_s1 + $0x18a4] ss:$16 sps:$4 sm:$0xff]   ;;  %v15274_v26 = vld [vmem:[%s21637_s1 + $0x18ac] ss:$16 sps:$4 sm:$0xff]  }
 0x2dc   :  { %10288 = vmatprep.subr.bf16.mxu0 %v15187_v36  ;;  %11313 = vmatprep.subr.bf16.mxu1 %v15190_v37  ;;  %v15269_v36 = vld [vmem:[%s21637_s1 + $0x18a0] ss:$16 sps:$4 sm:$0xff]   ;;  %v15272_v37 = vld [vmem:[%s21637_s1 + $0x18a8] ss:$16 sps:$4 sm:$0xff]  }
 0x2df   :  { %10289 = vmatpush1.bf16.msra.mxu0 %v15185_v21  ;;  %11314 = vmatpush1.bf16.msra.mxu1 %v15188_v39  ;;  %v15277_v21 = vld [vmem:[%s21637_s1 + $0x18c4] ss:$16 sps:$4 sm:$0xff]   ;;  %v15280_v39 = vld [vmem:[%s21637_s1 + $0x18cc] ss:$16 sps:$4 sm:$0xff]  }
 0x2e0   :  { %10290 = vmatprep.subr.bf16.mxu0 %v15193_v40  ;;  %11315 = vmatprep.subr.bf16.mxu1 %v15196_v41  ;;  %v15275_v40 = vld [vmem:[%s21637_s1 + $0x18c0] ss:$16 sps:$4 sm:$0xff]   ;;  %v15278_v41 = vld [vmem:[%s21637_s1 + $0x18c8] ss:$16 sps:$4 sm:$0xff]  }
 0x2e3   :  { %10291 = vmatpush1.bf16.msra.mxu0 %v15191_v34  ;;  %11316 = vmatpush1.bf16.msra.mxu1 %v15194_v43  ;;  %v15283_v34 = vld [vmem:[%s21637_s1 + $0x18e4] ss:$16 sps:$4 sm:$0xff]   ;;  %v15286_v43 = vld [vmem:[%s21637_s1 + $0x18ec] ss:$16 sps:$4 sm:$0xff]  }
 0x2e4   :  { %10292 = vmatprep.subr.bf16.mxu0 %v15199_v45  ;;  %11317 = vmatprep.subr.bf16.mxu1 %v15202_v46  ;;  %v15281_v45 = vld [vmem:[%s21637_s1 + $0x18e0] ss:$16 sps:$4 sm:$0xff]   ;;  %v15284_v46 = vld [vmem:[%s21637_s1 + $0x18e8] ss:$16 sps:$4 sm:$0xff]  }
 0x2e7   :  { %10293 = vmatpush1.bf16.msra.mxu0 %v15197_v35  ;;  %11318 = vmatpush1.bf16.msra.mxu1 %v15200_v50  ;;  %v15289_v35 = vld [vmem:[%s21637_s1 + $0x1904] ss:$16 sps:$4 sm:$0xff]   ;;  %v15292_v50 = vld [vmem:[%s21637_s1 + $0x190c] ss:$16 sps:$4 sm:$0xff]  }
 0x2e8   :  { %10294 = vmatprep.subr.bf16.mxu0 %v15205_v51  ;;  %11319 = vmatprep.subr.bf16.mxu1 %v15208_v53  ;;  %v15287_v51 = vld [vmem:[%s21637_s1 + $0x1900] ss:$16 sps:$4 sm:$0xff]   ;;  %v15290_v53 = vld [vmem:[%s21637_s1 + $0x1908] ss:$16 sps:$4 sm:$0xff]  }
 0x2eb   :  { %10295 = vmatpush1.bf16.msra.mxu0 %v15203_v38  ;;  %11320 = vmatpush1.bf16.msra.mxu1 %v15206_v54  ;;  %v15295_v38 = vld [vmem:[%s21637_s1 + $0x1924] ss:$16 sps:$4 sm:$0xff]   ;;  %v15298_v54 = vld [vmem:[%s21637_s1 + $0x192c] ss:$16 sps:$4 sm:$0xff]  }
 0x2ec   :  { %10296 = vmatprep.subr.bf16.mxu0 %v15211_v55  ;;  %11321 = vmatprep.subr.bf16.mxu1 %v15214_v56  ;;  %v15293_v55 = vld [vmem:[%s21637_s1 + $0x1920] ss:$16 sps:$4 sm:$0xff]   ;;  %v15296_v56 = vld [vmem:[%s21637_s1 + $0x1928] ss:$16 sps:$4 sm:$0xff]  }
 0x2ef   :  { %10297 = vmatpush1.bf16.msra.mxu0 %v15209_v47  ;;  %11322 = vmatpush1.bf16.msra.mxu1 %v15212_v57  ;;  %v15301_v47 = vld [vmem:[%s21637_s1 + $0x1944] ss:$16 sps:$4 sm:$0xff]   ;;  %v15304_v57 = vld [vmem:[%s21637_s1 + $0x194c] ss:$16 sps:$4 sm:$0xff]  }
 0x2f0   :  { %10298 = vmatprep.subr.bf16.mxu0 %v15217_v58  ;;  %11323 = vmatprep.subr.bf16.mxu1 %v15220_v48  ;;  %v15299_v58 = vld [vmem:[%s21637_s1 + $0x1940] ss:$16 sps:$4 sm:$0xff]   ;;  %v15302_v48 = vld [vmem:[%s21637_s1 + $0x1948] ss:$16 sps:$4 sm:$0xff]  }
 0x2f3   :  { %10299 = vmatpush1.bf16.msra.mxu0 %v15215_v61  ;;  %11324 = vmatpush1.bf16.msra.mxu1 %v15218_v62  ;;  %v15307_v61 = vld [vmem:[%s21637_s1 + $0x1964] ss:$16 sps:$4 sm:$0xff]   ;;  %v15310_v62 = vld [vmem:[%s21637_s1 + $0x196c] ss:$16 sps:$4 sm:$0xff]  }
 0x2f4   :  { %10300 = vmatprep.subr.bf16.mxu0 %v15223_v44  ;;  %11325 = vmatprep.subr.bf16.mxu1 %v15226_v0  ;;  %v15305_v44 = vld [vmem:[%s21637_s1 + $0x1960] ss:$16 sps:$4 sm:$0xff]   ;;  %v15308_v0 = vld [vmem:[%s21637_s1 + $0x1968] ss:$16 sps:$4 sm:$0xff]  }
 0x2f7   :  { %10301 = vmatpush1.bf16.msra.mxu0 %v15221_v1  ;;  %11326 = vmatpush1.bf16.msra.mxu1 %v15224_v2  ;;  %v15313_v1 = vld [vmem:[%s21637_s1 + $0x1984] ss:$16 sps:$4 sm:$0xff]   ;;  %v15316_v2 = vld [vmem:[%s21637_s1 + $0x198c] ss:$16 sps:$4 sm:$0xff]  }
 0x2f8   :  { %10302 = vmatprep.subr.bf16.mxu0 %v15229_v59  ;;  %11327 = vmatprep.subr.bf16.mxu1 %v15232_v3  ;;  %v15311_v59 = vld [vmem:[%s21637_s1 + $0x1980] ss:$16 sps:$4 sm:$0xff]   ;;  %v15314_v3 = vld [vmem:[%s21637_s1 + $0x1988] ss:$16 sps:$4 sm:$0xff]  }
 0x2fb   :  { %10303 = vmatpush1.bf16.msra.mxu0 %v15227_v5  ;;  %11328 = vmatpush1.bf16.msra.mxu1 %v15230_v6  ;;  %v15319_v5 = vld [vmem:[%s21637_s1 + $0x19a4] ss:$16 sps:$4 sm:$0xff]   ;;  %v15322_v6 = vld [vmem:[%s21637_s1 + $0x19ac] ss:$16 sps:$4 sm:$0xff]  }
 0x2fc   :  { %10304 = vmatprep.subr.bf16.mxu0 %v15235_v60  ;;  %11329 = vmatprep.subr.bf16.mxu1 %v15238_v9  ;;  %v15317_v60 = vld [vmem:[%s21637_s1 + $0x19a0] ss:$16 sps:$4 sm:$0xff]   ;;  %v15320_v9 = vld [vmem:[%s21637_s1 + $0x19a8] ss:$16 sps:$4 sm:$0xff]  }
 0x2ff   :  { %10305 = vmatpush1.bf16.msra.mxu0 %v15233_v10  ;;  %11330 = vmatpush1.bf16.msra.mxu1 %v15236_v11  ;;  %v15325_v10 = vld [vmem:[%s21637_s1 + $0x19c4] ss:$16 sps:$4 sm:$0xff]   ;;  %v15328_v11 = vld [vmem:[%s21637_s1 + $0x19cc] ss:$16 sps:$4 sm:$0xff]  }
 0x300   :  { %10315 = vmatprep.subr.bf16.mxu0 %v15241_v63  ;;  %11340 = vmatprep.subr.bf16.mxu1 %v15244_v12  ;;  %v15323_v63 = vld [vmem:[%s21637_s1 + $0x19c0] ss:$16 sps:$4 sm:$0xff]   ;;  %v15326_v12 = vld [vmem:[%s21637_s1 + $0x19c8] ss:$16 sps:$4 sm:$0xff]  }
 0x302   :  { %10307 = vmatmul.mubr.bf16.vlgmr.msra.gmra.mrb[0].mxu0 %v1770_v15  ;;  %11332 = vmatmul.mubr.bf16.vlgmr.msra.gmra.mrb[0].mxu1 %v1770_v15  ;;  %v15334_v15 = vld [vmem:[%s21637_s1 + $0x19ec] ss:$16 sps:$4 sm:$0xff]  }
 0x303   :  { %10316 = vmatpush1.bf16.msra.mxu0 %v15239_v7  ;;  %11341 = vmatpush1.bf16.msra.mxu1 %v15242_v16  ;;  %v15329_v7 = vld [vmem:[%s21637_s1 + $0x19e0] ss:$16 sps:$4 sm:$0xff]   ;;  %v15332_v16 = vld [vmem:[%s21637_s1 + $0x19e8] ss:$16 sps:$4 sm:$0xff]  }
 0x304   :  { %10317 = vmatprep.subr.bf16.mxu0 %v15247_v17  ;;  %11342 = vmatprep.subr.bf16.mxu1 %v15250_v8  ;;  %v15337_v17 = vld [vmem:[%s21637_s1 + $0x1a04] ss:$16 sps:$4 sm:$0xff]   ;;  %v15340_v8 = vld [vmem:[%s21637_s1 + $0x1a0c] ss:$16 sps:$4 sm:$0xff]  }
 0x305   :  { %10347 = vmatprep.mubr.bf16.mxu0 %v18999_v18  ;;  %11372 = vmatprep.mubr.bf16.mxu1 %v18999_v18 }
 0x307   :  { %10318 = vmatpush1.bf16.msra.mxu0 %v15245_v19  ;;  %11343 = vmatpush1.bf16.msra.mxu1 %v15248_v20  ;;  %v19185_v19 = vrot.slane %v18956_v4, %v16672_v49  ;;  %v15335_v20 = vld [vmem:[%s21637_s1 + $0x1a00] ss:$16 sps:$4 sm:$0xff]   ;;  %v15346_v4 = vld [vmem:[%s21637_s1 + $0x1a2c] ss:$16 sps:$4 sm:$0xff]  }
 0x308   :  { %10319 = vmatprep.subr.bf16.mxu0 %v15253_v22  ;;  %11344 = vmatprep.subr.bf16.mxu1 %v15256_v23  ;;  %v15338_v22 = vld [vmem:[%s21637_s1 + $0x1a08] ss:$16 sps:$4 sm:$0xff]   ;;  %v15343_v23 = vld [vmem:[%s21637_s1 + $0x1a24] ss:$16 sps:$4 sm:$0xff]  }
 0x30b   :  { %10320 = vmatpush1.bf16.msra.mxu0 %v15251_v24  ;;  %11345 = vmatpush1.bf16.msra.mxu1 %v15254_v13  ;;  %v1820_v24 = vcombine.high %v18999_v18, %v18999_v18  ;;  %v15341_v13 = vld [vmem:[%s21637_s1 + $0x1a20] ss:$16 sps:$4 sm:$0xff]   ;;  %v15349_v18 = vld [vmem:[%s21637_s1 + $0x1a44] ss:$16 sps:$4 sm:$0xff]  }
 0x30c   :  { %10321 = vmatprep.subr.bf16.mxu0 %v15259_v27  ;;  %11346 = vmatprep.subr.bf16.mxu1 %v15262_v28  ;;  %v15344_v27 = vld [vmem:[%s21637_s1 + $0x1a28] ss:$16 sps:$4 sm:$0xff]   ;;  %v15352_v28 = vld [vmem:[%s21637_s1 + $0x1a4c] ss:$16 sps:$4 sm:$0xff]  }
 0x30f   :  { %10322 = vmatpush1.bf16.msra.mxu0 %v15257_v29  ;;  %11347 = vmatpush1.bf16.msra.mxu1 %v15260_v14  ;;  %v15347_v29 = vld [vmem:[%s21637_s1 + $0x1a40] ss:$16 sps:$4 sm:$0xff]   ;;  %v15350_v14 = vld [vmem:[%s21637_s1 + $0x1a48] ss:$16 sps:$4 sm:$0xff]  }
 0x310   :  { %10323 = vmatprep.subr.bf16.mxu0 %v15265_v30  ;;  %11348 = vmatprep.subr.bf16.mxu1 %v15268_v31  ;;  %v15355_v30 = vld [vmem:[%s21637_s1 + $0x1a64] ss:$16 sps:$4 sm:$0xff]   ;;  %v15358_v31 = vld [vmem:[%s21637_s1 + $0x1a6c] ss:$16 sps:$4 sm:$0xff]  }
 0x313   :  { %10324 = vmatpush1.bf16.msra.mxu0 %v15263_v25  ;;  %11349 = vmatpush1.bf16.msra.mxu1 %v15266_v32  ;;  %v15353_v25 = vld [vmem:[%s21637_s1 + $0x1a60] ss:$16 sps:$4 sm:$0xff]   ;;  %v15356_v32 = vld [vmem:[%s21637_s1 + $0x1a68] ss:$16 sps:$4 sm:$0xff]  }
 0x314   :  { %10325 = vmatprep.subr.bf16.mxu0 %v15271_v33  ;;  %11350 = vmatprep.subr.bf16.mxu1 %v15274_v26  ;;  %v15361_v33 = vld [vmem:[%s21637_s1 + $0x1a84] ss:$16 sps:$4 sm:$0xff]   ;;  %v15364_v26 = vld [vmem:[%s21637_s1 + $0x1a8c] ss:$16 sps:$4 sm:$0xff]  }
 0x317   :  { %10326 = vmatpush1.bf16.msra.mxu0 %v15269_v36  ;;  %11351 = vmatpush1.bf16.msra.mxu1 %v15272_v37  ;;  %v15359_v36 = vld [vmem:[%s21637_s1 + $0x1a80] ss:$16 sps:$4 sm:$0xff]   ;;  %v15362_v37 = vld [vmem:[%s21637_s1 + $0x1a88] ss:$16 sps:$4 sm:$0xff]  }
 0x318   :  { %10327 = vmatprep.subr.bf16.mxu0 %v15277_v21  ;;  %11352 = vmatprep.subr.bf16.mxu1 %v15280_v39  ;;  %v15367_v21 = vld [vmem:[%s21637_s1 + $0x1aa4] ss:$16 sps:$4 sm:$0xff]   ;;  %v15370_v39 = vld [vmem:[%s21637_s1 + $0x1aac] ss:$16 sps:$4 sm:$0xff]  }
 0x31b   :  { %10328 = vmatpush1.bf16.msra.mxu0 %v15275_v40  ;;  %11353 = vmatpush1.bf16.msra.mxu1 %v15278_v41  ;;  %v15365_v40 = vld [vmem:[%s21637_s1 + $0x1aa0] ss:$16 sps:$4 sm:$0xff]   ;;  %v15368_v41 = vld [vmem:[%s21637_s1 + $0x1aa8] ss:$16 sps:$4 sm:$0xff]  }
 0x31c   :  { %10329 = vmatprep.subr.bf16.mxu0 %v15283_v34  ;;  %11354 = vmatprep.subr.bf16.mxu1 %v15286_v43  ;;  %v15373_v34 = vld [vmem:[%s21637_s1 + $0x1ac4] ss:$16 sps:$4 sm:$0xff]   ;;  %v15376_v43 = vld [vmem:[%s21637_s1 + $0x1acc] ss:$16 sps:$4 sm:$0xff]  }
 0x31f   :  { %10330 = vmatpush1.bf16.msra.mxu0 %v15281_v45  ;;  %11355 = vmatpush1.bf16.msra.mxu1 %v15284_v46  ;;  %v15371_v45 = vld [vmem:[%s21637_s1 + $0x1ac0] ss:$16 sps:$4 sm:$0xff]   ;;  %v15374_v46 = vld [vmem:[%s21637_s1 + $0x1ac8] ss:$16 sps:$4 sm:$0xff]  }
 0x320   :  { %10331 = vmatprep.subr.bf16.mxu0 %v15289_v35  ;;  %11356 = vmatprep.subr.bf16.mxu1 %v15292_v50  ;;  %v15379_v35 = vld [vmem:[%s21637_s1 + $0x1ae4] ss:$16 sps:$4 sm:$0xff]   ;;  %v15382_v50 = vld [vmem:[%s21637_s1 + $0x1aec] ss:$16 sps:$4 sm:$0xff]  }
 0x323   :  { %10332 = vmatpush1.bf16.msra.mxu0 %v15287_v51  ;;  %11357 = vmatpush1.bf16.msra.mxu1 %v15290_v53  ;;  %v15377_v51 = vld [vmem:[%s21637_s1 + $0x1ae0] ss:$16 sps:$4 sm:$0xff]   ;;  %v15380_v53 = vld [vmem:[%s21637_s1 + $0x1ae8] ss:$16 sps:$4 sm:$0xff]  }
 0x324   :  { %10333 = vmatprep.subr.bf16.mxu0 %v15295_v38  ;;  %11358 = vmatprep.subr.bf16.mxu1 %v15298_v54  ;;  %v15385_v38 = vld [vmem:[%s21637_s1 + $0x1b04] ss:$16 sps:$4 sm:$0xff]   ;;  %v15388_v54 = vld [vmem:[%s21637_s1 + $0x1b0c] ss:$16 sps:$4 sm:$0xff]  }
 0x327   :  { %10334 = vmatpush1.bf16.msra.mxu0 %v15293_v55  ;;  %11359 = vmatpush1.bf16.msra.mxu1 %v15296_v56  ;;  %v15383_v55 = vld [vmem:[%s21637_s1 + $0x1b00] ss:$16 sps:$4 sm:$0xff]   ;;  %v15386_v56 = vld [vmem:[%s21637_s1 + $0x1b08] ss:$16 sps:$4 sm:$0xff]  }
 0x328   :  { %10335 = vmatprep.subr.bf16.mxu0 %v15301_v47  ;;  %11360 = vmatprep.subr.bf16.mxu1 %v15304_v57  ;;  %v15391_v47 = vld [vmem:[%s21637_s1 + $0x1b24] ss:$16 sps:$4 sm:$0xff]   ;;  %v15394_v57 = vld [vmem:[%s21637_s1 + $0x1b2c] ss:$16 sps:$4 sm:$0xff]  }
 0x32b   :  { %10336 = vmatpush1.bf16.msra.mxu0 %v15299_v58  ;;  %11361 = vmatpush1.bf16.msra.mxu1 %v15302_v48  ;;  %v15389_v58 = vld [vmem:[%s21637_s1 + $0x1b20] ss:$16 sps:$4 sm:$0xff]   ;;  %v15392_v48 = vld [vmem:[%s21637_s1 + $0x1b28] ss:$16 sps:$4 sm:$0xff]  }
 0x32c   :  { %10337 = vmatprep.subr.bf16.mxu0 %v15307_v61  ;;  %11362 = vmatprep.subr.bf16.mxu1 %v15310_v62  ;;  %v15397_v61 = vld [vmem:[%s21637_s1 + $0x1b44] ss:$16 sps:$4 sm:$0xff]   ;;  %v15400_v62 = vld [vmem:[%s21637_s1 + $0x1b4c] ss:$16 sps:$4 sm:$0xff]  }
 0x32f   :  { %10338 = vmatpush1.bf16.msra.mxu0 %v15305_v44  ;;  %11363 = vmatpush1.bf16.msra.mxu1 %v15308_v0  ;;  %v15395_v44 = vld [vmem:[%s21637_s1 + $0x1b40] ss:$16 sps:$4 sm:$0xff]   ;;  %v15398_v0 = vld [vmem:[%s21637_s1 + $0x1b48] ss:$16 sps:$4 sm:$0xff]  }
 0x330   :  { %10339 = vmatprep.subr.bf16.mxu0 %v15313_v1  ;;  %11364 = vmatprep.subr.bf16.mxu1 %v15316_v2  ;;  %v15403_v1 = vld [vmem:[%s21637_s1 + $0x1b64] ss:$16 sps:$4 sm:$0xff]   ;;  %v15406_v2 = vld [vmem:[%s21637_s1 + $0x1b6c] ss:$16 sps:$4 sm:$0xff]  }
 0x333   :  { %10340 = vmatpush1.bf16.msra.mxu0 %v15311_v59  ;;  %11365 = vmatpush1.bf16.msra.mxu1 %v15314_v3  ;;  %v15401_v59 = vld [vmem:[%s21637_s1 + $0x1b60] ss:$16 sps:$4 sm:$0xff]   ;;  %v15404_v3 = vld [vmem:[%s21637_s1 + $0x1b68] ss:$16 sps:$4 sm:$0xff]  }
 0x334   :  { %10341 = vmatprep.subr.bf16.mxu0 %v15319_v5  ;;  %11366 = vmatprep.subr.bf16.mxu1 %v15322_v6  ;;  %v15409_v5 = vld [vmem:[%s21637_s1 + $0x1b84] ss:$16 sps:$4 sm:$0xff]   ;;  %v15412_v6 = vld [vmem:[%s21637_s1 + $0x1b8c] ss:$16 sps:$4 sm:$0xff]  }
 0x337   :  { %10342 = vmatpush1.bf16.msra.mxu0 %v15317_v60  ;;  %11367 = vmatpush1.bf16.msra.mxu1 %v15320_v9  ;;  %v15407_v60 = vld [vmem:[%s21637_s1 + $0x1b80] ss:$16 sps:$4 sm:$0xff]   ;;  %v15410_v9 = vld [vmem:[%s21637_s1 + $0x1b88] ss:$16 sps:$4 sm:$0xff]  }
 0x338   :  { %10343 = vmatprep.subr.bf16.mxu0 %v15325_v10  ;;  %11368 = vmatprep.subr.bf16.mxu1 %v15328_v11  ;;  %v15415_v10 = vld [vmem:[%s21637_s1 + $0x1ba4] ss:$16 sps:$4 sm:$0xff]   ;;  %v15418_v11 = vld [vmem:[%s21637_s1 + $0x1bac] ss:$16 sps:$4 sm:$0xff]  }
 0x33b   :  { %10344 = vmatpush1.bf16.msra.mxu0 %v15323_v63  ;;  %11369 = vmatpush1.bf16.msra.mxu1 %v15326_v12 }
 0x33c   :  { %10345 = vmatprep.subr.bf16.mxu0 %v15331_v52  ;;  %11370 = vmatprep.subr.bf16.mxu1 %v15334_v15 }
 0x33f   :  { %10346 = vmatpush1.bf16.msra.mxu0 %v15329_v7  ;;  %11371 = vmatpush1.bf16.msra.mxu1 %v15332_v16 }
 0x340   :  { %10356 = vmatprep.subr.bf16.mxu0 %v15337_v17  ;;  %11381 = vmatprep.subr.bf16.mxu1 %v15340_v8 }
 0x342   :  { %10348 = vmatmul.mubr.bf16.vlgmr.msra.gmra.mrb[0].mxu0 %v19185_v19  ;;  %11373 = vmatmul.mubr.bf16.vlgmr.msra.gmra.mrb[0].mxu1 %v19185_v19 }
 0x343   :  { %10357 = vmatpush1.bf16.msra.mxu0 %v15335_v20  ;;  %11382 = vmatpush1.bf16.msra.mxu1 %v15338_v22 }
 0x344   :  { %10358 = vmatprep.subr.bf16.mxu0 %v15343_v23  ;;  %11383 = vmatprep.subr.bf16.mxu1 %v15346_v4 }
 0x345   :  { %10388 = vmatprep.mubr.bf16.mxu0 %v1820_v24  ;;  %11413 = vmatprep.mubr.bf16.mxu1 %v1820_v24 }
 0x347   :  { %10359 = vmatpush1.bf16.msra.mxu0 %v15341_v13  ;;  %11384 = vmatpush1.bf16.msra.mxu1 %v15344_v27 }
 0x348   :  { %10360 = vmatprep.subr.bf16.mxu0 %v15349_v18  ;;  %11385 = vmatprep.subr.bf16.mxu1 %v15352_v28 }
 0x34b   :  { %10361 = vmatpush1.bf16.msra.mxu0 %v15347_v29  ;;  %11386 = vmatpush1.bf16.msra.mxu1 %v15350_v14 }
 0x34c   :  { %10362 = vmatprep.subr.bf16.mxu0 %v15355_v30  ;;  %11387 = vmatprep.subr.bf16.mxu1 %v15358_v31 }
 0x34f   :  { %10363 = vmatpush1.bf16.msra.mxu0 %v15353_v25  ;;  %11388 = vmatpush1.bf16.msra.mxu1 %v15356_v32 }
 0x350   :  { %10364 = vmatprep.subr.bf16.mxu0 %v15361_v33  ;;  %11389 = vmatprep.subr.bf16.mxu1 %v15364_v26 }
 0x353   :  { %10365 = vmatpush1.bf16.msra.mxu0 %v15359_v36  ;;  %11390 = vmatpush1.bf16.msra.mxu1 %v15362_v37 }
 0x354   :  { %10366 = vmatprep.subr.bf16.mxu0 %v15367_v21  ;;  %11391 = vmatprep.subr.bf16.mxu1 %v15370_v39 }
 0x357   :  { %10367 = vmatpush1.bf16.msra.mxu0 %v15365_v40  ;;  %11392 = vmatpush1.bf16.msra.mxu1 %v15368_v41 }
 0x358   :  { %10368 = vmatprep.subr.bf16.mxu0 %v15373_v34  ;;  %11393 = vmatprep.subr.bf16.mxu1 %v15376_v43 }
 0x35b   :  { %10369 = vmatpush1.bf16.msra.mxu0 %v15371_v45  ;;  %11394 = vmatpush1.bf16.msra.mxu1 %v15374_v46 }
 0x35c   :  { %10370 = vmatprep.subr.bf16.mxu0 %v15379_v35  ;;  %11395 = vmatprep.subr.bf16.mxu1 %v15382_v50 }
 0x35f   :  { %10371 = vmatpush1.bf16.msra.mxu0 %v15377_v51  ;;  %11396 = vmatpush1.bf16.msra.mxu1 %v15380_v53 }
 0x360   :  { %10372 = vmatprep.subr.bf16.mxu0 %v15385_v38  ;;  %11397 = vmatprep.subr.bf16.mxu1 %v15388_v54 }
 0x363   :  { %10373 = vmatpush1.bf16.msra.mxu0 %v15383_v55  ;;  %11398 = vmatpush1.bf16.msra.mxu1 %v15386_v56 }
 0x364   :  { %10374 = vmatprep.subr.bf16.mxu0 %v15391_v47  ;;  %11399 = vmatprep.subr.bf16.mxu1 %v15394_v57 }
 0x367   :  { %10375 = vmatpush1.bf16.msra.mxu0 %v15389_v58  ;;  %11400 = vmatpush1.bf16.msra.mxu1 %v15392_v48 }
 0x368   :  { %10376 = vmatprep.subr.bf16.mxu0 %v15397_v61  ;;  %11401 = vmatprep.subr.bf16.mxu1 %v15400_v62 }
 0x36b   :  { %10377 = vmatpush1.bf16.msra.mxu0 %v15395_v44  ;;  %11402 = vmatpush1.bf16.msra.mxu1 %v15398_v0 }
 0x36c   :  { %10378 = vmatprep.subr.bf16.mxu0 %v15403_v1  ;;  %11403 = vmatprep.subr.bf16.mxu1 %v15406_v2 }
 0x36f   :  { %10379 = vmatpush1.bf16.msra.mxu0 %v15401_v59  ;;  %11404 = vmatpush1.bf16.msra.mxu1 %v15404_v3 }
 0x370   :  { %10380 = vmatprep.subr.bf16.mxu0 %v15409_v5  ;;  %11405 = vmatprep.subr.bf16.mxu1 %v15412_v6 }
 0x371   :  { %10 = vsyncpa [#allocation3], 0  ;;  %v15413_v63 = vld [vmem:[%s21637_s1 + $0x1ba0] ss:$16 sps:$4 sm:$0xff]   ;;  %v15416_v12 = vld [vmem:[%s21637_s1 + $0x1ba8] ss:$16 sps:$4 sm:$0xff]   ;;  %v1818_v28 = vcombine.high %v19185_v19, %v19185_v19 }
 0x372   :  { %v15421_v52 = vld [vmem:[%s21637_s1 + $0x1bc4] ss:$16 sps:$4 sm:$0xff]   ;;  %v15424_v15 = vld [vmem:[%s21637_s1 + $0x1bcc] ss:$16 sps:$4 sm:$0xff]   ;;  %v15419_v17 = vld [vmem:[%s21637_s1 + $0x1bc0] ss:$16 sps:$4 sm:$0xff]  }
 0x373   :  { %10381 = vmatpush1.bf16.msra.mxu0 %v15407_v60  ;;  %11406 = vmatpush1.bf16.msra.mxu1 %v15410_v9  ;;  %v16476_v7 = vld [vmem:[%s21636_s0 + $0x18] sm:$0xff]  ;;  %v15427_v20 = vld [vmem:[%s21637_s1 + $0x1be4] ss:$16 sps:$4 sm:$0xff]   ;;  %v15425_v4 = vld [vmem:[%s21637_s1 + $0x1be0] ss:$16 sps:$4 sm:$0xff]   ;;  %s16506_s9 = smov [#allocation2]  }
 0x374   :  { %10382 = vmatprep.subr.bf16.mxu0 %v15415_v10  ;;  %11407 = vmatprep.subr.bf16.mxu1 %v15418_v11  ;;  %v1773_v16 = vcombine.high %v16476_v7, %v16476_v7  ;;  %v15422_v8 = vld [vmem:[%s21637_s1 + $0x1bc8] ss:$16 sps:$4 sm:$0xff]   ;;  %v15430_v22 = vld [vmem:[%s21637_s1 + $0x1bec] ss:$16 sps:$4 sm:$0xff]   ;;  %v15433_v13 = vld [vmem:[%s21637_s1 + $0x1c04] ss:$16 sps:$4 sm:$0xff]  }
 0x375   :  { %v15428_v24 = vld [vmem:[%s21637_s1 + $0x1be8] ss:$16 sps:$4 sm:$0xff]   ;;  %v15436_v27 = vld [vmem:[%s21637_s1 + $0x1c0c] ss:$16 sps:$4 sm:$0xff]   ;;  %v15431_v29 = vld [vmem:[%s21637_s1 + $0x1c00] ss:$16 sps:$4 sm:$0xff]  }
 0x376   :  { %v19375_v23 = vrot.slane %v1773_v16, %v16672_v49  ;;  %v15434_v14 = vld [vmem:[%s21637_s1 + $0x1c08] ss:$16 sps:$4 sm:$0xff]   ;;  %v15439_v30 = vld [vmem:[%s21637_s1 + $0x1c24] ss:$16 sps:$4 sm:$0xff]   ;;  %v15442_v19 = vld [vmem:[%s21637_s1 + $0x1c2c] ss:$16 sps:$4 sm:$0xff]  }
 0x377   :  { %10383 = vmatpush1.bf16.msra.mxu0 %v15413_v63  ;;  %11408 = vmatpush1.bf16.msra.mxu1 %v15416_v12  ;;  %v15437_v25 = vld [vmem:[%s21637_s1 + $0x1c20] ss:$16 sps:$4 sm:$0xff]   ;;  %v15440_v32 = vld [vmem:[%s21637_s1 + $0x1c28] ss:$16 sps:$4 sm:$0xff]   ;;  %v15445_v33 = vld [vmem:[%s21637_s1 + $0x1c44] ss:$16 sps:$4 sm:$0xff]  }
 0x378   :  { %10384 = vmatprep.subr.bf16.mxu0 %v15421_v52  ;;  %11409 = vmatprep.subr.bf16.mxu1 %v15424_v15  ;;  %v1789_v18 = vcombine.high %v19375_v23, %v19375_v23  ;;  %v15448_v26 = vld [vmem:[%s21637_s1 + $0x1c4c] ss:$16 sps:$4 sm:$0xff]   ;;  %v15443_v36 = vld [vmem:[%s21637_s1 + $0x1c40] ss:$16 sps:$4 sm:$0xff]   ;;  %v15446_v37 = vld [vmem:[%s21637_s1 + $0x1c48] ss:$16 sps:$4 sm:$0xff]  }
 0x379   :  { %v15451_v21 = vld [vmem:[%s21637_s1 + $0x1c64] ss:$16 sps:$4 sm:$0xff]   ;;  %v15454_v39 = vld [vmem:[%s21637_s1 + $0x1c6c] ss:$16 sps:$4 sm:$0xff]   ;;  %v15449_v40 = vld [vmem:[%s21637_s1 + $0x1c60] ss:$16 sps:$4 sm:$0xff]  }
 0x37a   :  { %v19406_v31 = vrot.slane %v1789_v18, %v16672_v49  ;;  %v15452_v41 = vld [vmem:[%s21637_s1 + $0x1c68] ss:$16 sps:$4 sm:$0xff]   ;;  %v15457_v34 = vld [vmem:[%s21637_s1 + $0x1c84] ss:$16 sps:$4 sm:$0xff]   ;;  %v15460_v43 = vld [vmem:[%s21637_s1 + $0x1c8c] ss:$16 sps:$4 sm:$0xff]  }
 0x37b   :  { %10385 = vmatpush1.bf16.msra.mxu0 %v15419_v17  ;;  %11410 = vmatpush1.bf16.msra.mxu1 %v15422_v8  ;;  %v15455_v45 = vld [vmem:[%s21637_s1 + $0x1c80] ss:$16 sps:$4 sm:$0xff]   ;;  %v15458_v46 = vld [vmem:[%s21637_s1 + $0x1c88] ss:$16 sps:$4 sm:$0xff]   ;;  %v15463_v35 = vld [vmem:[%s21637_s1 + $0x1ca4] ss:$16 sps:$4 sm:$0xff]  }
 0x37c   :  { %10386 = vmatprep.subr.bf16.mxu0 %v15427_v20  ;;  %11411 = vmatprep.subr.bf16.mxu1 %v15430_v22  ;;  %v15466_v50 = vld [vmem:[%s21637_s1 + $0x1cac] ss:$16 sps:$4 sm:$0xff]   ;;  %v15461_v51 = vld [vmem:[%s21637_s1 + $0x1ca0] ss:$16 sps:$4 sm:$0xff]   ;;  %v15464_v53 = vld [vmem:[%s21637_s1 + $0x1ca8] ss:$16 sps:$4 sm:$0xff]  }
 0x37d   :  { %v15469_v38 = vld [vmem:[%s21637_s1 + $0x1cc4] ss:$16 sps:$4 sm:$0xff]   ;;  %v15472_v54 = vld [vmem:[%s21637_s1 + $0x1ccc] ss:$16 sps:$4 sm:$0xff]   ;;  %v15467_v55 = vld [vmem:[%s21637_s1 + $0x1cc0] ss:$16 sps:$4 sm:$0xff]  }
 0x37e   :  { %v15470_v56 = vld [vmem:[%s21637_s1 + $0x1cc8] ss:$16 sps:$4 sm:$0xff]   ;;  %v15475_v47 = vld [vmem:[%s21637_s1 + $0x1ce4] ss:$16 sps:$4 sm:$0xff]   ;;  %v15478_v57 = vld [vmem:[%s21637_s1 + $0x1cec] ss:$16 sps:$4 sm:$0xff]  }
 0x37f   :  { %10387 = vmatpush1.bf16.msra.mxu0 %v15425_v4  ;;  %11412 = vmatpush1.bf16.msra.mxu1 %v15428_v24  ;;  %v15473_v58 = vld [vmem:[%s21637_s1 + $0x1ce0] ss:$16 sps:$4 sm:$0xff]   ;;  %v15476_v48 = vld [vmem:[%s21637_s1 + $0x1ce8] ss:$16 sps:$4 sm:$0xff]   ;;  %v15481_v61 = vld [vmem:[%s21637_s1 + $0x1d04] ss:$16 sps:$4 sm:$0xff]  }
 0x380   :  { %10397 = vmatprep.subr.bf16.mxu0 %v15433_v13  ;;  %11422 = vmatprep.subr.bf16.mxu1 %v15436_v27  ;;  %v15484_v62 = vld [vmem:[%s21637_s1 + $0x1d0c] ss:$16 sps:$4 sm:$0xff]   ;;  %v15479_v44 = vld [vmem:[%s21637_s1 + $0x1d00] ss:$16 sps:$4 sm:$0xff]   ;;  %v15482_v0 = vld [vmem:[%s21637_s1 + $0x1d08] ss:$16 sps:$4 sm:$0xff]  }
 0x381   :  { %v15487_v1 = vld [vmem:[%s21637_s1 + $0x1d24] ss:$16 sps:$4 sm:$0xff]   ;;  %v15490_v2 = vld [vmem:[%s21637_s1 + $0x1d2c] ss:$16 sps:$4 sm:$0xff]   ;;  %v15485_v59 = vld [vmem:[%s21637_s1 + $0x1d20] ss:$16 sps:$4 sm:$0xff]  }
 0x382   :  { %10389 = vmatmul.mubr.bf16.vlgmr.msra.gmra.mrb[0].mxu0 %v1818_v28  ;;  %11414 = vmatmul.mubr.bf16.vlgmr.msra.gmra.mrb[0].mxu1 %v1818_v28  ;;  %v15488_v3 = vld [vmem:[%s21637_s1 + $0x1d28] ss:$16 sps:$4 sm:$0xff]   ;;  %v15493_v5 = vld [vmem:[%s21637_s1 + $0x1d44] ss:$16 sps:$4 sm:$0xff]   ;;  %v15496_v6 = vld [vmem:[%s21637_s1 + $0x1d4c] ss:$16 sps:$4 sm:$0xff]  }
 0x383   :  { %10398 = vmatpush1.bf16.msra.mxu0 %v15431_v29  ;;  %11423 = vmatpush1.bf16.msra.mxu1 %v15434_v14  ;;  %v15491_v60 = vld [vmem:[%s21637_s1 + $0x1d40] ss:$16 sps:$4 sm:$0xff]   ;;  %v15494_v9 = vld [vmem:[%s21637_s1 + $0x1d48] ss:$16 sps:$4 sm:$0xff]   ;;  %v15499_v10 = vld [vmem:[%s21637_s1 + $0x1d64] ss:$16 sps:$4 sm:$0xff]  }
 0x384   :  { %10399 = vmatprep.subr.bf16.mxu0 %v15439_v30  ;;  %11424 = vmatprep.subr.bf16.mxu1 %v15442_v19  ;;  %v15502_v11 = vld [vmem:[%s21637_s1 + $0x1d6c] ss:$16 sps:$4 sm:$0xff]   ;;  %v15497_v63 = vld [vmem:[%s21637_s1 + $0x1d60] ss:$16 sps:$4 sm:$0xff]   ;;  %v15500_v12 = vld [vmem:[%s21637_s1 + $0x1d68] ss:$16 sps:$4 sm:$0xff]  }
 0x385   :  { %10429 = vmatprep.mubr.bf16.mxu0 %v19406_v31  ;;  %11454 = vmatprep.mubr.bf16.mxu1 %v19406_v31  ;;  %v15505_v52 = vld [vmem:[%s21637_s1 + $0x1d84] ss:$16 sps:$4 sm:$0xff]   ;;  %v15508_v15 = vld [vmem:[%s21637_s1 + $0x1d8c] ss:$16 sps:$4 sm:$0xff]   ;;  %v15503_v7 = vld [vmem:[%s21637_s1 + $0x1d80] ss:$16 sps:$4 sm:$0xff]  }
 0x386   :  { %v15506_v16 = vld [vmem:[%s21637_s1 + $0x1d88] ss:$16 sps:$4 sm:$0xff]   ;;  %v15511_v17 = vld [vmem:[%s21637_s1 + $0x1da4] ss:$16 sps:$4 sm:$0xff]   ;;  %v15514_v8 = vld [vmem:[%s21637_s1 + $0x1dac] ss:$16 sps:$4 sm:$0xff]  }
 0x387   :  { %10400 = vmatpush1.bf16.msra.mxu0 %v15437_v25  ;;  %11425 = vmatpush1.bf16.msra.mxu1 %v15440_v32  ;;  %v15509_v20 = vld [vmem:[%s21637_s1 + $0x1da0] ss:$16 sps:$4 sm:$0xff]   ;;  %v15512_v22 = vld [vmem:[%s21637_s1 + $0x1da8] ss:$16 sps:$4 sm:$0xff]   ;;  %v15517_v4 = vld [vmem:[%s21637_s1 + $0x1dc4] ss:$16 sps:$4 sm:$0xff]   ;;  %v19592_v25 = vrot.slane %v19375_v23, %v16672_v49 }
 0x388   :  { %10401 = vmatprep.subr.bf16.mxu0 %v15445_v33  ;;  %11426 = vmatprep.subr.bf16.mxu1 %v15448_v26  ;;  %v15520_v24 = vld [vmem:[%s21637_s1 + $0x1dcc] ss:$16 sps:$4 sm:$0xff]   ;;  %v15515_v13 = vld [vmem:[%s21637_s1 + $0x1dc0] ss:$16 sps:$4 sm:$0xff]   ;;  %v15518_v27 = vld [vmem:[%s21637_s1 + $0x1dc8] ss:$16 sps:$4 sm:$0xff]  }
 0x389   :  { %v15523_v18 = vld [vmem:[%s21637_s1 + $0x1de4] ss:$16 sps:$4 sm:$0xff]   ;;  %v15526_v28 = vld [vmem:[%s21637_s1 + $0x1dec] ss:$16 sps:$4 sm:$0xff]   ;;  %v15521_v29 = vld [vmem:[%s21637_s1 + $0x1de0] ss:$16 sps:$4 sm:$0xff]  }
 0x38a   :  { %v15524_v14 = vld [vmem:[%s21637_s1 + $0x1de8] ss:$16 sps:$4 sm:$0xff]   ;;  %v15530_v30 = vld [vmem:[%s21637_s1 + $0x1e04] ss:$16 sps:$4 sm:$0xff]   ;;  %v15533_v19 = vld [vmem:[%s21637_s1 + $0x1e0c] ss:$16 sps:$4 sm:$0xff]  }
 0x38b   :  { %10402 = vmatpush1.bf16.msra.mxu0 %v15443_v36  ;;  %11427 = vmatpush1.bf16.msra.mxu1 %v15446_v37  ;;  %v15528_v32 = vld [vmem:[%s21637_s1 + $0x1e00] ss:$16 sps:$4 sm:$0xff]   ;;  %v15531_v33 = vld [vmem:[%s21637_s1 + $0x1e08] ss:$16 sps:$4 sm:$0xff]   ;;  %v15536_v26 = vld [vmem:[%s21637_s1 + $0x1e24] ss:$16 sps:$4 sm:$0xff]   ;;  %v1821_v36 = vcombine.high %v19406_v31, %v19406_v31 }
 0x38c   :  { %10403 = vmatprep.subr.bf16.mxu0 %v15451_v21  ;;  %11428 = vmatprep.subr.bf16.mxu1 %v15454_v39  ;;  %v15539_v23 = vld [vmem:[%s21637_s1 + $0x1e2c] ss:$16 sps:$4 sm:$0xff]   ;;  %v15534_v37 = vld [vmem:[%s21637_s1 + $0x1e20] ss:$16 sps:$4 sm:$0xff]   ;;  %v15537_v21 = vld [vmem:[%s21637_s1 + $0x1e28] ss:$16 sps:$4 sm:$0xff]  }
 0x38d   :  { %v15542_v31 = vld [vmem:[%s21637_s1 + $0x1e44] ss:$16 sps:$4 sm:$0xff]   ;;  %v15545_v39 = vld [vmem:[%s21637_s1 + $0x1e4c] ss:$16 sps:$4 sm:$0xff]   ;;  %s12231_s10 = sshll.u32 %s16506_s9, 4  ;;  %s12232_s10 = int_to_ptr.vmem [resolvable:$true] %s12231_s10 }
 0x38e   :  { %s16480_s11 = scalar_lea.vmem %s12232_s10, 32  ;;  %p16485_p1 = scmp.lt.s32.totalorder %s12232_s10, %s12232_s10 }
 0x38f   :  { %10404 = vmatpush1.bf16.msra.mxu0 %v15449_v40  ;;  %11429 = vmatpush1.bf16.msra.mxu1 %v15452_v41  ;;  %v15540_v40 = vld [vmem:[%s21637_s1 + $0x1e40] ss:$16 sps:$4 sm:$0xff]   ;;  %v15543_v41 = vld [vmem:[%s21637_s1 + $0x1e48] ss:$16 sps:$4 sm:$0xff]   ;;  %p16481_p0 = scmp.ne.s32.totalorder %s12232_s10, %s16480_s11  ;;  %p16486_p2 = scmp.lt.s32.totalorder %s16480_s11, %s16480_s11 }
 0x390   :  { %10405 = vmatprep.subr.bf16.mxu0 %v15457_v34  ;;  %11430 = vmatprep.subr.bf16.mxu1 %v15460_v43  ;;  %v15548_v34 = vld [vmem:[%s21637_s1 + $0x1e64] ss:$16 sps:$4 sm:$0xff]   ;;  %v15551_v43 = vld [vmem:[%s21637_s1 + $0x1e6c] ss:$16 sps:$4 sm:$0xff]  }
 0x391   :  { %p16487_p3 = por %p16486_p2, %p16485_p1 }
 0x393   :  { %10406 = vmatpush1.bf16.msra.mxu0 %v15455_v45  ;;  %11431 = vmatpush1.bf16.msra.mxu1 %v15458_v46  ;;  %v15546_v45 = vld [vmem:[%s21637_s1 + $0x1e60] ss:$16 sps:$4 sm:$0xff]   ;;  %v15549_v46 = vld [vmem:[%s21637_s1 + $0x1e68] ss:$16 sps:$4 sm:$0xff]   ;;  %p16488_p4 = pnand %p16487_p3, %p16481_p0 }
 0x394   :  { %10407 = vmatprep.subr.bf16.mxu0 %v15463_v35  ;;  %11432 = vmatprep.subr.bf16.mxu1 %v15466_v50  ;;  %v15554_v35 = vld [vmem:[%s21637_s1 + $0x1e84] ss:$16 sps:$4 sm:$0xff]   ;;  %v15557_v50 = vld [vmem:[%s21637_s1 + $0x1e8c] ss:$16 sps:$4 sm:$0xff]  }
 0x397   :  { %10408 = vmatpush1.bf16.msra.mxu0 %v15461_v51  ;;  %11433 = vmatpush1.bf16.msra.mxu1 %v15464_v53  ;;  %v15552_v51 = vld [vmem:[%s21637_s1 + $0x1e80] ss:$16 sps:$4 sm:$0xff]   ;;  %v15555_v53 = vld [vmem:[%s21637_s1 + $0x1e88] ss:$16 sps:$4 sm:$0xff]  }
 0x398   :  { %10409 = vmatprep.subr.bf16.mxu0 %v15469_v38  ;;  %11434 = vmatprep.subr.bf16.mxu1 %v15472_v54  ;;  %v15560_v38 = vld [vmem:[%s21637_s1 + $0x1ea4] ss:$16 sps:$4 sm:$0xff]   ;;  %v15563_v54 = vld [vmem:[%s21637_s1 + $0x1eac] ss:$16 sps:$4 sm:$0xff]  }
 0x39b   :  { %10410 = vmatpush1.bf16.msra.mxu0 %v15467_v55  ;;  %11435 = vmatpush1.bf16.msra.mxu1 %v15470_v56  ;;  %v15558_v55 = vld [vmem:[%s21637_s1 + $0x1ea0] ss:$16 sps:$4 sm:$0xff]   ;;  %v15561_v56 = vld [vmem:[%s21637_s1 + $0x1ea8] ss:$16 sps:$4 sm:$0xff]  }
 0x39c   :  { %10411 = vmatprep.subr.bf16.mxu0 %v15475_v47  ;;  %11436 = vmatprep.subr.bf16.mxu1 %v15478_v57  ;;  %v15566_v47 = vld [vmem:[%s21637_s1 + $0x1ec4] ss:$16 sps:$4 sm:$0xff]   ;;  %v15569_v57 = vld [vmem:[%s21637_s1 + $0x1ecc] ss:$16 sps:$4 sm:$0xff]  }
 0x39f   :  { %10412 = vmatpush1.bf16.msra.mxu0 %v15473_v58  ;;  %11437 = vmatpush1.bf16.msra.mxu1 %v15476_v48  ;;  %v15564_v58 = vld [vmem:[%s21637_s1 + $0x1ec0] ss:$16 sps:$4 sm:$0xff]   ;;  %v15567_v48 = vld [vmem:[%s21637_s1 + $0x1ec8] ss:$16 sps:$4 sm:$0xff]  }
 0x3a0   :  { %10413 = vmatprep.subr.bf16.mxu0 %v15481_v61  ;;  %11438 = vmatprep.subr.bf16.mxu1 %v15484_v62  ;;  %v15572_v61 = vld [vmem:[%s21637_s1 + $0x1ee4] ss:$16 sps:$4 sm:$0xff]   ;;  %v15575_v62 = vld [vmem:[%s21637_s1 + $0x1eec] ss:$16 sps:$4 sm:$0xff]  }
 0x3a3   :  { %10414 = vmatpush1.bf16.msra.mxu0 %v15479_v44  ;;  %11439 = vmatpush1.bf16.msra.mxu1 %v15482_v0  ;;  %v15570_v44 = vld [vmem:[%s21637_s1 + $0x1ee0] ss:$16 sps:$4 sm:$0xff]   ;;  %v15573_v0 = vld [vmem:[%s21637_s1 + $0x1ee8] ss:$16 sps:$4 sm:$0xff]  }
 0x3a4   :  { %10415 = vmatprep.subr.bf16.mxu0 %v15487_v1  ;;  %11440 = vmatprep.subr.bf16.mxu1 %v15490_v2  ;;  %v15578_v1 = vld [vmem:[%s21637_s1 + $0x1f04] ss:$16 sps:$4 sm:$0xff]   ;;  %v15581_v2 = vld [vmem:[%s21637_s1 + $0x1f0c] ss:$16 sps:$4 sm:$0xff]  }
 0x3a7   :  { %10416 = vmatpush1.bf16.msra.mxu0 %v15485_v59  ;;  %11441 = vmatpush1.bf16.msra.mxu1 %v15488_v3  ;;  %v15576_v59 = vld [vmem:[%s21637_s1 + $0x1f00] ss:$16 sps:$4 sm:$0xff]   ;;  %v15579_v3 = vld [vmem:[%s21637_s1 + $0x1f08] ss:$16 sps:$4 sm:$0xff]  }
 0x3a8   :  { %10417 = vmatprep.subr.bf16.mxu0 %v15493_v5  ;;  %11442 = vmatprep.subr.bf16.mxu1 %v15496_v6  ;;  %v15584_v5 = vld [vmem:[%s21637_s1 + $0x1f24] ss:$16 sps:$4 sm:$0xff]   ;;  %v15587_v6 = vld [vmem:[%s21637_s1 + $0x1f2c] ss:$16 sps:$4 sm:$0xff]  }
 0x3ab   :  { %10418 = vmatpush1.bf16.msra.mxu0 %v15491_v60  ;;  %11443 = vmatpush1.bf16.msra.mxu1 %v15494_v9  ;;  %v15582_v60 = vld [vmem:[%s21637_s1 + $0x1f20] ss:$16 sps:$4 sm:$0xff]   ;;  %v15585_v9 = vld [vmem:[%s21637_s1 + $0x1f28] ss:$16 sps:$4 sm:$0xff]  }
 0x3ac   :  { %10419 = vmatprep.subr.bf16.mxu0 %v15499_v10  ;;  %11444 = vmatprep.subr.bf16.mxu1 %v15502_v11  ;;  %v15590_v10 = vld [vmem:[%s21637_s1 + $0x1f44] ss:$16 sps:$4 sm:$0xff]   ;;  %v15593_v11 = vld [vmem:[%s21637_s1 + $0x1f4c] ss:$16 sps:$4 sm:$0xff]  }
 0x3af   :  { %10420 = vmatpush1.bf16.msra.mxu0 %v15497_v63  ;;  %11445 = vmatpush1.bf16.msra.mxu1 %v15500_v12  ;;  %v15588_v63 = vld [vmem:[%s21637_s1 + $0x1f40] ss:$16 sps:$4 sm:$0xff]   ;;  %v15591_v12 = vld [vmem:[%s21637_s1 + $0x1f48] ss:$16 sps:$4 sm:$0xff]  }
 0x3b0   :  { %10421 = vmatprep.subr.bf16.mxu0 %v15505_v52  ;;  %11446 = vmatprep.subr.bf16.mxu1 %v15508_v15  ;;  %v15596_v52 = vld [vmem:[%s21637_s1 + $0x1f64] ss:$16 sps:$4 sm:$0xff]   ;;  %v15599_v15 = vld [vmem:[%s21637_s1 + $0x1f6c] ss:$16 sps:$4 sm:$0xff]  }
 0x3b3   :  { %10422 = vmatpush1.bf16.msra.mxu0 %v15503_v7  ;;  %11447 = vmatpush1.bf16.msra.mxu1 %v15506_v16  ;;  %v15594_v7 = vld [vmem:[%s21637_s1 + $0x1f60] ss:$16 sps:$4 sm:$0xff]   ;;  %v15597_v16 = vld [vmem:[%s21637_s1 + $0x1f68] ss:$16 sps:$4 sm:$0xff]  }
 0x3b4   :  { %10423 = vmatprep.subr.bf16.mxu0 %v15511_v17  ;;  %11448 = vmatprep.subr.bf16.mxu1 %v15514_v8  ;;  %v15602_v17 = vld [vmem:[%s21637_s1 + $0x1f84] ss:$16 sps:$4 sm:$0xff]   ;;  %v15605_v8 = vld [vmem:[%s21637_s1 + $0x1f8c] ss:$16 sps:$4 sm:$0xff]  }
 0x3b7   :  { %10424 = vmatpush1.bf16.msra.mxu0 %v15509_v20  ;;  %11449 = vmatpush1.bf16.msra.mxu1 %v15512_v22  ;;  %v15600_v20 = vld [vmem:[%s21637_s1 + $0x1f80] ss:$16 sps:$4 sm:$0xff]   ;;  %v15603_v22 = vld [vmem:[%s21637_s1 + $0x1f88] ss:$16 sps:$4 sm:$0xff]  }
 0x3b8   :  { %10425 = vmatprep.subr.bf16.mxu0 %v15517_v4  ;;  %11450 = vmatprep.subr.bf16.mxu1 %v15520_v24  ;;  %v15608_v4 = vld [vmem:[%s21637_s1 + $0x1fa4] ss:$16 sps:$4 sm:$0xff]   ;;  %v15611_v24 = vld [vmem:[%s21637_s1 + $0x1fac] ss:$16 sps:$4 sm:$0xff]  }
 0x3bb   :  { %10426 = vmatpush1.bf16.msra.mxu0 %v15515_v13  ;;  %11451 = vmatpush1.bf16.msra.mxu1 %v15518_v27  ;;  %v15606_v13 = vld [vmem:[%s21637_s1 + $0x1fa0] ss:$16 sps:$4 sm:$0xff]   ;;  %v15609_v27 = vld [vmem:[%s21637_s1 + $0x1fa8] ss:$16 sps:$4 sm:$0xff]  }
 0x3bc   :  { %10427 = vmatprep.subr.bf16.mxu0 %v15523_v18  ;;  %11452 = vmatprep.subr.bf16.mxu1 %v15526_v28  ;;  %v15614_v18 = vld [vmem:[%s21637_s1 + $0x1fc4] ss:$16 sps:$4 sm:$0xff]   ;;  %v15617_v28 = vld [vmem:[%s21637_s1 + $0x1fcc] ss:$16 sps:$4 sm:$0xff]  }
 0x3bf   :  { %10428 = vmatpush1.bf16.msra.mxu0 %v15521_v29  ;;  %11453 = vmatpush1.bf16.msra.mxu1 %v15524_v14  ;;  %v19769_v29 = vld [vmem:[%s21636_s0 + $0x20] sm:$0xff] }
 0x3c0   :  { %10438 = vmatprep.subr.bf16.mxu0 %v15530_v30  ;;  %11463 = vmatprep.subr.bf16.mxu1 %v15533_v19  ;;  %v15612_v14 = vld [vmem:[%s21637_s1 + $0x1fc0] ss:$16 sps:$4 sm:$0xff]   ;;  %v15615_v30 = vld [vmem:[%s21637_s1 + $0x1fc8] ss:$16 sps:$4 sm:$0xff]   ;;  %v15620_v19 = vld [vmem:[%s21637_s1 + $0x1fe4] ss:$16 sps:$4 sm:$0xff]  }
 0x3c2   :  { %10430 = vmatmul.mubr.bf16.vlgmr.msra.gmra.mrb[0].mxu0 %v19592_v25  ;;  %11455 = vmatmul.mubr.bf16.vlgmr.msra.gmra.mrb[0].mxu1 %v19592_v25 }
 0x3c3   :  { %10439 = vmatpush1.bf16.msra.mxu0 %v15528_v32  ;;  %11464 = vmatpush1.bf16.msra.mxu1 %v15531_v33  ;;  %v15623_v32 = vld [vmem:[%s21637_s1 + $0x1fec] ss:$16 sps:$4 sm:$0xff]   ;;  %v19785_v33 = vrot.slane %v19769_v29, %v16672_v49 }
 0x3c4   :  { %10440 = vmatprep.subr.bf16.mxu0 %v15536_v26  ;;  %11465 = vmatprep.subr.bf16.mxu1 %v15539_v23  ;;  %v15618_v26 = vld [vmem:[%s21637_s1 + $0x1fe0] ss:$16 sps:$4 sm:$0xff]   ;;  %v15621_v23 = vld [vmem:[%s21637_s1 + $0x1fe8] ss:$16 sps:$4 sm:$0xff]  }
 0x3c5   :  { %10470 = vmatprep.mubr.bf16.mxu0 %v1821_v36  ;;  %11495 = vmatprep.mubr.bf16.mxu1 %v1821_v36  ;;  %v15626_v36 = vld [vmem:[%s21637_s1 + $0x2004] ss:$16 sps:$4 sm:$0xff]  }
 0x3c7   :  { %10441 = vmatpush1.bf16.msra.mxu0 %v15534_v37  ;;  %11466 = vmatpush1.bf16.msra.mxu1 %v15537_v21  ;;  %v15629_v37 = vld [vmem:[%s21637_s1 + $0x200c] ss:$16 sps:$4 sm:$0xff]   ;;  %v1837_v21 = vcombine.high %v19785_v33, %v19785_v33 }
 0x3c8   :  { %10442 = vmatprep.subr.bf16.mxu0 %v15542_v31  ;;  %11467 = vmatprep.subr.bf16.mxu1 %v15545_v39  ;;  %v1819_v31 = vcombine.high %v19592_v25, %v19592_v25  ;;  %v15624_v39 = vld [vmem:[%s21637_s1 + $0x2000] ss:$16 sps:$4 sm:$0xff]   ;;  %v15635_v25 = vld [vmem:[%s21637_s1 + $0x202c] ss:$16 sps:$4 sm:$0xff]  }
 0x3cb   :  { %10443 = vmatpush1.bf16.msra.mxu0 %v15540_v40  ;;  %11468 = vmatpush1.bf16.msra.mxu1 %v15543_v41  ;;  %v15627_v40 = vld [vmem:[%s21637_s1 + $0x2008] ss:$16 sps:$4 sm:$0xff]   ;;  %v15632_v41 = vld [vmem:[%s21637_s1 + $0x2024] ss:$16 sps:$4 sm:$0xff]  }
 0x3cc   :  { %10444 = vmatprep.subr.bf16.mxu0 %v15548_v34  ;;  %11469 = vmatprep.subr.bf16.mxu1 %v15551_v43  ;;  %v19816_v34 = vrot.slane %v1837_v21, %v16672_v49  ;;  %v15630_v43 = vld [vmem:[%s21637_s1 + $0x2020] ss:$16 sps:$4 sm:$0xff]   ;;  %v15711_v21 = vld [vmem:[%s21637_s1 + $0x21c8] ss:$16 sps:$4 sm:$0xff]  }
 0x3cf   :  { %10445 = vmatpush1.bf16.msra.mxu0 %v15546_v45  ;;  %11470 = vmatpush1.bf16.msra.mxu1 %v15549_v46  ;;  %v15633_v45 = vld [vmem:[%s21637_s1 + $0x2028] ss:$16 sps:$4 sm:$0xff]   ;;  %v15638_v46 = vld [vmem:[%s21637_s1 + $0x2044] ss:$16 sps:$4 sm:$0xff]  }
 0x3d0   :  { %10446 = vmatprep.subr.bf16.mxu0 %v15554_v35  ;;  %11471 = vmatprep.subr.bf16.mxu1 %v15557_v50  ;;  %v15641_v35 = vld [vmem:[%s21637_s1 + $0x204c] ss:$16 sps:$4 sm:$0xff]   ;;  %v15636_v50 = vld [vmem:[%s21637_s1 + $0x2040] ss:$16 sps:$4 sm:$0xff]  }
 0x3d3   :  { %10447 = vmatpush1.bf16.msra.mxu0 %v15552_v51  ;;  %11472 = vmatpush1.bf16.msra.mxu1 %v15555_v53  ;;  %v15639_v51 = vld [vmem:[%s21637_s1 + $0x2048] ss:$16 sps:$4 sm:$0xff]   ;;  %v15644_v53 = vld [vmem:[%s21637_s1 + $0x2064] ss:$16 sps:$4 sm:$0xff]  }
 0x3d4   :  { %10448 = vmatprep.subr.bf16.mxu0 %v15560_v38  ;;  %11473 = vmatprep.subr.bf16.mxu1 %v15563_v54  ;;  %v15647_v38 = vld [vmem:[%s21637_s1 + $0x206c] ss:$16 sps:$4 sm:$0xff]   ;;  %v15642_v54 = vld [vmem:[%s21637_s1 + $0x2060] ss:$16 sps:$4 sm:$0xff]  }
 0x3d7   :  { %10449 = vmatpush1.bf16.msra.mxu0 %v15558_v55  ;;  %11474 = vmatpush1.bf16.msra.mxu1 %v15561_v56  ;;  %v15645_v55 = vld [vmem:[%s21637_s1 + $0x2068] ss:$16 sps:$4 sm:$0xff]   ;;  %v15650_v56 = vld [vmem:[%s21637_s1 + $0x2084] ss:$16 sps:$4 sm:$0xff]  }
 0x3d8   :  { %10450 = vmatprep.subr.bf16.mxu0 %v15566_v47  ;;  %11475 = vmatprep.subr.bf16.mxu1 %v15569_v57  ;;  %v15653_v47 = vld [vmem:[%s21637_s1 + $0x208c] ss:$16 sps:$4 sm:$0xff]   ;;  %v15648_v57 = vld [vmem:[%s21637_s1 + $0x2080] ss:$16 sps:$4 sm:$0xff]  }
 0x3db   :  { %10451 = vmatpush1.bf16.msra.mxu0 %v15564_v58  ;;  %11476 = vmatpush1.bf16.msra.mxu1 %v15567_v48  ;;  %v15651_v58 = vld [vmem:[%s21637_s1 + $0x2088] ss:$16 sps:$4 sm:$0xff]   ;;  %v15656_v48 = vld [vmem:[%s21637_s1 + $0x20a4] ss:$16 sps:$4 sm:$0xff]  }
 0x3dc   :  { %10452 = vmatprep.subr.bf16.mxu0 %v15572_v61  ;;  %11477 = vmatprep.subr.bf16.mxu1 %v15575_v62  ;;  %v15659_v61 = vld [vmem:[%s21637_s1 + $0x20ac] ss:$16 sps:$4 sm:$0xff]   ;;  %v15654_v62 = vld [vmem:[%s21637_s1 + $0x20a0] ss:$16 sps:$4 sm:$0xff]  }
 0x3df   :  { %10453 = vmatpush1.bf16.msra.mxu0 %v15570_v44  ;;  %11478 = vmatpush1.bf16.msra.mxu1 %v15573_v0  ;;  %v15657_v44 = vld [vmem:[%s21637_s1 + $0x20a8] ss:$16 sps:$4 sm:$0xff]   ;;  %v15662_v0 = vld [vmem:[%s21637_s1 + $0x20c4] ss:$16 sps:$4 sm:$0xff]  }
 0x3e0   :  { %10454 = vmatprep.subr.bf16.mxu0 %v15578_v1  ;;  %11479 = vmatprep.subr.bf16.mxu1 %v15581_v2  ;;  %v15665_v1 = vld [vmem:[%s21637_s1 + $0x20cc] ss:$16 sps:$4 sm:$0xff]   ;;  %v15660_v2 = vld [vmem:[%s21637_s1 + $0x20c0] ss:$16 sps:$4 sm:$0xff]  }
 0x3e3   :  { %10455 = vmatpush1.bf16.msra.mxu0 %v15576_v59  ;;  %11480 = vmatpush1.bf16.msra.mxu1 %v15579_v3  ;;  %v15663_v59 = vld [vmem:[%s21637_s1 + $0x20c8] ss:$16 sps:$4 sm:$0xff]   ;;  %v15668_v3 = vld [vmem:[%s21637_s1 + $0x20e4] ss:$16 sps:$4 sm:$0xff]  }
 0x3e4   :  { %10456 = vmatprep.subr.bf16.mxu0 %v15584_v5  ;;  %11481 = vmatprep.subr.bf16.mxu1 %v15587_v6  ;;  %v15671_v5 = vld [vmem:[%s21637_s1 + $0x20ec] ss:$16 sps:$4 sm:$0xff]   ;;  %v15666_v6 = vld [vmem:[%s21637_s1 + $0x20e0] ss:$16 sps:$4 sm:$0xff]  }
 0x3e7   :  { %10457 = vmatpush1.bf16.msra.mxu0 %v15582_v60  ;;  %11482 = vmatpush1.bf16.msra.mxu1 %v15585_v9  ;;  %v15669_v60 = vld [vmem:[%s21637_s1 + $0x20e8] ss:$16 sps:$4 sm:$0xff]   ;;  %v15674_v9 = vld [vmem:[%s21637_s1 + $0x2104] ss:$16 sps:$4 sm:$0xff]  }
 0x3e8   :  { %10458 = vmatprep.subr.bf16.mxu0 %v15590_v10  ;;  %11483 = vmatprep.subr.bf16.mxu1 %v15593_v11  ;;  %v15677_v10 = vld [vmem:[%s21637_s1 + $0x210c] ss:$16 sps:$4 sm:$0xff]   ;;  %v15672_v11 = vld [vmem:[%s21637_s1 + $0x2100] ss:$16 sps:$4 sm:$0xff]  }
 0x3eb   :  { %10459 = vmatpush1.bf16.msra.mxu0 %v15588_v63  ;;  %11484 = vmatpush1.bf16.msra.mxu1 %v15591_v12  ;;  %v15675_v63 = vld [vmem:[%s21637_s1 + $0x2108] ss:$16 sps:$4 sm:$0xff]   ;;  %v15680_v12 = vld [vmem:[%s21637_s1 + $0x2124] ss:$16 sps:$4 sm:$0xff]  }
 0x3ec   :  { %10460 = vmatprep.subr.bf16.mxu0 %v15596_v52  ;;  %11485 = vmatprep.subr.bf16.mxu1 %v15599_v15  ;;  %v15683_v52 = vld [vmem:[%s21637_s1 + $0x212c] ss:$16 sps:$4 sm:$0xff]   ;;  %v15678_v15 = vld [vmem:[%s21637_s1 + $0x2120] ss:$16 sps:$4 sm:$0xff]  }
 0x3ef   :  { %10461 = vmatpush1.bf16.msra.mxu0 %v15594_v7  ;;  %11486 = vmatpush1.bf16.msra.mxu1 %v15597_v16  ;;  %v15681_v7 = vld [vmem:[%s21637_s1 + $0x2128] ss:$16 sps:$4 sm:$0xff]   ;;  %v15686_v16 = vld [vmem:[%s21637_s1 + $0x2144] ss:$16 sps:$4 sm:$0xff]  }
 0x3f0   :  { %10462 = vmatprep.subr.bf16.mxu0 %v15602_v17  ;;  %11487 = vmatprep.subr.bf16.mxu1 %v15605_v8  ;;  %v15689_v17 = vld [vmem:[%s21637_s1 + $0x214c] ss:$16 sps:$4 sm:$0xff]   ;;  %v15684_v8 = vld [vmem:[%s21637_s1 + $0x2140] ss:$16 sps:$4 sm:$0xff]  }
 0x3f3   :  { %10463 = vmatpush1.bf16.msra.mxu0 %v15600_v20  ;;  %11488 = vmatpush1.bf16.msra.mxu1 %v15603_v22  ;;  %v15687_v20 = vld [vmem:[%s21637_s1 + $0x2148] ss:$16 sps:$4 sm:$0xff]   ;;  %v15692_v22 = vld [vmem:[%s21637_s1 + $0x2164] ss:$16 sps:$4 sm:$0xff]  }
 0x3f4   :  { %10464 = vmatprep.subr.bf16.mxu0 %v15608_v4  ;;  %11489 = vmatprep.subr.bf16.mxu1 %v15611_v24  ;;  %v15695_v4 = vld [vmem:[%s21637_s1 + $0x216c] ss:$16 sps:$4 sm:$0xff]   ;;  %v15690_v24 = vld [vmem:[%s21637_s1 + $0x2160] ss:$16 sps:$4 sm:$0xff]  }
 0x3f7   :  { %10465 = vmatpush1.bf16.msra.mxu0 %v15606_v13  ;;  %11490 = vmatpush1.bf16.msra.mxu1 %v15609_v27  ;;  %v15693_v13 = vld [vmem:[%s21637_s1 + $0x2168] ss:$16 sps:$4 sm:$0xff]   ;;  %v15698_v27 = vld [vmem:[%s21637_s1 + $0x2184] ss:$16 sps:$4 sm:$0xff]  }
 0x3f8   :  { %10466 = vmatprep.subr.bf16.mxu0 %v15614_v18  ;;  %11491 = vmatprep.subr.bf16.mxu1 %v15617_v28  ;;  %v15701_v18 = vld [vmem:[%s21637_s1 + $0x218c] ss:$16 sps:$4 sm:$0xff]   ;;  %v15696_v28 = vld [vmem:[%s21637_s1 + $0x2180] ss:$16 sps:$4 sm:$0xff]  }
 0x3fb   :  { %10467 = vmatpush1.bf16.msra.mxu0 %v15612_v14  ;;  %11492 = vmatpush1.bf16.msra.mxu1 %v15615_v30  ;;  %v15699_v14 = vld [vmem:[%s21637_s1 + $0x2188] ss:$16 sps:$4 sm:$0xff]   ;;  %v15704_v30 = vld [vmem:[%s21637_s1 + $0x21a4] ss:$16 sps:$4 sm:$0xff]  }
 0x3fc   :  { %10468 = vmatprep.subr.bf16.mxu0 %v15620_v19  ;;  %11493 = vmatprep.subr.bf16.mxu1 %v15623_v32  ;;  %v15707_v19 = vld [vmem:[%s21637_s1 + $0x21ac] ss:$16 sps:$4 sm:$0xff]   ;;  %v15702_v32 = vld [vmem:[%s21637_s1 + $0x21a0] ss:$16 sps:$4 sm:$0xff]  }
 0x3ff   :  { %10469 = vmatpush1.bf16.msra.mxu0 %v15618_v26  ;;  %11494 = vmatpush1.bf16.msra.mxu1 %v15621_v23  ;;  %v15705_v26 = vld [vmem:[%s21637_s1 + $0x21a8] ss:$16 sps:$4 sm:$0xff]   ;;  %v15710_v23 = vld [vmem:[%s21637_s1 + $0x21c4] ss:$16 sps:$4 sm:$0xff]  }
 0x400   :  { %10479 = vmatprep.subr.bf16.mxu0 %v15626_v36  ;;  %11504 = vmatprep.subr.bf16.mxu1 %v15629_v37  ;;  %v15713_v36 = vld [vmem:[%s21637_s1 + $0x21cc] ss:$16 sps:$4 sm:$0xff]   ;;  %v15708_v37 = vld [vmem:[%s21637_s1 + $0x21c0] ss:$16 sps:$4 sm:$0xff]  }
 0x402   :  { %10471 = vmatmul.mubr.bf16.vlgmr.msra.gmra.mrb[0].mxu0 %v1819_v31  ;;  %11496 = vmatmul.mubr.bf16.vlgmr.msra.gmra.mrb[0].mxu1 %v1819_v31  ;;  %v15716_v31 = vld [vmem:[%s21637_s1 + $0x21e4] ss:$16 sps:$4 sm:$0xff]  }
 0x403   :  { %10480 = vmatpush1.bf16.msra.mxu0 %v15624_v39  ;;  %11505 = vmatpush1.bf16.msra.mxu1 %v15627_v40  ;;  %v15719_v39 = vld [vmem:[%s21637_s1 + $0x21ec] ss:$16 sps:$4 sm:$0xff]   ;;  %v15714_v40 = vld [vmem:[%s21637_s1 + $0x21e0] ss:$16 sps:$4 sm:$0xff]  }
 0x404   :  { %10481 = vmatprep.subr.bf16.mxu0 %v15632_v41  ;;  %11506 = vmatprep.subr.bf16.mxu1 %v15635_v25  ;;  %v15717_v41 = vld [vmem:[%s21637_s1 + $0x21e8] ss:$16 sps:$4 sm:$0xff]   ;;  %v15722_v25 = vld [vmem:[%s21637_s1 + $0x2204] ss:$16 sps:$4 sm:$0xff]  }
 0x405   :  { %10511 = vmatprep.mubr.bf16.mxu0 %v19816_v34  ;;  %11536 = vmatprep.mubr.bf16.mxu1 %v19816_v34 }
 0x407   :  { %10482 = vmatpush1.bf16.msra.mxu0 %v15630_v43  ;;  %11507 = vmatpush1.bf16.msra.mxu1 %v15633_v45  ;;  %v15725_v43 = vld [vmem:[%s21637_s1 + $0x220c] ss:$16 sps:$4 sm:$0xff]   ;;  %v20002_v45 = vrot.slane %v19785_v33, %v16672_v49 }
 0x408   :  { %10483 = vmatprep.subr.bf16.mxu0 %v15638_v46  ;;  %11508 = vmatprep.subr.bf16.mxu1 %v15641_v35  ;;  %v15720_v46 = vld [vmem:[%s21637_s1 + $0x2200] ss:$16 sps:$4 sm:$0xff]   ;;  %v15723_v35 = vld [vmem:[%s21637_s1 + $0x2208] ss:$16 sps:$4 sm:$0xff]   ;;  %v15731_v33 = vld [vmem:[%s21637_s1 + $0x222c] ss:$16 sps:$4 sm:$0xff]  }
 0x40b   :  { %10484 = vmatpush1.bf16.msra.mxu0 %v15636_v50  ;;  %11509 = vmatpush1.bf16.msra.mxu1 %v15639_v51  ;;  %v15728_v50 = vld [vmem:[%s21637_s1 + $0x2224] ss:$16 sps:$4 sm:$0xff]   ;;  %v1869_v51 = vcombine.high %v19816_v34, %v19816_v34 }
 0x40c   :  { %10485 = vmatprep.subr.bf16.mxu0 %v15644_v53  ;;  %11510 = vmatprep.subr.bf16.mxu1 %v15647_v38  ;;  %v15726_v53 = vld [vmem:[%s21637_s1 + $0x2220] ss:$16 sps:$4 sm:$0xff]   ;;  %v15729_v38 = vld [vmem:[%s21637_s1 + $0x2228] ss:$16 sps:$4 sm:$0xff]   ;;  %v15734_v34 = vld [vmem:[%s21637_s1 + $0x2244] ss:$16 sps:$4 sm:$0xff]  }
 0x40f   :  { %10486 = vmatpush1.bf16.msra.mxu0 %v15642_v54  ;;  %11511 = vmatpush1.bf16.msra.mxu1 %v15645_v55  ;;  %v15737_v54 = vld [vmem:[%s21637_s1 + $0x224c] ss:$16 sps:$4 sm:$0xff]   ;;  %v15732_v55 = vld [vmem:[%s21637_s1 + $0x2240] ss:$16 sps:$4 sm:$0xff]  }
 0x410   :  { %10487 = vmatprep.subr.bf16.mxu0 %v15650_v56  ;;  %11512 = vmatprep.subr.bf16.mxu1 %v15653_v47  ;;  %v15735_v56 = vld [vmem:[%s21637_s1 + $0x2248] ss:$16 sps:$4 sm:$0xff]   ;;  %v15740_v47 = vld [vmem:[%s21637_s1 + $0x2264] ss:$16 sps:$4 sm:$0xff]  }
 0x413   :  { %10488 = vmatpush1.bf16.msra.mxu0 %v15648_v57  ;;  %11513 = vmatpush1.bf16.msra.mxu1 %v15651_v58  ;;  %v15743_v57 = vld [vmem:[%s21637_s1 + $0x226c] ss:$16 sps:$4 sm:$0xff]   ;;  %v15738_v58 = vld [vmem:[%s21637_s1 + $0x2260] ss:$16 sps:$4 sm:$0xff]  }
 0x414   :  { %10489 = vmatprep.subr.bf16.mxu0 %v15656_v48  ;;  %11514 = vmatprep.subr.bf16.mxu1 %v15659_v61  ;;  %v15741_v48 = vld [vmem:[%s21637_s1 + $0x2268] ss:$16 sps:$4 sm:$0xff]   ;;  %v15746_v61 = vld [vmem:[%s21637_s1 + $0x2284] ss:$16 sps:$4 sm:$0xff]  }
 0x417   :  { %10490 = vmatpush1.bf16.msra.mxu0 %v15654_v62  ;;  %11515 = vmatpush1.bf16.msra.mxu1 %v15657_v44  ;;  %v15749_v62 = vld [vmem:[%s21637_s1 + $0x228c] ss:$16 sps:$4 sm:$0xff]   ;;  %v15744_v44 = vld [vmem:[%s21637_s1 + $0x2280] ss:$16 sps:$4 sm:$0xff]  }
 0x418   :  { %10491 = vmatprep.subr.bf16.mxu0 %v15662_v0  ;;  %11516 = vmatprep.subr.bf16.mxu1 %v15665_v1  ;;  %v15747_v0 = vld [vmem:[%s21637_s1 + $0x2288] ss:$16 sps:$4 sm:$0xff]   ;;  %v15752_v1 = vld [vmem:[%s21637_s1 + $0x22a4] ss:$16 sps:$4 sm:$0xff]  }
 0x41b   :  { %10492 = vmatpush1.bf16.msra.mxu0 %v15660_v2  ;;  %11517 = vmatpush1.bf16.msra.mxu1 %v15663_v59  ;;  %v15755_v2 = vld [vmem:[%s21637_s1 + $0x22ac] ss:$16 sps:$4 sm:$0xff]   ;;  %v15750_v59 = vld [vmem:[%s21637_s1 + $0x22a0] ss:$16 sps:$4 sm:$0xff]  }
 0x41c   :  { %10493 = vmatprep.subr.bf16.mxu0 %v15668_v3  ;;  %11518 = vmatprep.subr.bf16.mxu1 %v15671_v5  ;;  %v15753_v3 = vld [vmem:[%s21637_s1 + $0x22a8] ss:$16 sps:$4 sm:$0xff]   ;;  %v15758_v5 = vld [vmem:[%s21637_s1 + $0x22c4] ss:$16 sps:$4 sm:$0xff]  }
 0x41f   :  { %10494 = vmatpush1.bf16.msra.mxu0 %v15666_v6  ;;  %11519 = vmatpush1.bf16.msra.mxu1 %v15669_v60  ;;  %v15761_v6 = vld [vmem:[%s21637_s1 + $0x22cc] ss:$16 sps:$4 sm:$0xff]   ;;  %v15756_v60 = vld [vmem:[%s21637_s1 + $0x22c0] ss:$16 sps:$4 sm:$0xff]  }
 0x420   :  { %10495 = vmatprep.subr.bf16.mxu0 %v15674_v9  ;;  %11520 = vmatprep.subr.bf16.mxu1 %v15677_v10  ;;  %v15759_v9 = vld [vmem:[%s21637_s1 + $0x22c8] ss:$16 sps:$4 sm:$0xff]   ;;  %v15764_v10 = vld [vmem:[%s21637_s1 + $0x22e4] ss:$16 sps:$4 sm:$0xff]  }
 0x423   :  { %10496 = vmatpush1.bf16.msra.mxu0 %v15672_v11  ;;  %11521 = vmatpush1.bf16.msra.mxu1 %v15675_v63  ;;  %v15767_v11 = vld [vmem:[%s21637_s1 + $0x22ec] ss:$16 sps:$4 sm:$0xff]   ;;  %v15762_v63 = vld [vmem:[%s21637_s1 + $0x22e0] ss:$16 sps:$4 sm:$0xff]  }
 0x424   :  { %10497 = vmatprep.subr.bf16.mxu0 %v15680_v12  ;;  %11522 = vmatprep.subr.bf16.mxu1 %v15683_v52  ;;  %v15765_v12 = vld [vmem:[%s21637_s1 + $0x22e8] ss:$16 sps:$4 sm:$0xff]   ;;  %v15770_v52 = vld [vmem:[%s21637_s1 + $0x2304] ss:$16 sps:$4 sm:$0xff]  }
 0x427   :  { %10498 = vmatpush1.bf16.msra.mxu0 %v15678_v15  ;;  %11523 = vmatpush1.bf16.msra.mxu1 %v15681_v7  ;;  %v15773_v15 = vld [vmem:[%s21637_s1 + $0x230c] ss:$16 sps:$4 sm:$0xff]   ;;  %v15768_v7 = vld [vmem:[%s21637_s1 + $0x2300] ss:$16 sps:$4 sm:$0xff]  }
 0x428   :  { %10499 = vmatprep.subr.bf16.mxu0 %v15686_v16  ;;  %11524 = vmatprep.subr.bf16.mxu1 %v15689_v17  ;;  %v15771_v16 = vld [vmem:[%s21637_s1 + $0x2308] ss:$16 sps:$4 sm:$0xff]   ;;  %v15776_v17 = vld [vmem:[%s21637_s1 + $0x2324] ss:$16 sps:$4 sm:$0xff]  }
 0x42b   :  { %10500 = vmatpush1.bf16.msra.mxu0 %v15684_v8  ;;  %11525 = vmatpush1.bf16.msra.mxu1 %v15687_v20  ;;  %v15779_v8 = vld [vmem:[%s21637_s1 + $0x232c] ss:$16 sps:$4 sm:$0xff]   ;;  %v15774_v20 = vld [vmem:[%s21637_s1 + $0x2320] ss:$16 sps:$4 sm:$0xff]  }
 0x42c   :  { %10501 = vmatprep.subr.bf16.mxu0 %v15692_v22  ;;  %11526 = vmatprep.subr.bf16.mxu1 %v15695_v4  ;;  %v15777_v22 = vld [vmem:[%s21637_s1 + $0x2328] ss:$16 sps:$4 sm:$0xff]   ;;  %v15782_v4 = vld [vmem:[%s21637_s1 + $0x2344] ss:$16 sps:$4 sm:$0xff]  }
 0x42f   :  { %10502 = vmatpush1.bf16.msra.mxu0 %v15690_v24  ;;  %11527 = vmatpush1.bf16.msra.mxu1 %v15693_v13  ;;  %v15785_v24 = vld [vmem:[%s21637_s1 + $0x234c] ss:$16 sps:$4 sm:$0xff]   ;;  %v15780_v13 = vld [vmem:[%s21637_s1 + $0x2340] ss:$16 sps:$4 sm:$0xff]  }
 0x430   :  { %10503 = vmatprep.subr.bf16.mxu0 %v15698_v27  ;;  %11528 = vmatprep.subr.bf16.mxu1 %v15701_v18  ;;  %v15783_v27 = vld [vmem:[%s21637_s1 + $0x2348] ss:$16 sps:$4 sm:$0xff]   ;;  %v15788_v18 = vld [vmem:[%s21637_s1 + $0x2364] ss:$16 sps:$4 sm:$0xff]  }
 0x433   :  { %10504 = vmatpush1.bf16.msra.mxu0 %v15696_v28  ;;  %11529 = vmatpush1.bf16.msra.mxu1 %v15699_v14  ;;  %v15791_v28 = vld [vmem:[%s21637_s1 + $0x236c] ss:$16 sps:$4 sm:$0xff]   ;;  %v15786_v14 = vld [vmem:[%s21637_s1 + $0x2360] ss:$16 sps:$4 sm:$0xff]  }
 0x434   :  { %10505 = vmatprep.subr.bf16.mxu0 %v15704_v30  ;;  %11530 = vmatprep.subr.bf16.mxu1 %v15707_v19  ;;  %v15789_v30 = vld [vmem:[%s21637_s1 + $0x2368] ss:$16 sps:$4 sm:$0xff]   ;;  %v15794_v19 = vld [vmem:[%s21637_s1 + $0x2384] ss:$16 sps:$4 sm:$0xff]  }
 0x437   :  { %10506 = vmatpush1.bf16.msra.mxu0 %v15702_v32  ;;  %11531 = vmatpush1.bf16.msra.mxu1 %v15705_v26  ;;  %v15797_v32 = vld [vmem:[%s21637_s1 + $0x238c] ss:$16 sps:$4 sm:$0xff]   ;;  %v15792_v26 = vld [vmem:[%s21637_s1 + $0x2380] ss:$16 sps:$4 sm:$0xff]  }
 0x438   :  { %10507 = vmatprep.subr.bf16.mxu0 %v15710_v23  ;;  %11532 = vmatprep.subr.bf16.mxu1 %v15713_v36  ;;  %v15795_v23 = vld [vmem:[%s21637_s1 + $0x2388] ss:$16 sps:$4 sm:$0xff]   ;;  %v15800_v36 = vld [vmem:[%s21637_s1 + $0x23a4] ss:$16 sps:$4 sm:$0xff]  }
 0x43b   :  { %10508 = vmatpush1.bf16.msra.mxu0 %v15708_v37  ;;  %11533 = vmatpush1.bf16.msra.mxu1 %v15711_v21  ;;  %v15803_v37 = vld [vmem:[%s21637_s1 + $0x23ac] ss:$16 sps:$4 sm:$0xff]   ;;  %v15798_v21 = vld [vmem:[%s21637_s1 + $0x23a0] ss:$16 sps:$4 sm:$0xff]  }
 0x43c   :  { %10509 = vmatprep.subr.bf16.mxu0 %v15716_v31  ;;  %11534 = vmatprep.subr.bf16.mxu1 %v15719_v39  ;;  %v15801_v31 = vld [vmem:[%s21637_s1 + $0x23a8] ss:$16 sps:$4 sm:$0xff]   ;;  %v15806_v39 = vld [vmem:[%s21637_s1 + $0x23c4] ss:$16 sps:$4 sm:$0xff]  }
 0x43f   :  { %10510 = vmatpush1.bf16.msra.mxu0 %v15714_v40  ;;  %11535 = vmatpush1.bf16.msra.mxu1 %v15717_v41  ;;  %v15809_v40 = vld [vmem:[%s21637_s1 + $0x23cc] ss:$16 sps:$4 sm:$0xff]   ;;  %v1822_v41 = vcombine.high %v19769_v29, %v19769_v29 }
 0x440   :  { %10520 = vmatprep.subr.bf16.mxu0 %v15722_v25  ;;  %11545 = vmatprep.subr.bf16.mxu1 %v15725_v43  ;;  %v15804_v25 = vld [vmem:[%s21637_s1 + $0x23c0] ss:$16 sps:$4 sm:$0xff]   ;;  %v15807_v43 = vld [vmem:[%s21637_s1 + $0x23c8] ss:$16 sps:$4 sm:$0xff]   ;;  %v15815_v29 = vld [vmem:[%s21637_s1 + $0x23ec] ss:$16 sps:$4 sm:$0xff]  }
 0x442   :  { %10512 = vmatmul.mubr.bf16.vlgmr.msra.gmra.mrb[0].mxu0 %v20002_v45  ;;  %11537 = vmatmul.mubr.bf16.vlgmr.msra.gmra.mrb[0].mxu1 %v20002_v45 }
 0x443   :  { %10521 = vmatpush1.bf16.msra.mxu0 %v15720_v46  ;;  %11546 = vmatpush1.bf16.msra.mxu1 %v15723_v35  ;;  %v15812_v46 = vld [vmem:[%s21637_s1 + $0x23e4] ss:$16 sps:$4 sm:$0xff]   ;;  %v20191_v35 = vrot.slane %v1822_v41, %v16672_v49  ;;  %v15891_v41 = vld [vmem:[%s21637_s1 + $0x2588] ss:$16 sps:$4 sm:$0xff]  }
 0x444   :  { %10522 = vmatprep.subr.bf16.mxu0 %v15728_v50  ;;  %11547 = vmatprep.subr.bf16.mxu1 %v15731_v33  ;;  %v15810_v50 = vld [vmem:[%s21637_s1 + $0x23e0] ss:$16 sps:$4 sm:$0xff]   ;;  %v15813_v33 = vld [vmem:[%s21637_s1 + $0x23e8] ss:$16 sps:$4 sm:$0xff]  }
 0x445   :  { %10552 = vmatprep.mubr.bf16.mxu0 %v1869_v51  ;;  %11577 = vmatprep.mubr.bf16.mxu1 %v1869_v51  ;;  %v15818_v51 = vld [vmem:[%s21637_s1 + $0x2404] ss:$16 sps:$4 sm:$0xff]  }
 0x447   :  { %10523 = vmatpush1.bf16.msra.mxu0 %v15726_v53  ;;  %11548 = vmatpush1.bf16.msra.mxu1 %v15729_v38  ;;  %v15821_v53 = vld [vmem:[%s21637_s1 + $0x240c] ss:$16 sps:$4 sm:$0xff]   ;;  %v1838_v38 = vcombine.high %v20191_v35, %v20191_v35 }
 0x448   :  { %10524 = vmatprep.subr.bf16.mxu0 %v15734_v34  ;;  %11549 = vmatprep.subr.bf16.mxu1 %v15737_v54  ;;  %v1867_v34 = vcombine.high %v20002_v45, %v20002_v45  ;;  %v15816_v54 = vld [vmem:[%s21637_s1 + $0x2400] ss:$16 sps:$4 sm:$0xff]   ;;  %v15827_v45 = vld [vmem:[%s21637_s1 + $0x242c] ss:$16 sps:$4 sm:$0xff]  }
 0x44b   :  { %10525 = vmatpush1.bf16.msra.mxu0 %v15732_v55  ;;  %11550 = vmatpush1.bf16.msra.mxu1 %v15735_v56  ;;  %v15819_v55 = vld [vmem:[%s21637_s1 + $0x2408] ss:$16 sps:$4 sm:$0xff]   ;;  %v15824_v56 = vld [vmem:[%s21637_s1 + $0x2424] ss:$16 sps:$4 sm:$0xff]  }
 0x44c   :  { %10526 = vmatprep.subr.bf16.mxu0 %v15740_v47  ;;  %11551 = vmatprep.subr.bf16.mxu1 %v15743_v57  ;;  %v20222_v47 = vrot.slane %v1838_v38, %v16672_v49  ;;  %v15822_v57 = vld [vmem:[%s21637_s1 + $0x2420] ss:$16 sps:$4 sm:$0xff]   ;;  %v15908_v38 = vld [vmem:[%s21637_s1 + $0x25e4] ss:$16 sps:$4 sm:$0xff]  }
 0x44f   :  { %10527 = vmatpush1.bf16.msra.mxu0 %v15738_v58  ;;  %11552 = vmatpush1.bf16.msra.mxu1 %v15741_v48  ;;  %v15825_v58 = vld [vmem:[%s21637_s1 + $0x2428] ss:$16 sps:$4 sm:$0xff]   ;;  %v15830_v48 = vld [vmem:[%s21637_s1 + $0x2444] ss:$16 sps:$4 sm:$0xff]  }
 0x450   :  { %10528 = vmatprep.subr.bf16.mxu0 %v15746_v61  ;;  %11553 = vmatprep.subr.bf16.mxu1 %v15749_v62  ;;  %v15833_v61 = vld [vmem:[%s21637_s1 + $0x244c] ss:$16 sps:$4 sm:$0xff]   ;;  %v15828_v62 = vld [vmem:[%s21637_s1 + $0x2440] ss:$16 sps:$4 sm:$0xff]  }
 0x453   :  { %10529 = vmatpush1.bf16.msra.mxu0 %v15744_v44  ;;  %11554 = vmatpush1.bf16.msra.mxu1 %v15747_v0  ;;  %v15831_v44 = vld [vmem:[%s21637_s1 + $0x2448] ss:$16 sps:$4 sm:$0xff]   ;;  %v15836_v0 = vld [vmem:[%s21637_s1 + $0x2464] ss:$16 sps:$4 sm:$0xff]  }
 0x454   :  { %10530 = vmatprep.subr.bf16.mxu0 %v15752_v1  ;;  %11555 = vmatprep.subr.bf16.mxu1 %v15755_v2  ;;  %v15839_v1 = vld [vmem:[%s21637_s1 + $0x246c] ss:$16 sps:$4 sm:$0xff]   ;;  %v15834_v2 = vld [vmem:[%s21637_s1 + $0x2460] ss:$16 sps:$4 sm:$0xff]  }
 0x457   :  { %10531 = vmatpush1.bf16.msra.mxu0 %v15750_v59  ;;  %11556 = vmatpush1.bf16.msra.mxu1 %v15753_v3  ;;  %v15837_v59 = vld [vmem:[%s21637_s1 + $0x2468] ss:$16 sps:$4 sm:$0xff]   ;;  %v15842_v3 = vld [vmem:[%s21637_s1 + $0x2484] ss:$16 sps:$4 sm:$0xff]  }
 0x458   :  { %10532 = vmatprep.subr.bf16.mxu0 %v15758_v5  ;;  %11557 = vmatprep.subr.bf16.mxu1 %v15761_v6  ;;  %v15845_v5 = vld [vmem:[%s21637_s1 + $0x248c] ss:$16 sps:$4 sm:$0xff]   ;;  %v15840_v6 = vld [vmem:[%s21637_s1 + $0x2480] ss:$16 sps:$4 sm:$0xff]  }
 0x45b   :  { %10533 = vmatpush1.bf16.msra.mxu0 %v15756_v60  ;;  %11558 = vmatpush1.bf16.msra.mxu1 %v15759_v9  ;;  %v15843_v60 = vld [vmem:[%s21637_s1 + $0x2488] ss:$16 sps:$4 sm:$0xff]   ;;  %v15848_v9 = vld [vmem:[%s21637_s1 + $0x24a4] ss:$16 sps:$4 sm:$0xff]  }
 0x45c   :  { %10534 = vmatprep.subr.bf16.mxu0 %v15764_v10  ;;  %11559 = vmatprep.subr.bf16.mxu1 %v15767_v11  ;;  %v15851_v10 = vld [vmem:[%s21637_s1 + $0x24ac] ss:$16 sps:$4 sm:$0xff]   ;;  %v15846_v11 = vld [vmem:[%s21637_s1 + $0x24a0] ss:$16 sps:$4 sm:$0xff]  }
 0x45f   :  { %10535 = vmatpush1.bf16.msra.mxu0 %v15762_v63  ;;  %11560 = vmatpush1.bf16.msra.mxu1 %v15765_v12  ;;  %v15849_v63 = vld [vmem:[%s21637_s1 + $0x24a8] ss:$16 sps:$4 sm:$0xff]   ;;  %v15854_v12 = vld [vmem:[%s21637_s1 + $0x24c4] ss:$16 sps:$4 sm:$0xff]  }
 0x460   :  { %10536 = vmatprep.subr.bf16.mxu0 %v15770_v52  ;;  %11561 = vmatprep.subr.bf16.mxu1 %v15773_v15  ;;  %v15857_v52 = vld [vmem:[%s21637_s1 + $0x24cc] ss:$16 sps:$4 sm:$0xff]   ;;  %v15852_v15 = vld [vmem:[%s21637_s1 + $0x24c0] ss:$16 sps:$4 sm:$0xff]  }
 0x463   :  { %10537 = vmatpush1.bf16.msra.mxu0 %v15768_v7  ;;  %11562 = vmatpush1.bf16.msra.mxu1 %v15771_v16  ;;  %v15855_v7 = vld [vmem:[%s21637_s1 + $0x24c8] ss:$16 sps:$4 sm:$0xff]   ;;  %v15860_v16 = vld [vmem:[%s21637_s1 + $0x24e4] ss:$16 sps:$4 sm:$0xff]  }
 0x464   :  { %10538 = vmatprep.subr.bf16.mxu0 %v15776_v17  ;;  %11563 = vmatprep.subr.bf16.mxu1 %v15779_v8  ;;  %v15863_v17 = vld [vmem:[%s21637_s1 + $0x24ec] ss:$16 sps:$4 sm:$0xff]   ;;  %v15858_v8 = vld [vmem:[%s21637_s1 + $0x24e0] ss:$16 sps:$4 sm:$0xff]  }
 0x467   :  { %10539 = vmatpush1.bf16.msra.mxu0 %v15774_v20  ;;  %11564 = vmatpush1.bf16.msra.mxu1 %v15777_v22  ;;  %v15861_v20 = vld [vmem:[%s21637_s1 + $0x24e8] ss:$16 sps:$4 sm:$0xff]   ;;  %v15866_v22 = vld [vmem:[%s21637_s1 + $0x2504] ss:$16 sps:$4 sm:$0xff]  }
 0x468   :  { %10540 = vmatprep.subr.bf16.mxu0 %v15782_v4  ;;  %11565 = vmatprep.subr.bf16.mxu1 %v15785_v24  ;;  %v15869_v4 = vld [vmem:[%s21637_s1 + $0x250c] ss:$16 sps:$4 sm:$0xff]   ;;  %v15864_v24 = vld [vmem:[%s21637_s1 + $0x2500] ss:$16 sps:$4 sm:$0xff]  }
 0x46b   :  { %10541 = vmatpush1.bf16.msra.mxu0 %v15780_v13  ;;  %11566 = vmatpush1.bf16.msra.mxu1 %v15783_v27  ;;  %v15867_v13 = vld [vmem:[%s21637_s1 + $0x2508] ss:$16 sps:$4 sm:$0xff]   ;;  %v15872_v27 = vld [vmem:[%s21637_s1 + $0x2524] ss:$16 sps:$4 sm:$0xff]  }
 0x46c   :  { %10542 = vmatprep.subr.bf16.mxu0 %v15788_v18  ;;  %11567 = vmatprep.subr.bf16.mxu1 %v15791_v28  ;;  %v15875_v18 = vld [vmem:[%s21637_s1 + $0x252c] ss:$16 sps:$4 sm:$0xff]   ;;  %v15870_v28 = vld [vmem:[%s21637_s1 + $0x2520] ss:$16 sps:$4 sm:$0xff]  }
 0x46f   :  { %10543 = vmatpush1.bf16.msra.mxu0 %v15786_v14  ;;  %11568 = vmatpush1.bf16.msra.mxu1 %v15789_v30  ;;  %v15873_v14 = vld [vmem:[%s21637_s1 + $0x2528] ss:$16 sps:$4 sm:$0xff]   ;;  %v15878_v30 = vld [vmem:[%s21637_s1 + $0x2544] ss:$16 sps:$4 sm:$0xff]  }
 0x470   :  { %10544 = vmatprep.subr.bf16.mxu0 %v15794_v19  ;;  %11569 = vmatprep.subr.bf16.mxu1 %v15797_v32  ;;  %v15881_v19 = vld [vmem:[%s21637_s1 + $0x254c] ss:$16 sps:$4 sm:$0xff]   ;;  %v15876_v32 = vld [vmem:[%s21637_s1 + $0x2540] ss:$16 sps:$4 sm:$0xff]  }
 0x473   :  { %10545 = vmatpush1.bf16.msra.mxu0 %v15792_v26  ;;  %11570 = vmatpush1.bf16.msra.mxu1 %v15795_v23  ;;  %v15879_v26 = vld [vmem:[%s21637_s1 + $0x2548] ss:$16 sps:$4 sm:$0xff]   ;;  %v15884_v23 = vld [vmem:[%s21637_s1 + $0x2564] ss:$16 sps:$4 sm:$0xff]  }
 0x474   :  { %10546 = vmatprep.subr.bf16.mxu0 %v15800_v36  ;;  %11571 = vmatprep.subr.bf16.mxu1 %v15803_v37  ;;  %v15887_v36 = vld [vmem:[%s21637_s1 + $0x256c] ss:$16 sps:$4 sm:$0xff]   ;;  %v15882_v37 = vld [vmem:[%s21637_s1 + $0x2560] ss:$16 sps:$4 sm:$0xff]  }
 0x477   :  { %10547 = vmatpush1.bf16.msra.mxu0 %v15798_v21  ;;  %11572 = vmatpush1.bf16.msra.mxu1 %v15801_v31  ;;  %v15885_v21 = vld [vmem:[%s21637_s1 + $0x2568] ss:$16 sps:$4 sm:$0xff]   ;;  %v15890_v31 = vld [vmem:[%s21637_s1 + $0x2584] ss:$16 sps:$4 sm:$0xff]  }
 0x478   :  { %10548 = vmatprep.subr.bf16.mxu0 %v15806_v39  ;;  %11573 = vmatprep.subr.bf16.mxu1 %v15809_v40  ;;  %v15893_v39 = vld [vmem:[%s21637_s1 + $0x258c] ss:$16 sps:$4 sm:$0xff]   ;;  %v15888_v40 = vld [vmem:[%s21637_s1 + $0x2580] ss:$16 sps:$4 sm:$0xff]  }
 0x47b   :  { %10549 = vmatpush1.bf16.msra.mxu0 %v15804_v25  ;;  %11574 = vmatpush1.bf16.msra.mxu1 %v15807_v43  ;;  %v15896_v25 = vld [vmem:[%s21637_s1 + $0x25a4] ss:$16 sps:$4 sm:$0xff]   ;;  %v15899_v43 = vld [vmem:[%s21637_s1 + $0x25ac] ss:$16 sps:$4 sm:$0xff]  }
 0x47c   :  { %10550 = vmatprep.subr.bf16.mxu0 %v15812_v46  ;;  %11575 = vmatprep.subr.bf16.mxu1 %v15815_v29  ;;  %v15894_v46 = vld [vmem:[%s21637_s1 + $0x25a0] ss:$16 sps:$4 sm:$0xff]   ;;  %v15897_v29 = vld [vmem:[%s21637_s1 + $0x25a8] ss:$16 sps:$4 sm:$0xff]  }
 0x47f   :  { %10551 = vmatpush1.bf16.msra.mxu0 %v15810_v50  ;;  %11576 = vmatpush1.bf16.msra.mxu1 %v15813_v33  ;;  %v15902_v50 = vld [vmem:[%s21637_s1 + $0x25c4] ss:$16 sps:$4 sm:$0xff]   ;;  %v15905_v33 = vld [vmem:[%s21637_s1 + $0x25cc] ss:$16 sps:$4 sm:$0xff]  }
 0x480   :  { %10561 = vmatprep.subr.bf16.mxu0 %v15818_v51  ;;  %11586 = vmatprep.subr.bf16.mxu1 %v15821_v53  ;;  %v15900_v51 = vld [vmem:[%s21637_s1 + $0x25c0] ss:$16 sps:$4 sm:$0xff]   ;;  %v15903_v53 = vld [vmem:[%s21637_s1 + $0x25c8] ss:$16 sps:$4 sm:$0xff]  }
 0x482   :  { %10553 = vmatmul.mubr.bf16.vlgmr.msra.gmra.mrb[0].mxu0 %v1867_v34  ;;  %11578 = vmatmul.mubr.bf16.vlgmr.msra.gmra.mrb[0].mxu1 %v1867_v34  ;;  %v15911_v34 = vld [vmem:[%s21637_s1 + $0x25ec] ss:$16 sps:$4 sm:$0xff]  }
 0x483   :  { %10562 = vmatpush1.bf16.msra.mxu0 %v15816_v54  ;;  %11587 = vmatpush1.bf16.msra.mxu1 %v15819_v55  ;;  %v15906_v54 = vld [vmem:[%s21637_s1 + $0x25e0] ss:$16 sps:$4 sm:$0xff]   ;;  %v15909_v55 = vld [vmem:[%s21637_s1 + $0x25e8] ss:$16 sps:$4 sm:$0xff]  }
 0x484   :  { %10563 = vmatprep.subr.bf16.mxu0 %v15824_v56  ;;  %11588 = vmatprep.subr.bf16.mxu1 %v15827_v45  ;;  %v15915_v56 = vld [vmem:[%s21637_s1 + $0x2604] ss:$16 sps:$4 sm:$0xff]   ;;  %v15918_v45 = vld [vmem:[%s21637_s1 + $0x260c] ss:$16 sps:$4 sm:$0xff]  }
 0x485   :  { %10593 = vmatprep.mubr.bf16.mxu0 %v20222_v47  ;;  %11618 = vmatprep.mubr.bf16.mxu1 %v20222_v47 }
 0x487   :  { %10564 = vmatpush1.bf16.msra.mxu0 %v15822_v57  ;;  %11589 = vmatpush1.bf16.msra.mxu1 %v15825_v58  ;;  %v20408_v57 = vrot.slane %v20191_v35, %v16672_v49  ;;  %v15913_v58 = vld [vmem:[%s21637_s1 + $0x2600] ss:$16 sps:$4 sm:$0xff]   ;;  %v15924_v35 = vld [vmem:[%s21637_s1 + $0x262c] ss:$16 sps:$4 sm:$0xff]  }
 0x488   :  { %10565 = vmatprep.subr.bf16.mxu0 %v15830_v48  ;;  %11590 = vmatprep.subr.bf16.mxu1 %v15833_v61  ;;  %v15916_v48 = vld [vmem:[%s21637_s1 + $0x2608] ss:$16 sps:$4 sm:$0xff]   ;;  %v15921_v61 = vld [vmem:[%s21637_s1 + $0x2624] ss:$16 sps:$4 sm:$0xff]  }
 0x48b   :  { %10566 = vmatpush1.bf16.msra.mxu0 %v15828_v62  ;;  %11591 = vmatpush1.bf16.msra.mxu1 %v15831_v44  ;;  %v1870_v62 = vcombine.high %v20222_v47, %v20222_v47  ;;  %v15919_v44 = vld [vmem:[%s21637_s1 + $0x2620] ss:$16 sps:$4 sm:$0xff]   ;;  %v15927_v47 = vld [vmem:[%s21637_s1 + $0x2644] ss:$16 sps:$4 sm:$0xff]  }
 0x48c   :  { %10567 = vmatprep.subr.bf16.mxu0 %v15836_v0  ;;  %11592 = vmatprep.subr.bf16.mxu1 %v15839_v1  ;;  %v15922_v0 = vld [vmem:[%s21637_s1 + $0x2628] ss:$16 sps:$4 sm:$0xff]   ;;  %v15930_v1 = vld [vmem:[%s21637_s1 + $0x264c] ss:$16 sps:$4 sm:$0xff]  }
 0x48f   :  { %10568 = vmatpush1.bf16.msra.mxu0 %v15834_v2  ;;  %11593 = vmatpush1.bf16.msra.mxu1 %v15837_v59  ;;  %v15925_v2 = vld [vmem:[%s21637_s1 + $0x2640] ss:$16 sps:$4 sm:$0xff]   ;;  %v15928_v59 = vld [vmem:[%s21637_s1 + $0x2648] ss:$16 sps:$4 sm:$0xff]  }
 0x490   :  { %10569 = vmatprep.subr.bf16.mxu0 %v15842_v3  ;;  %11594 = vmatprep.subr.bf16.mxu1 %v15845_v5  ;;  %v15933_v3 = vld [vmem:[%s21637_s1 + $0x2664] ss:$16 sps:$4 sm:$0xff]   ;;  %v15936_v5 = vld [vmem:[%s21637_s1 + $0x266c] ss:$16 sps:$4 sm:$0xff]  }
 0x493   :  { %10570 = vmatpush1.bf16.msra.mxu0 %v15840_v6  ;;  %11595 = vmatpush1.bf16.msra.mxu1 %v15843_v60  ;;  %v15931_v6 = vld [vmem:[%s21637_s1 + $0x2660] ss:$16 sps:$4 sm:$0xff]   ;;  %v15934_v60 = vld [vmem:[%s21637_s1 + $0x2668] ss:$16 sps:$4 sm:$0xff]  }
 0x494   :  { %10571 = vmatprep.subr.bf16.mxu0 %v15848_v9  ;;  %11596 = vmatprep.subr.bf16.mxu1 %v15851_v10  ;;  %v15939_v9 = vld [vmem:[%s21637_s1 + $0x2684] ss:$16 sps:$4 sm:$0xff]   ;;  %v15942_v10 = vld [vmem:[%s21637_s1 + $0x268c] ss:$16 sps:$4 sm:$0xff]  }
 0x497   :  { %10572 = vmatpush1.bf16.msra.mxu0 %v15846_v11  ;;  %11597 = vmatpush1.bf16.msra.mxu1 %v15849_v63  ;;  %v15937_v11 = vld [vmem:[%s21637_s1 + $0x2680] ss:$16 sps:$4 sm:$0xff]   ;;  %v15940_v63 = vld [vmem:[%s21637_s1 + $0x2688] ss:$16 sps:$4 sm:$0xff]  }
 0x498   :  { %10573 = vmatprep.subr.bf16.mxu0 %v15854_v12  ;;  %11598 = vmatprep.subr.bf16.mxu1 %v15857_v52  ;;  %v15945_v12 = vld [vmem:[%s21637_s1 + $0x26a4] ss:$16 sps:$4 sm:$0xff]   ;;  %v15948_v52 = vld [vmem:[%s21637_s1 + $0x26ac] ss:$16 sps:$4 sm:$0xff]  }
 0x49b   :  { %10574 = vmatpush1.bf16.msra.mxu0 %v15852_v15  ;;  %11599 = vmatpush1.bf16.msra.mxu1 %v15855_v7  ;;  %v15943_v15 = vld [vmem:[%s21637_s1 + $0x26a0] ss:$16 sps:$4 sm:$0xff]   ;;  %v15946_v7 = vld [vmem:[%s21637_s1 + $0x26a8] ss:$16 sps:$4 sm:$0xff]  }
 0x49c   :  { %10575 = vmatprep.subr.bf16.mxu0 %v15860_v16  ;;  %11600 = vmatprep.subr.bf16.mxu1 %v15863_v17  ;;  %v15951_v16 = vld [vmem:[%s21637_s1 + $0x26c4] ss:$16 sps:$4 sm:$0xff]   ;;  %v15954_v17 = vld [vmem:[%s21637_s1 + $0x26cc] ss:$16 sps:$4 sm:$0xff]  }
 0x49f   :  { %10576 = vmatpush1.bf16.msra.mxu0 %v15858_v8  ;;  %11601 = vmatpush1.bf16.msra.mxu1 %v15861_v20  ;;  %v15949_v8 = vld [vmem:[%s21637_s1 + $0x26c0] ss:$16 sps:$4 sm:$0xff]   ;;  %v15952_v20 = vld [vmem:[%s21637_s1 + $0x26c8] ss:$16 sps:$4 sm:$0xff]  }
 0x4a0   :  { %10577 = vmatprep.subr.bf16.mxu0 %v15866_v22  ;;  %11602 = vmatprep.subr.bf16.mxu1 %v15869_v4  ;;  %v15957_v22 = vld [vmem:[%s21637_s1 + $0x26e4] ss:$16 sps:$4 sm:$0xff]   ;;  %v15960_v4 = vld [vmem:[%s21637_s1 + $0x26ec] ss:$16 sps:$4 sm:$0xff]  }
 0x4a3   :  { %10578 = vmatpush1.bf16.msra.mxu0 %v15864_v24  ;;  %11603 = vmatpush1.bf16.msra.mxu1 %v15867_v13  ;;  %v15955_v24 = vld [vmem:[%s21637_s1 + $0x26e0] ss:$16 sps:$4 sm:$0xff]   ;;  %v15958_v13 = vld [vmem:[%s21637_s1 + $0x26e8] ss:$16 sps:$4 sm:$0xff]  }
 0x4a4   :  { %10579 = vmatprep.subr.bf16.mxu0 %v15872_v27  ;;  %11604 = vmatprep.subr.bf16.mxu1 %v15875_v18  ;;  %v15963_v27 = vld [vmem:[%s21637_s1 + $0x2704] ss:$16 sps:$4 sm:$0xff]   ;;  %v15966_v18 = vld [vmem:[%s21637_s1 + $0x270c] ss:$16 sps:$4 sm:$0xff]  }
 0x4a7   :  { %10580 = vmatpush1.bf16.msra.mxu0 %v15870_v28  ;;  %11605 = vmatpush1.bf16.msra.mxu1 %v15873_v14  ;;  %v15961_v28 = vld [vmem:[%s21637_s1 + $0x2700] ss:$16 sps:$4 sm:$0xff]   ;;  %v15964_v14 = vld [vmem:[%s21637_s1 + $0x2708] ss:$16 sps:$4 sm:$0xff]  }
 0x4a8   :  { %10581 = vmatprep.subr.bf16.mxu0 %v15878_v30  ;;  %11606 = vmatprep.subr.bf16.mxu1 %v15881_v19  ;;  %v15969_v30 = vld [vmem:[%s21637_s1 + $0x2724] ss:$16 sps:$4 sm:$0xff]   ;;  %v15972_v19 = vld [vmem:[%s21637_s1 + $0x272c] ss:$16 sps:$4 sm:$0xff]  }
 0x4ab   :  { %10582 = vmatpush1.bf16.msra.mxu0 %v15876_v32  ;;  %11607 = vmatpush1.bf16.msra.mxu1 %v15879_v26  ;;  %v15967_v32 = vld [vmem:[%s21637_s1 + $0x2720] ss:$16 sps:$4 sm:$0xff]   ;;  %v15970_v26 = vld [vmem:[%s21637_s1 + $0x2728] ss:$16 sps:$4 sm:$0xff]  }
 0x4ac   :  { %10583 = vmatprep.subr.bf16.mxu0 %v15884_v23  ;;  %11608 = vmatprep.subr.bf16.mxu1 %v15887_v36  ;;  %v15975_v23 = vld [vmem:[%s21637_s1 + $0x2744] ss:$16 sps:$4 sm:$0xff]   ;;  %v15978_v36 = vld [vmem:[%s21637_s1 + $0x274c] ss:$16 sps:$4 sm:$0xff]  }
 0x4af   :  { %10584 = vmatpush1.bf16.msra.mxu0 %v15882_v37  ;;  %11609 = vmatpush1.bf16.msra.mxu1 %v15885_v21  ;;  %v15973_v37 = vld [vmem:[%s21637_s1 + $0x2740] ss:$16 sps:$4 sm:$0xff]   ;;  %v15976_v21 = vld [vmem:[%s21637_s1 + $0x2748] ss:$16 sps:$4 sm:$0xff]  }
 0x4b0   :  { %10585 = vmatprep.subr.bf16.mxu0 %v15890_v31  ;;  %11610 = vmatprep.subr.bf16.mxu1 %v15893_v39  ;;  %v15981_v31 = vld [vmem:[%s21637_s1 + $0x2764] ss:$16 sps:$4 sm:$0xff]   ;;  %v15984_v39 = vld [vmem:[%s21637_s1 + $0x276c] ss:$16 sps:$4 sm:$0xff]  }
 0x4b3   :  { %10586 = vmatpush1.bf16.msra.mxu0 %v15888_v40  ;;  %11611 = vmatpush1.bf16.msra.mxu1 %v15891_v41  ;;  %v15979_v40 = vld [vmem:[%s21637_s1 + $0x2760] ss:$16 sps:$4 sm:$0xff]   ;;  %v15982_v41 = vld [vmem:[%s21637_s1 + $0x2768] ss:$16 sps:$4 sm:$0xff]  }
 0x4b4   :  { %10587 = vmatprep.subr.bf16.mxu0 %v15896_v25  ;;  %11612 = vmatprep.subr.bf16.mxu1 %v15899_v43  ;;  %v15987_v25 = vld [vmem:[%s21637_s1 + $0x2784] ss:$16 sps:$4 sm:$0xff]   ;;  %v15990_v43 = vld [vmem:[%s21637_s1 + $0x278c] ss:$16 sps:$4 sm:$0xff]  }
 0x4b7   :  { %10588 = vmatpush1.bf16.msra.mxu0 %v15894_v46  ;;  %11613 = vmatpush1.bf16.msra.mxu1 %v15897_v29  ;;  %v15985_v46 = vld [vmem:[%s21637_s1 + $0x2780] ss:$16 sps:$4 sm:$0xff]   ;;  %v15988_v29 = vld [vmem:[%s21637_s1 + $0x2788] ss:$16 sps:$4 sm:$0xff]  }
 0x4b8   :  { %10589 = vmatprep.subr.bf16.mxu0 %v15902_v50  ;;  %11614 = vmatprep.subr.bf16.mxu1 %v15905_v33  ;;  %v15993_v50 = vld [vmem:[%s21637_s1 + $0x27a4] ss:$16 sps:$4 sm:$0xff]   ;;  %v15996_v33 = vld [vmem:[%s21637_s1 + $0x27ac] ss:$16 sps:$4 sm:$0xff]  }
 0x4bb   :  { %10590 = vmatpush1.bf16.msra.mxu0 %v15900_v51  ;;  %11615 = vmatpush1.bf16.msra.mxu1 %v15903_v53  ;;  %v15991_v51 = vld [vmem:[%s21637_s1 + $0x27a0] ss:$16 sps:$4 sm:$0xff]   ;;  %v15994_v53 = vld [vmem:[%s21637_s1 + $0x27a8] ss:$16 sps:$4 sm:$0xff]  }
 0x4bc   :  { %10591 = vmatprep.subr.bf16.mxu0 %v15908_v38  ;;  %11616 = vmatprep.subr.bf16.mxu1 %v15911_v34  ;;  %v15999_v38 = vld [vmem:[%s21637_s1 + $0x27c4] ss:$16 sps:$4 sm:$0xff]   ;;  %v16002_v34 = vld [vmem:[%s21637_s1 + $0x27cc] ss:$16 sps:$4 sm:$0xff]  }
 0x4bf   :  { %10592 = vmatpush1.bf16.msra.mxu0 %v15906_v54  ;;  %11617 = vmatpush1.bf16.msra.mxu1 %v15909_v55  ;;  %v20585_v54 = vld [vmem:[%s21636_s0 + $0x28] sm:$0xff]  ;;  %v15997_v55 = vld [vmem:[%s21637_s1 + $0x27c0] ss:$16 sps:$4 sm:$0xff]  }
 0x4c0   :  { %10602 = vmatprep.subr.bf16.mxu0 %v15915_v56  ;;  %11627 = vmatprep.subr.bf16.mxu1 %v15918_v45  ;;  %v16000_v56 = vld [vmem:[%s21637_s1 + $0x27c8] ss:$16 sps:$4 sm:$0xff]   ;;  %v16005_v45 = vld [vmem:[%s21637_s1 + $0x27e4] ss:$16 sps:$4 sm:$0xff]  }
 0x4c2   :  { %10594 = vmatmul.mubr.bf16.vlgmr.msra.gmra.mrb[0].mxu0 %v20408_v57  ;;  %11619 = vmatmul.mubr.bf16.vlgmr.msra.gmra.mrb[0].mxu1 %v20408_v57 }
 0x4c3   :  { %10603 = vmatpush1.bf16.msra.mxu0 %v15913_v58  ;;  %11628 = vmatpush1.bf16.msra.mxu1 %v15916_v48  ;;  %v16008_v58 = vld [vmem:[%s21637_s1 + $0x27ec] ss:$16 sps:$4 sm:$0xff]   ;;  %v20601_v48 = vrot.slane %v20585_v54, %v16672_v49 }
 0x4c4   :  { %10604 = vmatprep.subr.bf16.mxu0 %v15921_v61  ;;  %11629 = vmatprep.subr.bf16.mxu1 %v15924_v35  ;;  %v16003_v61 = vld [vmem:[%s21637_s1 + $0x27e0] ss:$16 sps:$4 sm:$0xff]   ;;  %v16006_v35 = vld [vmem:[%s21637_s1 + $0x27e8] ss:$16 sps:$4 sm:$0xff]  }
 0x4c5   :  { %10634 = vmatprep.mubr.bf16.mxu0 %v1870_v62  ;;  %11659 = vmatprep.mubr.bf16.mxu1 %v1870_v62  ;;  %v16011_v62 = vld [vmem:[%s21637_s1 + $0x2804] ss:$16 sps:$4 sm:$0xff]  }
 0x4c7   :  { %10605 = vmatpush1.bf16.msra.mxu0 %v15919_v44  ;;  %11630 = vmatpush1.bf16.msra.mxu1 %v15922_v0  ;;  %v16014_v44 = vld [vmem:[%s21637_s1 + $0x280c] ss:$16 sps:$4 sm:$0xff]   ;;  %v1886_v0 = vcombine.high %v20601_v48, %v20601_v48 }
 0x4c8   :  { %10606 = vmatprep.subr.bf16.mxu0 %v15927_v47  ;;  %11631 = vmatprep.subr.bf16.mxu1 %v15930_v1  ;;  %v1868_v47 = vcombine.high %v20408_v57, %v20408_v57  ;;  %v16009_v1 = vld [vmem:[%s21637_s1 + $0x2800] ss:$16 sps:$4 sm:$0xff]   ;;  %v16020_v57 = vld [vmem:[%s21637_s1 + $0x282c] ss:$16 sps:$4 sm:$0xff]  }
 0x4cb   :  { %10607 = vmatpush1.bf16.msra.mxu0 %v15925_v2  ;;  %11632 = vmatpush1.bf16.msra.mxu1 %v15928_v59  ;;  %v16012_v2 = vld [vmem:[%s21637_s1 + $0x2808] ss:$16 sps:$4 sm:$0xff]   ;;  %v16017_v59 = vld [vmem:[%s21637_s1 + $0x2824] ss:$16 sps:$4 sm:$0xff]  }
 0x4cc   :  { %10608 = vmatprep.subr.bf16.mxu0 %v15933_v3  ;;  %11633 = vmatprep.subr.bf16.mxu1 %v15936_v5  ;;  %v20632_v3 = vrot.slane %v1886_v0, %v16672_v49  ;;  %v16015_v5 = vld [vmem:[%s21637_s1 + $0x2820] ss:$16 sps:$4 sm:$0xff]   ;;  %v16096_v0 = vld [vmem:[%s21637_s1 + $0x29c8] ss:$16 sps:$4 sm:$0xff]  }
 0x4cf   :  { %10609 = vmatpush1.bf16.msra.mxu0 %v15931_v6  ;;  %11634 = vmatpush1.bf16.msra.mxu1 %v15934_v60  ;;  %v16018_v6 = vld [vmem:[%s21637_s1 + $0x2828] ss:$16 sps:$4 sm:$0xff]   ;;  %v16023_v60 = vld [vmem:[%s21637_s1 + $0x2844] ss:$16 sps:$4 sm:$0xff]  }
 0x4d0   :  { %10610 = vmatprep.subr.bf16.mxu0 %v15939_v9  ;;  %11635 = vmatprep.subr.bf16.mxu1 %v15942_v10  ;;  %v16026_v9 = vld [vmem:[%s21637_s1 + $0x284c] ss:$16 sps:$4 sm:$0xff]   ;;  %v16021_v10 = vld [vmem:[%s21637_s1 + $0x2840] ss:$16 sps:$4 sm:$0xff]  }
 0x4d3   :  { %10611 = vmatpush1.bf16.msra.mxu0 %v15937_v11  ;;  %11636 = vmatpush1.bf16.msra.mxu1 %v15940_v63  ;;  %v16024_v11 = vld [vmem:[%s21637_s1 + $0x2848] ss:$16 sps:$4 sm:$0xff]   ;;  %v16029_v63 = vld [vmem:[%s21637_s1 + $0x2864] ss:$16 sps:$4 sm:$0xff]  }
 0x4d4   :  { %10612 = vmatprep.subr.bf16.mxu0 %v15945_v12  ;;  %11637 = vmatprep.subr.bf16.mxu1 %v15948_v52  ;;  %v16032_v12 = vld [vmem:[%s21637_s1 + $0x286c] ss:$16 sps:$4 sm:$0xff]   ;;  %v16027_v52 = vld [vmem:[%s21637_s1 + $0x2860] ss:$16 sps:$4 sm:$0xff]  }
 0x4d7   :  { %10613 = vmatpush1.bf16.msra.mxu0 %v15943_v15  ;;  %11638 = vmatpush1.bf16.msra.mxu1 %v15946_v7  ;;  %v16030_v15 = vld [vmem:[%s21637_s1 + $0x2868] ss:$16 sps:$4 sm:$0xff]   ;;  %v16035_v7 = vld [vmem:[%s21637_s1 + $0x2884] ss:$16 sps:$4 sm:$0xff]  }
 0x4d8   :  { %10614 = vmatprep.subr.bf16.mxu0 %v15951_v16  ;;  %11639 = vmatprep.subr.bf16.mxu1 %v15954_v17  ;;  %v16038_v16 = vld [vmem:[%s21637_s1 + $0x288c] ss:$16 sps:$4 sm:$0xff]   ;;  %v16033_v17 = vld [vmem:[%s21637_s1 + $0x2880] ss:$16 sps:$4 sm:$0xff]  }
 0x4db   :  { %10615 = vmatpush1.bf16.msra.mxu0 %v15949_v8  ;;  %11640 = vmatpush1.bf16.msra.mxu1 %v15952_v20  ;;  %v16036_v8 = vld [vmem:[%s21637_s1 + $0x2888] ss:$16 sps:$4 sm:$0xff]   ;;  %v16041_v20 = vld [vmem:[%s21637_s1 + $0x28a4] ss:$16 sps:$4 sm:$0xff]  }
 0x4dc   :  { %10616 = vmatprep.subr.bf16.mxu0 %v15957_v22  ;;  %11641 = vmatprep.subr.bf16.mxu1 %v15960_v4  ;;  %v16044_v22 = vld [vmem:[%s21637_s1 + $0x28ac] ss:$16 sps:$4 sm:$0xff]   ;;  %v16039_v4 = vld [vmem:[%s21637_s1 + $0x28a0] ss:$16 sps:$4 sm:$0xff]  }
 0x4df   :  { %10617 = vmatpush1.bf16.msra.mxu0 %v15955_v24  ;;  %11642 = vmatpush1.bf16.msra.mxu1 %v15958_v13  ;;  %v16042_v24 = vld [vmem:[%s21637_s1 + $0x28a8] ss:$16 sps:$4 sm:$0xff]   ;;  %v16047_v13 = vld [vmem:[%s21637_s1 + $0x28c4] ss:$16 sps:$4 sm:$0xff]  }
 0x4e0   :  { %10618 = vmatprep.subr.bf16.mxu0 %v15963_v27  ;;  %11643 = vmatprep.subr.bf16.mxu1 %v15966_v18  ;;  %v16050_v27 = vld [vmem:[%s21637_s1 + $0x28cc] ss:$16 sps:$4 sm:$0xff]   ;;  %v16045_v18 = vld [vmem:[%s21637_s1 + $0x28c0] ss:$16 sps:$4 sm:$0xff]  }
 0x4e3   :  { %10619 = vmatpush1.bf16.msra.mxu0 %v15961_v28  ;;  %11644 = vmatpush1.bf16.msra.mxu1 %v15964_v14  ;;  %v16048_v28 = vld [vmem:[%s21637_s1 + $0x28c8] ss:$16 sps:$4 sm:$0xff]   ;;  %v16053_v14 = vld [vmem:[%s21637_s1 + $0x28e4] ss:$16 sps:$4 sm:$0xff]  }
 0x4e4   :  { %10620 = vmatprep.subr.bf16.mxu0 %v15969_v30  ;;  %11645 = vmatprep.subr.bf16.mxu1 %v15972_v19  ;;  %v16056_v30 = vld [vmem:[%s21637_s1 + $0x28ec] ss:$16 sps:$4 sm:$0xff]   ;;  %v16051_v19 = vld [vmem:[%s21637_s1 + $0x28e0] ss:$16 sps:$4 sm:$0xff]  }
 0x4e7   :  { %10621 = vmatpush1.bf16.msra.mxu0 %v15967_v32  ;;  %11646 = vmatpush1.bf16.msra.mxu1 %v15970_v26  ;;  %v16054_v32 = vld [vmem:[%s21637_s1 + $0x28e8] ss:$16 sps:$4 sm:$0xff]   ;;  %v16059_v26 = vld [vmem:[%s21637_s1 + $0x2904] ss:$16 sps:$4 sm:$0xff]  }
 0x4e8   :  { %10622 = vmatprep.subr.bf16.mxu0 %v15975_v23  ;;  %11647 = vmatprep.subr.bf16.mxu1 %v15978_v36  ;;  %v16062_v23 = vld [vmem:[%s21637_s1 + $0x290c] ss:$16 sps:$4 sm:$0xff]   ;;  %v16057_v36 = vld [vmem:[%s21637_s1 + $0x2900] ss:$16 sps:$4 sm:$0xff]  }
 0x4eb   :  { %10623 = vmatpush1.bf16.msra.mxu0 %v15973_v37  ;;  %11648 = vmatpush1.bf16.msra.mxu1 %v15976_v21  ;;  %v16060_v37 = vld [vmem:[%s21637_s1 + $0x2908] ss:$16 sps:$4 sm:$0xff]   ;;  %v16065_v21 = vld [vmem:[%s21637_s1 + $0x2924] ss:$16 sps:$4 sm:$0xff]  }
 0x4ec   :  { %10624 = vmatprep.subr.bf16.mxu0 %v15981_v31  ;;  %11649 = vmatprep.subr.bf16.mxu1 %v15984_v39  ;;  %v16068_v31 = vld [vmem:[%s21637_s1 + $0x292c] ss:$16 sps:$4 sm:$0xff]   ;;  %v16063_v39 = vld [vmem:[%s21637_s1 + $0x2920] ss:$16 sps:$4 sm:$0xff]  }
 0x4ef   :  { %10625 = vmatpush1.bf16.msra.mxu0 %v15979_v40  ;;  %11650 = vmatpush1.bf16.msra.mxu1 %v15982_v41  ;;  %v16066_v40 = vld [vmem:[%s21637_s1 + $0x2928] ss:$16 sps:$4 sm:$0xff]   ;;  %v16071_v41 = vld [vmem:[%s21637_s1 + $0x2944] ss:$16 sps:$4 sm:$0xff]  }
 0x4f0   :  { %10626 = vmatprep.subr.bf16.mxu0 %v15987_v25  ;;  %11651 = vmatprep.subr.bf16.mxu1 %v15990_v43  ;;  %v16074_v25 = vld [vmem:[%s21637_s1 + $0x294c] ss:$16 sps:$4 sm:$0xff]   ;;  %v16069_v43 = vld [vmem:[%s21637_s1 + $0x2940] ss:$16 sps:$4 sm:$0xff]  }
 0x4f3   :  { %10627 = vmatpush1.bf16.msra.mxu0 %v15985_v46  ;;  %11652 = vmatpush1.bf16.msra.mxu1 %v15988_v29  ;;  %v16072_v46 = vld [vmem:[%s21637_s1 + $0x2948] ss:$16 sps:$4 sm:$0xff]   ;;  %v16077_v29 = vld [vmem:[%s21637_s1 + $0x2964] ss:$16 sps:$4 sm:$0xff]  }
 0x4f4   :  { %10628 = vmatprep.subr.bf16.mxu0 %v15993_v50  ;;  %11653 = vmatprep.subr.bf16.mxu1 %v15996_v33  ;;  %v16080_v50 = vld [vmem:[%s21637_s1 + $0x296c] ss:$16 sps:$4 sm:$0xff]   ;;  %v16075_v33 = vld [vmem:[%s21637_s1 + $0x2960] ss:$16 sps:$4 sm:$0xff]  }
 0x4f7   :  { %10629 = vmatpush1.bf16.msra.mxu0 %v15991_v51  ;;  %11654 = vmatpush1.bf16.msra.mxu1 %v15994_v53  ;;  %v16078_v51 = vld [vmem:[%s21637_s1 + $0x2968] ss:$16 sps:$4 sm:$0xff]   ;;  %v16083_v53 = vld [vmem:[%s21637_s1 + $0x2984] ss:$16 sps:$4 sm:$0xff]  }
 0x4f8   :  { %10630 = vmatprep.subr.bf16.mxu0 %v15999_v38  ;;  %11655 = vmatprep.subr.bf16.mxu1 %v16002_v34  ;;  %v16086_v38 = vld [vmem:[%s21637_s1 + $0x298c] ss:$16 sps:$4 sm:$0xff]   ;;  %v16081_v34 = vld [vmem:[%s21637_s1 + $0x2980] ss:$16 sps:$4 sm:$0xff]  }
 0x4fb   :  { %10631 = vmatpush1.bf16.msra.mxu0 %v15997_v55  ;;  %11656 = vmatpush1.bf16.msra.mxu1 %v16000_v56  ;;  %v16084_v55 = vld [vmem:[%s21637_s1 + $0x2988] ss:$16 sps:$4 sm:$0xff]   ;;  %v16089_v56 = vld [vmem:[%s21637_s1 + $0x29a4] ss:$16 sps:$4 sm:$0xff]  }
 0x4fc   :  { %10632 = vmatprep.subr.bf16.mxu0 %v16005_v45  ;;  %11657 = vmatprep.subr.bf16.mxu1 %v16008_v58  ;;  %v16092_v45 = vld [vmem:[%s21637_s1 + $0x29ac] ss:$16 sps:$4 sm:$0xff]   ;;  %v16087_v58 = vld [vmem:[%s21637_s1 + $0x29a0] ss:$16 sps:$4 sm:$0xff]  }
 0x4ff   :  { %10633 = vmatpush1.bf16.msra.mxu0 %v16003_v61  ;;  %11658 = vmatpush1.bf16.msra.mxu1 %v16006_v35  ;;  %v16090_v61 = vld [vmem:[%s21637_s1 + $0x29a8] ss:$16 sps:$4 sm:$0xff]   ;;  %v16095_v35 = vld [vmem:[%s21637_s1 + $0x29c4] ss:$16 sps:$4 sm:$0xff]  }
 0x500   :  { %10643 = vmatprep.subr.bf16.mxu0 %v16011_v62  ;;  %11668 = vmatprep.subr.bf16.mxu1 %v16014_v44  ;;  %v16098_v62 = vld [vmem:[%s21637_s1 + $0x29cc] ss:$16 sps:$4 sm:$0xff]   ;;  %v16093_v44 = vld [vmem:[%s21637_s1 + $0x29c0] ss:$16 sps:$4 sm:$0xff]  }
 0x502   :  { %10635 = vmatmul.mubr.bf16.vlgmr.msra.gmra.mrb[0].mxu0 %v1868_v47  ;;  %11660 = vmatmul.mubr.bf16.vlgmr.msra.gmra.mrb[0].mxu1 %v1868_v47  ;;  %v16101_v47 = vld [vmem:[%s21637_s1 + $0x29e4] ss:$16 sps:$4 sm:$0xff]  }
 0x503   :  { %10644 = vmatpush1.bf16.msra.mxu0 %v16009_v1  ;;  %11669 = vmatpush1.bf16.msra.mxu1 %v16012_v2  ;;  %v16104_v1 = vld [vmem:[%s21637_s1 + $0x29ec] ss:$16 sps:$4 sm:$0xff]   ;;  %v16099_v2 = vld [vmem:[%s21637_s1 + $0x29e0] ss:$16 sps:$4 sm:$0xff]  }
 0x504   :  { %10645 = vmatprep.subr.bf16.mxu0 %v16017_v59  ;;  %11670 = vmatprep.subr.bf16.mxu1 %v16020_v57  ;;  %v16102_v59 = vld [vmem:[%s21637_s1 + $0x29e8] ss:$16 sps:$4 sm:$0xff]   ;;  %v16107_v57 = vld [vmem:[%s21637_s1 + $0x2a04] ss:$16 sps:$4 sm:$0xff]  }
 0x505   :  { %10675 = vmatprep.mubr.bf16.mxu0 %v20632_v3  ;;  %11700 = vmatprep.mubr.bf16.mxu1 %v20632_v3 }
 0x507   :  { %10646 = vmatpush1.bf16.msra.mxu0 %v16015_v5  ;;  %11671 = vmatpush1.bf16.msra.mxu1 %v16018_v6  ;;  %v16110_v5 = vld [vmem:[%s21637_s1 + $0x2a0c] ss:$16 sps:$4 sm:$0xff]   ;;  %v20818_v6 = vrot.slane %v20601_v48, %v16672_v49 }
 0x508   :  { %10647 = vmatprep.subr.bf16.mxu0 %v16023_v60  ;;  %11672 = vmatprep.subr.bf16.mxu1 %v16026_v9  ;;  %v16105_v60 = vld [vmem:[%s21637_s1 + $0x2a00] ss:$16 sps:$4 sm:$0xff]   ;;  %v16108_v9 = vld [vmem:[%s21637_s1 + $0x2a08] ss:$16 sps:$4 sm:$0xff]   ;;  %v16116_v48 = vld [vmem:[%s21637_s1 + $0x2a2c] ss:$16 sps:$4 sm:$0xff]  }
 0x50b   :  { %10648 = vmatpush1.bf16.msra.mxu0 %v16021_v10  ;;  %11673 = vmatpush1.bf16.msra.mxu1 %v16024_v11  ;;  %v16113_v10 = vld [vmem:[%s21637_s1 + $0x2a24] ss:$16 sps:$4 sm:$0xff]   ;;  %v1918_v11 = vcombine.high %v20632_v3, %v20632_v3 }
 0x50c   :  { %10649 = vmatprep.subr.bf16.mxu0 %v16029_v63  ;;  %11674 = vmatprep.subr.bf16.mxu1 %v16032_v12  ;;  %v16111_v63 = vld [vmem:[%s21637_s1 + $0x2a20] ss:$16 sps:$4 sm:$0xff]   ;;  %v16114_v12 = vld [vmem:[%s21637_s1 + $0x2a28] ss:$16 sps:$4 sm:$0xff]   ;;  %v16119_v3 = vld [vmem:[%s21637_s1 + $0x2a44] ss:$16 sps:$4 sm:$0xff]  }
 0x50f   :  { %10650 = vmatpush1.bf16.msra.mxu0 %v16027_v52  ;;  %11675 = vmatpush1.bf16.msra.mxu1 %v16030_v15  ;;  %v16122_v52 = vld [vmem:[%s21637_s1 + $0x2a4c] ss:$16 sps:$4 sm:$0xff]   ;;  %v16117_v15 = vld [vmem:[%s21637_s1 + $0x2a40] ss:$16 sps:$4 sm:$0xff]  }
 0x510   :  { %10651 = vmatprep.subr.bf16.mxu0 %v16035_v7  ;;  %11676 = vmatprep.subr.bf16.mxu1 %v16038_v16  ;;  %v16120_v7 = vld [vmem:[%s21637_s1 + $0x2a48] ss:$16 sps:$4 sm:$0xff]   ;;  %v16125_v16 = vld [vmem:[%s21637_s1 + $0x2a64] ss:$16 sps:$4 sm:$0xff]  }
 0x513   :  { %10652 = vmatpush1.bf16.msra.mxu0 %v16033_v17  ;;  %11677 = vmatpush1.bf16.msra.mxu1 %v16036_v8  ;;  %v16128_v17 = vld [vmem:[%s21637_s1 + $0x2a6c] ss:$16 sps:$4 sm:$0xff]   ;;  %v16123_v8 = vld [vmem:[%s21637_s1 + $0x2a60] ss:$16 sps:$4 sm:$0xff]  }
 0x514   :  { %10653 = vmatprep.subr.bf16.mxu0 %v16041_v20  ;;  %11678 = vmatprep.subr.bf16.mxu1 %v16044_v22  ;;  %v16126_v20 = vld [vmem:[%s21637_s1 + $0x2a68] ss:$16 sps:$4 sm:$0xff]   ;;  %v16131_v22 = vld [vmem:[%s21637_s1 + $0x2a84] ss:$16 sps:$4 sm:$0xff]  }
 0x517   :  { %10654 = vmatpush1.bf16.msra.mxu0 %v16039_v4  ;;  %11679 = vmatpush1.bf16.msra.mxu1 %v16042_v24  ;;  %v16134_v4 = vld [vmem:[%s21637_s1 + $0x2a8c] ss:$16 sps:$4 sm:$0xff]   ;;  %v16129_v24 = vld [vmem:[%s21637_s1 + $0x2a80] ss:$16 sps:$4 sm:$0xff]  }
 0x518   :  { %10655 = vmatprep.subr.bf16.mxu0 %v16047_v13  ;;  %11680 = vmatprep.subr.bf16.mxu1 %v16050_v27  ;;  %v16132_v13 = vld [vmem:[%s21637_s1 + $0x2a88] ss:$16 sps:$4 sm:$0xff]   ;;  %v16137_v27 = vld [vmem:[%s21637_s1 + $0x2aa4] ss:$16 sps:$4 sm:$0xff]  }
 0x51b   :  { %10656 = vmatpush1.bf16.msra.mxu0 %v16045_v18  ;;  %11681 = vmatpush1.bf16.msra.mxu1 %v16048_v28  ;;  %v16140_v18 = vld [vmem:[%s21637_s1 + $0x2aac] ss:$16 sps:$4 sm:$0xff]   ;;  %v16135_v28 = vld [vmem:[%s21637_s1 + $0x2aa0] ss:$16 sps:$4 sm:$0xff]  }
 0x51c   :  { %10657 = vmatprep.subr.bf16.mxu0 %v16053_v14  ;;  %11682 = vmatprep.subr.bf16.mxu1 %v16056_v30  ;;  %v16138_v14 = vld [vmem:[%s21637_s1 + $0x2aa8] ss:$16 sps:$4 sm:$0xff]   ;;  %v16143_v30 = vld [vmem:[%s21637_s1 + $0x2ac4] ss:$16 sps:$4 sm:$0xff]  }
 0x51f   :  { %10658 = vmatpush1.bf16.msra.mxu0 %v16051_v19  ;;  %11683 = vmatpush1.bf16.msra.mxu1 %v16054_v32  ;;  %v16146_v19 = vld [vmem:[%s21637_s1 + $0x2acc] ss:$16 sps:$4 sm:$0xff]   ;;  %v16141_v32 = vld [vmem:[%s21637_s1 + $0x2ac0] ss:$16 sps:$4 sm:$0xff]  }
 0x520   :  { %10659 = vmatprep.subr.bf16.mxu0 %v16059_v26  ;;  %11684 = vmatprep.subr.bf16.mxu1 %v16062_v23  ;;  %v16144_v26 = vld [vmem:[%s21637_s1 + $0x2ac8] ss:$16 sps:$4 sm:$0xff]   ;;  %v16149_v23 = vld [vmem:[%s21637_s1 + $0x2ae4] ss:$16 sps:$4 sm:$0xff]  }
 0x523   :  { %10660 = vmatpush1.bf16.msra.mxu0 %v16057_v36  ;;  %11685 = vmatpush1.bf16.msra.mxu1 %v16060_v37  ;;  %v16152_v36 = vld [vmem:[%s21637_s1 + $0x2aec] ss:$16 sps:$4 sm:$0xff]   ;;  %v16147_v37 = vld [vmem:[%s21637_s1 + $0x2ae0] ss:$16 sps:$4 sm:$0xff]  }
 0x524   :  { %10661 = vmatprep.subr.bf16.mxu0 %v16065_v21  ;;  %11686 = vmatprep.subr.bf16.mxu1 %v16068_v31  ;;  %v16150_v21 = vld [vmem:[%s21637_s1 + $0x2ae8] ss:$16 sps:$4 sm:$0xff]   ;;  %v16155_v31 = vld [vmem:[%s21637_s1 + $0x2b04] ss:$16 sps:$4 sm:$0xff]  }
 0x527   :  { %10662 = vmatpush1.bf16.msra.mxu0 %v16063_v39  ;;  %11687 = vmatpush1.bf16.msra.mxu1 %v16066_v40  ;;  %v16158_v39 = vld [vmem:[%s21637_s1 + $0x2b0c] ss:$16 sps:$4 sm:$0xff]   ;;  %v16153_v40 = vld [vmem:[%s21637_s1 + $0x2b00] ss:$16 sps:$4 sm:$0xff]  }
 0x528   :  { %10663 = vmatprep.subr.bf16.mxu0 %v16071_v41  ;;  %11688 = vmatprep.subr.bf16.mxu1 %v16074_v25  ;;  %v16156_v41 = vld [vmem:[%s21637_s1 + $0x2b08] ss:$16 sps:$4 sm:$0xff]   ;;  %v16161_v25 = vld [vmem:[%s21637_s1 + $0x2b24] ss:$16 sps:$4 sm:$0xff]  }
 0x52b   :  { %10664 = vmatpush1.bf16.msra.mxu0 %v16069_v43  ;;  %11689 = vmatpush1.bf16.msra.mxu1 %v16072_v46  ;;  %v16164_v43 = vld [vmem:[%s21637_s1 + $0x2b2c] ss:$16 sps:$4 sm:$0xff]   ;;  %v16159_v46 = vld [vmem:[%s21637_s1 + $0x2b20] ss:$16 sps:$4 sm:$0xff]  }
 0x52c   :  { %10665 = vmatprep.subr.bf16.mxu0 %v16077_v29  ;;  %11690 = vmatprep.subr.bf16.mxu1 %v16080_v50  ;;  %v16162_v29 = vld [vmem:[%s21637_s1 + $0x2b28] ss:$16 sps:$4 sm:$0xff]   ;;  %v16167_v50 = vld [vmem:[%s21637_s1 + $0x2b44] ss:$16 sps:$4 sm:$0xff]  }
 0x52f   :  { %10666 = vmatpush1.bf16.msra.mxu0 %v16075_v33  ;;  %11691 = vmatpush1.bf16.msra.mxu1 %v16078_v51  ;;  %v16170_v33 = vld [vmem:[%s21637_s1 + $0x2b4c] ss:$16 sps:$4 sm:$0xff]   ;;  %v16165_v51 = vld [vmem:[%s21637_s1 + $0x2b40] ss:$16 sps:$4 sm:$0xff]  }
 0x530   :  { %10667 = vmatprep.subr.bf16.mxu0 %v16083_v53  ;;  %11692 = vmatprep.subr.bf16.mxu1 %v16086_v38  ;;  %v16168_v53 = vld [vmem:[%s21637_s1 + $0x2b48] ss:$16 sps:$4 sm:$0xff]   ;;  %v16173_v38 = vld [vmem:[%s21637_s1 + $0x2b64] ss:$16 sps:$4 sm:$0xff]  }
 0x533   :  { %10668 = vmatpush1.bf16.msra.mxu0 %v16081_v34  ;;  %11693 = vmatpush1.bf16.msra.mxu1 %v16084_v55  ;;  %v16176_v34 = vld [vmem:[%s21637_s1 + $0x2b6c] ss:$16 sps:$4 sm:$0xff]   ;;  %v16171_v55 = vld [vmem:[%s21637_s1 + $0x2b60] ss:$16 sps:$4 sm:$0xff]  }
 0x534   :  { %10669 = vmatprep.subr.bf16.mxu0 %v16089_v56  ;;  %11694 = vmatprep.subr.bf16.mxu1 %v16092_v45  ;;  %v16174_v56 = vld [vmem:[%s21637_s1 + $0x2b68] ss:$16 sps:$4 sm:$0xff]   ;;  %v16179_v45 = vld [vmem:[%s21637_s1 + $0x2b84] ss:$16 sps:$4 sm:$0xff]  }
 0x537   :  { %10670 = vmatpush1.bf16.msra.mxu0 %v16087_v58  ;;  %11695 = vmatpush1.bf16.msra.mxu1 %v16090_v61  ;;  %v16182_v58 = vld [vmem:[%s21637_s1 + $0x2b8c] ss:$16 sps:$4 sm:$0xff]   ;;  %v16177_v61 = vld [vmem:[%s21637_s1 + $0x2b80] ss:$16 sps:$4 sm:$0xff]  }
 0x538   :  { %10671 = vmatprep.subr.bf16.mxu0 %v16095_v35  ;;  %11696 = vmatprep.subr.bf16.mxu1 %v16098_v62  ;;  %v16180_v35 = vld [vmem:[%s21637_s1 + $0x2b88] ss:$16 sps:$4 sm:$0xff]   ;;  %v16185_v62 = vld [vmem:[%s21637_s1 + $0x2ba4] ss:$16 sps:$4 sm:$0xff]  }
 0x53b   :  { %10672 = vmatpush1.bf16.msra.mxu0 %v16093_v44  ;;  %11697 = vmatpush1.bf16.msra.mxu1 %v16096_v0  ;;  %v16188_v44 = vld [vmem:[%s21637_s1 + $0x2bac] ss:$16 sps:$4 sm:$0xff]   ;;  %v16183_v0 = vld [vmem:[%s21637_s1 + $0x2ba0] ss:$16 sps:$4 sm:$0xff]  }
 0x53c   :  { %10673 = vmatprep.subr.bf16.mxu0 %v16101_v47  ;;  %11698 = vmatprep.subr.bf16.mxu1 %v16104_v1  ;;  %v16186_v47 = vld [vmem:[%s21637_s1 + $0x2ba8] ss:$16 sps:$4 sm:$0xff]   ;;  %v16191_v1 = vld [vmem:[%s21637_s1 + $0x2bc4] ss:$16 sps:$4 sm:$0xff]  }
 0x53f   :  { %10674 = vmatpush1.bf16.msra.mxu0 %v16099_v2  ;;  %11699 = vmatpush1.bf16.msra.mxu1 %v16102_v59  ;;  %v16194_v2 = vld [vmem:[%s21637_s1 + $0x2bcc] ss:$16 sps:$4 sm:$0xff]   ;;  %v1871_v59 = vcombine.high %v20585_v54, %v20585_v54 }
 0x540   :  { %10684 = vmatprep.subr.bf16.mxu0 %v16107_v57  ;;  %11709 = vmatprep.subr.bf16.mxu1 %v16110_v5  ;;  %v16189_v57 = vld [vmem:[%s21637_s1 + $0x2bc0] ss:$16 sps:$4 sm:$0xff]   ;;  %v16192_v5 = vld [vmem:[%s21637_s1 + $0x2bc8] ss:$16 sps:$4 sm:$0xff]   ;;  %v16200_v54 = vld [vmem:[%s21637_s1 + $0x2bec] ss:$16 sps:$4 sm:$0xff]  }
 0x542   :  { %10676 = vmatmul.mubr.bf16.vlgmr.msra.gmra.mrb[0].mxu0 %v20818_v6  ;;  %11701 = vmatmul.mubr.bf16.vlgmr.msra.gmra.mrb[0].mxu1 %v20818_v6 }
 0x543   :  { %10685 = vmatpush1.bf16.msra.mxu0 %v16105_v60  ;;  %11710 = vmatpush1.bf16.msra.mxu1 %v16108_v9  ;;  %v16197_v60 = vld [vmem:[%s21637_s1 + $0x2be4] ss:$16 sps:$4 sm:$0xff]   ;;  %v21007_v9 = vrot.slane %v1871_v59, %v16672_v49  ;;  %v16276_v59 = vld [vmem:[%s21637_s1 + $0x2d88] ss:$16 sps:$4 sm:$0xff]  }
 0x544   :  { %10686 = vmatprep.subr.bf16.mxu0 %v16113_v10  ;;  %11711 = vmatprep.subr.bf16.mxu1 %v16116_v48  ;;  %v16195_v10 = vld [vmem:[%s21637_s1 + $0x2be0] ss:$16 sps:$4 sm:$0xff]   ;;  %v16198_v48 = vld [vmem:[%s21637_s1 + $0x2be8] ss:$16 sps:$4 sm:$0xff]  }
 0x545   :  { %10716 = vmatprep.mubr.bf16.mxu0 %v1918_v11  ;;  %11741 = vmatprep.mubr.bf16.mxu1 %v1918_v11  ;;  %v16203_v11 = vld [vmem:[%s21637_s1 + $0x2c04] ss:$16 sps:$4 sm:$0xff]  }
 0x547   :  { %10687 = vmatpush1.bf16.msra.mxu0 %v16111_v63  ;;  %11712 = vmatpush1.bf16.msra.mxu1 %v16114_v12  ;;  %v16206_v63 = vld [vmem:[%s21637_s1 + $0x2c0c] ss:$16 sps:$4 sm:$0xff]   ;;  %v1887_v12 = vcombine.high %v21007_v9, %v21007_v9 }
 0x548   :  { %10688 = vmatprep.subr.bf16.mxu0 %v16119_v3  ;;  %11713 = vmatprep.subr.bf16.mxu1 %v16122_v52  ;;  %v1916_v3 = vcombine.high %v20818_v6, %v20818_v6  ;;  %v16201_v52 = vld [vmem:[%s21637_s1 + $0x2c00] ss:$16 sps:$4 sm:$0xff]   ;;  %v16212_v6 = vld [vmem:[%s21637_s1 + $0x2c2c] ss:$16 sps:$4 sm:$0xff]  }
 0x54b   :  { %10689 = vmatpush1.bf16.msra.mxu0 %v16117_v15  ;;  %11714 = vmatpush1.bf16.msra.mxu1 %v16120_v7  ;;  %v16204_v15 = vld [vmem:[%s21637_s1 + $0x2c08] ss:$16 sps:$4 sm:$0xff]   ;;  %v16209_v7 = vld [vmem:[%s21637_s1 + $0x2c24] ss:$16 sps:$4 sm:$0xff]  }
 0x54c   :  { %10690 = vmatprep.subr.bf16.mxu0 %v16125_v16  ;;  %11715 = vmatprep.subr.bf16.mxu1 %v16128_v17  ;;  %v21038_v16 = vrot.slane %v1887_v12, %v16672_v49  ;;  %v16207_v17 = vld [vmem:[%s21637_s1 + $0x2c20] ss:$16 sps:$4 sm:$0xff]   ;;  %v16293_v12 = vld [vmem:[%s21637_s1 + $0x2de4] ss:$16 sps:$4 sm:$0xff]  }
 0x54f   :  { %10691 = vmatpush1.bf16.msra.mxu0 %v16123_v8  ;;  %11716 = vmatpush1.bf16.msra.mxu1 %v16126_v20  ;;  %v16210_v8 = vld [vmem:[%s21637_s1 + $0x2c28] ss:$16 sps:$4 sm:$0xff]   ;;  %v16215_v20 = vld [vmem:[%s21637_s1 + $0x2c44] ss:$16 sps:$4 sm:$0xff]  }
 0x550   :  { %10692 = vmatprep.subr.bf16.mxu0 %v16131_v22  ;;  %11717 = vmatprep.subr.bf16.mxu1 %v16134_v4  ;;  %v16218_v22 = vld [vmem:[%s21637_s1 + $0x2c4c] ss:$16 sps:$4 sm:$0xff]   ;;  %v16213_v4 = vld [vmem:[%s21637_s1 + $0x2c40] ss:$16 sps:$4 sm:$0xff]  }
 0x553   :  { %10693 = vmatpush1.bf16.msra.mxu0 %v16129_v24  ;;  %11718 = vmatpush1.bf16.msra.mxu1 %v16132_v13  ;;  %v16216_v24 = vld [vmem:[%s21637_s1 + $0x2c48] ss:$16 sps:$4 sm:$0xff]   ;;  %v16221_v13 = vld [vmem:[%s21637_s1 + $0x2c64] ss:$16 sps:$4 sm:$0xff]  }
 0x554   :  { %10694 = vmatprep.subr.bf16.mxu0 %v16137_v27  ;;  %11719 = vmatprep.subr.bf16.mxu1 %v16140_v18  ;;  %v16224_v27 = vld [vmem:[%s21637_s1 + $0x2c6c] ss:$16 sps:$4 sm:$0xff]   ;;  %v16219_v18 = vld [vmem:[%s21637_s1 + $0x2c60] ss:$16 sps:$4 sm:$0xff]  }
 0x557   :  { %10695 = vmatpush1.bf16.msra.mxu0 %v16135_v28  ;;  %11720 = vmatpush1.bf16.msra.mxu1 %v16138_v14  ;;  %v16222_v28 = vld [vmem:[%s21637_s1 + $0x2c68] ss:$16 sps:$4 sm:$0xff]   ;;  %v16227_v14 = vld [vmem:[%s21637_s1 + $0x2c84] ss:$16 sps:$4 sm:$0xff]  }
 0x558   :  { %10696 = vmatprep.subr.bf16.mxu0 %v16143_v30  ;;  %11721 = vmatprep.subr.bf16.mxu1 %v16146_v19  ;;  %v16230_v30 = vld [vmem:[%s21637_s1 + $0x2c8c] ss:$16 sps:$4 sm:$0xff]   ;;  %v16225_v19 = vld [vmem:[%s21637_s1 + $0x2c80] ss:$16 sps:$4 sm:$0xff]  }
 0x55b   :  { %10697 = vmatpush1.bf16.msra.mxu0 %v16141_v32  ;;  %11722 = vmatpush1.bf16.msra.mxu1 %v16144_v26  ;;  %v16228_v32 = vld [vmem:[%s21637_s1 + $0x2c88] ss:$16 sps:$4 sm:$0xff]   ;;  %v16233_v26 = vld [vmem:[%s21637_s1 + $0x2ca4] ss:$16 sps:$4 sm:$0xff]  }
 0x55c   :  { %10698 = vmatprep.subr.bf16.mxu0 %v16149_v23  ;;  %11723 = vmatprep.subr.bf16.mxu1 %v16152_v36  ;;  %v16236_v23 = vld [vmem:[%s21637_s1 + $0x2cac] ss:$16 sps:$4 sm:$0xff]   ;;  %v16231_v36 = vld [vmem:[%s21637_s1 + $0x2ca0] ss:$16 sps:$4 sm:$0xff]  }
 0x55f   :  { %10699 = vmatpush1.bf16.msra.mxu0 %v16147_v37  ;;  %11724 = vmatpush1.bf16.msra.mxu1 %v16150_v21  ;;  %v16234_v37 = vld [vmem:[%s21637_s1 + $0x2ca8] ss:$16 sps:$4 sm:$0xff]   ;;  %v16239_v21 = vld [vmem:[%s21637_s1 + $0x2cc4] ss:$16 sps:$4 sm:$0xff]  }
 0x560   :  { %10700 = vmatprep.subr.bf16.mxu0 %v16155_v31  ;;  %11725 = vmatprep.subr.bf16.mxu1 %v16158_v39  ;;  %v16242_v31 = vld [vmem:[%s21637_s1 + $0x2ccc] ss:$16 sps:$4 sm:$0xff]   ;;  %v16237_v39 = vld [vmem:[%s21637_s1 + $0x2cc0] ss:$16 sps:$4 sm:$0xff]  }
 0x563   :  { %10701 = vmatpush1.bf16.msra.mxu0 %v16153_v40  ;;  %11726 = vmatpush1.bf16.msra.mxu1 %v16156_v41  ;;  %v16240_v40 = vld [vmem:[%s21637_s1 + $0x2cc8] ss:$16 sps:$4 sm:$0xff]   ;;  %v16245_v41 = vld [vmem:[%s21637_s1 + $0x2ce4] ss:$16 sps:$4 sm:$0xff]  }
 0x564   :  { %10702 = vmatprep.subr.bf16.mxu0 %v16161_v25  ;;  %11727 = vmatprep.subr.bf16.mxu1 %v16164_v43  ;;  %v16248_v25 = vld [vmem:[%s21637_s1 + $0x2cec] ss:$16 sps:$4 sm:$0xff]   ;;  %v16243_v43 = vld [vmem:[%s21637_s1 + $0x2ce0] ss:$16 sps:$4 sm:$0xff]  }
 0x567   :  { %10703 = vmatpush1.bf16.msra.mxu0 %v16159_v46  ;;  %11728 = vmatpush1.bf16.msra.mxu1 %v16162_v29  ;;  %v16246_v46 = vld [vmem:[%s21637_s1 + $0x2ce8] ss:$16 sps:$4 sm:$0xff]   ;;  %v16251_v29 = vld [vmem:[%s21637_s1 + $0x2d04] ss:$16 sps:$4 sm:$0xff]  }
 0x568   :  { %10704 = vmatprep.subr.bf16.mxu0 %v16167_v50  ;;  %11729 = vmatprep.subr.bf16.mxu1 %v16170_v33  ;;  %v16254_v50 = vld [vmem:[%s21637_s1 + $0x2d0c] ss:$16 sps:$4 sm:$0xff]   ;;  %v16249_v33 = vld [vmem:[%s21637_s1 + $0x2d00] ss:$16 sps:$4 sm:$0xff]  }
 0x56b   :  { %10705 = vmatpush1.bf16.msra.mxu0 %v16165_v51  ;;  %11730 = vmatpush1.bf16.msra.mxu1 %v16168_v53  ;;  %v16252_v51 = vld [vmem:[%s21637_s1 + $0x2d08] ss:$16 sps:$4 sm:$0xff]   ;;  %v16257_v53 = vld [vmem:[%s21637_s1 + $0x2d24] ss:$16 sps:$4 sm:$0xff]  }
 0x56c   :  { %10706 = vmatprep.subr.bf16.mxu0 %v16173_v38  ;;  %11731 = vmatprep.subr.bf16.mxu1 %v16176_v34  ;;  %v16260_v38 = vld [vmem:[%s21637_s1 + $0x2d2c] ss:$16 sps:$4 sm:$0xff]   ;;  %v16255_v34 = vld [vmem:[%s21637_s1 + $0x2d20] ss:$16 sps:$4 sm:$0xff]  }
 0x56f   :  { %10707 = vmatpush1.bf16.msra.mxu0 %v16171_v55  ;;  %11732 = vmatpush1.bf16.msra.mxu1 %v16174_v56  ;;  %v16258_v55 = vld [vmem:[%s21637_s1 + $0x2d28] ss:$16 sps:$4 sm:$0xff]   ;;  %v16263_v56 = vld [vmem:[%s21637_s1 + $0x2d44] ss:$16 sps:$4 sm:$0xff]  }
 0x570   :  { %10708 = vmatprep.subr.bf16.mxu0 %v16179_v45  ;;  %11733 = vmatprep.subr.bf16.mxu1 %v16182_v58  ;;  %v16266_v45 = vld [vmem:[%s21637_s1 + $0x2d4c] ss:$16 sps:$4 sm:$0xff]   ;;  %v16261_v58 = vld [vmem:[%s21637_s1 + $0x2d40] ss:$16 sps:$4 sm:$0xff]  }
 0x573   :  { %10709 = vmatpush1.bf16.msra.mxu0 %v16177_v61  ;;  %11734 = vmatpush1.bf16.msra.mxu1 %v16180_v35  ;;  %v16264_v61 = vld [vmem:[%s21637_s1 + $0x2d48] ss:$16 sps:$4 sm:$0xff]   ;;  %v16269_v35 = vld [vmem:[%s21637_s1 + $0x2d64] ss:$16 sps:$4 sm:$0xff]  }
 0x574   :  { %10710 = vmatprep.subr.bf16.mxu0 %v16185_v62  ;;  %11735 = vmatprep.subr.bf16.mxu1 %v16188_v44  ;;  %v16272_v62 = vld [vmem:[%s21637_s1 + $0x2d6c] ss:$16 sps:$4 sm:$0xff]   ;;  %v16267_v44 = vld [vmem:[%s21637_s1 + $0x2d60] ss:$16 sps:$4 sm:$0xff]  }
 0x577   :  { %10711 = vmatpush1.bf16.msra.mxu0 %v16183_v0  ;;  %11736 = vmatpush1.bf16.msra.mxu1 %v16186_v47  ;;  %v16270_v0 = vld [vmem:[%s21637_s1 + $0x2d68] ss:$16 sps:$4 sm:$0xff]   ;;  %v16275_v47 = vld [vmem:[%s21637_s1 + $0x2d84] ss:$16 sps:$4 sm:$0xff]  }
 0x578   :  { %10712 = vmatprep.subr.bf16.mxu0 %v16191_v1  ;;  %11737 = vmatprep.subr.bf16.mxu1 %v16194_v2  ;;  %v16278_v1 = vld [vmem:[%s21637_s1 + $0x2d8c] ss:$16 sps:$4 sm:$0xff]   ;;  %v16273_v2 = vld [vmem:[%s21637_s1 + $0x2d80] ss:$16 sps:$4 sm:$0xff]  }
 0x57b   :  { %10713 = vmatpush1.bf16.msra.mxu0 %v16189_v57  ;;  %11738 = vmatpush1.bf16.msra.mxu1 %v16192_v5  ;;  %v16281_v57 = vld [vmem:[%s21637_s1 + $0x2da4] ss:$16 sps:$4 sm:$0xff]   ;;  %v16284_v5 = vld [vmem:[%s21637_s1 + $0x2dac] ss:$16 sps:$4 sm:$0xff]  }
 0x57c   :  { %10714 = vmatprep.subr.bf16.mxu0 %v16197_v60  ;;  %11739 = vmatprep.subr.bf16.mxu1 %v16200_v54  ;;  %v16279_v60 = vld [vmem:[%s21637_s1 + $0x2da0] ss:$16 sps:$4 sm:$0xff]   ;;  %v16282_v54 = vld [vmem:[%s21637_s1 + $0x2da8] ss:$16 sps:$4 sm:$0xff]  }
 0x57f   :  { %10715 = vmatpush1.bf16.msra.mxu0 %v16195_v10  ;;  %11740 = vmatpush1.bf16.msra.mxu1 %v16198_v48  ;;  %v16287_v10 = vld [vmem:[%s21637_s1 + $0x2dc4] ss:$16 sps:$4 sm:$0xff]   ;;  %v16290_v48 = vld [vmem:[%s21637_s1 + $0x2dcc] ss:$16 sps:$4 sm:$0xff]  }
 0x580   :  { %10725 = vmatprep.subr.bf16.mxu0 %v16203_v11  ;;  %11750 = vmatprep.subr.bf16.mxu1 %v16206_v63  ;;  %v16285_v11 = vld [vmem:[%s21637_s1 + $0x2dc0] ss:$16 sps:$4 sm:$0xff]   ;;  %v16288_v63 = vld [vmem:[%s21637_s1 + $0x2dc8] ss:$16 sps:$4 sm:$0xff]  }
 0x582   :  { %10717 = vmatmul.mubr.bf16.vlgmr.msra.gmra.mrb[0].mxu0 %v1916_v3  ;;  %11742 = vmatmul.mubr.bf16.vlgmr.msra.gmra.mrb[0].mxu1 %v1916_v3  ;;  %v16296_v3 = vld [vmem:[%s21637_s1 + $0x2dec] ss:$16 sps:$4 sm:$0xff]  }
 0x583   :  { %10726 = vmatpush1.bf16.msra.mxu0 %v16201_v52  ;;  %11751 = vmatpush1.bf16.msra.mxu1 %v16204_v15  ;;  %v16291_v52 = vld [vmem:[%s21637_s1 + $0x2de0] ss:$16 sps:$4 sm:$0xff]   ;;  %v16294_v15 = vld [vmem:[%s21637_s1 + $0x2de8] ss:$16 sps:$4 sm:$0xff]  }
 0x584   :  { %10727 = vmatprep.subr.bf16.mxu0 %v16209_v7  ;;  %11752 = vmatprep.subr.bf16.mxu1 %v16212_v6  ;;  %v16300_v7 = vld [vmem:[%s21637_s1 + $0x2e04] ss:$16 sps:$4 sm:$0xff]   ;;  %v16303_v6 = vld [vmem:[%s21637_s1 + $0x2e0c] ss:$16 sps:$4 sm:$0xff]  }
 0x585   :  { %10757 = vmatprep.mubr.bf16.mxu0 %v21038_v16  ;;  %11782 = vmatprep.mubr.bf16.mxu1 %v21038_v16 }
 0x587   :  { %10728 = vmatpush1.bf16.msra.mxu0 %v16207_v17  ;;  %11753 = vmatpush1.bf16.msra.mxu1 %v16210_v8  ;;  %v21224_v17 = vrot.slane %v21007_v9, %v16672_v49  ;;  %v16298_v8 = vld [vmem:[%s21637_s1 + $0x2e00] ss:$16 sps:$4 sm:$0xff]   ;;  %v16309_v9 = vld [vmem:[%s21637_s1 + $0x2e2c] ss:$16 sps:$4 sm:$0xff]  }
 0x588   :  { %10729 = vmatprep.subr.bf16.mxu0 %v16215_v20  ;;  %11754 = vmatprep.subr.bf16.mxu1 %v16218_v22  ;;  %v16301_v20 = vld [vmem:[%s21637_s1 + $0x2e08] ss:$16 sps:$4 sm:$0xff]   ;;  %v16306_v22 = vld [vmem:[%s21637_s1 + $0x2e24] ss:$16 sps:$4 sm:$0xff]  }
 0x58b   :  { %10730 = vmatpush1.bf16.msra.mxu0 %v16213_v4  ;;  %11755 = vmatpush1.bf16.msra.mxu1 %v16216_v24  ;;  %v1919_v4 = vcombine.high %v21038_v16, %v21038_v16  ;;  %v16304_v24 = vld [vmem:[%s21637_s1 + $0x2e20] ss:$16 sps:$4 sm:$0xff]   ;;  %v16312_v16 = vld [vmem:[%s21637_s1 + $0x2e44] ss:$16 sps:$4 sm:$0xff]  }
 0x58c   :  { %10731 = vmatprep.subr.bf16.mxu0 %v16221_v13  ;;  %11756 = vmatprep.subr.bf16.mxu1 %v16224_v27  ;;  %v16307_v13 = vld [vmem:[%s21637_s1 + $0x2e28] ss:$16 sps:$4 sm:$0xff]   ;;  %v16315_v27 = vld [vmem:[%s21637_s1 + $0x2e4c] ss:$16 sps:$4 sm:$0xff]  }
 0x58f   :  { %10732 = vmatpush1.bf16.msra.mxu0 %v16219_v18  ;;  %11757 = vmatpush1.bf16.msra.mxu1 %v16222_v28  ;;  %v16310_v18 = vld [vmem:[%s21637_s1 + $0x2e40] ss:$16 sps:$4 sm:$0xff]   ;;  %v16313_v28 = vld [vmem:[%s21637_s1 + $0x2e48] ss:$16 sps:$4 sm:$0xff]  }
 0x590   :  { %10733 = vmatprep.subr.bf16.mxu0 %v16227_v14  ;;  %11758 = vmatprep.subr.bf16.mxu1 %v16230_v30  ;;  %v16318_v14 = vld [vmem:[%s21637_s1 + $0x2e64] ss:$16 sps:$4 sm:$0xff]   ;;  %v16321_v30 = vld [vmem:[%s21637_s1 + $0x2e6c] ss:$16 sps:$4 sm:$0xff]  }
 0x593   :  { %10734 = vmatpush1.bf16.msra.mxu0 %v16225_v19  ;;  %11759 = vmatpush1.bf16.msra.mxu1 %v16228_v32  ;;  %v16316_v19 = vld [vmem:[%s21637_s1 + $0x2e60] ss:$16 sps:$4 sm:$0xff]   ;;  %v16319_v32 = vld [vmem:[%s21637_s1 + $0x2e68] ss:$16 sps:$4 sm:$0xff]  }
 0x594   :  { %10735 = vmatprep.subr.bf16.mxu0 %v16233_v26  ;;  %11760 = vmatprep.subr.bf16.mxu1 %v16236_v23  ;;  %v16324_v26 = vld [vmem:[%s21637_s1 + $0x2e84] ss:$16 sps:$4 sm:$0xff]   ;;  %v16327_v23 = vld [vmem:[%s21637_s1 + $0x2e8c] ss:$16 sps:$4 sm:$0xff]  }
 0x597   :  { %10736 = vmatpush1.bf16.msra.mxu0 %v16231_v36  ;;  %11761 = vmatpush1.bf16.msra.mxu1 %v16234_v37  ;;  %v16322_v36 = vld [vmem:[%s21637_s1 + $0x2e80] ss:$16 sps:$4 sm:$0xff]   ;;  %v16325_v37 = vld [vmem:[%s21637_s1 + $0x2e88] ss:$16 sps:$4 sm:$0xff]  }
 0x598   :  { %10737 = vmatprep.subr.bf16.mxu0 %v16239_v21  ;;  %11762 = vmatprep.subr.bf16.mxu1 %v16242_v31  ;;  %v16330_v21 = vld [vmem:[%s21637_s1 + $0x2ea4] ss:$16 sps:$4 sm:$0xff]   ;;  %v16333_v31 = vld [vmem:[%s21637_s1 + $0x2eac] ss:$16 sps:$4 sm:$0xff]  }
 0x59b   :  { %10738 = vmatpush1.bf16.msra.mxu0 %v16237_v39  ;;  %11763 = vmatpush1.bf16.msra.mxu1 %v16240_v40  ;;  %v16328_v39 = vld [vmem:[%s21637_s1 + $0x2ea0] ss:$16 sps:$4 sm:$0xff]   ;;  %v16331_v40 = vld [vmem:[%s21637_s1 + $0x2ea8] ss:$16 sps:$4 sm:$0xff]  }
 0x59c   :  { %10739 = vmatprep.subr.bf16.mxu0 %v16245_v41  ;;  %11764 = vmatprep.subr.bf16.mxu1 %v16248_v25  ;;  %v16336_v41 = vld [vmem:[%s21637_s1 + $0x2ec4] ss:$16 sps:$4 sm:$0xff]   ;;  %v16339_v25 = vld [vmem:[%s21637_s1 + $0x2ecc] ss:$16 sps:$4 sm:$0xff]  }
 0x59f   :  { %10740 = vmatpush1.bf16.msra.mxu0 %v16243_v43  ;;  %11765 = vmatpush1.bf16.msra.mxu1 %v16246_v46  ;;  %v16334_v43 = vld [vmem:[%s21637_s1 + $0x2ec0] ss:$16 sps:$4 sm:$0xff]   ;;  %v16337_v46 = vld [vmem:[%s21637_s1 + $0x2ec8] ss:$16 sps:$4 sm:$0xff]  }
 0x5a0   :  { %10741 = vmatprep.subr.bf16.mxu0 %v16251_v29  ;;  %11766 = vmatprep.subr.bf16.mxu1 %v16254_v50  ;;  %v16342_v29 = vld [vmem:[%s21637_s1 + $0x2ee4] ss:$16 sps:$4 sm:$0xff]   ;;  %v16345_v50 = vld [vmem:[%s21637_s1 + $0x2eec] ss:$16 sps:$4 sm:$0xff]  }
 0x5a3   :  { %10742 = vmatpush1.bf16.msra.mxu0 %v16249_v33  ;;  %11767 = vmatpush1.bf16.msra.mxu1 %v16252_v51  ;;  %v16340_v33 = vld [vmem:[%s21637_s1 + $0x2ee0] ss:$16 sps:$4 sm:$0xff]   ;;  %v16343_v51 = vld [vmem:[%s21637_s1 + $0x2ee8] ss:$16 sps:$4 sm:$0xff]  }
 0x5a4   :  { %10743 = vmatprep.subr.bf16.mxu0 %v16257_v53  ;;  %11768 = vmatprep.subr.bf16.mxu1 %v16260_v38  ;;  %v16348_v53 = vld [vmem:[%s21637_s1 + $0x2f04] ss:$16 sps:$4 sm:$0xff]   ;;  %v16351_v38 = vld [vmem:[%s21637_s1 + $0x2f0c] ss:$16 sps:$4 sm:$0xff]  }
 0x5a7   :  { %10744 = vmatpush1.bf16.msra.mxu0 %v16255_v34  ;;  %11769 = vmatpush1.bf16.msra.mxu1 %v16258_v55  ;;  %v16346_v34 = vld [vmem:[%s21637_s1 + $0x2f00] ss:$16 sps:$4 sm:$0xff]   ;;  %v16349_v55 = vld [vmem:[%s21637_s1 + $0x2f08] ss:$16 sps:$4 sm:$0xff]  }
 0x5a8   :  { %10745 = vmatprep.subr.bf16.mxu0 %v16263_v56  ;;  %11770 = vmatprep.subr.bf16.mxu1 %v16266_v45  ;;  %v16354_v56 = vld [vmem:[%s21637_s1 + $0x2f24] ss:$16 sps:$4 sm:$0xff]   ;;  %v16357_v45 = vld [vmem:[%s21637_s1 + $0x2f2c] ss:$16 sps:$4 sm:$0xff]  }
 0x5ab   :  { %10746 = vmatpush1.bf16.msra.mxu0 %v16261_v58  ;;  %11771 = vmatpush1.bf16.msra.mxu1 %v16264_v61  ;;  %v16352_v58 = vld [vmem:[%s21637_s1 + $0x2f20] ss:$16 sps:$4 sm:$0xff]   ;;  %v16355_v61 = vld [vmem:[%s21637_s1 + $0x2f28] ss:$16 sps:$4 sm:$0xff]  }
 0x5ac   :  { %10747 = vmatprep.subr.bf16.mxu0 %v16269_v35  ;;  %11772 = vmatprep.subr.bf16.mxu1 %v16272_v62  ;;  %v16360_v35 = vld [vmem:[%s21637_s1 + $0x2f44] ss:$16 sps:$4 sm:$0xff]   ;;  %v16363_v62 = vld [vmem:[%s21637_s1 + $0x2f4c] ss:$16 sps:$4 sm:$0xff]  }
 0x5af   :  { %10748 = vmatpush1.bf16.msra.mxu0 %v16267_v44  ;;  %11773 = vmatpush1.bf16.msra.mxu1 %v16270_v0  ;;  %v16358_v44 = vld [vmem:[%s21637_s1 + $0x2f40] ss:$16 sps:$4 sm:$0xff]   ;;  %v16361_v0 = vld [vmem:[%s21637_s1 + $0x2f48] ss:$16 sps:$4 sm:$0xff]  }
 0x5b0   :  { %10749 = vmatprep.subr.bf16.mxu0 %v16275_v47  ;;  %11774 = vmatprep.subr.bf16.mxu1 %v16278_v1  ;;  %v16366_v47 = vld [vmem:[%s21637_s1 + $0x2f64] ss:$16 sps:$4 sm:$0xff]   ;;  %v16369_v1 = vld [vmem:[%s21637_s1 + $0x2f6c] ss:$16 sps:$4 sm:$0xff]  }
 0x5b3   :  { %10750 = vmatpush1.bf16.msra.mxu0 %v16273_v2  ;;  %11775 = vmatpush1.bf16.msra.mxu1 %v16276_v59  ;;  %v16364_v2 = vld [vmem:[%s21637_s1 + $0x2f60] ss:$16 sps:$4 sm:$0xff]   ;;  %v16367_v59 = vld [vmem:[%s21637_s1 + $0x2f68] ss:$16 sps:$4 sm:$0xff]  }
 0x5b4   :  { %10751 = vmatprep.subr.bf16.mxu0 %v16281_v57  ;;  %11776 = vmatprep.subr.bf16.mxu1 %v16284_v5  ;;  %v16372_v57 = vld [vmem:[%s21637_s1 + $0x2f84] ss:$16 sps:$4 sm:$0xff]   ;;  %v16375_v5 = vld [vmem:[%s21637_s1 + $0x2f8c] ss:$16 sps:$4 sm:$0xff]  }
 0x5b7   :  { %10752 = vmatpush1.bf16.msra.mxu0 %v16279_v60  ;;  %11777 = vmatpush1.bf16.msra.mxu1 %v16282_v54  ;;  %v16370_v60 = vld [vmem:[%s21637_s1 + $0x2f80] ss:$16 sps:$4 sm:$0xff]   ;;  %v16373_v54 = vld [vmem:[%s21637_s1 + $0x2f88] ss:$16 sps:$4 sm:$0xff]  }
 0x5b8   :  { %10753 = vmatprep.subr.bf16.mxu0 %v16287_v10  ;;  %11778 = vmatprep.subr.bf16.mxu1 %v16290_v48  ;;  %v16378_v10 = vld [vmem:[%s21637_s1 + $0x2fa4] ss:$16 sps:$4 sm:$0xff]   ;;  %v16381_v48 = vld [vmem:[%s21637_s1 + $0x2fac] ss:$16 sps:$4 sm:$0xff]  }
 0x5bb   :  { %10754 = vmatpush1.bf16.msra.mxu0 %v16285_v11  ;;  %11779 = vmatpush1.bf16.msra.mxu1 %v16288_v63  ;;  %v16376_v11 = vld [vmem:[%s21637_s1 + $0x2fa0] ss:$16 sps:$4 sm:$0xff]   ;;  %v16379_v63 = vld [vmem:[%s21637_s1 + $0x2fa8] ss:$16 sps:$4 sm:$0xff]  }
 0x5bc   :  { %10755 = vmatprep.subr.bf16.mxu0 %v16293_v12  ;;  %11780 = vmatprep.subr.bf16.mxu1 %v16296_v3  ;;  %v16384_v12 = vld [vmem:[%s21637_s1 + $0x2fc4] ss:$16 sps:$4 sm:$0xff]   ;;  %v16387_v3 = vld [vmem:[%s21637_s1 + $0x2fcc] ss:$16 sps:$4 sm:$0xff]  }
 0x5bf   :  { %10756 = vmatpush1.bf16.msra.mxu0 %v16291_v52  ;;  %11781 = vmatpush1.bf16.msra.mxu1 %v16294_v15  ;;  %v16382_v52 = vld [vmem:[%s21637_s1 + $0x2fc0] ss:$16 sps:$4 sm:$0xff]   ;;  %v16385_v15 = vld [vmem:[%s21637_s1 + $0x2fc8] ss:$16 sps:$4 sm:$0xff]  }
 0x5c0   :  { %10766 = vmatprep.subr.bf16.mxu0 %v16300_v7  ;;  %11791 = vmatprep.subr.bf16.mxu1 %v16303_v6  ;;  %v16390_v7 = vld [vmem:[%s21637_s1 + $0x2fe4] ss:$16 sps:$4 sm:$0xff]   ;;  %v16393_v6 = vld [vmem:[%s21637_s1 + $0x2fec] ss:$16 sps:$4 sm:$0xff]  }
 0x5c2   :  { %10758 = vmatmul.mubr.bf16.vlgmr.msra.gmra.mrb[0].mxu0 %v21224_v17  ;;  %11783 = vmatmul.mubr.bf16.vlgmr.msra.gmra.mrb[0].mxu1 %v21224_v17 }
 0x5c3   :  { %10767 = vmatpush1.bf16.msra.mxu0 %v16298_v8  ;;  %11792 = vmatpush1.bf16.msra.mxu1 %v16301_v20  ;;  %v16388_v8 = vld [vmem:[%s21637_s1 + $0x2fe0] ss:$16 sps:$4 sm:$0xff]   ;;  %v16391_v20 = vld [vmem:[%s21637_s1 + $0x2fe8] ss:$16 sps:$4 sm:$0xff]  }
 0x5c4   :  { %10768 = vmatprep.subr.bf16.mxu0 %v16306_v22  ;;  %11793 = vmatprep.subr.bf16.mxu1 %v16309_v9  ;;  %v16396_v22 = vld [vmem:[%s21637_s1 + $0x3004] ss:$16 sps:$4 sm:$0xff]   ;;  %v16399_v9 = vld [vmem:[%s21637_s1 + $0x300c] ss:$16 sps:$4 sm:$0xff]  }
 0x5c5   :  { %10798 = vmatprep.mubr.bf16.mxu0 %v1919_v4  ;;  %11823 = vmatprep.mubr.bf16.mxu1 %v1919_v4  ;;  %v1917_v4 = vcombine.high %v21224_v17, %v21224_v17  ;;  %v16405_v17 = vld [vmem:[%s21637_s1 + $0x302c] ss:$16 sps:$4 sm:$0xff]  }
 0x5c7   :  { %10769 = vmatpush1.bf16.msra.mxu0 %v16304_v24  ;;  %11794 = vmatpush1.bf16.msra.mxu1 %v16307_v13  ;;  %v16394_v24 = vld [vmem:[%s21637_s1 + $0x3000] ss:$16 sps:$4 sm:$0xff]   ;;  %v16397_v13 = vld [vmem:[%s21637_s1 + $0x3008] ss:$16 sps:$4 sm:$0xff]  }
 0x5c8   :  { %10770 = vmatprep.subr.bf16.mxu0 %v16312_v16  ;;  %11795 = vmatprep.subr.bf16.mxu1 %v16315_v27  ;;  %v16402_v16 = vld [vmem:[%s21637_s1 + $0x3024] ss:$16 sps:$4 sm:$0xff]   ;;  %v16400_v27 = vld [vmem:[%s21637_s1 + $0x3020] ss:$16 sps:$4 sm:$0xff]  }
 0x5cb   :  { %10771 = vmatpush1.bf16.msra.mxu0 %v16310_v18  ;;  %11796 = vmatpush1.bf16.msra.mxu1 %v16313_v28  ;;  %v16403_v18 = vld [vmem:[%s21637_s1 + $0x3028] ss:$16 sps:$4 sm:$0xff]   ;;  %v16408_v28 = vld [vmem:[%s21637_s1 + $0x3044] ss:$16 sps:$4 sm:$0xff]  }
 0x5cc   :  { %10772 = vmatprep.subr.bf16.mxu0 %v16318_v14  ;;  %11797 = vmatprep.subr.bf16.mxu1 %v16321_v30  ;;  %v16411_v14 = vld [vmem:[%s21637_s1 + $0x304c] ss:$16 sps:$4 sm:$0xff]   ;;  %v16505_v30 = vmov 0  }
 0x5cf   :  { %10773 = vmatpush1.bf16.msra.mxu0 %v16316_v19  ;;  %11798 = vmatpush1.bf16.msra.mxu1 %v16319_v32  ;;  %v16406_v19 = vld [vmem:[%s21637_s1 + $0x3040] ss:$16 sps:$4 sm:$0xff]   ;;  %v16409_v32 = vld [vmem:[%s21637_s1 + $0x3048] ss:$16 sps:$4 sm:$0xff]  }
 0x5d0   :  { %10774 = vmatprep.subr.bf16.mxu0 %v16324_v26  ;;  %11799 = vmatprep.subr.bf16.mxu1 %v16327_v23  ;;  %v16414_v26 = vld [vmem:[%s21637_s1 + $0x3064] ss:$16 sps:$4 sm:$0xff]   ;;  %v16417_v23 = vld [vmem:[%s21637_s1 + $0x306c] ss:$16 sps:$4 sm:$0xff]  }
 0x5d3   :  { %10775 = vmatpush1.bf16.msra.mxu0 %v16322_v36  ;;  %11800 = vmatpush1.bf16.msra.mxu1 %v16325_v37  ;;  %v16412_v36 = vld [vmem:[%s21637_s1 + $0x3060] ss:$16 sps:$4 sm:$0xff]   ;;  %v16415_v37 = vld [vmem:[%s21637_s1 + $0x3068] ss:$16 sps:$4 sm:$0xff]  }
 0x5d4   :  { %10776 = vmatprep.subr.bf16.mxu0 %v16330_v21  ;;  %11801 = vmatprep.subr.bf16.mxu1 %v16333_v31  ;;  %v16420_v21 = vld [vmem:[%s21637_s1 + $0x3084] ss:$16 sps:$4 sm:$0xff]   ;;  %v16423_v31 = vld [vmem:[%s21637_s1 + $0x308c] ss:$16 sps:$4 sm:$0xff]  }
 0x5d7   :  { %10777 = vmatpush1.bf16.msra.mxu0 %v16328_v39  ;;  %11802 = vmatpush1.bf16.msra.mxu1 %v16331_v40  ;;  %v16418_v39 = vld [vmem:[%s21637_s1 + $0x3080] ss:$16 sps:$4 sm:$0xff]   ;;  %v16421_v40 = vld [vmem:[%s21637_s1 + $0x3088] ss:$16 sps:$4 sm:$0xff]  }
 0x5d8   :  { %10778 = vmatprep.subr.bf16.mxu0 %v16336_v41  ;;  %11803 = vmatprep.subr.bf16.mxu1 %v16339_v25  ;;  %v16426_v41 = vld [vmem:[%s21637_s1 + $0x30a4] ss:$16 sps:$4 sm:$0xff]   ;;  %v16429_v25 = vld [vmem:[%s21637_s1 + $0x30ac] ss:$16 sps:$4 sm:$0xff]  }
 0x5db   :  { %10779 = vmatpush1.bf16.msra.mxu0 %v16334_v43  ;;  %11804 = vmatpush1.bf16.msra.mxu1 %v16337_v46  ;;  %v16424_v43 = vld [vmem:[%s21637_s1 + $0x30a0] ss:$16 sps:$4 sm:$0xff]   ;;  %v16427_v46 = vld [vmem:[%s21637_s1 + $0x30a8] ss:$16 sps:$4 sm:$0xff]  }
 0x5dc   :  { %10780 = vmatprep.subr.bf16.mxu0 %v16342_v29  ;;  %11805 = vmatprep.subr.bf16.mxu1 %v16345_v50  ;;  %v16432_v29 = vld [vmem:[%s21637_s1 + $0x30c4] ss:$16 sps:$4 sm:$0xff]   ;;  %v16435_v50 = vld [vmem:[%s21637_s1 + $0x30cc] ss:$16 sps:$4 sm:$0xff]  }
 0x5df   :  { %10781 = vmatpush1.bf16.msra.mxu0 %v16340_v33  ;;  %11806 = vmatpush1.bf16.msra.mxu1 %v16343_v51  ;;  %v16430_v33 = vld [vmem:[%s21637_s1 + $0x30c0] ss:$16 sps:$4 sm:$0xff]   ;;  %v16433_v51 = vld [vmem:[%s21637_s1 + $0x30c8] ss:$16 sps:$4 sm:$0xff]  }
 0x5e0   :  { %10782 = vmatprep.subr.bf16.mxu0 %v16348_v53  ;;  %11807 = vmatprep.subr.bf16.mxu1 %v16351_v38  ;;  %v16438_v53 = vld [vmem:[%s21637_s1 + $0x30e4] ss:$16 sps:$4 sm:$0xff]   ;;  %v16441_v38 = vld [vmem:[%s21637_s1 + $0x30ec] ss:$16 sps:$4 sm:$0xff]  }
 0x5e3   :  { %10783 = vmatpush1.bf16.msra.mxu0 %v16346_v34  ;;  %11808 = vmatpush1.bf16.msra.mxu1 %v16349_v55  ;;  %v16436_v34 = vld [vmem:[%s21637_s1 + $0x30e0] ss:$16 sps:$4 sm:$0xff]   ;;  %v16439_v55 = vld [vmem:[%s21637_s1 + $0x30e8] ss:$16 sps:$4 sm:$0xff]  }
 0x5e4   :  { %10784 = vmatprep.subr.bf16.mxu0 %v16354_v56  ;;  %11809 = vmatprep.subr.bf16.mxu1 %v16357_v45  ;;  %v12239_v56 = vld.sshfl [vmem:[%s21636_s0 + $0x30] sm:$0x1 pattern:$0x75316420]  ;;  %v16442_v45 = vld [vmem:[%s21639_s3 + $0x40] sm:$0xff]  }
 0x5e7   :  { %10785 = vmatpush1.bf16.msra.mxu0 %v16352_v58  ;;  %11810 = vmatpush1.bf16.msra.mxu1 %v16355_v61  ;;  %v16443_v58 = vld [vmem:[%s21639_s3 + $0xc0] sm:$0xff]   ;;  %v1933_v61 = vrot.slane %v12239_v56, %v16672_v49  ;;  %v16447_v49 = vld [vmem:[%s21639_s3 + $0xc8] sm:$0xff]  }
 0x5e8   :  { %10786 = vmatprep.subr.bf16.mxu0 %v16360_v35  ;;  %11811 = vmatprep.subr.bf16.mxu1 %v16363_v62  ;;  %v16444_v35 = vld [vmem:[%s21639_s3] sm:$0xff]  }
 0x5e9   :  { %v16445_v62 = vld [vmem:[%s21639_s3 + $0x80] sm:$0xff]  }
 0x5eb   :  { %10787 = vmatpush1.bf16.msra.mxu0 %v16358_v44  ;;  %11812 = vmatpush1.bf16.msra.mxu1 %v16361_v0  ;;  %v16446_v44 = vld [vmem:[%s21639_s3 + $0x48] sm:$0xff]  }
 0x5ec   :  { %10788 = vmatprep.subr.bf16.mxu0 %v16366_v47  ;;  %11813 = vmatprep.subr.bf16.mxu1 %v16369_v1  ;;  %v16448_v0 = vld [vmem:[%s21639_s3 + $0x8] sm:$0xff]   ;;  %v16450_v1 = vld [vmem:[%s21639_s3 + $0x50] sm:$0xff]  }
 0x5ed   :  { %v16449_v47 = vld [vmem:[%s21639_s3 + $0x88] sm:$0xff]  }
 0x5ef   :  { %10789 = vmatpush1.bf16.msra.mxu0 %v16364_v2  ;;  %11814 = vmatpush1.bf16.msra.mxu1 %v16367_v59  ;;  %v16451_v2 = vld [vmem:[%s21639_s3 + $0xd0] sm:$0xff]  }
 0x5f0   :  { %10790 = vmatprep.subr.bf16.mxu0 %v16372_v57  ;;  %11815 = vmatprep.subr.bf16.mxu1 %v16375_v5  ;;  %v16452_v59 = vld [vmem:[%s21639_s3 + $0x10] sm:$0xff]   ;;  %v16454_v5 = vld [vmem:[%s21639_s3 + $0x58] sm:$0xff]  }
 0x5f1   :  { %v16453_v57 = vld [vmem:[%s21639_s3 + $0x90] sm:$0xff]  }
 0x5f3   :  { %10791 = vmatpush1.bf16.msra.mxu0 %v16370_v60  ;;  %11816 = vmatpush1.bf16.msra.mxu1 %v16373_v54  ;;  %v16455_v60 = vld [vmem:[%s21639_s3 + $0xd8] sm:$0xff]  }
 0x5f4   :  { %10792 = vmatprep.subr.bf16.mxu0 %v16378_v10  ;;  %11817 = vmatprep.subr.bf16.mxu1 %v16381_v48  ;;  %v16456_v54 = vld [vmem:[%s21639_s3 + $0x18] sm:$0xff]   ;;  %v16458_v48 = vld [vmem:[%s21639_s3 + $0x60] sm:$0xff]  }
 0x5f5   :  { %v16457_v10 = vld [vmem:[%s21639_s3 + $0x98] sm:$0xff]  }
 0x5f7   :  { %10793 = vmatpush1.bf16.msra.mxu0 %v16376_v11  ;;  %11818 = vmatpush1.bf16.msra.mxu1 %v16379_v63  ;;  %v16459_v11 = vld [vmem:[%s21639_s3 + $0xe0] sm:$0xff]  }
 0x5f8   :  { %10794 = vmatprep.subr.bf16.mxu0 %v16384_v12  ;;  %11819 = vmatprep.subr.bf16.mxu1 %v16387_v3  ;;  %v16460_v63 = vld [vmem:[%s21639_s3 + $0x20] sm:$0xff]   ;;  %v16462_v3 = vld [vmem:[%s21639_s3 + $0x68] sm:$0xff]  }
 0x5f9   :  { %v16461_v12 = vld [vmem:[%s21639_s3 + $0xa0] sm:$0xff]  }
 0x5fb   :  { %10795 = vmatpush1.bf16.msra.mxu0 %v16382_v52  ;;  %11820 = vmatpush1.bf16.msra.mxu1 %v16385_v15  ;;  %v16463_v52 = vld [vmem:[%s21639_s3 + $0xe8] sm:$0xff]  }
 0x5fc   :  { %10796 = vmatprep.subr.bf16.mxu0 %v16390_v7  ;;  %11821 = vmatprep.subr.bf16.mxu1 %v16393_v6  ;;  %v16464_v15 = vld [vmem:[%s21639_s3 + $0x28] sm:$0xff]   ;;  %v16466_v6 = vld [vmem:[%s21639_s3 + $0x70] sm:$0xff]  }
 0x5fd   :  { %v16465_v7 = vld [vmem:[%s21639_s3 + $0xa8] sm:$0xff]  }
 0x5ff   :  { %10797 = vmatpush1.bf16.msra.mxu0 %v16388_v8  ;;  %11822 = vmatpush1.bf16.msra.mxu1 %v16391_v20  ;;  %v16467_v8 = vld [vmem:[%s21639_s3 + $0xf0] sm:$0xff]  }
 0x600   :  { %10807 = vmatprep.subr.bf16.mxu0 %v16396_v22  ;;  %11832 = vmatprep.subr.bf16.mxu1 %v16399_v9  ;;  %v16468_v20 = vld [vmem:[%s21639_s3 + $0x30] sm:$0xff]   ;;  %v16470_v9 = vld [vmem:[%s21639_s3 + $0x78] sm:$0xff]  }
 0x601   :  { %v16469_v22 = vld [vmem:[%s21639_s3 + $0xb0] sm:$0xff]  }
 0x602   :  { %10799 = vmatmul.mubr.bf16.vlgmr.msra.gmra.mrb[0].mxu0 %v1917_v4  ;;  %11824 = vmatmul.mubr.bf16.vlgmr.msra.gmra.mrb[0].mxu1 %v1917_v4  ;;  %v16471_v4 = vld [vmem:[%s21639_s3 + $0xf8] sm:$0xff]  }
 0x603   :  { %10808 = vmatpush1.bf16.msra.mxu0 %v16394_v24  ;;  %11833 = vmatpush1.bf16.msra.mxu1 %v16397_v13  ;;  %v16472_v24 = vld [vmem:[%s21639_s3 + $0x38] sm:$0xff]  }
 0x604   :  { %10809 = vmatprep.subr.bf16.mxu0 %v16402_v16  ;;  %11834 = vmatprep.subr.bf16.mxu1 %v16405_v17  ;;  %v16473_v13 = vld [vmem:[%s21639_s3 + $0xb8] sm:$0xff]   ;;  %v1601_v16 = vsub.s32 0, %v16654_v42  ;;  %v1609_v17 = vsub.s32 2, %v16654_v42 }
 0x605   :  { %10839 = vmatprep.mubr.bf16.mxu0 %v16505_v30  ;;  %11864 = vmatprep.mubr.bf16.mxu1 %v16505_v30 }
 0x607   :  { %10810 = vmatpush1.bf16.msra.mxu0 %v16400_v27  ;;  %11835 = vmatpush1.bf16.msra.mxu1 %v16403_v18  ;;  %v1597_v27 = vld [vmem:[%s21638_s2] sm:$0xf]  ;;  %v1605_v18 = vsub.s32 1, %v16654_v42 }
 0x608   :  { %10811 = vmatprep.subr.bf16.mxu0 %v16408_v28  ;;  %11836 = vmatprep.subr.bf16.mxu1 %v16411_v14  ;;  %v1613_v28 = vsub.s32 3, %v16654_v42  ;;  %v1602_v14 = vrot.slane %v1597_v27, %v1601_v16  ;;  %v1610_v30 = vrot.slane %v1597_v27, %v1609_v17 }
 0x60b   :  { %10812 = vmatpush1.bf16.msra.mxu0 %v16406_v19  ;;  %11837 = vmatpush1.bf16.msra.mxu1 %v16409_v32  ;;  %v1606_v19 = vrot.slane %v1597_v27, %v1605_v18  ;;  %v1614_v32 = vrot.slane %v1597_v27, %v1613_v28 }
 0x60c   :  { %10813 = vmatprep.subr.bf16.mxu0 %v16414_v26  ;;  %11838 = vmatprep.subr.bf16.mxu1 %v16417_v23 }
 0x60f   :  { %10814 = vmatpush1.bf16.msra.mxu0 %v16412_v36  ;;  %11839 = vmatpush1.bf16.msra.mxu1 %v16415_v37 }
 0x610   :  { %10815 = vmatprep.subr.bf16.mxu0 %v16420_v21  ;;  %11840 = vmatprep.subr.bf16.mxu1 %v16423_v31 }
 0x613   :  { %10816 = vmatpush1.bf16.msra.mxu0 %v16418_v39  ;;  %11841 = vmatpush1.bf16.msra.mxu1 %v16421_v40 }
 0x614   :  { %10817 = vmatprep.subr.bf16.mxu0 %v16426_v41  ;;  %11842 = vmatprep.subr.bf16.mxu1 %v16429_v25 }
 0x617   :  { %10818 = vmatpush1.bf16.msra.mxu0 %v16424_v43  ;;  %11843 = vmatpush1.bf16.msra.mxu1 %v16427_v46 }
 0x618   :  { %10819 = vmatprep.subr.bf16.mxu0 %v16432_v29  ;;  %11844 = vmatprep.subr.bf16.mxu1 %v16435_v50 }
 0x61b   :  { %10820 = vmatpush1.bf16.msra.mxu0 %v16430_v33  ;;  %11845 = vmatpush1.bf16.msra.mxu1 %v16433_v51 }
 0x61c   :  { %10821 = vmatprep.subr.bf16.mxu0 %v16438_v53  ;;  %11846 = vmatprep.subr.bf16.mxu1 %v16441_v38 }
 0x61f   :  { %10822 = vmatpush1.bf16.msra.mxu0 %v16436_v34  ;;  %11847 = vmatpush1.bf16.msra.mxu1 %v16439_v55 }
 0x620   :  { %13841 = vmatprep.subr.bf16.mxu0 %v16442_v45  ;;  %13863 = vmatprep.subr.bf16.mxu1 %v16443_v58  ;;  %v13808_v45 = vld [vmem:[%s21640_s4] ss:$0 sm:$0xff] }
 0x622   :  { %10840 = vmatmul.mubr.bf16.vlgmr.msra.gmra.mrb[0].mxu0 %v1933_v61  ;;  %11865 = vmatmul.mubr.bf16.vlgmr.msra.gmra.mrb[0].mxu1 %v1933_v61 }
 0x623   :  { %13842 = vmatpush3.bf16.msra.mxu0 %v16444_v35  ;;  %13864 = vmatpush3.bf16.msra.mxu1 %v16445_v62 }
 0x624   :  { %13843 = vmatprep.subr.bf16.mxu0 %v16446_v44  ;;  %13865 = vmatprep.subr.bf16.mxu1 %v16447_v49 }
 0x627   :  { %13844 = vmatpush3.bf16.msra.mxu0 %v16448_v0  ;;  %13866 = vmatpush3.bf16.msra.mxu1 %v16449_v47 }
 0x628   :  { %13845 = vmatprep.subr.bf16.mxu0 %v16450_v1  ;;  %13867 = vmatprep.subr.bf16.mxu1 %v16451_v2 }
 0x62b   :  { %13846 = vmatpush3.bf16.msra.mxu0 %v16452_v59  ;;  %13868 = vmatpush3.bf16.msra.mxu1 %v16453_v57 }
 0x62c   :  { %13847 = vmatprep.subr.bf16.mxu0 %v16454_v5  ;;  %13869 = vmatprep.subr.bf16.mxu1 %v16455_v60 }
 0x62f   :  { %13848 = vmatpush3.bf16.msra.mxu0 %v16456_v54  ;;  %13870 = vmatpush3.bf16.msra.mxu1 %v16457_v10 }
 0x630   :  { %13849 = vmatprep.subr.bf16.mxu0 %v16458_v48  ;;  %13871 = vmatprep.subr.bf16.mxu1 %v16459_v11 }
 0x633   :  { %13850 = vmatpush3.bf16.msra.mxu0 %v16460_v63  ;;  %13872 = vmatpush3.bf16.msra.mxu1 %v16461_v12 }
 0x634   :  { %13851 = vmatprep.subr.bf16.mxu0 %v16462_v3  ;;  %13873 = vmatprep.subr.bf16.mxu1 %v16463_v52 }
 0x637   :  { %13852 = vmatpush3.bf16.msra.mxu0 %v16464_v15  ;;  %13874 = vmatpush3.bf16.msra.mxu1 %v16465_v7 }
 0x638   :  { %13853 = vmatprep.subr.bf16.mxu0 %v16466_v6  ;;  %13875 = vmatprep.subr.bf16.mxu1 %v16467_v8 }
 0x63b   :  { %13854 = vmatpush3.bf16.msra.mxu0 %v16468_v20  ;;  %13876 = vmatpush3.bf16.msra.mxu1 %v16469_v22 }
 0x63c   :  { %13855 = vmatprep.subr.bf16.mxu0 %v16470_v9  ;;  %13877 = vmatprep.subr.bf16.mxu1 %v16471_v4 }
 0x63f   :  { %13856 = vmatpush3.bf16.msra.mxu0 %v16472_v24  ;;  %13878 = vmatpush3.bf16.msra.mxu1 %v16473_v13 }
 0x6f5   :  { %v10841_v26 = vpop.f32.mrb[0].mxu0  ;;  %v11866_v23 = vpop.f32.mrb[0].mxu1 }
 0x6f6   :  { %v13885_v36 = vadd.f32 %v10841_v26, %v1602_v14  ;;  %v13887_v37 = vadd.f32 %v11866_v23, %v1610_v30  ;;  %v10843_v21 = vpop.f32.mrb[1].mxu0  ;;  %v11868_v31 = vpop.f32.mrb[1].mxu1 }
 0x6f7   :  { %v13886_v39 = vadd.f32 %v10843_v21, %v1606_v19  ;;  %v13888_v40 = vadd.f32 %v11868_v31, %v1614_v32  ;;  %v10845_v41 = vpop.f32.mrb[2].mxu0  ;;  %v11870_v25 = vpop.f32.mrb[2].mxu1 }
 0x6f8   :  { %v11873_v43 = vmax.f32 %v13885_v36, 0.0  ;;  %v11875_v46 = vmax.f32 %v13887_v37, 0.0  ;;  %v10846_v29 = vpop.f32.mrb[3].mxu0  ;;  %v11871_v50 = vpop.f32.mrb[3].mxu1 }
 0x6f9   :  { %v11874_v33 = vmax.f32 %v13886_v39, 0.0  ;;  %v11876_v42 = vmax.f32 %v13888_v40, 0.0 }
 0x6fa   :  { %v11877_v38 = vpack.c.bf16 %v11873_v43, %v11873_v43  ;;  %v11879_v34 = vpack.c.bf16 %v11875_v46, %v11875_v46 }
 0x6fb   :  { %v11878_v51 = vpack.c.bf16 %v11874_v33, %v11874_v33  ;;  %v11880_v53 = vpack.c.bf16 %v11876_v42, %v11876_v42 }
 0x6fd   :  { %12176 = vmatprep.mubr.bf16.mxu0 %v11878_v51  ;;  %12216 = vmatprep.mubr.bf16.mxu1 %v11880_v53 }
 0x6fe   :  { %12177 = vmatmul.mubr.bf16.vlgmr.msra.gmra.mrb[4].mxu0 %v11877_v38  ;;  %12217 = vmatmul.mubr.bf16.vlgmr.msra.gmra.mrb[4].mxu1 %v11879_v34 }
 0x7d1   :  { %v13857_v55 = vpop.f32.mrb[4].mxu0  ;;  %v13879_v56 = vpop.f32.mrb[4].mxu1 }
 0x7d2   :  { %v13858_v58 = vpop.f32.mrb[5].mxu0  ;;  %v13880_v61 = vpop.f32.mrb[5].mxu1 }
 0x7d3   :  { %v13859_v35 = vadd.f32 %v13858_v58, %v13857_v55  ;;  %v13881_v62 = vadd.f32 %v13880_v61, %v13879_v56  ;;  %v13860_v44 = vpop.f32.mrb[6].mxu0  ;;  %v13882_v49 = vpop.f32.mrb[6].mxu1 }
 0x7d4   :  { %v13861_v0 = vpop.f32.mrb[7].mxu0  ;;  %v13883_v47 = vpop.f32.mrb[7].mxu1 }
 0x7d5   :  { %v12179_v1 = vadd.f32 %v13859_v35, %v13808_v45 }
 0x7d7   :  { %v12219_v2 = vadd.f32 %v13881_v62, %v12179_v1 }
 0x7d9   :  { %12224 = vst [vmem:[#allocation2] sm:$0x3] %v12219_v2 }
 0x7da   :  { %16491 = shalt.err (!%p16488_p4)
}
 0x7db   :  { %s16492_s13 = scalar_lea.hbm %s21641_s5, 32 }
 0x7dc   :  { %p16493_p5 = scmp.ne.s32.totalorder %s21641_s5, %s16492_s13  ;;  %p16496_p6 = scmp.lt.u32.totalorder %s16492_s13, %s21641_s5 }
 0x7de   :  { %p16498_p7 = pnand %p16496_p6, %p16493_p5 }
 0x7e0   :  { %16501 = shalt.err (!%p16498_p7)
}
 0x7e1   :  { %12234 = dma.vmem_to_hbm [thread:$0]  %s12232_s10, 32, %s21641_s5, [#allocation3]  }
 0x7e2   :  { %16502 = dma.done.wait [#allocation3], 32  }
 0x7e3   :  { %16503 = vsyncadd [#allocation3], 4294967264 }
 0x7e4   :  { %12238 = vsyncpa [#allocation3], 1 }

</bundles_post_ra>
